<compile_context>
chip_gen: v7x
topology: tpu7x:2x2x1
jax: 0.10.0
libtpu: 0.0.40
codegen_flags: <defaults>
</compile_context>

<pallas_src>
import functools

import numpy as np
import jax
import jax.numpy as jnp
from jax import lax
from jax.experimental import pallas as pl
from jax.experimental.pallas import tpu as pltpu

LEAKY_SLOPE = 0.01
BIG = 1e30


# ----------------------------------------------------------------------------
# Static constant builders (masks / 0-1 selection matrices), built once.
# ----------------------------------------------------------------------------
def _build_masks(side):
    """mask[t, p, 0] = 1 iff shifting flat position p by tap t stays in-bounds."""
    m = np.zeros((9, side * side, 1), np.float32)
    for di in (-1, 0, 1):
        for dj in (-1, 0, 1):
            t = (di + 1) * 3 + (dj + 1)
            for i in range(side):
                for j in range(side):
                    if 0 <= i + di < side and 0 <= j + dj < side:
                        m[t, i * side + j, 0] = 1.0
    return jnp.asarray(m)


def _build_g_s2d(side_in, b1, r1):
    """pad-by-1 + space-to-depth(2) of a (side_in x side_in) activation stored
    flat on a (b1 x b1) grid (row = i*b1 + j), as 4 selection matrices."""
    b2 = side_in // 2 + 1
    g = np.zeros((4, b2 * b2, r1), np.float32)
    for pr in (0, 1):
        for pc in (0, 1):
            p = pr * 2 + pc
            for bi in range(b2):
                for bj in range(b2):
                    r = 2 * bi + pr - 1
                    c = 2 * bj + pc - 1
                    if 0 <= r < side_in and 0 <= c < side_in:
                        g[p, bi * b2 + bj, r * b1 + c] = 1.0
    return jnp.asarray(g, jnp.bfloat16)          # 0/1 exact in bf16


def _build_g_compact(side, b2, r2):
    """select the valid (side x side) rows out of the (b2 x b2)-flat layout."""
    g = np.zeros((side * side, r2), np.float32)
    for i in range(side):
        for j in range(side):
            g[i * side + j, i * b2 + j] = 1.0
    return jnp.asarray(g, jnp.bfloat16)


def _build_g_d2s(side):
    """depth-to-space: 4 parity planes (side x side) -> flat (2*side x 2*side)."""
    out_side = 2 * side
    g = np.zeros((4, out_side * out_side, side * side), np.float32)
    for py in (0, 1):
        for px in (0, 1):
            p = py * 2 + px
            for m in range(side):
                for n in range(side):
                    g[p, (2 * m + py) * out_side + (2 * n + px), m * side + n] = 1.0
    return jnp.asarray(g, jnp.bfloat16)


# ----------------------------------------------------------------------------
# Weight packing (done once, outside the jitted forward).
# ----------------------------------------------------------------------------
def _pack_s2d_conv4_k(w):
    """(4,4,cin,cout) stride-2 conv -> single K-packed (4*4*cin, cout) matrix.
    Row order: block-tap (tbr,tbc) major, then (pr, pc, cin)."""
    _, _, cin, cout = w.shape
    wt = w.reshape(2, 2, 2, 2, cin, cout)            # (tbr, pr, tbc, pc, c, co)
    wt = jnp.transpose(wt, (0, 2, 1, 3, 4, 5))       # (tbr, tbc, pr, pc, c, co)
    return wt.reshape(4 * 4 * cin, cout).astype(jnp.bfloat16)


def _pack_conv3_k(w):
    """(3,3,cin,cout) -> K-packed (9*cin, cout), tap t = (di+1)*3+(dj+1)."""
    _, _, cin, cout = w.shape
    return w.reshape(9 * cin, cout).astype(jnp.bfloat16)


def _pack_convT4_nk(w):
    """PyTorch ConvTranspose2d weight (cin,cout,4,4) -> (9*cin, 4*cout):
    taps packed along K (zero blocks for taps a parity doesn't use), output
    parities packed along N (column group par = py*2+px)."""
    w = np.asarray(jax.device_get(w), np.float32)
    cin, cout = w.shape[0], w.shape[1]
    ky_tab = ((1, 3), (2, 0))
    out = np.zeros((9 * cin, 4 * cout), np.float32)
    for py in (0, 1):
        dis = (0, -1) if py == 0 else (0, 1)
        for px in (0, 1):
            djs = (0, -1) if px == 0 else (0, 1)
            par = py * 2 + px
            for a, di in enumerate(dis):
                for b, dj in enumerate(djs):
                    t = (di + 1) * 3 + (dj + 1)
                    ky, kx = ky_tab[py][a], ky_tab[px][b]
                    out[t * cin:(t + 1) * cin, par * cout:(par + 1) * cout] = w[:, :, ky, kx]
    return jnp.asarray(out, jnp.bfloat16)


def _bias(b):
    return b.reshape(1, -1).astype(jnp.float32)


def _bias4(b):
    return jnp.tile(b.reshape(1, -1).astype(jnp.float32), (1, 4))


def pack_params(params, in_channels, img_size, num_embeddings):
    hd = params["hidden_dims"]
    assert len(hd) == 2, "fused kernel assumes two down / one up sampling stage"
    h1, h2 = hd
    d_emb = params["codebook"].shape[1]

    s_a1 = img_size // 2           # spatial after 1st downsample (8)
    s4 = img_size // 4             # core spatial side (4)
    s8 = img_size // 2             # upsampled side (8)
    b1 = img_size // 2 + 1         # s2d grid of the padded input (9)
    r1 = b1 * b1 - (b1 + 1)        # rows computed for conv-1 output (71)
    b2 = s_a1 // 2 + 1             # s2d grid for conv-2 (5)
    r2 = b2 * b2 - (b2 + 1)        # rows computed for conv-2 output (19)

    kpad = max(128, ((num_embeddings + 127) // 128) * 128)
    cb = jnp.zeros((kpad, d_emb), jnp.float32).at[:num_embeddings].set(
        params["codebook"].astype(jnp.float32))
    pen = jnp.where(jnp.arange(kpad) < num_embeddings, 0.0, BIG).astype(jnp.float32)
    e2pen = (jnp.sum(cb * cb, axis=1) + pen).reshape(1, kpad)   # host-precomputed

    wr3 = jnp.stack(
        [_pack_conv3_k(w3) for (w3, _w1) in params["enc_res"]] +
        [_pack_conv3_k(w3) for (w3, _w1) in params["dec_res"]], axis=0)      # (12, 9*H2, H2)
    wr1 = jnp.stack(
        [w1.reshape(h2, h2) for (_w3, w1) in params["enc_res"]] +
        [w1.reshape(h2, h2) for (_w3, w1) in params["dec_res"]],
        axis=0).astype(jnp.bfloat16)

    args = (
        _pack_s2d_conv4_k(params["enc_down"][0][0]), _bias(params["enc_down"][0][1]),
        _build_g_s2d(s_a1, b1, r1),
        _pack_s2d_conv4_k(params["enc_down"][1][0]), _bias(params["enc_down"][1][1]),
        _build_g_compact(s4, b2, r2),
        _build_masks(s4),
        _pack_conv3_k(params["enc_conv3"][0]), _bias(params["enc_conv3"][1]),
        wr3, wr1,
        params["enc_out"][0].reshape(h2, d_emb).astype(jnp.bfloat16),
        _bias(params["enc_out"][1]),
        cb, e2pen,
        _pack_conv3_k(params["dec_in"][0]), _bias(params["dec_in"][1]),
        _pack_convT4_nk(params["dec_up"][0][0]), _bias4(params["dec_up"][0][1]),
        _build_g_d2s(s4),
        _build_masks(s8),
        _pack_convT4_nk(params["dec_out"][0]), _bias4(params["dec_out"][1]),
    )
    cfg = dict(B1=b1, R1=r1, B2=b2, R2=r2, S4=s4, S8=s8,
               n_res=len(params["enc_res"]), C=in_channels, D=d_emb, H1=h1, H2=h2)
    return {"args": args, "cfg": cfg}


# ----------------------------------------------------------------------------
# pltpu.roll direction probe (falls back to concatenate-based shifts if roll
# is unavailable or behaves unexpectedly).
# ----------------------------------------------------------------------------
def detect_roll_mode():
    def probe(rows, cols, shift):
        def k(x_ref, o_ref):
            o_ref[...] = pltpu.roll(x_ref[...], shift, axis=0)
        x = jnp.tile(jnp.arange(rows, dtype=jnp.float32)[:, None], (1, cols))
        r = pl.pallas_call(k, out_shape=jax.ShapeDtypeStruct((rows, cols), jnp.float32))(x)
        v = float(r[shift, 0])
        if v == 0.0:
            return "np"                          # out[i] = in[(i - shift) % n]
        if v == float((2 * shift) % rows):
            return "inv"                         # out[i] = in[(i + shift) % n]
        return None
    try:
        modes = {probe(16, 64, 5), probe(64, 32, 9)}
    except Exception:
        return None
    if len(modes) == 1 and None not in modes:
        return modes.pop()
    return None


# ----------------------------------------------------------------------------
# The fused kernel (whole VQVAE forward per batch element).
# ----------------------------------------------------------------------------
def _make_kernel(cfg, roll_mode):
    B1, R1 = cfg["B1"], cfg["R1"]
    B2, R2 = cfg["B2"], cfg["R2"]
    S4, S8 = cfg["S4"], cfg["S8"]
    H1 = cfg["H1"]
    n_res = cfg["n_res"]

    f32, bf16 = jnp.float32, jnp.bfloat16

    def leaky(v):
        return jnp.where(v > 0, v, LEAKY_SLOPE * v)

    def sigmoid(v):
        return 1.0 / (1.0 + jnp.exp(-v))

    def mm(a, b):
        # bf16 MXU matmul with f32 accumulation.
        return jnp.dot(a.astype(bf16), b.astype(bf16), preferred_element_type=f32)

    def row_shift(x, d):
        # y[p] = x[(p + d) mod S]; wrapped rows are masked out by the caller.
        s = x.shape[0]
        if roll_mode == "np":
            return pltpu.roll(x, (-d) % s, axis=0)
        if roll_mode == "inv":
            return pltpu.roll(x, d % s, axis=0)
        dd = d % s
        return jnp.concatenate([x[dd:], x[:dd]], axis=0)

    def taps_lhs(x, masks, side):
        # (side*side, Cin) -> (side*side, 9*Cin): 9 rolled+masked copies packed
        # along the contraction dim (one MXU issue per conv instead of 9).
        cols = []
        for di in (-1, 0, 1):
            for dj in (-1, 0, 1):
                d = di * side + dj
                if d == 0:
                    cols.append(x)
                else:
                    t = (di + 1) * 3 + (dj + 1)
                    cols.append(row_shift(x, d) * masks[t])
        return jnp.concatenate(cols, axis=1)

    def kernel(x_ref,
               w1, b1, gs2d, w2, b2, gc, m16,
               w3e, b3e, wr3, wr1, weo, beo, cb, e2pen,
               w3d, b3d, wup, bup, gd2s, m64, wou, bou,
               recon_ref, sq_ref):
        m16v = m16[...]
        m64v = m64[...]

        # ---- encoder downsample conv #1 (4x4 s2 p1), K-packed over 4 block-taps
        x81 = x_ref[0]                                            # (B1*B1, 4*Cin)
        lhs1 = jnp.concatenate(
            [x81[0:R1], x81[1:1 + R1], x81[B1:B1 + R1], x81[B1 + 1:B1 + 1 + R1]],
            axis=1)                                               # (R1, 16*Cin)
        a1 = leaky(mm(lhs1, w1[...]) + b1[...])                   # (R1, H1)

        # ---- pad + space-to-depth via bf16 selection matmuls (stays in VMEM)
        x25 = jnp.concatenate([mm(gs2d[p], a1) for p in range(4)], axis=1)  # (B2*B2, 4*H1)

        # ---- encoder downsample conv #2 (4x4 s2 p1), K-packed
        lhs2 = jnp.concatenate(
            [x25[0:R2], x25[1:1 + R2], x25[B2:B2 + R2], x25[B2 + 1:B2 + 1 + R2]],
            axis=1)                                               # (R2, 16*H1)
        a2 = leaky(mm(lhs2, w2[...]) + b2[...])                   # (R2, H2)
        h = mm(gc[...], a2)                                       # (S4*S4, H2)

        # ---- encoder 3x3 conv + LeakyReLU (single matmul)
        h = leaky(mm(taps_lhs(h, m16v, S4), w3e[...]) + b3e[...])

        # ---- encoder residual stack (+ trailing LeakyReLU)
        for l in range(n_res):
            r = jnp.maximum(mm(taps_lhs(h, m16v, S4), wr3[l]), 0.0)
            h = h + mm(r, wr1[l])
        h = leaky(h)

        # ---- 1x1 conv to embedding dim
        z = leaky(mm(h, weo[...]) + beo[...])                     # (S4*S4, D)

        # ---- vector quantizer (f32; codebook padded; e2+penalty precomputed)
        e = cb[...]                                               # (Kp, D)
        z2 = jnp.sum(z * z, axis=1, keepdims=True)
        ze = jax.lax.dot_general(z, e, (((1,), (1,)), ((), ())),
                                 preferred_element_type=f32)
        dist = z2 + e2pen[...] - 2.0 * ze
        m_rows, kp = dist.shape
        minv = jnp.min(dist, axis=1, keepdims=True)
        iota = jax.lax.broadcasted_iota(jnp.int32, (m_rows, kp), 1)
        inds = jnp.min(jnp.where(dist <= minv, iota, kp), axis=1, keepdims=True)
        onehot = (iota == inds).astype(f32)
        q = jnp.dot(onehot, e, preferred_element_type=f32)        # (S4*S4, D)
        dqz = q - z
        sq_ref[0] = jnp.sum(dqz * dqz, keepdims=True)
        # TODO(synk): straight-through estimator / stop_gradient structure is
        # forward-only here; gradients through the VQ are not implemented.

        # ---- decoder head 3x3 conv
        h = leaky(mm(taps_lhs(q, m16v, S4), w3d[...]) + b3d[...])

        # ---- decoder residual stack (+ trailing LeakyReLU)
        for l in range(n_res):
            r = jnp.maximum(mm(taps_lhs(h, m16v, S4), wr3[n_res + l]), 0.0)
            h = h + mm(r, wr1[n_res + l])
        h = leaky(h)

        # ---- transposed conv #1 (H2 -> H1): 4 parities along N, taps along K
        ups = leaky(mm(taps_lhs(h, m16v, S4), wup[...]) + bup[...])   # (S4*S4, 4*H1)

        # ---- depth-to-space 4x4 -> 8x8 (bf16 selection matmuls)
        x64 = None
        for p in range(4):
            y = mm(gd2s[p], ups[:, p * H1:(p + 1) * H1])
            x64 = y if x64 is None else x64 + y                       # (S8*S8, H1)

        # ---- transposed conv #2 (H1 -> C): parity-packed output, Sigmoid
        out = sigmoid(mm(taps_lhs(x64, m64v, S8), wou[...]) + bou[...])  # (S8*S8, 4*C)
        recon_ref[0] = out

    return kernel


def _const_spec(a):
    return pl.BlockSpec(a.shape, lambda n, _nd=a.ndim: (0,) * _nd)


# ----------------------------------------------------------------------------
# Forward pass (== VQVAE.forward with bPoseCondition=False)
# ----------------------------------------------------------------------------
def vqvae_forward(args, x_nchw, *, cfg, roll_mode, beta=0.25):
    # TODO(synk): bPoseCondition=True branch (utils.positional_encoding) not
    # implemented — that utility is not part of the provided module.
    N, C, H, W = x_nchw.shape
    B1, S4, S8, D = cfg["B1"], cfg["S4"], cfg["S8"], cfg["D"]
    C4 = 4 * cfg["C"]

    # pad + space-to-depth(2) the input, flatten spatial (layout glue only).
    x_nhwc = jnp.transpose(x_nchw, (0, 2, 3, 1))
    xp = jnp.pad(x_nhwc, ((0, 0), (1, 1), (1, 1), (0, 0)))
    xs = xp.reshape(N, B1, 2, B1, 2, cfg["C"]).transpose(0, 1, 3, 2, 4, 5)
    xs = xs.reshape(N, B1 * B1, C4)

    kernel = _make_kernel(cfg, roll_mode)
    in_specs = [pl.BlockSpec((1, B1 * B1, C4), lambda n: (n, 0, 0))]
    in_specs += [_const_spec(a) for a in args]
    out_shape = (jax.ShapeDtypeStruct((N, S8 * S8, C4), jnp.float32),
                 jax.ShapeDtypeStruct((N, 1, 1), jnp.float32))
    out_specs = (pl.BlockSpec((1, S8 * S8, C4), lambda n: (n, 0, 0)),
                 pl.BlockSpec((1, 1, 1), lambda n: (n, 0, 0)))

    recon_flat, sq = pl.pallas_call(
        kernel,
        grid=(N,),
        in_specs=in_specs,
        out_specs=out_specs,
        out_shape=out_shape,
        compiler_params=pltpu.CompilerParams(
            dimension_semantics=("parallel",)),
        cost_estimate=pl.CostEstimate(
            flops=int(5e7), transcendentals=4096, bytes_accessed=int(2e6)),
    )(xs, *args)

    # depth-to-space the sub-pixel output back to NHWC, then to NCHW.
    r = recon_flat.reshape(N, S8, S8, 2, 2, cfg["C"]).transpose(0, 1, 3, 2, 4, 5)
    recon = r.reshape(N, 2 * S8, 2 * S8, cfg["C"]).transpose(0, 3, 1, 2)

    mse = jnp.sum(sq) / float(N * S4 * S4 * D)
    vq_loss = (1.0 + beta) * mse          # commitment*beta + embedding (equal fwd values)
    return recon, vq_loss, x_nchw


# ----------------------------------------------------------------------------
# Pure-f32 JAX reference of the PyTorch module (for the tolerance check).
# ----------------------------------------------------------------------------
def vqvae_reference(params, x_nchw, beta=0.25):
    def conv(x, w, b, stride, pad):
        y = lax.conv_general_dilated(
            x, w, (stride, stride), ((pad, pad), (pad, pad)),
            dimension_numbers=('NHWC', 'HWIO', 'NHWC'))
        return y if b is None else y + b

    def convT(x, w, b):  # PyTorch ConvTranspose2d(k=4, s=2, p=1), w: (cin,cout,4,4)
        wk = jnp.transpose(w[:, :, ::-1, ::-1], (2, 3, 0, 1))
        y = lax.conv_general_dilated(
            x, wk, (1, 1), ((2, 2), (2, 2)), lhs_dilation=(2, 2),
            dimension_numbers=('NHWC', 'HWIO', 'NHWC'))
        return y + b

    def leaky(v):
        return jnp.where(v > 0, v, LEAKY_SLOPE * v)

    h = jnp.transpose(x_nchw, (0, 2, 3, 1))
    for (w, b) in params["enc_down"]:
        h = leaky(conv(h, w, b, 2, 1))
    h = leaky(conv(h, params["enc_conv3"][0], params["enc_conv3"][1], 1, 1))
    for (w3, w1) in params["enc_res"]:
        r = jnp.maximum(conv(h, w3, None, 1, 1), 0.0)
        h = h + conv(r, w1, None, 1, 0)
    h = leaky(h)
    z = leaky(conv(h, params["enc_out"][0], params["enc_out"][1], 1, 0))

    D = z.shape[-1]
    flat = z.reshape(-1, D)
    e = params["codebook"]
    dist = (jnp.sum(flat ** 2, axis=1, keepdims=True)
            + jnp.sum(e ** 2, axis=1)[None, :] - 2.0 * flat @ e.T)
    inds = jnp.argmin(dist, axis=1)
    q = e[inds].reshape(z.shape)
    mse = jnp.mean((q - z) ** 2)
    vq_loss = (1.0 + beta) * mse

    h = leaky(conv(q, params["dec_in"][0], params["dec_in"][1], 1, 1))
    for (w3, w1) in params["dec_res"]:
        r = jnp.maximum(conv(h, w3, None, 1, 1), 0.0)
        h = h + conv(r, w1, None, 1, 0)
    h = leaky(h)
    for (w, b) in params["dec_up"]:
        h = leaky(convT(h, w, b))
    recon = jax.nn.sigmoid(convT(h, params["dec_out"][0], params["dec_out"][1]))
    return jnp.transpose(recon, (0, 3, 1, 2)), vq_loss


# ----------------------------------------------------------------------------
# Parameter construction (deterministic, PyTorch-default-style uniform init)
# ----------------------------------------------------------------------------
def conv_params(key, kh, kw, cin, cout, bias=True):
    k1, k2 = jax.random.split(key)
    bound = 1.0 / jnp.sqrt(float(kh * kw * cin))
    w = jax.random.uniform(k1, (kh, kw, cin, cout), jnp.float32, -bound, bound)
    b = jax.random.uniform(k2, (cout,), jnp.float32, -bound, bound) if bias else None
    return w, b


def convT_params(key, cin, cout, k):
    k1, k2 = jax.random.split(key)
    bound = 1.0 / jnp.sqrt(float(cout * k * k))
    w = jax.random.uniform(k1, (cin, cout, k, k), jnp.float32, -bound, bound)
    b = jax.random.uniform(k2, (cout,), jnp.float32, -bound, bound)
    return w, b


def init_vqvae_params(key, in_channels, embedding_dim, num_embeddings, hidden_dims):
    keys = iter(jax.random.split(key, 64))
    p = {"hidden_dims": list(hidden_dims)}
    c = in_channels
    enc_down = []
    for h in hidden_dims:
        enc_down.append(conv_params(next(keys), 4, 4, c, h))       # k4 s2 p1 + LReLU
        c = h
    p["enc_down"] = enc_down
    p["enc_conv3"] = conv_params(next(keys), 3, 3, c, c)            # k3 s1 p1 + LReLU
    p["enc_res"] = [(conv_params(next(keys), 3, 3, c, c, bias=False)[0],
                     conv_params(next(keys), 1, 1, c, c, bias=False)[0])
                    for _ in range(6)]
    p["enc_out"] = conv_params(next(keys), 1, 1, c, embedding_dim)  # 1x1 + LReLU
    p["codebook"] = jax.random.uniform(
        next(keys), (num_embeddings, embedding_dim), jnp.float32,
        -1.0 / num_embeddings, 1.0 / num_embeddings)
    p["dec_in"] = conv_params(next(keys), 3, 3, embedding_dim, hidden_dims[-1])
    ch = hidden_dims[-1]
    p["dec_res"] = [(conv_params(next(keys), 3, 3, ch, ch, bias=False)[0],
                     conv_params(next(keys), 1, 1, ch, ch, bias=False)[0])
                    for _ in range(6)]
    rev = list(reversed(hidden_dims))
    p["dec_up"] = [convT_params(next(keys), rev[i], rev[i + 1], 4)
                   for i in range(len(rev) - 1)]
    p["dec_out"] = convT_params(next(keys), rev[-1], in_channels, 4)
    return p


# ----------------------------------------------------------------------------
if __name__ == "__main__":
    key = jax.random.PRNGKey(0)
    kp_, kx_ = jax.random.split(key)

    in_channels = 4
    embedding_dim = 32
    num_embeddings = 64
    hidden_dims = [32, 64]
    img_size = 16
    batch = 2

    params = init_vqvae_params(kp_, in_channels, embedding_dim,
                               num_embeddings, hidden_dims)
    packed = pack_params(params, in_channels, img_size, num_embeddings)

    x = jax.random.normal(kx_, (batch, in_channels, img_size, img_size),
                          jnp.float32)

    roll_mode = detect_roll_mode()     # 'np' / 'inv' / None (concat fallback)

    fwd = jax.jit(functools.partial(vqvae_forward, cfg=packed["cfg"],
                                    roll_mode=roll_mode, beta=0.25))
    recon, vq_loss, inp = fwd(packed["args"], x)
    jax.block_until_ready((recon, vq_loss, inp))

    assert recon.shape == (batch, in_channels, img_size, img_size)
    assert recon.dtype == jnp.float32
    assert vq_loss.shape == ()
    assert bool(jnp.all(jnp.isfinite(recon)))

    # correctness check vs. pure-f32 JAX reference (bf16 matmuls -> loose atol)
    recon_ref, vq_ref = vqvae_reference(params, x, beta=0.25)
    err = float(jnp.max(jnp.abs(recon - recon_ref)))
    vq_err = abs(float(vq_loss) - float(vq_ref))
    assert err < 0.08, f"recon mismatch vs reference: max abs err {err}"
    assert vq_err < 0.05 * float(vq_ref) + 1e-3, \
        f"vq_loss mismatch: {float(vq_loss)} vs {float(vq_ref)}"

    print("KERNEL_OK")
</pallas_src>

<mosaic_0001>
module attributes {stable_mosaic.version = 11 : i64} {
  func.func @k(%arg0: memref<16x64xf32, #tpu.memory_space<vmem>>, %arg1: memref<16x64xf32, #tpu.memory_space<vmem>>) attributes {dimension_semantics = [], scalar_prefetch = 0 : i64, scratch_operands = 0 : i64, tpu.core_type = #tpu.core_type<tc>} {
    %c0 = arith.constant 0 : index
    %c0_0 = arith.constant 0 : index
    %0 = vector.load %arg0[%c0, %c0_0] : memref<16x64xf32, #tpu.memory_space<vmem>>, vector<16x64xf32>
    %c5_i32 = arith.constant 5 : i32
    %1 = tpu.dynamic_rotate %0 by %c5_i32 dim 0 : vector<16x64xf32>, i32 -> vector<16x64xf32>
    %c0_1 = arith.constant 0 : index
    %c0_2 = arith.constant 0 : index
    %2 = vector.load %arg1[%c0_1, %c0_2] : memref<16x64xf32, #tpu.memory_space<vmem>>, vector<16x64xf32>
    tpu.vector_store %arg1[%c0_1, %c0_2], %1 {strides = array<i32>} : memref<16x64xf32, #tpu.memory_space<vmem>>, vector<16x64xf32>,
    return
  }
}

module attributes {stable_mosaic.version = 11 : i64} {
  func.func @kernel(%arg0: i32, %arg1: memref<1x81x16xf32, #tpu.memory_space<vmem>>, %arg2: memref<64x32xbf16, #tpu.memory_space<vmem>>, %arg3: memref<1x32xf32, #tpu.memory_space<vmem>>, %arg4: memref<4x25x71xbf16, #tpu.memory_space<vmem>>, %arg5: memref<512x64xbf16, #tpu.memory_space<vmem>>, %arg6: memref<1x64xf32, #tpu.memory_space<vmem>>, %arg7: memref<16x19xbf16, #tpu.memory_space<vmem>>, %arg8: memref<9x16x1xf32, #tpu.memory_space<vmem>>, %arg9: memref<576x64xbf16, #tpu.memory_space<vmem>>, %arg10: memref<1x64xf32, #tpu.memory_space<vmem>>, %arg11: memref<12x576x64xbf16, #tpu.memory_space<vmem>>, %arg12: memref<12x64x64xbf16, #tpu.memory_space<vmem>>, %arg13: memref<64x32xbf16, #tpu.memory_space<vmem>>, %arg14: memref<1x32xf32, #tpu.memory_space<vmem>>, %arg15: memref<128x32xf32, #tpu.memory_space<vmem>>, %arg16: memref<1x128xf32, #tpu.memory_space<vmem>>, %arg17: memref<288x64xbf16, #tpu.memory_space<vmem>>, %arg18: memref<1x64xf32, #tpu.memory_space<vmem>>, %arg19: memref<576x128xbf16, #tpu.memory_space<vmem>>, %arg20: memref<1x128xf32, #tpu.memory_space<vmem>>, %arg21: memref<4x64x16xbf16, #tpu.memory_space<vmem>>, %arg22: memref<9x64x1xf32, #tpu.memory_space<vmem>>, %arg23: memref<288x16xbf16, #tpu.memory_space<vmem>>, %arg24: memref<1x16xf32, #tpu.memory_space<vmem>>, %arg25: memref<1x64x16xf32, #tpu.memory_space<vmem>>, %arg26: memref<1x1x1xf32, #tpu.memory_space<vmem>>) attributes {dimension_semantics = [#tpu.dimension_semantics<parallel>], iteration_bounds = array<i64: 2>, scalar_prefetch = 0 : i64, scratch_operands = 0 : i64, tpu.core_type = #tpu.core_type<tc>, window_params = [{transform_indices = @transform_0, window_bounds = array<i64: 1, 81, 16>}, {pipeline_mode = #tpu.pipeline_mode<synchronous>, transform_indices = @transform_1, window_bounds = array<i64: 64, 32>}, {pipeline_mode = #tpu.pipeline_mode<synchronous>, transform_indices = @transform_2, window_bounds = array<i64: 1, 32>}, {pipeline_mode = #tpu.pipeline_mode<synchronous>, transform_indices = @transform_3, window_bounds = array<i64: 4, 25, 71>}, {pipeline_mode = #tpu.pipeline_mode<synchronous>, transform_indices = @transform_4, window_bounds = array<i64: 512, 64>}, {pipeline_mode = #tpu.pipeline_mode<synchronous>, transform_indices = @transform_5, window_bounds = array<i64: 1, 64>}, {pipeline_mode = #tpu.pipeline_mode<synchronous>, transform_indices = @transform_6, window_bounds = array<i64: 16, 19>}, {pipeline_mode = #tpu.pipeline_mode<synchronous>, transform_indices = @transform_7, window_bounds = array<i64: 9, 16, 1>}, {pipeline_mode = #tpu.pipeline_mode<synchronous>, transform_indices = @transform_8, window_bounds = array<i64: 576, 64>}, {pipeline_mode = #tpu.pipeline_mode<synchronous>, transform_indices = @transform_9, window_bounds = array<i64: 1, 64>}, {pipeline_mode = #tpu.pipeline_mode<synchronous>, transform_indices = @transform_10, window_bounds = array<i64: 12, 576, 64>}, {pipeline_mode = #tpu.pipeline_mode<synchronous>, transform_indices = @transform_11, window_bounds = array<i64: 12, 64, 64>}, {pipeline_mode = #tpu.pipeline_mode<synchronous>, transform_indices = @transform_12, window_bounds = array<i64: 64, 32>}, {pipeline_mode = #tpu.pipeline_mode<synchronous>, transform_indices = @transform_13, window_bounds = array<i64: 1, 32>}, {pipeline_mode = #tpu.pipeline_mode<synchronous>, transform_indices = @transform_14, window_bounds = array<i64: 128, 32>}, {pipeline_mode = #tpu.pipeline_mode<synchronous>, transform_indices = @transform_15, window_bounds = array<i64: 1, 128>}, {pipeline_mode = #tpu.pipeline_mode<synchronous>, transform_indices = @transform_16, window_bounds = array<i64: 288, 64>}, {pipeline_mode = #tpu.pipeline_mode<synchronous>, transform_indices = @transform_17, window_bounds = array<i64: 1, 64>}, {pipeline_mode = #tpu.pipeline_mode<synchronous>, transform_indices = @transform_18, window_bounds = array<i64: 576, 128>}, {pipeline_mode = #tpu.pipeline_mode<synchronous>, transform_indices = @transform_19, window_bounds = array<i64: 1, 128>}, {pipeline_mode = #tpu.pipeline_mode<synchronous>, transform_indices = @transform_20, window_bounds = array<i64: 4, 64, 16>}, {pipeline_mode = #tpu.pipeline_mode<synchronous>, transform_indices = @transform_21, window_bounds = array<i64: 9, 64, 1>}, {pipeline_mode = #tpu.pipeline_mode<synchronous>, transform_indices = @transform_22, window_bounds = array<i64: 288, 16>}, {pipeline_mode = #tpu.pipeline_mode<synchronous>, transform_indices = @transform_23, window_bounds = array<i64: 1, 16>}, {transform_indices = @transform_24, window_bounds = array<i64: 1, 64, 16>}, {transform_indices = @transform_25, window_bounds = array<i64: 1, 1, 1>}]} {
    %c0 = arith.constant 0 : index
    %c0_0 = arith.constant 0 : index
    %c0_1 = arith.constant 0 : index
    %0 = vector.load %arg8[%c0, %c0_0, %c0_1] : memref<9x16x1xf32, #tpu.memory_space<vmem>>, vector<9x16x1xf32>
    %c0_2 = arith.constant 0 : index
    %c0_3 = arith.constant 0 : index
    %c0_4 = arith.constant 0 : index
    %1 = vector.load %arg22[%c0_2, %c0_3, %c0_4] : memref<9x64x1xf32, #tpu.memory_space<vmem>>, vector<9x64x1xf32>
    %c0_5 = arith.constant 0 : index
    %c0_6 = arith.constant 0 : index
    %c0_7 = arith.constant 0 : index
    %2 = vector.load %arg1[%c0_5, %c0_6, %c0_7] : memref<1x81x16xf32, #tpu.memory_space<vmem>>, vector<1x81x16xf32>
    %3 = vector.shape_cast %2 : vector<1x81x16xf32> to vector<81x16xf32>
    %4 = vector.extract_strided_slice %3 {offsets = [0, 0], sizes = [71, 16], strides = [1, 1]} : vector<81x16xf32> to vector<71x16xf32>
    %5 = vector.extract_strided_slice %3 {offsets = [1, 0], sizes = [71, 16], strides = [1, 1]} : vector<81x16xf32> to vector<71x16xf32>
    %6 = vector.extract_strided_slice %3 {offsets = [9, 0], sizes = [71, 16], strides = [1, 1]} : vector<81x16xf32> to vector<71x16xf32>
    %7 = vector.extract_strided_slice %3 {offsets = [10, 0], sizes = [71, 16], strides = [1, 1]} : vector<81x16xf32> to vector<71x16xf32>
    %8 = tpu.concatenate %4, %5, %6, %7 in 1 : vector<71x16xf32>, vector<71x16xf32>, vector<71x16xf32>, vector<71x16xf32> -> vector<71x64xf32>
    %c0_8 = arith.constant 0 : index
    %c0_9 = arith.constant 0 : index
    %9 = vector.load %arg2[%c0_8, %c0_9] : memref<64x32xbf16, #tpu.memory_space<vmem>>, vector<64x32xbf16>
    %10 = arith.truncf %8 : vector<71x64xf32> to vector<71x64xbf16>
    %cst = arith.constant dense<0.000000e+00> : vector<71x32xf32>
    %11 = tpu.matmul %10, %9, %cst {dimension_numbers = #tpu.dot_dimension_numbers<[1], [0], [0], [1], [0, 0, 1, 1], [], []>} : vector<71x64xbf16>, vector<64x32xbf16>, vector<71x32xf32> -> vector<71x32xf32>
    %c0_10 = arith.constant 0 : index
    %c0_11 = arith.constant 0 : index
    %12 = vector.load %arg3[%c0_10, %c0_11] : memref<1x32xf32, #tpu.memory_space<vmem>>, vector<1x32xf32>
    %13 = vector.broadcast %12 : vector<1x32xf32> to vector<71x32xf32>
    %14 = arith.addf %11, %13 : vector<71x32xf32>
    %cst_12 = arith.constant 0.000000e+00 : f32
    %15 = vector.broadcast %cst_12 : f32 to vector<71x32xf32>
    %16 = arith.cmpf ogt, %14, %15 : vector<71x32xf32>
    %cst_13 = arith.constant 0.00999999977 : f32
    %17 = vector.broadcast %cst_13 : f32 to vector<71x32xf32>
    %18 = arith.mulf %17, %14 : vector<71x32xf32>
    %19 = arith.select %16, %14, %18 : vector<71x32xi1>, vector<71x32xf32>
    %c0_14 = arith.constant 0 : index
    %c0_15 = arith.constant 0 : index
    %c0_16 = arith.constant 0 : index
    %20 = vector.load %arg4[%c0_14, %c0_15, %c0_16] : memref<4x25x71xbf16, #tpu.memory_space<vmem>>, vector<1x25x71xbf16>
    %21 = vector.shape_cast %20 : vector<1x25x71xbf16> to vector<25x71xbf16>
    %22 = arith.truncf %19 : vector<71x32xf32> to vector<71x32xbf16>
    %cst_17 = arith.constant dense<0.000000e+00> : vector<25x32xf32>
    %23 = tpu.matmul %21, %22, %cst_17 {dimension_numbers = #tpu.dot_dimension_numbers<[1], [0], [0], [1], [0, 0, 1, 1], [], []>} : vector<25x71xbf16>, vector<71x32xbf16>, vector<25x32xf32> -> vector<25x32xf32>
    %c1 = arith.constant 1 : index
    %c0_18 = arith.constant 0 : index
    %c0_19 = arith.constant 0 : index
    %24 = vector.load %arg4[%c1, %c0_18, %c0_19] : memref<4x25x71xbf16, #tpu.memory_space<vmem>>, vector<1x25x71xbf16>
    %25 = vector.shape_cast %24 : vector<1x25x71xbf16> to vector<25x71xbf16>
    %26 = arith.truncf %19 : vector<71x32xf32> to vector<71x32xbf16>
    %cst_20 = arith.constant dense<0.000000e+00> : vector<25x32xf32>
    %27 = tpu.matmul %25, %26, %cst_20 {dimension_numbers = #tpu.dot_dimension_numbers<[1], [0], [0], [1], [0, 0, 1, 1], [], []>} : vector<25x71xbf16>, vector<71x32xbf16>, vector<25x32xf32> -> vector<25x32xf32>
    %c2 = arith.constant 2 : index
    %c0_21 = arith.constant 0 : index
    %c0_22 = arith.constant 0 : index
    %28 = vector.load %arg4[%c2, %c0_21, %c0_22] : memref<4x25x71xbf16, #tpu.memory_space<vmem>>, vector<1x25x71xbf16>
    %29 = vector.shape_cast %28 : vector<1x25x71xbf16> to vector<25x71xbf16>
    %30 = arith.truncf %19 : vector<71x32xf32> to vector<71x32xbf16>
    %cst_23 = arith.constant dense<0.000000e+00> : vector<25x32xf32>
    %31 = tpu.matmul %29, %30, %cst_23 {dimension_numbers = #tpu.dot_dimension_numbers<[1], [0], [0], [1], [0, 0, 1, 1], [], []>} : vector<25x71xbf16>, vector<71x32xbf16>, vector<25x32xf32> -> vector<25x32xf32>
    %c3 = arith.constant 3 : index
    %c0_24 = arith.constant 0 : index
    %c0_25 = arith.constant 0 : index
    %32 = vector.load %arg4[%c3, %c0_24, %c0_25] : memref<4x25x71xbf16, #tpu.memory_space<vmem>>, vector<1x25x71xbf16>
    %33 = vector.shape_cast %32 : vector<1x25x71xbf16> to vector<25x71xbf16>
    %34 = arith.truncf %19 : vector<71x32xf32> to vector<71x32xbf16>
    %cst_26 = arith.constant dense<0.000000e+00> : vector<25x32xf32>
    %35 = tpu.matmul %33, %34, %cst_26 {dimension_numbers = #tpu.dot_dimension_numbers<[1], [0], [0], [1], [0, 0, 1, 1], [], []>} : vector<25x71xbf16>, vector<71x32xbf16>, vector<25x32xf32> -> vector<25x32xf32>
    %36 = tpu.concatenate %23, %27, %31, %35 in 1 : vector<25x32xf32>, vector<25x32xf32>, vector<25x32xf32>, vector<25x32xf32> -> vector<25x128xf32>
    %37 = vector.extract_strided_slice %36 {offsets = [0, 0], sizes = [19, 128], strides = [1, 1]} : vector<25x128xf32> to vector<19x128xf32>
    %38 = vector.extract_strided_slice %36 {offsets = [1, 0], sizes = [19, 128], strides = [1, 1]} : vector<25x128xf32> to vector<19x128xf32>
    %39 = vector.extract_strided_slice %36 {offsets = [5, 0], sizes = [19, 128], strides = [1, 1]} : vector<25x128xf32> to vector<19x128xf32>
    %40 = vector.extract_strided_slice %36 {offsets = [6, 0], sizes = [19, 128], strides = [1, 1]} : vector<25x128xf32> to vector<19x128xf32>
    %41 = tpu.concatenate %37, %38, %39, %40 in 1 : vector<19x128xf32>, vector<19x128xf32>, vector<19x128xf32>, vector<19x128xf32> -> vector<19x512xf32>
    %c0_27 = arith.constant 0 : index
    %c0_28 = arith.constant 0 : index
    %42 = vector.load %arg5[%c0_27, %c0_28] : memref<512x64xbf16, #tpu.memory_space<vmem>>, vector<512x64xbf16>
    %43 = arith.truncf %41 : vector<19x512xf32> to vector<19x512xbf16>
    %cst_29 = arith.constant dense<0.000000e+00> : vector<19x64xf32>
    %44 = tpu.matmul %43, %42, %cst_29 {dimension_numbers = #tpu.dot_dimension_numbers<[1], [0], [0], [1], [0, 0, 1, 1], [], []>} : vector<19x512xbf16>, vector<512x64xbf16>, vector<19x64xf32> -> vector<19x64xf32>
    %c0_30 = arith.constant 0 : index
    %c0_31 = arith.constant 0 : index
    %45 = vector.load %arg6[%c0_30, %c0_31] : memref<1x64xf32, #tpu.memory_space<vmem>>, vector<1x64xf32>
    %46 = vector.broadcast %45 : vector<1x64xf32> to vector<19x64xf32>
    %47 = arith.addf %44, %46 : vector<19x64xf32>
    %cst_32 = arith.constant 0.000000e+00 : f32
    %48 = vector.broadcast %cst_32 : f32 to vector<19x64xf32>
    %49 = arith.cmpf ogt, %47, %48 : vector<19x64xf32>
    %cst_33 = arith.constant 0.00999999977 : f32
    %50 = vector.broadcast %cst_33 : f32 to vector<19x64xf32>
    %51 = arith.mulf %50, %47 : vector<19x64xf32>
    %52 = arith.select %49, %47, %51 : vector<19x64xi1>, vector<19x64xf32>
    %c0_34 = arith.constant 0 : index
    %c0_35 = arith.constant 0 : index
    %53 = vector.load %arg7[%c0_34, %c0_35] : memref<16x19xbf16, #tpu.memory_space<vmem>>, vector<16x19xbf16>
    %54 = arith.truncf %52 : vector<19x64xf32> to vector<19x64xbf16>
    %cst_36 = arith.constant dense<0.000000e+00> : vector<16x64xf32>
    %55 = tpu.matmul %53, %54, %cst_36 {dimension_numbers = #tpu.dot_dimension_numbers<[1], [0], [0], [1], [0, 0, 1, 1], [], []>} : vector<16x19xbf16>, vector<19x64xbf16>, vector<16x64xf32> -> vector<16x64xf32>
    %56 = vector.extract_strided_slice %55 {offsets = [11, 0], sizes = [5, 64], strides = [1, 1]} : vector<16x64xf32> to vector<5x64xf32>
    %57 = vector.extract_strided_slice %55 {offsets = [0, 0], sizes = [11, 64], strides = [1, 1]} : vector<16x64xf32> to vector<11x64xf32>
    %58 = tpu.concatenate %56, %57 in 0 : vector<5x64xf32>, vector<11x64xf32> -> vector<16x64xf32>
    %59 = vector.extract_strided_slice %0 {offsets = [0, 0, 0], sizes = [1, 16, 1], strides = [1, 1, 1]} : vector<9x16x1xf32> to vector<1x16x1xf32>
    %60 = vector.shape_cast %59 : vector<1x16x1xf32> to vector<16x1xf32>
    %61 = vector.broadcast %60 : vector<16x1xf32> to vector<16x64xf32>
    %62 = arith.mulf %58, %61 : vector<16x64xf32>
    %63 = vector.extract_strided_slice %55 {offsets = [12, 0], sizes = [4, 64], strides = [1, 1]} : vector<16x64xf32> to vector<4x64xf32>
    %64 = vector.extract_strided_slice %55 {offsets = [0, 0], sizes = [12, 64], strides = [1, 1]} : vector<16x64xf32> to vector<12x64xf32>
    %65 = tpu.concatenate %63, %64 in 0 : vector<4x64xf32>, vector<12x64xf32> -> vector<16x64xf32>
    %66 = vector.extract_strided_slice %0 {offsets = [1, 0, 0], sizes = [1, 16, 1], strides = [1, 1, 1]} : vector<9x16x1xf32> to vector<1x16x1xf32>
    %67 = vector.shape_cast %66 : vector<1x16x1xf32> to vector<16x1xf32>
    %68 = vector.broadcast %67 : vector<16x1xf32> to vector<16x64xf32>
    %69 = arith.mulf %65, %68 : vector<16x64xf32>
    %70 = vector.extract_strided_slice %55 {offsets = [13, 0], sizes = [3, 64], strides = [1, 1]} : vector<16x64xf32> to vector<3x64xf32>
    %71 = vector.extract_strided_slice %55 {offsets = [0, 0], sizes = [13, 64], strides = [1, 1]} : vector<16x64xf32> to vector<13x64xf32>
    %72 = tpu.concatenate %70, %71 in 0 : vector<3x64xf32>, vector<13x64xf32> -> vector<16x64xf32>
    %73 = vector.extract_strided_slice %0 {offsets = [2, 0, 0], sizes = [1, 16, 1], strides = [1, 1, 1]} : vector<9x16x1xf32> to vector<1x16x1xf32>
    %74 = vector.shape_cast %73 : vector<1x16x1xf32> to vector<16x1xf32>
    %75 = vector.broadcast %74 : vector<16x1xf32> to vector<16x64xf32>
    %76 = arith.mulf %72, %75 : vector<16x64xf32>
    %77 = vector.extract_strided_slice %55 {offsets = [15, 0], sizes = [1, 64], strides = [1, 1]} : vector<16x64xf32> to vector<1x64xf32>
    %78 = vector.extract_strided_slice %55 {offsets = [0, 0], sizes = [15, 64], strides = [1, 1]} : vector<16x64xf32> to vector<15x64xf32>
    %79 = tpu.concatenate %77, %78 in 0 : vector<1x64xf32>, vector<15x64xf32> -> vector<16x64xf32>
    %80 = vector.extract_strided_slice %0 {offsets = [3, 0, 0], sizes = [1, 16, 1], strides = [1, 1, 1]} : vector<9x16x1xf32> to vector<1x16x1xf32>
    %81 = vector.shape_cast %80 : vector<1x16x1xf32> to vector<16x1xf32>
    %82 = vector.broadcast %81 : vector<16x1xf32> to vector<16x64xf32>
    %83 = arith.mulf %79, %82 : vector<16x64xf32>
    %84 = vector.extract_strided_slice %55 {offsets = [1, 0], sizes = [15, 64], strides = [1, 1]} : vector<16x64xf32> to vector<15x64xf32>
    %85 = vector.extract_strided_slice %55 {offsets = [0, 0], sizes = [1, 64], strides = [1, 1]} : vector<16x64xf32> to vector<1x64xf32>
    %86 = tpu.concatenate %84, %85 in 0 : vector<15x64xf32>, vector<1x64xf32> -> vector<16x64xf32>
    %87 = vector.extract_strided_slice %0 {offsets = [5, 0, 0], sizes = [1, 16, 1], strides = [1, 1, 1]} : vector<9x16x1xf32> to vector<1x16x1xf32>
    %88 = vector.shape_cast %87 : vector<1x16x1xf32> to vector<16x1xf32>
    %89 = vector.broadcast %88 : vector<16x1xf32> to vector<16x64xf32>
    %90 = arith.mulf %86, %89 : vector<16x64xf32>
    %91 = vector.extract_strided_slice %55 {offsets = [3, 0], sizes = [13, 64], strides = [1, 1]} : vector<16x64xf32> to vector<13x64xf32>
    %92 = vector.extract_strided_slice %55 {offsets = [0, 0], sizes = [3, 64], strides = [1, 1]} : vector<16x64xf32> to vector<3x64xf32>
    %93 = tpu.concatenate %91, %92 in 0 : vector<13x64xf32>, vector<3x64xf32> -> vector<16x64xf32>
    %94 = vector.extract_strided_slice %0 {offsets = [6, 0, 0], sizes = [1, 16, 1], strides = [1, 1, 1]} : vector<9x16x1xf32> to vector<1x16x1xf32>
    %95 = vector.shape_cast %94 : vector<1x16x1xf32> to vector<16x1xf32>
    %96 = vector.broadcast %95 : vector<16x1xf32> to vector<16x64xf32>
    %97 = arith.mulf %93, %96 : vector<16x64xf32>
    %98 = vector.extract_strided_slice %55 {offsets = [4, 0], sizes = [12, 64], strides = [1, 1]} : vector<16x64xf32> to vector<12x64xf32>
    %99 = vector.extract_strided_slice %55 {offsets = [0, 0], sizes = [4, 64], strides = [1, 1]} : vector<16x64xf32> to vector<4x64xf32>
    %100 = tpu.concatenate %98, %99 in 0 : vector<12x64xf32>, vector<4x64xf32> -> vector<16x64xf32>
    %101 = vector.extract_strided_slice %0 {offsets = [7, 0, 0], sizes = [1, 16, 1], strides = [1, 1, 1]} : vector<9x16x1xf32> to vector<1x16x1xf32>
    %102 = vector.shape_cast %101 : vector<1x16x1xf32> to vector<16x1xf32>
    %103 = vector.broadcast %102 : vector<16x1xf32> to vector<16x64xf32>
    %104 = arith.mulf %100, %103 : vector<16x64xf32>
    %105 = vector.extract_strided_slice %55 {offsets = [5, 0], sizes = [11, 64], strides = [1, 1]} : vector<16x64xf32> to vector<11x64xf32>
    %106 = vector.extract_strided_slice %55 {offsets = [0, 0], sizes = [5, 64], strides = [1, 1]} : vector<16x64xf32> to vector<5x64xf32>
    %107 = tpu.concatenate %105, %106 in 0 : vector<11x64xf32>, vector<5x64xf32> -> vector<16x64xf32>
    %108 = vector.extract_strided_slice %0 {offsets = [8, 0, 0], sizes = [1, 16, 1], strides = [1, 1, 1]} : vector<9x16x1xf32> to vector<1x16x1xf32>
    %109 = vector.shape_cast %108 : vector<1x16x1xf32> to vector<16x1xf32>
    %110 = vector.broadcast %109 : vector<16x1xf32> to vector<16x64xf32>
    %111 = arith.mulf %107, %110 : vector<16x64xf32>
    %112 = tpu.concatenate %62, %69, %76, %83, %55, %90, %97, %104, %111 in 1 : vector<16x64xf32>, vector<16x64xf32>, vector<16x64xf32>, vector<16x64xf32>, vector<16x64xf32>, vector<16x64xf32>, vector<16x64xf32>, vector<16x64xf32>, vector<16x64xf32> -> vector<16x576xf32>
    %c0_37 = arith.constant 0 : index
    %c0_38 = arith.constant 0 : index
    %113 = vector.load %arg9[%c0_37, %c0_38] : memref<576x64xbf16, #tpu.memory_space<vmem>>, vector<576x64xbf16>
    %114 = arith.truncf %112 : vector<16x576xf32> to vector<16x576xbf16>
    %cst_39 = arith.constant dense<0.000000e+00> : vector<16x64xf32>
    %115 = tpu.matmul %114, %113, %cst_39 {dimension_numbers = #tpu.dot_dimension_numbers<[1], [0], [0], [1], [0, 0, 1, 1], [], []>} : vector<16x576xbf16>, vector<576x64xbf16>, vector<16x64xf32> -> vector<16x64xf32>
    %c0_40 = arith.constant 0 : index
    %c0_41 = arith.constant 0 : index
    %116 = vector.load %arg10[%c0_40, %c0_41] : memref<1x64xf32, #tpu.memory_space<vmem>>, vector<1x64xf32>
    %117 = vector.broadcast %116 : vector<1x64xf32> to vector<16x64xf32>
    %118 = arith.addf %115, %117 : vector<16x64xf32>
    %cst_42 = arith.constant 0.000000e+00 : f32
    %119 = vector.broadcast %cst_42 : f32 to vector<16x64xf32>
    %120 = arith.cmpf ogt, %118, %119 : vector<16x64xf32>
    %cst_43 = arith.constant 0.00999999977 : f32
    %121 = vector.broadcast %cst_43 : f32 to vector<16x64xf32>
    %122 = arith.mulf %121, %118 : vector<16x64xf32>
    %123 = arith.select %120, %118, %122 : vector<16x64xi1>, vector<16x64xf32>
    %124 = vector.extract_strided_slice %123 {offsets = [11, 0], sizes = [5, 64], strides = [1, 1]} : vector<16x64xf32> to vector<5x64xf32>
    %125 = vector.extract_strided_slice %123 {offsets = [0, 0], sizes = [11, 64], strides = [1, 1]} : vector<16x64xf32> to vector<11x64xf32>
    %126 = tpu.concatenate %124, %125 in 0 : vector<5x64xf32>, vector<11x64xf32> -> vector<16x64xf32>
    %127 = vector.extract_strided_slice %0 {offsets = [0, 0, 0], sizes = [1, 16, 1], strides = [1, 1, 1]} : vector<9x16x1xf32> to vector<1x16x1xf32>
    %128 = vector.shape_cast %127 : vector<1x16x1xf32> to vector<16x1xf32>
    %129 = vector.broadcast %128 : vector<16x1xf32> to vector<16x64xf32>
    %130 = arith.mulf %126, %129 : vector<16x64xf32>
    %131 = vector.extract_strided_slice %123 {offsets = [12, 0], sizes = [4, 64], strides = [1, 1]} : vector<16x64xf32> to vector<4x64xf32>
    %132 = vector.extract_strided_slice %123 {offsets = [0, 0], sizes = [12, 64], strides = [1, 1]} : vector<16x64xf32> to vector<12x64xf32>
    %133 = tpu.concatenate %131, %132 in 0 : vector<4x64xf32>, vector<12x64xf32> -> vector<16x64xf32>
    %134 = vector.extract_strided_slice %0 {offsets = [1, 0, 0], sizes = [1, 16, 1], strides = [1, 1, 1]} : vector<9x16x1xf32> to vector<1x16x1xf32>
    %135 = vector.shape_cast %134 : vector<1x16x1xf32> to vector<16x1xf32>
    %136 = vector.broadcast %135 : vector<16x1xf32> to vector<16x64xf32>
    %137 = arith.mulf %133, %136 : vector<16x64xf32>
    %138 = vector.extract_strided_slice %123 {offsets = [13, 0], sizes = [3, 64], strides = [1, 1]} : vector<16x64xf32> to vector<3x64xf32>
    %139 = vector.extract_strided_slice %123 {offsets = [0, 0], sizes = [13, 64], strides = [1, 1]} : vector<16x64xf32> to vector<13x64xf32>
    %140 = tpu.concatenate %138, %139 in 0 : vector<3x64xf32>, vector<13x64xf32> -> vector<16x64xf32>
    %141 = vector.extract_strided_slice %0 {offsets = [2, 0, 0], sizes = [1, 16, 1], strides = [1, 1, 1]} : vector<9x16x1xf32> to vector<1x16x1xf32>
    %142 = vector.shape_cast %141 : vector<1x16x1xf32> to vector<16x1xf32>
    %143 = vector.broadcast %142 : vector<16x1xf32> to vector<16x64xf32>
    %144 = arith.mulf %140, %143 : vector<16x64xf32>
    %145 = vector.extract_strided_slice %123 {offsets = [15, 0], sizes = [1, 64], strides = [1, 1]} : vector<16x64xf32> to vector<1x64xf32>
    %146 = vector.extract_strided_slice %123 {offsets = [0, 0], sizes = [15, 64], strides = [1, 1]} : vector<16x64xf32> to vector<15x64xf32>
    %147 = tpu.concatenate %145, %146 in 0 : vector<1x64xf32>, vector<15x64xf32> -> vector<16x64xf32>
    %148 = vector.extract_strided_slice %0 {offsets = [3, 0, 0], sizes = [1, 16, 1], strides = [1, 1, 1]} : vector<9x16x1xf32> to vector<1x16x1xf32>
    %149 = vector.shape_cast %148 : vector<1x16x1xf32> to vector<16x1xf32>
    %150 = vector.broadcast %149 : vector<16x1xf32> to vector<16x64xf32>
    %151 = arith.mulf %147, %150 : vector<16x64xf32>
    %152 = vector.extract_strided_slice %123 {offsets = [1, 0], sizes = [15, 64], strides = [1, 1]} : vector<16x64xf32> to vector<15x64xf32>
    %153 = vector.extract_strided_slice %123 {offsets = [0, 0], sizes = [1, 64], strides = [1, 1]} : vector<16x64xf32> to vector<1x64xf32>
    %154 = tpu.concatenate %152, %153 in 0 : vector<15x64xf32>, vector<1x64xf32> -> vector<16x64xf32>
    %155 = vector.extract_strided_slice %0 {offsets = [5, 0, 0], sizes = [1, 16, 1], strides = [1, 1, 1]} : vector<9x16x1xf32> to vector<1x16x1xf32>
    %156 = vector.shape_cast %155 : vector<1x16x1xf32> to vector<16x1xf32>
    %157 = vector.broadcast %156 : vector<16x1xf32> to vector<16x64xf32>
    %158 = arith.mulf %154, %157 : vector<16x64xf32>
    %159 = vector.extract_strided_slice %123 {offsets = [3, 0], sizes = [13, 64], strides = [1, 1]} : vector<16x64xf32> to vector<13x64xf32>
    %160 = vector.extract_strided_slice %123 {offsets = [0, 0], sizes = [3, 64], strides = [1, 1]} : vector<16x64xf32> to vector<3x64xf32>
    %161 = tpu.concatenate %159, %160 in 0 : vector<13x64xf32>, vector<3x64xf32> -> vector<16x64xf32>
    %162 = vector.extract_strided_slice %0 {offsets = [6, 0, 0], sizes = [1, 16, 1], strides = [1, 1, 1]} : vector<9x16x1xf32> to vector<1x16x1xf32>
    %163 = vector.shape_cast %162 : vector<1x16x1xf32> to vector<16x1xf32>
    %164 = vector.broadcast %163 : vector<16x1xf32> to vector<16x64xf32>
    %165 = arith.mulf %161, %164 : vector<16x64xf32>
    %166 = vector.extract_strided_slice %123 {offsets = [4, 0], sizes = [12, 64], strides = [1, 1]} : vector<16x64xf32> to vector<12x64xf32>
    %167 = vector.extract_strided_slice %123 {offsets = [0, 0], sizes = [4, 64], strides = [1, 1]} : vector<16x64xf32> to vector<4x64xf32>
    %168 = tpu.concatenate %166, %167 in 0 : vector<12x64xf32>, vector<4x64xf32> -> vector<16x64xf32>
    %169 = vector.extract_strided_slice %0 {offsets = [7, 0, 0], sizes = [1, 16, 1], strides = [1, 1, 1]} : vector<9x16x1xf32> to vector<1x16x1xf32>
    %170 = vector.shape_cast %169 : vector<1x16x1xf32> to vector<16x1xf32>
    %171 = vector.broadcast %170 : vector<16x1xf32> to vector<16x64xf32>
    %172 = arith.mulf %168, %171 : vector<16x64xf32>
    %173 = vector.extract_strided_slice %123 {offsets = [5, 0], sizes = [11, 64], strides = [1, 1]} : vector<16x64xf32> to vector<11x64xf32>
    %174 = vector.extract_strided_slice %123 {offsets = [0, 0], sizes = [5, 64], strides = [1, 1]} : vector<16x64xf32> to vector<5x64xf32>
    %175 = tpu.concatenate %173, %174 in 0 : vector<11x64xf32>, vector<5x64xf32> -> vector<16x64xf32>
    %176 = vector.extract_strided_slice %0 {offsets = [8, 0, 0], sizes = [1, 16, 1], strides = [1, 1, 1]} : vector<9x16x1xf32> to vector<1x16x1xf32>
    %177 = vector.shape_cast %176 : vector<1x16x1xf32> to vector<16x1xf32>
    %178 = vector.broadcast %177 : vector<16x1xf32> to vector<16x64xf32>
    %179 = arith.mulf %175, %178 : vector<16x64xf32>
    %180 = tpu.concatenate %130, %137, %144, %151, %123, %158, %165, %172, %179 in 1 : vector<16x64xf32>, vector<16x64xf32>, vector<16x64xf32>, vector<16x64xf32>, vector<16x64xf32>, vector<16x64xf32>, vector<16x64xf32>, vector<16x64xf32>, vector<16x64xf32> -> vector<16x576xf32>
    %c0_44 = arith.constant 0 : index
    %c0_45 = arith.constant 0 : index
    %c0_46 = arith.constant 0 : index
    %181 = vector.load %arg11[%c0_44, %c0_45, %c0_46] : memref<12x576x64xbf16, #tpu.memory_space<vmem>>, vector<1x576x64xbf16>
    %182 = vector.shape_cast %181 : vector<1x576x64xbf16> to vector<576x64xbf16>
    %183 = arith.truncf %180 : vector<16x576xf32> to vector<16x576xbf16>
    %cst_47 = arith.constant dense<0.000000e+00> : vector<16x64xf32>
    %184 = tpu.matmul %183, %182, %cst_47 {dimension_numbers = #tpu.dot_dimension_numbers<[1], [0], [0], [1], [0, 0, 1, 1], [], []>} : vector<16x576xbf16>, vector<576x64xbf16>, vector<16x64xf32> -> vector<16x64xf32>
    %cst_48 = arith.constant 0.000000e+00 : f32
    %185 = vector.broadcast %cst_48 : f32 to vector<16x64xf32>
    %186 = arith.maximumf %184, %185 : vector<16x64xf32>
    %c0_49 = arith.constant 0 : index
    %c0_50 = arith.constant 0 : index
    %c0_51 = arith.constant 0 : index
    %187 = vector.load %arg12[%c0_49, %c0_50, %c0_51] : memref<12x64x64xbf16, #tpu.memory_space<vmem>>, vector<1x64x64xbf16>
    %188 = vector.shape_cast %187 : vector<1x64x64xbf16> to vector<64x64xbf16>
    %189 = arith.truncf %186 : vector<16x64xf32> to vector<16x64xbf16>
    %cst_52 = arith.constant dense<0.000000e+00> : vector<16x64xf32>
    %190 = tpu.matmul %189, %188, %cst_52 {dimension_numbers = #tpu.dot_dimension_numbers<[1], [0], [0], [1], [0, 0, 1, 1], [], []>} : vector<16x64xbf16>, vector<64x64xbf16>, vector<16x64xf32> -> vector<16x64xf32>
    %191 = arith.addf %123, %190 : vector<16x64xf32>
    %192 = vector.extract_strided_slice %191 {offsets = [11, 0], sizes = [5, 64], strides = [1, 1]} : vector<16x64xf32> to vector<5x64xf32>
    %193 = vector.extract_strided_slice %191 {offsets = [0, 0], sizes = [11, 64], strides = [1, 1]} : vector<16x64xf32> to vector<11x64xf32>
    %194 = tpu.concatenate %192, %193 in 0 : vector<5x64xf32>, vector<11x64xf32> -> vector<16x64xf32>
    %195 = vector.extract_strided_slice %0 {offsets = [0, 0, 0], sizes = [1, 16, 1], strides = [1, 1, 1]} : vector<9x16x1xf32> to vector<1x16x1xf32>
    %196 = vector.shape_cast %195 : vector<1x16x1xf32> to vector<16x1xf32>
    %197 = vector.broadcast %196 : vector<16x1xf32> to vector<16x64xf32>
    %198 = arith.mulf %194, %197 : vector<16x64xf32>
    %199 = vector.extract_strided_slice %191 {offsets = [12, 0], sizes = [4, 64], strides = [1, 1]} : vector<16x64xf32> to vector<4x64xf32>
    %200 = vector.extract_strided_slice %191 {offsets = [0, 0], sizes = [12, 64], strides = [1, 1]} : vector<16x64xf32> to vector<12x64xf32>
    %201 = tpu.concatenate %199, %200 in 0 : vector<4x64xf32>, vector<12x64xf32> -> vector<16x64xf32>
    %202 = vector.extract_strided_slice %0 {offsets = [1, 0, 0], sizes = [1, 16, 1], strides = [1, 1, 1]} : vector<9x16x1xf32> to vector<1x16x1xf32>
    %203 = vector.shape_cast %202 : vector<1x16x1xf32> to vector<16x1xf32>
    %204 = vector.broadcast %203 : vector<16x1xf32> to vector<16x64xf32>
    %205 = arith.mulf %201, %204 : vector<16x64xf32>
    %206 = vector.extract_strided_slice %191 {offsets = [13, 0], sizes = [3, 64], strides = [1, 1]} : vector<16x64xf32> to vector<3x64xf32>
    %207 = vector.extract_strided_slice %191 {offsets = [0, 0], sizes = [13, 64], strides = [1, 1]} : vector<16x64xf32> to vector<13x64xf32>
    %208 = tpu.concatenate %206, %207 in 0 : vector<3x64xf32>, vector<13x64xf32> -> vector<16x64xf32>
    %209 = vector.extract_strided_slice %0 {offsets = [2, 0, 0], sizes = [1, 16, 1], strides = [1, 1, 1]} : vector<9x16x1xf32> to vector<1x16x1xf32>
    %210 = vector.shape_cast %209 : vector<1x16x1xf32> to vector<16x1xf32>
    %211 = vector.broadcast %210 : vector<16x1xf32> to vector<16x64xf32>
    %212 = arith.mulf %208, %211 : vector<16x64xf32>
    %213 = vector.extract_strided_slice %191 {offsets = [15, 0], sizes = [1, 64], strides = [1, 1]} : vector<16x64xf32> to vector<1x64xf32>
    %214 = vector.extract_strided_slice %191 {offsets = [0, 0], sizes = [15, 64], strides = [1, 1]} : vector<16x64xf32> to vector<15x64xf32>
    %215 = tpu.concatenate %213, %214 in 0 : vector<1x64xf32>, vector<15x64xf32> -> vector<16x64xf32>
    %216 = vector.extract_strided_slice %0 {offsets = [3, 0, 0], sizes = [1, 16, 1], strides = [1, 1, 1]} : vector<9x16x1xf32> to vector<1x16x1xf32>
    %217 = vector.shape_cast %216 : vector<1x16x1xf32> to vector<16x1xf32>
    %218 = vector.broadcast %217 : vector<16x1xf32> to vector<16x64xf32>
    %219 = arith.mulf %215, %218 : vector<16x64xf32>
    %220 = vector.extract_strided_slice %191 {offsets = [1, 0], sizes = [15, 64], strides = [1, 1]} : vector<16x64xf32> to vector<15x64xf32>
    %221 = vector.extract_strided_slice %191 {offsets = [0, 0], sizes = [1, 64], strides = [1, 1]} : vector<16x64xf32> to vector<1x64xf32>
    %222 = tpu.concatenate %220, %221 in 0 : vector<15x64xf32>, vector<1x64xf32> -> vector<16x64xf32>
    %223 = vector.extract_strided_slice %0 {offsets = [5, 0, 0], sizes = [1, 16, 1], strides = [1, 1, 1]} : vector<9x16x1xf32> to vector<1x16x1xf32>
    %224 = vector.shape_cast %223 : vector<1x16x1xf32> to vector<16x1xf32>
    %225 = vector.broadcast %224 : vector<16x1xf32> to vector<16x64xf32>
    %226 = arith.mulf %222, %225 : vector<16x64xf32>
    %227 = vector.extract_strided_slice %191 {offsets = [3, 0], sizes = [13, 64], strides = [1, 1]} : vector<16x64xf32> to vector<13x64xf32>
    %228 = vector.extract_strided_slice %191 {offsets = [0, 0], sizes = [3, 64], strides = [1, 1]} : vector<16x64xf32> to vector<3x64xf32>
    %229 = tpu.concatenate %227, %228 in 0 : vector<13x64xf32>, vector<3x64xf32> -> vector<16x64xf32>
    %230 = vector.extract_strided_slice %0 {offsets = [6, 0, 0], sizes = [1, 16, 1], strides = [1, 1, 1]} : vector<9x16x1xf32> to vector<1x16x1xf32>
    %231 = vector.shape_cast %230 : vector<1x16x1xf32> to vector<16x1xf32>
    %232 = vector.broadcast %231 : vector<16x1xf32> to vector<16x64xf32>
    %233 = arith.mulf %229, %232 : vector<16x64xf32>
    %234 = vector.extract_strided_slice %191 {offsets = [4, 0], sizes = [12, 64], strides = [1, 1]} : vector<16x64xf32> to vector<12x64xf32>
    %235 = vector.extract_strided_slice %191 {offsets = [0, 0], sizes = [4, 64], strides = [1, 1]} : vector<16x64xf32> to vector<4x64xf32>
    %236 = tpu.concatenate %234, %235 in 0 : vector<12x64xf32>, vector<4x64xf32> -> vector<16x64xf32>
    %237 = vector.extract_strided_slice %0 {offsets = [7, 0, 0], sizes = [1, 16, 1], strides = [1, 1, 1]} : vector<9x16x1xf32> to vector<1x16x1xf32>
    %238 = vector.shape_cast %237 : vector<1x16x1xf32> to vector<16x1xf32>
    %239 = vector.broadcast %238 : vector<16x1xf32> to vector<16x64xf32>
    %240 = arith.mulf %236, %239 : vector<16x64xf32>
    %241 = vector.extract_strided_slice %191 {offsets = [5, 0], sizes = [11, 64], strides = [1, 1]} : vector<16x64xf32> to vector<11x64xf32>
    %242 = vector.extract_strided_slice %191 {offsets = [0, 0], sizes = [5, 64], strides = [1, 1]} : vector<16x64xf32> to vector<5x64xf32>
    %243 = tpu.concatenate %241, %242 in 0 : vector<11x64xf32>, vector<5x64xf32> -> vector<16x64xf32>
    %244 = vector.extract_strided_slice %0 {offsets = [8, 0, 0], sizes = [1, 16, 1], strides = [1, 1, 1]} : vector<9x16x1xf32> to vector<1x16x1xf32>
    %245 = vector.shape_cast %244 : vector<1x16x1xf32> to vector<16x1xf32>
    %246 = vector.broadcast %245 : vector<16x1xf32> to vector<16x64xf32>
    %247 = arith.mulf %243, %246 : vector<16x64xf32>
    %248 = tpu.concatenate %198, %205, %212, %219, %191, %226, %233, %240, %247 in 1 : vector<16x64xf32>, vector<16x64xf32>, vector<16x64xf32>, vector<16x64xf32>, vector<16x64xf32>, vector<16x64xf32>, vector<16x64xf32>, vector<16x64xf32>, vector<16x64xf32> -> vector<16x576xf32>
    %c1_53 = arith.constant 1 : index
    %c0_54 = arith.constant 0 : index
    %c0_55 = arith.constant 0 : index
    %249 = vector.load %arg11[%c1_53, %c0_54, %c0_55] : memref<12x576x64xbf16, #tpu.memory_space<vmem>>, vector<1x576x64xbf16>
    %250 = vector.shape_cast %249 : vector<1x576x64xbf16> to vector<576x64xbf16>
    %251 = arith.truncf %248 : vector<16x576xf32> to vector<16x576xbf16>
    %cst_56 = arith.constant dense<0.000000e+00> : vector<16x64xf32>
    %252 = tpu.matmul %251, %250, %cst_56 {dimension_numbers = #tpu.dot_dimension_numbers<[1], [0], [0], [1], [0, 0, 1, 1], [], []>} : vector<16x576xbf16>, vector<576x64xbf16>, vector<16x64xf32> -> vector<16x64xf32>
    %cst_57 = arith.constant 0.000000e+00 : f32
    %253 = vector.broadcast %cst_57 : f32 to vector<16x64xf32>
    %254 = arith.maximumf %252, %253 : vector<16x64xf32>
    %c1_58 = arith.constant 1 : index
    %c0_59 = arith.constant 0 : index
    %c0_60 = arith.constant 0 : index
    %255 = vector.load %arg12[%c1_58, %c0_59, %c0_60] : memref<12x64x64xbf16, #tpu.memory_space<vmem>>, vector<1x64x64xbf16>
    %256 = vector.shape_cast %255 : vector<1x64x64xbf16> to vector<64x64xbf16>
    %257 = arith.truncf %254 : vector<16x64xf32> to vector<16x64xbf16>
    %cst_61 = arith.constant dense<0.000000e+00> : vector<16x64xf32>
    %258 = tpu.matmul %257, %256, %cst_61 {dimension_numbers = #tpu.dot_dimension_numbers<[1], [0], [0], [1], [0, 0, 1, 1], [], []>} : vector<16x64xbf16>, vector<64x64xbf16>, vector<16x64xf32> -> vector<16x64xf32>
    %259 = arith.addf %191, %258 : vector<16x64xf32>
    %260 = vector.extract_strided_slice %259 {offsets = [11, 0], sizes = [5, 64], strides = [1, 1]} : vector<16x64xf32> to vector<5x64xf32>
    %261 = vector.extract_strided_slice %259 {offsets = [0, 0], sizes = [11, 64], strides = [1, 1]} : vector<16x64xf32> to vector<11x64xf32>
    %262 = tpu.concatenate %260, %261 in 0 : vector<5x64xf32>, vector<11x64xf32> -> vector<16x64xf32>
    %263 = vector.extract_strided_slice %0 {offsets = [0, 0, 0], sizes = [1, 16, 1], strides = [1, 1, 1]} : vector<9x16x1xf32> to vector<1x16x1xf32>
    %264 = vector.shape_cast %263 : vector<1x16x1xf32> to vector<16x1xf32>
    %265 = vector.broadcast %264 : vector<16x1xf32> to vector<16x64xf32>
    %266 = arith.mulf %262, %265 : vector<16x64xf32>
    %267 = vector.extract_strided_slice %259 {offsets = [12, 0], sizes = [4, 64], strides = [1, 1]} : vector<16x64xf32> to vector<4x64xf32>
    %268 = vector.extract_strided_slice %259 {offsets = [0, 0], sizes = [12, 64], strides = [1, 1]} : vector<16x64xf32> to vector<12x64xf32>
    %269 = tpu.concatenate %267, %268 in 0 : vector<4x64xf32>, vector<12x64xf32> -> vector<16x64xf32>
    %270 = vector.extract_strided_slice %0 {offsets = [1, 0, 0], sizes = [1, 16, 1], strides = [1, 1, 1]} : vector<9x16x1xf32> to vector<1x16x1xf32>
    %271 = vector.shape_cast %270 : vector<1x16x1xf32> to vector<16x1xf32>
    %272 = vector.broadcast %271 : vector<16x1xf32> to vector<16x64xf32>
    %273 = arith.mulf %269, %272 : vector<16x64xf32>
    %274 = vector.extract_strided_slice %259 {offsets = [13, 0], sizes = [3, 64], strides = [1, 1]} : vector<16x64xf32> to vector<3x64xf32>
    %275 = vector.extract_strided_slice %259 {offsets = [0, 0], sizes = [13, 64], strides = [1, 1]} : vector<16x64xf32> to vector<13x64xf32>
    %276 = tpu.concatenate %274, %275 in 0 : vector<3x64xf32>, vector<13x64xf32> -> vector<16x64xf32>
    %277 = vector.extract_strided_slice %0 {offsets = [2, 0, 0], sizes = [1, 16, 1], strides = [1, 1, 1]} : vector<9x16x1xf32> to vector<1x16x1xf32>
    %278 = vector.shape_cast %277 : vector<1x16x1xf32> to vector<16x1xf32>
    %279 = vector.broadcast %278 : vector<16x1xf32> to vector<16x64xf32>
    %280 = arith.mulf %276, %279 : vector<16x64xf32>
    %281 = vector.extract_strided_slice %259 {offsets = [15, 0], sizes = [1, 64], strides = [1, 1]} : vector<16x64xf32> to vector<1x64xf32>
    %282 = vector.extract_strided_slice %259 {offsets = [0, 0], sizes = [15, 64], strides = [1, 1]} : vector<16x64xf32> to vector<15x64xf32>
    %283 = tpu.concatenate %281, %282 in 0 : vector<1x64xf32>, vector<15x64xf32> -> vector<16x64xf32>
    %284 = vector.extract_strided_slice %0 {offsets = [3, 0, 0], sizes = [1, 16, 1], strides = [1, 1, 1]} : vector<9x16x1xf32> to vector<1x16x1xf32>
    %285 = vector.shape_cast %284 : vector<1x16x1xf32> to vector<16x1xf32>
    %286 = vector.broadcast %285 : vector<16x1xf32> to vector<16x64xf32>
    %287 = arith.mulf %283, %286 : vector<16x64xf32>
    %288 = vector.extract_strided_slice %259 {offsets = [1, 0], sizes = [15, 64], strides = [1, 1]} : vector<16x64xf32> to vector<15x64xf32>
    %289 = vector.extract_strided_slice %259 {offsets = [0, 0], sizes = [1, 64], strides = [1, 1]} : vector<16x64xf32> to vector<1x64xf32>
    %290 = tpu.concatenate %288, %289 in 0 : vector<15x64xf32>, vector<1x64xf32> -> vector<16x64xf32>
    %291 = vector.extract_strided_slice %0 {offsets = [5, 0, 0], sizes = [1, 16, 1], strides = [1, 1, 1]} : vector<9x16x1xf32> to vector<1x16x1xf32>
    %292 = vector.shape_cast %291 : vector<1x16x1xf32> to vector<16x1xf32>
    %293 = vector.broadcast %292 : vector<16x1xf32> to vector<16x64xf32>
    %294 = arith.mulf %290, %293 : vector<16x64xf32>
    %295 = vector.extract_strided_slice %259 {offsets = [3, 0], sizes = [13, 64], strides = [1, 1]} : vector<16x64xf32> to vector<13x64xf32>
    %296 = vector.extract_strided_slice %259 {offsets = [0, 0], sizes = [3, 64], strides = [1, 1]} : vector<16x64xf32> to vector<3x64xf32>
    %297 = tpu.concatenate %295, %296 in 0 : vector<13x64xf32>, vector<3x64xf32> -> vector<16x64xf32>
    %298 = vector.extract_strided_slice %0 {offsets = [6, 0, 0], sizes = [1, 16, 1], strides = [1, 1, 1]} : vector<9x16x1xf32> to vector<1x16x1xf32>
    %299 = vector.shape_cast %298 : vector<1x16x1xf32> to vector<16x1xf32>
    %300 = vector.broadcast %299 : vector<16x1xf32> to vector<16x64xf32>
    %301 = arith.mulf %297, %300 : vector<16x64xf32>
    %302 = vector.extract_strided_slice %259 {offsets = [4, 0], sizes = [12, 64], strides = [1, 1]} : vector<16x64xf32> to vector<12x64xf32>
    %303 = vector.extract_strided_slice %259 {offsets = [0, 0], sizes = [4, 64], strides = [1, 1]} : vector<16x64xf32> to vector<4x64xf32>
    %304 = tpu.concatenate %302, %303 in 0 : vector<12x64xf32>, vector<4x64xf32> -> vector<16x64xf32>
    %305 = vector.extract_strided_slice %0 {offsets = [7, 0, 0], sizes = [1, 16, 1], strides = [1, 1, 1]} : vector<9x16x1xf32> to vector<1x16x1xf32>
    %306 = vector.shape_cast %305 : vector<1x16x1xf32> to vector<16x1xf32>
    %307 = vector.broadcast %306 : vector<16x1xf32> to vector<16x64xf32>
    %308 = arith.mulf %304, %307 : vector<16x64xf32>
    %309 = vector.extract_strided_slice %259 {offsets = [5, 0], sizes = [11, 64], strides = [1, 1]} : vector<16x64xf32> to vector<11x64xf32>
    %310 = vector.extract_strided_slice %259 {offsets = [0, 0], sizes = [5, 64], strides = [1, 1]} : vector<16x64xf32> to vector<5x64xf32>
    %311 = tpu.concatenate %309, %310 in 0 : vector<11x64xf32>, vector<5x64xf32> -> vector<16x64xf32>
    %312 = vector.extract_strided_slice %0 {offsets = [8, 0, 0], sizes = [1, 16, 1], strides = [1, 1, 1]} : vector<9x16x1xf32> to vector<1x16x1xf32>
    %313 = vector.shape_cast %312 : vector<1x16x1xf32> to vector<16x1xf32>
    %314 = vector.broadcast %313 : vector<16x1xf32> to vector<16x64xf32>
    %315 = arith.mulf %311, %314 : vector<16x64xf32>
    %316 = tpu.concatenate %266, %273, %280, %287, %259, %294, %301, %308, %315 in 1 : vector<16x64xf32>, vector<16x64xf32>, vector<16x64xf32>, vector<16x64xf32>, vector<16x64xf32>, vector<16x64xf32>, vector<16x64xf32>, vector<16x64xf32>, vector<16x64xf32> -> vector<16x576xf32>
    %c2_62 = arith.constant 2 : index
    %c0_63 = arith.constant 0 : index
    %c0_64 = arith.constant 0 : index
    %317 = vector.load %arg11[%c2_62, %c0_63, %c0_64] : memref<12x576x64xbf16, #tpu.memory_space<vmem>>, vector<1x576x64xbf16>
    %318 = vector.shape_cast %317 : vector<1x576x64xbf16> to vector<576x64xbf16>
    %319 = arith.truncf %316 : vector<16x576xf32> to vector<16x576xbf16>
    %cst_65 = arith.constant dense<0.000000e+00> : vector<16x64xf32>
    %320 = tpu.matmul %319, %318, %cst_65 {dimension_numbers = #tpu.dot_dimension_numbers<[1], [0], [0], [1], [0, 0, 1, 1], [], []>} : vector<16x576xbf16>, vector<576x64xbf16>, vector<16x64xf32> -> vector<16x64xf32>
    %cst_66 = arith.constant 0.000000e+00 : f32
    %321 = vector.broadcast %cst_66 : f32 to vector<16x64xf32>
    %322 = arith.maximumf %320, %321 : vector<16x64xf32>
    %c2_67 = arith.constant 2 : index
    %c0_68 = arith.constant 0 : index
    %c0_69 = arith.constant 0 : index
    %323 = vector.load %arg12[%c2_67, %c0_68, %c0_69] : memref<12x64x64xbf16, #tpu.memory_space<vmem>>, vector<1x64x64xbf16>
    %324 = vector.shape_cast %323 : vector<1x64x64xbf16> to vector<64x64xbf16>
    %325 = arith.truncf %322 : vector<16x64xf32> to vector<16x64xbf16>
    %cst_70 = arith.constant dense<0.000000e+00> : vector<16x64xf32>
    %326 = tpu.matmul %325, %324, %cst_70 {dimension_numbers = #tpu.dot_dimension_numbers<[1], [0], [0], [1], [0, 0, 1, 1], [], []>} : vector<16x64xbf16>, vector<64x64xbf16>, vector<16x64xf32> -> vector<16x64xf32>
    %327 = arith.addf %259, %326 : vector<16x64xf32>
    %328 = vector.extract_strided_slice %327 {offsets = [11, 0], sizes = [5, 64], strides = [1, 1]} : vector<16x64xf32> to vector<5x64xf32>
    %329 = vector.extract_strided_slice %327 {offsets = [0, 0], sizes = [11, 64], strides = [1, 1]} : vector<16x64xf32> to vector<11x64xf32>
    %330 = tpu.concatenate %328, %329 in 0 : vector<5x64xf32>, vector<11x64xf32> -> vector<16x64xf32>
    %331 = vector.extract_strided_slice %0 {offsets = [0, 0, 0], sizes = [1, 16, 1], strides = [1, 1, 1]} : vector<9x16x1xf32> to vector<1x16x1xf32>
    %332 = vector.shape_cast %331 : vector<1x16x1xf32> to vector<16x1xf32>
    %333 = vector.broadcast %332 : vector<16x1xf32> to vector<16x64xf32>
    %334 = arith.mulf %330, %333 : vector<16x64xf32>
    %335 = vector.extract_strided_slice %327 {offsets = [12, 0], sizes = [4, 64], strides = [1, 1]} : vector<16x64xf32> to vector<4x64xf32>
    %336 = vector.extract_strided_slice %327 {offsets = [0, 0], sizes = [12, 64], strides = [1, 1]} : vector<16x64xf32> to vector<12x64xf32>
    %337 = tpu.concatenate %335, %336 in 0 : vector<4x64xf32>, vector<12x64xf32> -> vector<16x64xf32>
    %338 = vector.extract_strided_slice %0 {offsets = [1, 0, 0], sizes = [1, 16, 1], strides = [1, 1, 1]} : vector<9x16x1xf32> to vector<1x16x1xf32>
    %339 = vector.shape_cast %338 : vector<1x16x1xf32> to vector<16x1xf32>
    %340 = vector.broadcast %339 : vector<16x1xf32> to vector<16x64xf32>
    %341 = arith.mulf %337, %340 : vector<16x64xf32>
    %342 = vector.extract_strided_slice %327 {offsets = [13, 0], sizes = [3, 64], strides = [1, 1]} : vector<16x64xf32> to vector<3x64xf32>
    %343 = vector.extract_strided_slice %327 {offsets = [0, 0], sizes = [13, 64], strides = [1, 1]} : vector<16x64xf32> to vector<13x64xf32>
    %344 = tpu.concatenate %342, %343 in 0 : vector<3x64xf32>, vector<13x64xf32> -> vector<16x64xf32>
    %345 = vector.extract_strided_slice %0 {offsets = [2, 0, 0], sizes = [1, 16, 1], strides = [1, 1, 1]} : vector<9x16x1xf32> to vector<1x16x1xf32>
    %346 = vector.shape_cast %345 : vector<1x16x1xf32> to vector<16x1xf32>
    %347 = vector.broadcast %346 : vector<16x1xf32> to vector<16x64xf32>
    %348 = arith.mulf %344, %347 : vector<16x64xf32>
    %349 = vector.extract_strided_slice %327 {offsets = [15, 0], sizes = [1, 64], strides = [1, 1]} : vector<16x64xf32> to vector<1x64xf32>
    %350 = vector.extract_strided_slice %327 {offsets = [0, 0], sizes = [15, 64], strides = [1, 1]} : vector<16x64xf32> to vector<15x64xf32>
    %351 = tpu.concatenate %349, %350 in 0 : vector<1x64xf32>, vector<15x64xf32> -> vector<16x64xf32>
    %352 = vector.extract_strided_slice %0 {offsets = [3, 0, 0], sizes = [1, 16, 1], strides = [1, 1, 1]} : vector<9x16x1xf32> to vector<1x16x1xf32>
    %353 = vector.shape_cast %352 : vector<1x16x1xf32> to vector<16x1xf32>
    %354 = vector.broadcast %353 : vector<16x1xf32> to vector<16x64xf32>
    %355 = arith.mulf %351, %354 : vector<16x64xf32>
    %356 = vector.extract_strided_slice %327 {offsets = [1, 0], sizes = [15, 64], strides = [1, 1]} : vector<16x64xf32> to vector<15x64xf32>
    %357 = vector.extract_strided_slice %327 {offsets = [0, 0], sizes = [1, 64], strides = [1, 1]} : vector<16x64xf32> to vector<1x64xf32>
    %358 = tpu.concatenate %356, %357 in 0 : vector<15x64xf32>, vector<1x64xf32> -> vector<16x64xf32>
    %359 = vector.extract_strided_slice %0 {offsets = [5, 0, 0], sizes = [1, 16, 1], strides = [1, 1, 1]} : vector<9x16x1xf32> to vector<1x16x1xf32>
    %360 = vector.shape_cast %359 : vector<1x16x1xf32> to vector<16x1xf32>
    %361 = vector.broadcast %360 : vector<16x1xf32> to vector<16x64xf32>
    %362 = arith.mulf %358, %361 : vector<16x64xf32>
    %363 = vector.extract_strided_slice %327 {offsets = [3, 0], sizes = [13, 64], strides = [1, 1]} : vector<16x64xf32> to vector<13x64xf32>
    %364 = vector.extract_strided_slice %327 {offsets = [0, 0], sizes = [3, 64], strides = [1, 1]} : vector<16x64xf32> to vector<3x64xf32>
    %365 = tpu.concatenate %363, %364 in 0 : vector<13x64xf32>, vector<3x64xf32> -> vector<16x64xf32>
    %366 = vector.extract_strided_slice %0 {offsets = [6, 0, 0], sizes = [1, 16, 1], strides = [1, 1, 1]} : vector<9x16x1xf32> to vector<1x16x1xf32>
    %367 = vector.shape_cast %366 : vector<1x16x1xf32> to vector<16x1xf32>
    %368 = vector.broadcast %367 : vector<16x1xf32> to vector<16x64xf32>
    %369 = arith.mulf %365, %368 : vector<16x64xf32>
    %370 = vector.extract_strided_slice %327 {offsets = [4, 0], sizes = [12, 64], strides = [1, 1]} : vector<16x64xf32> to vector<12x64xf32>
    %371 = vector.extract_strided_slice %327 {offsets = [0, 0], sizes = [4, 64], strides = [1, 1]} : vector<16x64xf32> to vector<4x64xf32>
    %372 = tpu.concatenate %370, %371 in 0 : vector<12x64xf32>, vector<4x64xf32> -> vector<16x64xf32>
    %373 = vector.extract_strided_slice %0 {offsets = [7, 0, 0], sizes = [1, 16, 1], strides = [1, 1, 1]} : vector<9x16x1xf32> to vector<1x16x1xf32>
    %374 = vector.shape_cast %373 : vector<1x16x1xf32> to vector<16x1xf32>
    %375 = vector.broadcast %374 : vector<16x1xf32> to vector<16x64xf32>
    %376 = arith.mulf %372, %375 : vector<16x64xf32>
    %377 = vector.extract_strided_slice %327 {offsets = [5, 0], sizes = [11, 64], strides = [1, 1]} : vector<16x64xf32> to vector<11x64xf32>
    %378 = vector.extract_strided_slice %327 {offsets = [0, 0], sizes = [5, 64], strides = [1, 1]} : vector<16x64xf32> to vector<5x64xf32>
    %379 = tpu.concatenate %377, %378 in 0 : vector<11x64xf32>, vector<5x64xf32> -> vector<16x64xf32>
    %380 = vector.extract_strided_slice %0 {offsets = [8, 0, 0], sizes = [1, 16, 1], strides = [1, 1, 1]} : vector<9x16x1xf32> to vector<1x16x1xf32>
    %381 = vector.shape_cast %380 : vector<1x16x1xf32> to vector<16x1xf32>
    %382 = vector.broadcast %381 : vector<16x1xf32> to vector<16x64xf32>
    %383 = arith.mulf %379, %382 : vector<16x64xf32>
    %384 = tpu.concatenate %334, %341, %348, %355, %327, %362, %369, %376, %383 in 1 : vector<16x64xf32>, vector<16x64xf32>, vector<16x64xf32>, vector<16x64xf32>, vector<16x64xf32>, vector<16x64xf32>, vector<16x64xf32>, vector<16x64xf32>, vector<16x64xf32> -> vector<16x576xf32>
    %c3_71 = arith.constant 3 : index
    %c0_72 = arith.constant 0 : index
    %c0_73 = arith.constant 0 : index
    %385 = vector.load %arg11[%c3_71, %c0_72, %c0_73] : memref<12x576x64xbf16, #tpu.memory_space<vmem>>, vector<1x576x64xbf16>
    %386 = vector.shape_cast %385 : vector<1x576x64xbf16> to vector<576x64xbf16>
    %387 = arith.truncf %384 : vector<16x576xf32> to vector<16x576xbf16>
    %cst_74 = arith.constant dense<0.000000e+00> : vector<16x64xf32>
    %388 = tpu.matmul %387, %386, %cst_74 {dimension_numbers = #tpu.dot_dimension_numbers<[1], [0], [0], [1], [0, 0, 1, 1], [], []>} : vector<16x576xbf16>, vector<576x64xbf16>, vector<16x64xf32> -> vector<16x64xf32>
    %cst_75 = arith.constant 0.000000e+00 : f32
    %389 = vector.broadcast %cst_75 : f32 to vector<16x64xf32>
    %390 = arith.maximumf %388, %389 : vector<16x64xf32>
    %c3_76 = arith.constant 3 : index
    %c0_77 = arith.constant 0 : index
    %c0_78 = arith.constant 0 : index
    %391 = vector.load %arg12[%c3_76, %c0_77, %c0_78] : memref<12x64x64xbf16, #tpu.memory_space<vmem>>, vector<1x64x64xbf16>
    %392 = vector.shape_cast %391 : vector<1x64x64xbf16> to vector<64x64xbf16>
    %393 = arith.truncf %390 : vector<16x64xf32> to vector<16x64xbf16>
    %cst_79 = arith.constant dense<0.000000e+00> : vector<16x64xf32>
    %394 = tpu.matmul %393, %392, %cst_79 {dimension_numbers = #tpu.dot_dimension_numbers<[1], [0], [0], [1], [0, 0, 1, 1], [], []>} : vector<16x64xbf16>, vector<64x64xbf16>, vector<16x64xf32> -> vector<16x64xf32>
    %395 = arith.addf %327, %394 : vector<16x64xf32>
    %396 = vector.extract_strided_slice %395 {offsets = [11, 0], sizes = [5, 64], strides = [1, 1]} : vector<16x64xf32> to vector<5x64xf32>
    %397 = vector.extract_strided_slice %395 {offsets = [0, 0], sizes = [11, 64], strides = [1, 1]} : vector<16x64xf32> to vector<11x64xf32>
    %398 = tpu.concatenate %396, %397 in 0 : vector<5x64xf32>, vector<11x64xf32> -> vector<16x64xf32>
    %399 = vector.extract_strided_slice %0 {offsets = [0, 0, 0], sizes = [1, 16, 1], strides = [1, 1, 1]} : vector<9x16x1xf32> to vector<1x16x1xf32>
    %400 = vector.shape_cast %399 : vector<1x16x1xf32> to vector<16x1xf32>
    %401 = vector.broadcast %400 : vector<16x1xf32> to vector<16x64xf32>
    %402 = arith.mulf %398, %401 : vector<16x64xf32>
    %403 = vector.extract_strided_slice %395 {offsets = [12, 0], sizes = [4, 64], strides = [1, 1]} : vector<16x64xf32> to vector<4x64xf32>
    %404 = vector.extract_strided_slice %395 {offsets = [0, 0], sizes = [12, 64], strides = [1, 1]} : vector<16x64xf32> to vector<12x64xf32>
    %405 = tpu.concatenate %403, %404 in 0 : vector<4x64xf32>, vector<12x64xf32> -> vector<16x64xf32>
    %406 = vector.extract_strided_slice %0 {offsets = [1, 0, 0], sizes = [1, 16, 1], strides = [1, 1, 1]} : vector<9x16x1xf32> to vector<1x16x1xf32>
    %407 = vector.shape_cast %406 : vector<1x16x1xf32> to vector<16x1xf32>
    %408 = vector.broadcast %407 : vector<16x1xf32> to vector<16x64xf32>
    %409 = arith.mulf %405, %408 : vector<16x64xf32>
    %410 = vector.extract_strided_slice %395 {offsets = [13, 0], sizes = [3, 64], strides = [1, 1]} : vector<16x64xf32> to vector<3x64xf32>
    %411 = vector.extract_strided_slice %395 {offsets = [0, 0], sizes = [13, 64], strides = [1, 1]} : vector<16x64xf32> to vector<13x64xf32>
    %412 = tpu.concatenate %410, %411 in 0 : vector<3x64xf32>, vector<13x64xf32> -> vector<16x64xf32>
    %413 = vector.extract_strided_slice %0 {offsets = [2, 0, 0], sizes = [1, 16, 1], strides = [1, 1, 1]} : vector<9x16x1xf32> to vector<1x16x1xf32>
    %414 = vector.shape_cast %413 : vector<1x16x1xf32> to vector<16x1xf32>
    %415 = vector.broadcast %414 : vector<16x1xf32> to vector<16x64xf32>
    %416 = arith.mulf %412, %415 : vector<16x64xf32>
    %417 = vector.extract_strided_slice %395 {offsets = [15, 0], sizes = [1, 64], strides = [1, 1]} : vector<16x64xf32> to vector<1x64xf32>
    %418 = vector.extract_strided_slice %395 {offsets = [0, 0], sizes = [15, 64], strides = [1, 1]} : vector<16x64xf32> to vector<15x64xf32>
    %419 = tpu.concatenate %417, %418 in 0 : vector<1x64xf32>, vector<15x64xf32> -> vector<16x64xf32>
    %420 = vector.extract_strided_slice %0 {offsets = [3, 0, 0], sizes = [1, 16, 1], strides = [1, 1, 1]} : vector<9x16x1xf32> to vector<1x16x1xf32>
    %421 = vector.shape_cast %420 : vector<1x16x1xf32> to vector<16x1xf32>
    %422 = vector.broadcast %421 : vector<16x1xf32> to vector<16x64xf32>
    %423 = arith.mulf %419, %422 : vector<16x64xf32>
    %424 = vector.extract_strided_slice %395 {offsets = [1, 0], sizes = [15, 64], strides = [1, 1]} : vector<16x64xf32> to vector<15x64xf32>
    %425 = vector.extract_strided_slice %395 {offsets = [0, 0], sizes = [1, 64], strides = [1, 1]} : vector<16x64xf32> to vector<1x64xf32>
    %426 = tpu.concatenate %424, %425 in 0 : vector<15x64xf32>, vector<1x64xf32> -> vector<16x64xf32>
    %427 = vector.extract_strided_slice %0 {offsets = [5, 0, 0], sizes = [1, 16, 1], strides = [1, 1, 1]} : vector<9x16x1xf32> to vector<1x16x1xf32>
    %428 = vector.shape_cast %427 : vector<1x16x1xf32> to vector<16x1xf32>
    %429 = vector.broadcast %428 : vector<16x1xf32> to vector<16x64xf32>
    %430 = arith.mulf %426, %429 : vector<16x64xf32>
    %431 = vector.extract_strided_slice %395 {offsets = [3, 0], sizes = [13, 64], strides = [1, 1]} : vector<16x64xf32> to vector<13x64xf32>
    %432 = vector.extract_strided_slice %395 {offsets = [0, 0], sizes = [3, 64], strides = [1, 1]} : vector<16x64xf32> to vector<3x64xf32>
    %433 = tpu.concatenate %431, %432 in 0 : vector<13x64xf32>, vector<3x64xf32> -> vector<16x64xf32>
    %434 = vector.extract_strided_slice %0 {offsets = [6, 0, 0], sizes = [1, 16, 1], strides = [1, 1, 1]} : vector<9x16x1xf32> to vector<1x16x1xf32>
    %435 = vector.shape_cast %434 : vector<1x16x1xf32> to vector<16x1xf32>
    %436 = vector.broadcast %435 : vector<16x1xf32> to vector<16x64xf32>
    %437 = arith.mulf %433, %436 : vector<16x64xf32>
    %438 = vector.extract_strided_slice %395 {offsets = [4, 0], sizes = [12, 64], strides = [1, 1]} : vector<16x64xf32> to vector<12x64xf32>
    %439 = vector.extract_strided_slice %395 {offsets = [0, 0], sizes = [4, 64], strides = [1, 1]} : vector<16x64xf32> to vector<4x64xf32>
    %440 = tpu.concatenate %438, %439 in 0 : vector<12x64xf32>, vector<4x64xf32> -> vector<16x64xf32>
    %441 = vector.extract_strided_slice %0 {offsets = [7, 0, 0], sizes = [1, 16, 1], strides = [1, 1, 1]} : vector<9x16x1xf32> to vector<1x16x1xf32>
    %442 = vector.shape_cast %441 : vector<1x16x1xf32> to vector<16x1xf32>
    %443 = vector.broadcast %442 : vector<16x1xf32> to vector<16x64xf32>
    %444 = arith.mulf %440, %443 : vector<16x64xf32>
    %445 = vector.extract_strided_slice %395 {offsets = [5, 0], sizes = [11, 64], strides = [1, 1]} : vector<16x64xf32> to vector<11x64xf32>
    %446 = vector.extract_strided_slice %395 {offsets = [0, 0], sizes = [5, 64], strides = [1, 1]} : vector<16x64xf32> to vector<5x64xf32>
    %447 = tpu.concatenate %445, %446 in 0 : vector<11x64xf32>, vector<5x64xf32> -> vector<16x64xf32>
    %448 = vector.extract_strided_slice %0 {offsets = [8, 0, 0], sizes = [1, 16, 1], strides = [1, 1, 1]} : vector<9x16x1xf32> to vector<1x16x1xf32>
    %449 = vector.shape_cast %448 : vector<1x16x1xf32> to vector<16x1xf32>
    %450 = vector.broadcast %449 : vector<16x1xf32> to vector<16x64xf32>
    %451 = arith.mulf %447, %450 : vector<16x64xf32>
    %452 = tpu.concatenate %402, %409, %416, %423, %395, %430, %437, %444, %451 in 1 : vector<16x64xf32>, vector<16x64xf32>, vector<16x64xf32>, vector<16x64xf32>, vector<16x64xf32>, vector<16x64xf32>, vector<16x64xf32>, vector<16x64xf32>, vector<16x64xf32> -> vector<16x576xf32>
    %c4 = arith.constant 4 : index
    %c0_80 = arith.constant 0 : index
    %c0_81 = arith.constant 0 : index
    %453 = vector.load %arg11[%c4, %c0_80, %c0_81] : memref<12x576x64xbf16, #tpu.memory_space<vmem>>, vector<1x576x64xbf16>
    %454 = vector.shape_cast %453 : vector<1x576x64xbf16> to vector<576x64xbf16>
    %455 = arith.truncf %452 : vector<16x576xf32> to vector<16x576xbf16>
    %cst_82 = arith.constant dense<0.000000e+00> : vector<16x64xf32>
    %456 = tpu.matmul %455, %454, %cst_82 {dimension_numbers = #tpu.dot_dimension_numbers<[1], [0], [0], [1], [0, 0, 1, 1], [], []>} : vector<16x576xbf16>, vector<576x64xbf16>, vector<16x64xf32> -> vector<16x64xf32>
    %cst_83 = arith.constant 0.000000e+00 : f32
    %457 = vector.broadcast %cst_83 : f32 to vector<16x64xf32>
    %458 = arith.maximumf %456, %457 : vector<16x64xf32>
    %c4_84 = arith.constant 4 : index
    %c0_85 = arith.constant 0 : index
    %c0_86 = arith.constant 0 : index
    %459 = vector.load %arg12[%c4_84, %c0_85, %c0_86] : memref<12x64x64xbf16, #tpu.memory_space<vmem>>, vector<1x64x64xbf16>
    %460 = vector.shape_cast %459 : vector<1x64x64xbf16> to vector<64x64xbf16>
    %461 = arith.truncf %458 : vector<16x64xf32> to vector<16x64xbf16>
    %cst_87 = arith.constant dense<0.000000e+00> : vector<16x64xf32>
    %462 = tpu.matmul %461, %460, %cst_87 {dimension_numbers = #tpu.dot_dimension_numbers<[1], [0], [0], [1], [0, 0, 1, 1], [], []>} : vector<16x64xbf16>, vector<64x64xbf16>, vector<16x64xf32> -> vector<16x64xf32>
    %463 = arith.addf %395, %462 : vector<16x64xf32>
    %464 = vector.extract_strided_slice %463 {offsets = [11, 0], sizes = [5, 64], strides = [1, 1]} : vector<16x64xf32> to vector<5x64xf32>
    %465 = vector.extract_strided_slice %463 {offsets = [0, 0], sizes = [11, 64], strides = [1, 1]} : vector<16x64xf32> to vector<11x64xf32>
    %466 = tpu.concatenate %464, %465 in 0 : vector<5x64xf32>, vector<11x64xf32> -> vector<16x64xf32>
    %467 = vector.extract_strided_slice %0 {offsets = [0, 0, 0], sizes = [1, 16, 1], strides = [1, 1, 1]} : vector<9x16x1xf32> to vector<1x16x1xf32>
    %468 = vector.shape_cast %467 : vector<1x16x1xf32> to vector<16x1xf32>
    %469 = vector.broadcast %468 : vector<16x1xf32> to vector<16x64xf32>
    %470 = arith.mulf %466, %469 : vector<16x64xf32>
    %471 = vector.extract_strided_slice %463 {offsets = [12, 0], sizes = [4, 64], strides = [1, 1]} : vector<16x64xf32> to vector<4x64xf32>
    %472 = vector.extract_strided_slice %463 {offsets = [0, 0], sizes = [12, 64], strides = [1, 1]} : vector<16x64xf32> to vector<12x64xf32>
    %473 = tpu.concatenate %471, %472 in 0 : vector<4x64xf32>, vector<12x64xf32> -> vector<16x64xf32>
    %474 = vector.extract_strided_slice %0 {offsets = [1, 0, 0], sizes = [1, 16, 1], strides = [1, 1, 1]} : vector<9x16x1xf32> to vector<1x16x1xf32>
    %475 = vector.shape_cast %474 : vector<1x16x1xf32> to vector<16x1xf32>
    %476 = vector.broadcast %475 : vector<16x1xf32> to vector<16x64xf32>
    %477 = arith.mulf %473, %476 : vector<16x64xf32>
    %478 = vector.extract_strided_slice %463 {offsets = [13, 0], sizes = [3, 64], strides = [1, 1]} : vector<16x64xf32> to vector<3x64xf32>
    %479 = vector.extract_strided_slice %463 {offsets = [0, 0], sizes = [13, 64], strides = [1, 1]} : vector<16x64xf32> to vector<13x64xf32>
    %480 = tpu.concatenate %478, %479 in 0 : vector<3x64xf32>, vector<13x64xf32> -> vector<16x64xf32>
    %481 = vector.extract_strided_slice %0 {offsets = [2, 0, 0], sizes = [1, 16, 1], strides = [1, 1, 1]} : vector<9x16x1xf32> to vector<1x16x1xf32>
    %482 = vector.shape_cast %481 : vector<1x16x1xf32> to vector<16x1xf32>
    %483 = vector.broadcast %482 : vector<16x1xf32> to vector<16x64xf32>
    %484 = arith.mulf %480, %483 : vector<16x64xf32>
    %485 = vector.extract_strided_slice %463 {offsets = [15, 0], sizes = [1, 64], strides = [1, 1]} : vector<16x64xf32> to vector<1x64xf32>
    %486 = vector.extract_strided_slice %463 {offsets = [0, 0], sizes = [15, 64], strides = [1, 1]} : vector<16x64xf32> to vector<15x64xf32>
    %487 = tpu.concatenate %485, %486 in 0 : vector<1x64xf32>, vector<15x64xf32> -> vector<16x64xf32>
    %488 = vector.extract_strided_slice %0 {offsets = [3, 0, 0], sizes = [1, 16, 1], strides = [1, 1, 1]} : vector<9x16x1xf32> to vector<1x16x1xf32>
    %489 = vector.shape_cast %488 : vector<1x16x1xf32> to vector<16x1xf32>
    %490 = vector.broadcast %489 : vector<16x1xf32> to vector<16x64xf32>
    %491 = arith.mulf %487, %490 : vector<16x64xf32>
    %492 = vector.extract_strided_slice %463 {offsets = [1, 0], sizes = [15, 64], strides = [1, 1]} : vector<16x64xf32> to vector<15x64xf32>
    %493 = vector.extract_strided_slice %463 {offsets = [0, 0], sizes = [1, 64], strides = [1, 1]} : vector<16x64xf32> to vector<1x64xf32>
    %494 = tpu.concatenate %492, %493 in 0 : vector<15x64xf32>, vector<1x64xf32> -> vector<16x64xf32>
    %495 = vector.extract_strided_slice %0 {offsets = [5, 0, 0], sizes = [1, 16, 1], strides = [1, 1, 1]} : vector<9x16x1xf32> to vector<1x16x1xf32>
    %496 = vector.shape_cast %495 : vector<1x16x1xf32> to vector<16x1xf32>
    %497 = vector.broadcast %496 : vector<16x1xf32> to vector<16x64xf32>
    %498 = arith.mulf %494, %497 : vector<16x64xf32>
    %499 = vector.extract_strided_slice %463 {offsets = [3, 0], sizes = [13, 64], strides = [1, 1]} : vector<16x64xf32> to vector<13x64xf32>
    %500 = vector.extract_strided_slice %463 {offsets = [0, 0], sizes = [3, 64], strides = [1, 1]} : vector<16x64xf32> to vector<3x64xf32>
    %501 = tpu.concatenate %499, %500 in 0 : vector<13x64xf32>, vector<3x64xf32> -> vector<16x64xf32>
    %502 = vector.extract_strided_slice %0 {offsets = [6, 0, 0], sizes = [1, 16, 1], strides = [1, 1, 1]} : vector<9x16x1xf32> to vector<1x16x1xf32>
    %503 = vector.shape_cast %502 : vector<1x16x1xf32> to vector<16x1xf32>
    %504 = vector.broadcast %503 : vector<16x1xf32> to vector<16x64xf32>
    %505 = arith.mulf %501, %504 : vector<16x64xf32>
    %506 = vector.extract_strided_slice %463 {offsets = [4, 0], sizes = [12, 64], strides = [1, 1]} : vector<16x64xf32> to vector<12x64xf32>
    %507 = vector.extract_strided_slice %463 {offsets = [0, 0], sizes = [4, 64], strides = [1, 1]} : vector<16x64xf32> to vector<4x64xf32>
    %508 = tpu.concatenate %506, %507 in 0 : vector<12x64xf32>, vector<4x64xf32> -> vector<16x64xf32>
    %509 = vector.extract_strided_slice %0 {offsets = [7, 0, 0], sizes = [1, 16, 1], strides = [1, 1, 1]} : vector<9x16x1xf32> to vector<1x16x1xf32>
    %510 = vector.shape_cast %509 : vector<1x16x1xf32> to vector<16x1xf32>
    %511 = vector.broadcast %510 : vector<16x1xf32> to vector<16x64xf32>
    %512 = arith.mulf %508, %511 : vector<16x64xf32>
    %513 = vector.extract_strided_slice %463 {offsets = [5, 0], sizes = [11, 64], strides = [1, 1]} : vector<16x64xf32> to vector<11x64xf32>
    %514 = vector.extract_strided_slice %463 {offsets = [0, 0], sizes = [5, 64], strides = [1, 1]} : vector<16x64xf32> to vector<5x64xf32>
    %515 = tpu.concatenate %513, %514 in 0 : vector<11x64xf32>, vector<5x64xf32> -> vector<16x64xf32>
    %516 = vector.extract_strided_slice %0 {offsets = [8, 0, 0], sizes = [1, 16, 1], strides = [1, 1, 1]} : vector<9x16x1xf32> to vector<1x16x1xf32>
    %517 = vector.shape_cast %516 : vector<1x16x1xf32> to vector<16x1xf32>
    %518 = vector.broadcast %517 : vector<16x1xf32> to vector<16x64xf32>
    %519 = arith.mulf %515, %518 : vector<16x64xf32>
    %520 = tpu.concatenate %470, %477, %484, %491, %463, %498, %505, %512, %519 in 1 : vector<16x64xf32>, vector<16x64xf32>, vector<16x64xf32>, vector<16x64xf32>, vector<16x64xf32>, vector<16x64xf32>, vector<16x64xf32>, vector<16x64xf32>, vector<16x64xf32> -> vector<16x576xf32>
    %c5 = arith.constant 5 : index
    %c0_88 = arith.constant 0 : index
    %c0_89 = arith.constant 0 : index
    %521 = vector.load %arg11[%c5, %c0_88, %c0_89] : memref<12x576x64xbf16, #tpu.memory_space<vmem>>, vector<1x576x64xbf16>
    %522 = vector.shape_cast %521 : vector<1x576x64xbf16> to vector<576x64xbf16>
    %523 = arith.truncf %520 : vector<16x576xf32> to vector<16x576xbf16>
    %cst_90 = arith.constant dense<0.000000e+00> : vector<16x64xf32>
    %524 = tpu.matmul %523, %522, %cst_90 {dimension_numbers = #tpu.dot_dimension_numbers<[1], [0], [0], [1], [0, 0, 1, 1], [], []>} : vector<16x576xbf16>, vector<576x64xbf16>, vector<16x64xf32> -> vector<16x64xf32>
    %cst_91 = arith.constant 0.000000e+00 : f32
    %525 = vector.broadcast %cst_91 : f32 to vector<16x64xf32>
    %526 = arith.maximumf %524, %525 : vector<16x64xf32>
    %c5_92 = arith.constant 5 : index
    %c0_93 = arith.constant 0 : index
    %c0_94 = arith.constant 0 : index
    %527 = vector.load %arg12[%c5_92, %c0_93, %c0_94] : memref<12x64x64xbf16, #tpu.memory_space<vmem>>, vector<1x64x64xbf16>
    %528 = vector.shape_cast %527 : vector<1x64x64xbf16> to vector<64x64xbf16>
    %529 = arith.truncf %526 : vector<16x64xf32> to vector<16x64xbf16>
    %cst_95 = arith.constant dense<0.000000e+00> : vector<16x64xf32>
    %530 = tpu.matmul %529, %528, %cst_95 {dimension_numbers = #tpu.dot_dimension_numbers<[1], [0], [0], [1], [0, 0, 1, 1], [], []>} : vector<16x64xbf16>, vector<64x64xbf16>, vector<16x64xf32> -> vector<16x64xf32>
    %531 = arith.addf %463, %530 : vector<16x64xf32>
    %cst_96 = arith.constant 0.000000e+00 : f32
    %532 = vector.broadcast %cst_96 : f32 to vector<16x64xf32>
    %533 = arith.cmpf ogt, %531, %532 : vector<16x64xf32>
    %cst_97 = arith.constant 0.00999999977 : f32
    %534 = vector.broadcast %cst_97 : f32 to vector<16x64xf32>
    %535 = arith.mulf %534, %531 : vector<16x64xf32>
    %536 = arith.select %533, %531, %535 : vector<16x64xi1>, vector<16x64xf32>
    %c0_98 = arith.constant 0 : index
    %c0_99 = arith.constant 0 : index
    %537 = vector.load %arg13[%c0_98, %c0_99] : memref<64x32xbf16, #tpu.memory_space<vmem>>, vector<64x32xbf16>
    %538 = arith.truncf %536 : vector<16x64xf32> to vector<16x64xbf16>
    %cst_100 = arith.constant dense<0.000000e+00> : vector<16x32xf32>
    %539 = tpu.matmul %538, %537, %cst_100 {dimension_numbers = #tpu.dot_dimension_numbers<[1], [0], [0], [1], [0, 0, 1, 1], [], []>} : vector<16x64xbf16>, vector<64x32xbf16>, vector<16x32xf32> -> vector<16x32xf32>
    %c0_101 = arith.constant 0 : index
    %c0_102 = arith.constant 0 : index
    %540 = vector.load %arg14[%c0_101, %c0_102] : memref<1x32xf32, #tpu.memory_space<vmem>>, vector<1x32xf32>
    %541 = vector.broadcast %540 : vector<1x32xf32> to vector<16x32xf32>
    %542 = arith.addf %539, %541 : vector<16x32xf32>
    %cst_103 = arith.constant 0.000000e+00 : f32
    %543 = vector.broadcast %cst_103 : f32 to vector<16x32xf32>
    %544 = arith.cmpf ogt, %542, %543 : vector<16x32xf32>
    %cst_104 = arith.constant 0.00999999977 : f32
    %545 = vector.broadcast %cst_104 : f32 to vector<16x32xf32>
    %546 = arith.mulf %545, %542 : vector<16x32xf32>
    %547 = arith.select %544, %542, %546 : vector<16x32xi1>, vector<16x32xf32>
    %c0_105 = arith.constant 0 : index
    %c0_106 = arith.constant 0 : index
    %548 = vector.load %arg15[%c0_105, %c0_106] : memref<128x32xf32, #tpu.memory_space<vmem>>, vector<128x32xf32>
    %549 = arith.mulf %547, %547 : vector<16x32xf32>
    %cst_107 = arith.constant dense<0.000000e+00> : vector<16xf32>
    %550 = vector.multi_reduction <add>, %549, %cst_107 [1] : vector<16x32xf32> to vector<16xf32>
    %551 = vector.shape_cast %550 : vector<16xf32> to vector<16x1xf32>
    %cst_108 = arith.constant dense<0.000000e+00> : vector<16x128xf32>
    %552 = tpu.matmul %547, %548, %cst_108 {dimension_numbers = #tpu.dot_dimension_numbers<[1], [1], [0], [0], [0, 0, 1, 0], [], []>} : vector<16x32xf32>, vector<128x32xf32>, vector<16x128xf32> -> vector<16x128xf32>
    %c0_109 = arith.constant 0 : index
    %c0_110 = arith.constant 0 : index
    %553 = vector.load %arg16[%c0_109, %c0_110] : memref<1x128xf32, #tpu.memory_space<vmem>>, vector<1x128xf32>
    %554 = vector.broadcast %551 : vector<16x1xf32> to vector<16x128xf32>
    %555 = vector.broadcast %553 : vector<1x128xf32> to vector<16x128xf32>
    %556 = arith.addf %554, %555 : vector<16x128xf32>
    %cst_111 = arith.constant 2.000000e+00 : f32
    %557 = vector.broadcast %cst_111 : f32 to vector<16x128xf32>
    %558 = arith.mulf %557, %552 : vector<16x128xf32>
    %559 = arith.subf %556, %558 : vector<16x128xf32>
    %cst_112 = arith.constant dense<0x7F800000> : vector<16xf32>
    %560 = vector.multi_reduction <minimumf>, %559, %cst_112 [1] : vector<16x128xf32> to vector<16xf32>
    %561 = vector.shape_cast %560 : vector<16xf32> to vector<16x1xf32>
    %562 = tpu.iota {dimensions = array<i32: 1>} : vector<16x128xi32>
    %563 = vector.broadcast %561 : vector<16x1xf32> to vector<16x128xf32>
    %564 = arith.cmpf ole, %559, %563 : vector<16x128xf32>
    %c128_i32 = arith.constant 128 : i32
    %565 = vector.broadcast %c128_i32 : i32 to vector<16x128xi32>
    %566 = arith.select %564, %562, %565 : vector<16x128xi1>, vector<16x128xi32>
    %cst_113 = arith.constant dense<2147483647> : vector<16xi32>
    %567 = vector.multi_reduction <minsi>, %566, %cst_113 [1] : vector<16x128xi32> to vector<16xi32>
    %568 = vector.shape_cast %567 : vector<16xi32> to vector<16x1xi32>
    %569 = vector.broadcast %568 : vector<16x1xi32> to vector<16x128xi32>
    %570 = arith.cmpi eq, %562, %569 : vector<16x128xi32>
    %571 = arith.extui %570 : vector<16x128xi1> to vector<16x128xi32>
    %572 = arith.sitofp %571 : vector<16x128xi32> to vector<16x128xf32>
    %cst_114 = arith.constant dense<0.000000e+00> : vector<16x32xf32>
    %573 = tpu.matmul %572, %548, %cst_114 {dimension_numbers = #tpu.dot_dimension_numbers<[1], [0], [0], [1], [0, 0, 1, 1], [], []>} : vector<16x128xf32>, vector<128x32xf32>, vector<16x32xf32> -> vector<16x32xf32>
    %574 = arith.subf %573, %547 : vector<16x32xf32>
    %575 = arith.mulf %574, %574 : vector<16x32xf32>
    %576 = vector.shape_cast %575 : vector<16x32xf32> to vector<1x16x32xf32>
    %cst_115 = arith.constant dense<0.000000e+00> : vector<1xf32>
    %577 = vector.multi_reduction <add>, %576, %cst_115 [1, 2] : vector<1x16x32xf32> to vector<1xf32>
    %578 = vector.shape_cast %577 : vector<1xf32> to vector<1x1x1xf32>
    %579 = vector.extract %578[0, 0, 0] : f32 from vector<1x1x1xf32>
    %580 = vector.broadcast %579 : f32 to vector<1x1xf32>
    %c0_116 = arith.constant 0 : index
    %c0_117 = arith.constant 0 : index
    %c0_118 = arith.constant 0 : index
    %581 = vector.load %arg26[%c0_116, %c0_117, %c0_118] : memref<1x1x1xf32, #tpu.memory_space<vmem>>, vector<1x1x1xf32>
    %582 = vector.shape_cast %581 : vector<1x1x1xf32> to vector<1x1xf32>
    %583 = vector.shape_cast %580 : vector<1x1xf32> to vector<1x1x1xf32>
    tpu.vector_store %arg26[%c0_116, %c0_117, %c0_118], %583 {strides = array<i32>} : memref<1x1x1xf32, #tpu.memory_space<vmem>>, vector<1x1x1xf32>,
    %584 = vector.extract_strided_slice %573 {offsets = [11, 0], sizes = [5, 32], strides = [1, 1]} : vector<16x32xf32> to vector<5x32xf32>
    %585 = vector.extract_strided_slice %573 {offsets = [0, 0], sizes = [11, 32], strides = [1, 1]} : vector<16x32xf32> to vector<11x32xf32>
    %586 = tpu.concatenate %584, %585 in 0 : vector<5x32xf32>, vector<11x32xf32> -> vector<16x32xf32>
    %587 = vector.extract_strided_slice %0 {offsets = [0, 0, 0], sizes = [1, 16, 1], strides = [1, 1, 1]} : vector<9x16x1xf32> to vector<1x16x1xf32>
    %588 = vector.shape_cast %587 : vector<1x16x1xf32> to vector<16x1xf32>
    %589 = vector.broadcast %588 : vector<16x1xf32> to vector<16x32xf32>
    %590 = arith.mulf %586, %589 : vector<16x32xf32>
    %591 = vector.extract_strided_slice %573 {offsets = [12, 0], sizes = [4, 32], strides = [1, 1]} : vector<16x32xf32> to vector<4x32xf32>
    %592 = vector.extract_strided_slice %573 {offsets = [0, 0], sizes = [12, 32], strides = [1, 1]} : vector<16x32xf32> to vector<12x32xf32>
    %593 = tpu.concatenate %591, %592 in 0 : vector<4x32xf32>, vector<12x32xf32> -> vector<16x32xf32>
    %594 = vector.extract_strided_slice %0 {offsets = [1, 0, 0], sizes = [1, 16, 1], strides = [1, 1, 1]} : vector<9x16x1xf32> to vector<1x16x1xf32>
    %595 = vector.shape_cast %594 : vector<1x16x1xf32> to vector<16x1xf32>
    %596 = vector.broadcast %595 : vector<16x1xf32> to vector<16x32xf32>
    %597 = arith.mulf %593, %596 : vector<16x32xf32>
    %598 = vector.extract_strided_slice %573 {offsets = [13, 0], sizes = [3, 32], strides = [1, 1]} : vector<16x32xf32> to vector<3x32xf32>
    %599 = vector.extract_strided_slice %573 {offsets = [0, 0], sizes = [13, 32], strides = [1, 1]} : vector<16x32xf32> to vector<13x32xf32>
    %600 = tpu.concatenate %598, %599 in 0 : vector<3x32xf32>, vector<13x32xf32> -> vector<16x32xf32>
    %601 = vector.extract_strided_slice %0 {offsets = [2, 0, 0], sizes = [1, 16, 1], strides = [1, 1, 1]} : vector<9x16x1xf32> to vector<1x16x1xf32>
    %602 = vector.shape_cast %601 : vector<1x16x1xf32> to vector<16x1xf32>
    %603 = vector.broadcast %602 : vector<16x1xf32> to vector<16x32xf32>
    %604 = arith.mulf %600, %603 : vector<16x32xf32>
    %605 = vector.extract_strided_slice %573 {offsets = [15, 0], sizes = [1, 32], strides = [1, 1]} : vector<16x32xf32> to vector<1x32xf32>
    %606 = vector.extract_strided_slice %573 {offsets = [0, 0], sizes = [15, 32], strides = [1, 1]} : vector<16x32xf32> to vector<15x32xf32>
    %607 = tpu.concatenate %605, %606 in 0 : vector<1x32xf32>, vector<15x32xf32> -> vector<16x32xf32>
    %608 = vector.extract_strided_slice %0 {offsets = [3, 0, 0], sizes = [1, 16, 1], strides = [1, 1, 1]} : vector<9x16x1xf32> to vector<1x16x1xf32>
    %609 = vector.shape_cast %608 : vector<1x16x1xf32> to vector<16x1xf32>
    %610 = vector.broadcast %609 : vector<16x1xf32> to vector<16x32xf32>
    %611 = arith.mulf %607, %610 : vector<16x32xf32>
    %612 = vector.extract_strided_slice %573 {offsets = [1, 0], sizes = [15, 32], strides = [1, 1]} : vector<16x32xf32> to vector<15x32xf32>
    %613 = vector.extract_strided_slice %573 {offsets = [0, 0], sizes = [1, 32], strides = [1, 1]} : vector<16x32xf32> to vector<1x32xf32>
    %614 = tpu.concatenate %612, %613 in 0 : vector<15x32xf32>, vector<1x32xf32> -> vector<16x32xf32>
    %615 = vector.extract_strided_slice %0 {offsets = [5, 0, 0], sizes = [1, 16, 1], strides = [1, 1, 1]} : vector<9x16x1xf32> to vector<1x16x1xf32>
    %616 = vector.shape_cast %615 : vector<1x16x1xf32> to vector<16x1xf32>
    %617 = vector.broadcast %616 : vector<16x1xf32> to vector<16x32xf32>
    %618 = arith.mulf %614, %617 : vector<16x32xf32>
    %619 = vector.extract_strided_slice %573 {offsets = [3, 0], sizes = [13, 32], strides = [1, 1]} : vector<16x32xf32> to vector<13x32xf32>
    %620 = vector.extract_strided_slice %573 {offsets = [0, 0], sizes = [3, 32], strides = [1, 1]} : vector<16x32xf32> to vector<3x32xf32>
    %621 = tpu.concatenate %619, %620 in 0 : vector<13x32xf32>, vector<3x32xf32> -> vector<16x32xf32>
    %622 = vector.extract_strided_slice %0 {offsets = [6, 0, 0], sizes = [1, 16, 1], strides = [1, 1, 1]} : vector<9x16x1xf32> to vector<1x16x1xf32>
    %623 = vector.shape_cast %622 : vector<1x16x1xf32> to vector<16x1xf32>
    %624 = vector.broadcast %623 : vector<16x1xf32> to vector<16x32xf32>
    %625 = arith.mulf %621, %624 : vector<16x32xf32>
    %626 = vector.extract_strided_slice %573 {offsets = [4, 0], sizes = [12, 32], strides = [1, 1]} : vector<16x32xf32> to vector<12x32xf32>
    %627 = vector.extract_strided_slice %573 {offsets = [0, 0], sizes = [4, 32], strides = [1, 1]} : vector<16x32xf32> to vector<4x32xf32>
    %628 = tpu.concatenate %626, %627 in 0 : vector<12x32xf32>, vector<4x32xf32> -> vector<16x32xf32>
    %629 = vector.extract_strided_slice %0 {offsets = [7, 0, 0], sizes = [1, 16, 1], strides = [1, 1, 1]} : vector<9x16x1xf32> to vector<1x16x1xf32>
    %630 = vector.shape_cast %629 : vector<1x16x1xf32> to vector<16x1xf32>
    %631 = vector.broadcast %630 : vector<16x1xf32> to vector<16x32xf32>
    %632 = arith.mulf %628, %631 : vector<16x32xf32>
    %633 = vector.extract_strided_slice %573 {offsets = [5, 0], sizes = [11, 32], strides = [1, 1]} : vector<16x32xf32> to vector<11x32xf32>
    %634 = vector.extract_strided_slice %573 {offsets = [0, 0], sizes = [5, 32], strides = [1, 1]} : vector<16x32xf32> to vector<5x32xf32>
    %635 = tpu.concatenate %633, %634 in 0 : vector<11x32xf32>, vector<5x32xf32> -> vector<16x32xf32>
    %636 = vector.extract_strided_slice %0 {offsets = [8, 0, 0], sizes = [1, 16, 1], strides = [1, 1, 1]} : vector<9x16x1xf32> to vector<1x16x1xf32>
    %637 = vector.shape_cast %636 : vector<1x16x1xf32> to vector<16x1xf32>
    %638 = vector.broadcast %637 : vector<16x1xf32> to vector<16x32xf32>
    %639 = arith.mulf %635, %638 : vector<16x32xf32>
    %640 = tpu.concatenate %590, %597, %604, %611, %573, %618, %625, %632, %639 in 1 : vector<16x32xf32>, vector<16x32xf32>, vector<16x32xf32>, vector<16x32xf32>, vector<16x32xf32>, vector<16x32xf32>, vector<16x32xf32>, vector<16x32xf32>, vector<16x32xf32> -> vector<16x288xf32>
    %c0_119 = arith.constant 0 : index
    %c0_120 = arith.constant 0 : index
    %641 = vector.load %arg17[%c0_119, %c0_120] : memref<288x64xbf16, #tpu.memory_space<vmem>>, vector<288x64xbf16>
    %642 = arith.truncf %640 : vector<16x288xf32> to vector<16x288xbf16>
    %cst_121 = arith.constant dense<0.000000e+00> : vector<16x64xf32>
    %643 = tpu.matmul %642, %641, %cst_121 {dimension_numbers = #tpu.dot_dimension_numbers<[1], [0], [0], [1], [0, 0, 1, 1], [], []>} : vector<16x288xbf16>, vector<288x64xbf16>, vector<16x64xf32> -> vector<16x64xf32>
    %c0_122 = arith.constant 0 : index
    %c0_123 = arith.constant 0 : index
    %644 = vector.load %arg18[%c0_122, %c0_123] : memref<1x64xf32, #tpu.memory_space<vmem>>, vector<1x64xf32>
    %645 = vector.broadcast %644 : vector<1x64xf32> to vector<16x64xf32>
    %646 = arith.addf %643, %645 : vector<16x64xf32>
    %cst_124 = arith.constant 0.000000e+00 : f32
    %647 = vector.broadcast %cst_124 : f32 to vector<16x64xf32>
    %648 = arith.cmpf ogt, %646, %647 : vector<16x64xf32>
    %cst_125 = arith.constant 0.00999999977 : f32
    %649 = vector.broadcast %cst_125 : f32 to vector<16x64xf32>
    %650 = arith.mulf %649, %646 : vector<16x64xf32>
    %651 = arith.select %648, %646, %650 : vector<16x64xi1>, vector<16x64xf32>
    %652 = vector.extract_strided_slice %651 {offsets = [11, 0], sizes = [5, 64], strides = [1, 1]} : vector<16x64xf32> to vector<5x64xf32>
    %653 = vector.extract_strided_slice %651 {offsets = [0, 0], sizes = [11, 64], strides = [1, 1]} : vector<16x64xf32> to vector<11x64xf32>
    %654 = tpu.concatenate %652, %653 in 0 : vector<5x64xf32>, vector<11x64xf32> -> vector<16x64xf32>
    %655 = vector.extract_strided_slice %0 {offsets = [0, 0, 0], sizes = [1, 16, 1], strides = [1, 1, 1]} : vector<9x16x1xf32> to vector<1x16x1xf32>
    %656 = vector.shape_cast %655 : vector<1x16x1xf32> to vector<16x1xf32>
    %657 = vector.broadcast %656 : vector<16x1xf32> to vector<16x64xf32>
    %658 = arith.mulf %654, %657 : vector<16x64xf32>
    %659 = vector.extract_strided_slice %651 {offsets = [12, 0], sizes = [4, 64], strides = [1, 1]} : vector<16x64xf32> to vector<4x64xf32>
    %660 = vector.extract_strided_slice %651 {offsets = [0, 0], sizes = [12, 64], strides = [1, 1]} : vector<16x64xf32> to vector<12x64xf32>
    %661 = tpu.concatenate %659, %660 in 0 : vector<4x64xf32>, vector<12x64xf32> -> vector<16x64xf32>
    %662 = vector.extract_strided_slice %0 {offsets = [1, 0, 0], sizes = [1, 16, 1], strides = [1, 1, 1]} : vector<9x16x1xf32> to vector<1x16x1xf32>
    %663 = vector.shape_cast %662 : vector<1x16x1xf32> to vector<16x1xf32>
    %664 = vector.broadcast %663 : vector<16x1xf32> to vector<16x64xf32>
    %665 = arith.mulf %661, %664 : vector<16x64xf32>
    %666 = vector.extract_strided_slice %651 {offsets = [13, 0], sizes = [3, 64], strides = [1, 1]} : vector<16x64xf32> to vector<3x64xf32>
    %667 = vector.extract_strided_slice %651 {offsets = [0, 0], sizes = [13, 64], strides = [1, 1]} : vector<16x64xf32> to vector<13x64xf32>
    %668 = tpu.concatenate %666, %667 in 0 : vector<3x64xf32>, vector<13x64xf32> -> vector<16x64xf32>
    %669 = vector.extract_strided_slice %0 {offsets = [2, 0, 0], sizes = [1, 16, 1], strides = [1, 1, 1]} : vector<9x16x1xf32> to vector<1x16x1xf32>
    %670 = vector.shape_cast %669 : vector<1x16x1xf32> to vector<16x1xf32>
    %671 = vector.broadcast %670 : vector<16x1xf32> to vector<16x64xf32>
    %672 = arith.mulf %668, %671 : vector<16x64xf32>
    %673 = vector.extract_strided_slice %651 {offsets = [15, 0], sizes = [1, 64], strides = [1, 1]} : vector<16x64xf32> to vector<1x64xf32>
    %674 = vector.extract_strided_slice %651 {offsets = [0, 0], sizes = [15, 64], strides = [1, 1]} : vector<16x64xf32> to vector<15x64xf32>
    %675 = tpu.concatenate %673, %674 in 0 : vector<1x64xf32>, vector<15x64xf32> -> vector<16x64xf32>
    %676 = vector.extract_strided_slice %0 {offsets = [3, 0, 0], sizes = [1, 16, 1], strides = [1, 1, 1]} : vector<9x16x1xf32> to vector<1x16x1xf32>
    %677 = vector.shape_cast %676 : vector<1x16x1xf32> to vector<16x1xf32>
    %678 = vector.broadcast %677 : vector<16x1xf32> to vector<16x64xf32>
    %679 = arith.mulf %675, %678 : vector<16x64xf32>
    %680 = vector.extract_strided_slice %651 {offsets = [1, 0], sizes = [15, 64], strides = [1, 1]} : vector<16x64xf32> to vector<15x64xf32>
    %681 = vector.extract_strided_slice %651 {offsets = [0, 0], sizes = [1, 64], strides = [1, 1]} : vector<16x64xf32> to vector<1x64xf32>
    %682 = tpu.concatenate %680, %681 in 0 : vector<15x64xf32>, vector<1x64xf32> -> vector<16x64xf32>
    %683 = vector.extract_strided_slice %0 {offsets = [5, 0, 0], sizes = [1, 16, 1], strides = [1, 1, 1]} : vector<9x16x1xf32> to vector<1x16x1xf32>
    %684 = vector.shape_cast %683 : vector<1x16x1xf32> to vector<16x1xf32>
    %685 = vector.broadcast %684 : vector<16x1xf32> to vector<16x64xf32>
    %686 = arith.mulf %682, %685 : vector<16x64xf32>
    %687 = vector.extract_strided_slice %651 {offsets = [3, 0], sizes = [13, 64], strides = [1, 1]} : vector<16x64xf32> to vector<13x64xf32>
    %688 = vector.extract_strided_slice %651 {offsets = [0, 0], sizes = [3, 64], strides = [1, 1]} : vector<16x64xf32> to vector<3x64xf32>
    %689 = tpu.concatenate %687, %688 in 0 : vector<13x64xf32>, vector<3x64xf32> -> vector<16x64xf32>
    %690 = vector.extract_strided_slice %0 {offsets = [6, 0, 0], sizes = [1, 16, 1], strides = [1, 1, 1]} : vector<9x16x1xf32> to vector<1x16x1xf32>
    %691 = vector.shape_cast %690 : vector<1x16x1xf32> to vector<16x1xf32>
    %692 = vector.broadcast %691 : vector<16x1xf32> to vector<16x64xf32>
    %693 = arith.mulf %689, %692 : vector<16x64xf32>
    %694 = vector.extract_strided_slice %651 {offsets = [4, 0], sizes = [12, 64], strides = [1, 1]} : vector<16x64xf32> to vector<12x64xf32>
    %695 = vector.extract_strided_slice %651 {offsets = [0, 0], sizes = [4, 64], strides = [1, 1]} : vector<16x64xf32> to vector<4x64xf32>
    %696 = tpu.concatenate %694, %695 in 0 : vector<12x64xf32>, vector<4x64xf32> -> vector<16x64xf32>
    %697 = vector.extract_strided_slice %0 {offsets = [7, 0, 0], sizes = [1, 16, 1], strides = [1, 1, 1]} : vector<9x16x1xf32> to vector<1x16x1xf32>
    %698 = vector.shape_cast %697 : vector<1x16x1xf32> to vector<16x1xf32>
    %699 = vector.broadcast %698 : vector<16x1xf32> to vector<16x64xf32>
    %700 = arith.mulf %696, %699 : vector<16x64xf32>
    %701 = vector.extract_strided_slice %651 {offsets = [5, 0], sizes = [11, 64], strides = [1, 1]} : vector<16x64xf32> to vector<11x64xf32>
    %702 = vector.extract_strided_slice %651 {offsets = [0, 0], sizes = [5, 64], strides = [1, 1]} : vector<16x64xf32> to vector<5x64xf32>
    %703 = tpu.concatenate %701, %702 in 0 : vector<11x64xf32>, vector<5x64xf32> -> vector<16x64xf32>
    %704 = vector.extract_strided_slice %0 {offsets = [8, 0, 0], sizes = [1, 16, 1], strides = [1, 1, 1]} : vector<9x16x1xf32> to vector<1x16x1xf32>
    %705 = vector.shape_cast %704 : vector<1x16x1xf32> to vector<16x1xf32>
    %706 = vector.broadcast %705 : vector<16x1xf32> to vector<16x64xf32>
    %707 = arith.mulf %703, %706 : vector<16x64xf32>
    %708 = tpu.concatenate %658, %665, %672, %679, %651, %686, %693, %700, %707 in 1 : vector<16x64xf32>, vector<16x64xf32>, vector<16x64xf32>, vector<16x64xf32>, vector<16x64xf32>, vector<16x64xf32>, vector<16x64xf32>, vector<16x64xf32>, vector<16x64xf32> -> vector<16x576xf32>
    %c6 = arith.constant 6 : index
    %c0_126 = arith.constant 0 : index
    %c0_127 = arith.constant 0 : index
    %709 = vector.load %arg11[%c6, %c0_126, %c0_127] : memref<12x576x64xbf16, #tpu.memory_space<vmem>>, vector<1x576x64xbf16>
    %710 = vector.shape_cast %709 : vector<1x576x64xbf16> to vector<576x64xbf16>
    %711 = arith.truncf %708 : vector<16x576xf32> to vector<16x576xbf16>
    %cst_128 = arith.constant dense<0.000000e+00> : vector<16x64xf32>
    %712 = tpu.matmul %711, %710, %cst_128 {dimension_numbers = #tpu.dot_dimension_numbers<[1], [0], [0], [1], [0, 0, 1, 1], [], []>} : vector<16x576xbf16>, vector<576x64xbf16>, vector<16x64xf32> -> vector<16x64xf32>
    %cst_129 = arith.constant 0.000000e+00 : f32
    %713 = vector.broadcast %cst_129 : f32 to vector<16x64xf32>
    %714 = arith.maximumf %712, %713 : vector<16x64xf32>
    %c6_130 = arith.constant 6 : index
    %c0_131 = arith.constant 0 : index
    %c0_132 = arith.constant 0 : index
    %715 = vector.load %arg12[%c6_130, %c0_131, %c0_132] : memref<12x64x64xbf16, #tpu.memory_space<vmem>>, vector<1x64x64xbf16>
    %716 = vector.shape_cast %715 : vector<1x64x64xbf16> to vector<64x64xbf16>
    %717 = arith.truncf %714 : vector<16x64xf32> to vector<16x64xbf16>
    %cst_133 = arith.constant dense<0.000000e+00> : vector<16x64xf32>
    %718 = tpu.matmul %717, %716, %cst_133 {dimension_numbers = #tpu.dot_dimension_numbers<[1], [0], [0], [1], [0, 0, 1, 1], [], []>} : vector<16x64xbf16>, vector<64x64xbf16>, vector<16x64xf32> -> vector<16x64xf32>
    %719 = arith.addf %651, %718 : vector<16x64xf32>
    %720 = vector.extract_strided_slice %719 {offsets = [11, 0], sizes = [5, 64], strides = [1, 1]} : vector<16x64xf32> to vector<5x64xf32>
    %721 = vector.extract_strided_slice %719 {offsets = [0, 0], sizes = [11, 64], strides = [1, 1]} : vector<16x64xf32> to vector<11x64xf32>
    %722 = tpu.concatenate %720, %721 in 0 : vector<5x64xf32>, vector<11x64xf32> -> vector<16x64xf32>
    %723 = vector.extract_strided_slice %0 {offsets = [0, 0, 0], sizes = [1, 16, 1], strides = [1, 1, 1]} : vector<9x16x1xf32> to vector<1x16x1xf32>
    %724 = vector.shape_cast %723 : vector<1x16x1xf32> to vector<16x1xf32>
    %725 = vector.broadcast %724 : vector<16x1xf32> to vector<16x64xf32>
    %726 = arith.mulf %722, %725 : vector<16x64xf32>
    %727 = vector.extract_strided_slice %719 {offsets = [12, 0], sizes = [4, 64], strides = [1, 1]} : vector<16x64xf32> to vector<4x64xf32>
    %728 = vector.extract_strided_slice %719 {offsets = [0, 0], sizes = [12, 64], strides = [1, 1]} : vector<16x64xf32> to vector<12x64xf32>
    %729 = tpu.concatenate %727, %728 in 0 : vector<4x64xf32>, vector<12x64xf32> -> vector<16x64xf32>
    %730 = vector.extract_strided_slice %0 {offsets = [1, 0, 0], sizes = [1, 16, 1], strides = [1, 1, 1]} : vector<9x16x1xf32> to vector<1x16x1xf32>
    %731 = vector.shape_cast %730 : vector<1x16x1xf32> to vector<16x1xf32>
    %732 = vector.broadcast %731 : vector<16x1xf32> to vector<16x64xf32>
    %733 = arith.mulf %729, %732 : vector<16x64xf32>
    %734 = vector.extract_strided_slice %719 {offsets = [13, 0], sizes = [3, 64], strides = [1, 1]} : vector<16x64xf32> to vector<3x64xf32>
    %735 = vector.extract_strided_slice %719 {offsets = [0, 0], sizes = [13, 64], strides = [1, 1]} : vector<16x64xf32> to vector<13x64xf32>
    %736 = tpu.concatenate %734, %735 in 0 : vector<3x64xf32>, vector<13x64xf32> -> vector<16x64xf32>
    %737 = vector.extract_strided_slice %0 {offsets = [2, 0, 0], sizes = [1, 16, 1], strides = [1, 1, 1]} : vector<9x16x1xf32> to vector<1x16x1xf32>
    %738 = vector.shape_cast %737 : vector<1x16x1xf32> to vector<16x1xf32>
    %739 = vector.broadcast %738 : vector<16x1xf32> to vector<16x64xf32>
    %740 = arith.mulf %736, %739 : vector<16x64xf32>
    %741 = vector.extract_strided_slice %719 {offsets = [15, 0], sizes = [1, 64], strides = [1, 1]} : vector<16x64xf32> to vector<1x64xf32>
    %742 = vector.extract_strided_slice %719 {offsets = [0, 0], sizes = [15, 64], strides = [1, 1]} : vector<16x64xf32> to vector<15x64xf32>
    %743 = tpu.concatenate %741, %742 in 0 : vector<1x64xf32>, vector<15x64xf32> -> vector<16x64xf32>
    %744 = vector.extract_strided_slice %0 {offsets = [3, 0, 0], sizes = [1, 16, 1], strides = [1, 1, 1]} : vector<9x16x1xf32> to vector<1x16x1xf32>
    %745 = vector.shape_cast %744 : vector<1x16x1xf32> to vector<16x1xf32>
    %746 = vector.broadcast %745 : vector<16x1xf32> to vector<16x64xf32>
    %747 = arith.mulf %743, %746 : vector<16x64xf32>
    %748 = vector.extract_strided_slice %719 {offsets = [1, 0], sizes = [15, 64], strides = [1, 1]} : vector<16x64xf32> to vector<15x64xf32>
    %749 = vector.extract_strided_slice %719 {offsets = [0, 0], sizes = [1, 64], strides = [1, 1]} : vector<16x64xf32> to vector<1x64xf32>
    %750 = tpu.concatenate %748, %749 in 0 : vector<15x64xf32>, vector<1x64xf32> -> vector<16x64xf32>
    %751 = vector.extract_strided_slice %0 {offsets = [5, 0, 0], sizes = [1, 16, 1], strides = [1, 1, 1]} : vector<9x16x1xf32> to vector<1x16x1xf32>
    %752 = vector.shape_cast %751 : vector<1x16x1xf32> to vector<16x1xf32>
    %753 = vector.broadcast %752 : vector<16x1xf32> to vector<16x64xf32>
    %754 = arith.mulf %750, %753 : vector<16x64xf32>
    %755 = vector.extract_strided_slice %719 {offsets = [3, 0], sizes = [13, 64], strides = [1, 1]} : vector<16x64xf32> to vector<13x64xf32>
    %756 = vector.extract_strided_slice %719 {offsets = [0, 0], sizes = [3, 64], strides = [1, 1]} : vector<16x64xf32> to vector<3x64xf32>
    %757 = tpu.concatenate %755, %756 in 0 : vector<13x64xf32>, vector<3x64xf32> -> vector<16x64xf32>
    %758 = vector.extract_strided_slice %0 {offsets = [6, 0, 0], sizes = [1, 16, 1], strides = [1, 1, 1]} : vector<9x16x1xf32> to vector<1x16x1xf32>
    %759 = vector.shape_cast %758 : vector<1x16x1xf32> to vector<16x1xf32>
    %760 = vector.broadcast %759 : vector<16x1xf32> to vector<16x64xf32>
    %761 = arith.mulf %757, %760 : vector<16x64xf32>
    %762 = vector.extract_strided_slice %719 {offsets = [4, 0], sizes = [12, 64], strides = [1, 1]} : vector<16x64xf32> to vector<12x64xf32>
    %763 = vector.extract_strided_slice %719 {offsets = [0, 0], sizes = [4, 64], strides = [1, 1]} : vector<16x64xf32> to vector<4x64xf32>
    %764 = tpu.concatenate %762, %763 in 0 : vector<12x64xf32>, vector<4x64xf32> -> vector<16x64xf32>
    %765 = vector.extract_strided_slice %0 {offsets = [7, 0, 0], sizes = [1, 16, 1], strides = [1, 1, 1]} : vector<9x16x1xf32> to vector<1x16x1xf32>
    %766 = vector.shape_cast %765 : vector<1x16x1xf32> to vector<16x1xf32>
    %767 = vector.broadcast %766 : vector<16x1xf32> to vector<16x64xf32>
    %768 = arith.mulf %764, %767 : vector<16x64xf32>
    %769 = vector.extract_strided_slice %719 {offsets = [5, 0], sizes = [11, 64], strides = [1, 1]} : vector<16x64xf32> to vector<11x64xf32>
    %770 = vector.extract_strided_slice %719 {offsets = [0, 0], sizes = [5, 64], strides = [1, 1]} : vector<16x64xf32> to vector<5x64xf32>
    %771 = tpu.concatenate %769, %770 in 0 : vector<11x64xf32>, vector<5x64xf32> -> vector<16x64xf32>
    %772 = vector.extract_strided_slice %0 {offsets = [8, 0, 0], sizes = [1, 16, 1], strides = [1, 1, 1]} : vector<9x16x1xf32> to vector<1x16x1xf32>
    %773 = vector.shape_cast %772 : vector<1x16x1xf32> to vector<16x1xf32>
    %774 = vector.broadcast %773 : vector<16x1xf32> to vector<16x64xf32>
    %775 = arith.mulf %771, %774 : vector<16x64xf32>
    %776 = tpu.concatenate %726, %733, %740, %747, %719, %754, %761, %768, %775 in 1 : vector<16x64xf32>, vector<16x64xf32>, vector<16x64xf32>, vector<16x64xf32>, vector<16x64xf32>, vector<16x64xf32>, vector<16x64xf32>, vector<16x64xf32>, vector<16x64xf32> -> vector<16x576xf32>
    %c7 = arith.constant 7 : index
    %c0_134 = arith.constant 0 : index
    %c0_135 = arith.constant 0 : index
    %777 = vector.load %arg11[%c7, %c0_134, %c0_135] : memref<12x576x64xbf16, #tpu.memory_space<vmem>>, vector<1x576x64xbf16>
    %778 = vector.shape_cast %777 : vector<1x576x64xbf16> to vector<576x64xbf16>
    %779 = arith.truncf %776 : vector<16x576xf32> to vector<16x576xbf16>
    %cst_136 = arith.constant dense<0.000000e+00> : vector<16x64xf32>
    %780 = tpu.matmul %779, %778, %cst_136 {dimension_numbers = #tpu.dot_dimension_numbers<[1], [0], [0], [1], [0, 0, 1, 1], [], []>} : vector<16x576xbf16>, vector<576x64xbf16>, vector<16x64xf32> -> vector<16x64xf32>
    %cst_137 = arith.constant 0.000000e+00 : f32
    %781 = vector.broadcast %cst_137 : f32 to vector<16x64xf32>
    %782 = arith.maximumf %780, %781 : vector<16x64xf32>
    %c7_138 = arith.constant 7 : index
    %c0_139 = arith.constant 0 : index
    %c0_140 = arith.constant 0 : index
    %783 = vector.load %arg12[%c7_138, %c0_139, %c0_140] : memref<12x64x64xbf16, #tpu.memory_space<vmem>>, vector<1x64x64xbf16>
    %784 = vector.shape_cast %783 : vector<1x64x64xbf16> to vector<64x64xbf16>
    %785 = arith.truncf %782 : vector<16x64xf32> to vector<16x64xbf16>
    %cst_141 = arith.constant dense<0.000000e+00> : vector<16x64xf32>
    %786 = tpu.matmul %785, %784, %cst_141 {dimension_numbers = #tpu.dot_dimension_numbers<[1], [0], [0], [1], [0, 0, 1, 1], [], []>} : vector<16x64xbf16>, vector<64x64xbf16>, vector<16x64xf32> -> vector<16x64xf32>
    %787 = arith.addf %719, %786 : vector<16x64xf32>
    %788 = vector.extract_strided_slice %787 {offsets = [11, 0], sizes = [5, 64], strides = [1, 1]} : vector<16x64xf32> to vector<5x64xf32>
    %789 = vector.extract_strided_slice %787 {offsets = [0, 0], sizes = [11, 64], strides = [1, 1]} : vector<16x64xf32> to vector<11x64xf32>
    %790 = tpu.concatenate %788, %789 in 0 : vector<5x64xf32>, vector<11x64xf32> -> vector<16x64xf32>
    %791 = vector.extract_strided_slice %0 {offsets = [0, 0, 0], sizes = [1, 16, 1], strides = [1, 1, 1]} : vector<9x16x1xf32> to vector<1x16x1xf32>
    %792 = vector.shape_cast %791 : vector<1x16x1xf32> to vector<16x1xf32>
    %793 = vector.broadcast %792 : vector<16x1xf32> to vector<16x64xf32>
    %794 = arith.mulf %790, %793 : vector<16x64xf32>
    %795 = vector.extract_strided_slice %787 {offsets = [12, 0], sizes = [4, 64], strides = [1, 1]} : vector<16x64xf32> to vector<4x64xf32>
    %796 = vector.extract_strided_slice %787 {offsets = [0, 0], sizes = [12, 64], strides = [1, 1]} : vector<16x64xf32> to vector<12x64xf32>
    %797 = tpu.concatenate %795, %796 in 0 : vector<4x64xf32>, vector<12x64xf32> -> vector<16x64xf32>
    %798 = vector.extract_strided_slice %0 {offsets = [1, 0, 0], sizes = [1, 16, 1], strides = [1, 1, 1]} : vector<9x16x1xf32> to vector<1x16x1xf32>
    %799 = vector.shape_cast %798 : vector<1x16x1xf32> to vector<16x1xf32>
    %800 = vector.broadcast %799 : vector<16x1xf32> to vector<16x64xf32>
    %801 = arith.mulf %797, %800 : vector<16x64xf32>
    %802 = vector.extract_strided_slice %787 {offsets = [13, 0], sizes = [3, 64], strides = [1, 1]} : vector<16x64xf32> to vector<3x64xf32>
    %803 = vector.extract_strided_slice %787 {offsets = [0, 0], sizes = [13, 64], strides = [1, 1]} : vector<16x64xf32> to vector<13x64xf32>
    %804 = tpu.concatenate %802, %803 in 0 : vector<3x64xf32>, vector<13x64xf32> -> vector<16x64xf32>
    %805 = vector.extract_strided_slice %0 {offsets = [2, 0, 0], sizes = [1, 16, 1], strides = [1, 1, 1]} : vector<9x16x1xf32> to vector<1x16x1xf32>
    %806 = vector.shape_cast %805 : vector<1x16x1xf32> to vector<16x1xf32>
    %807 = vector.broadcast %806 : vector<16x1xf32> to vector<16x64xf32>
    %808 = arith.mulf %804, %807 : vector<16x64xf32>
    %809 = vector.extract_strided_slice %787 {offsets = [15, 0], sizes = [1, 64], strides = [1, 1]} : vector<16x64xf32> to vector<1x64xf32>
    %810 = vector.extract_strided_slice %787 {offsets = [0, 0], sizes = [15, 64], strides = [1, 1]} : vector<16x64xf32> to vector<15x64xf32>
    %811 = tpu.concatenate %809, %810 in 0 : vector<1x64xf32>, vector<15x64xf32> -> vector<16x64xf32>
    %812 = vector.extract_strided_slice %0 {offsets = [3, 0, 0], sizes = [1, 16, 1], strides = [1, 1, 1]} : vector<9x16x1xf32> to vector<1x16x1xf32>
    %813 = vector.shape_cast %812 : vector<1x16x1xf32> to vector<16x1xf32>
    %814 = vector.broadcast %813 : vector<16x1xf32> to vector<16x64xf32>
    %815 = arith.mulf %811, %814 : vector<16x64xf32>
    %816 = vector.extract_strided_slice %787 {offsets = [1, 0], sizes = [15, 64], strides = [1, 1]} : vector<16x64xf32> to vector<15x64xf32>
    %817 = vector.extract_strided_slice %787 {offsets = [0, 0], sizes = [1, 64], strides = [1, 1]} : vector<16x64xf32> to vector<1x64xf32>
    %818 = tpu.concatenate %816, %817 in 0 : vector<15x64xf32>, vector<1x64xf32> -> vector<16x64xf32>
    %819 = vector.extract_strided_slice %0 {offsets = [5, 0, 0], sizes = [1, 16, 1], strides = [1, 1, 1]} : vector<9x16x1xf32> to vector<1x16x1xf32>
    %820 = vector.shape_cast %819 : vector<1x16x1xf32> to vector<16x1xf32>
    %821 = vector.broadcast %820 : vector<16x1xf32> to vector<16x64xf32>
    %822 = arith.mulf %818, %821 : vector<16x64xf32>
    %823 = vector.extract_strided_slice %787 {offsets = [3, 0], sizes = [13, 64], strides = [1, 1]} : vector<16x64xf32> to vector<13x64xf32>
    %824 = vector.extract_strided_slice %787 {offsets = [0, 0], sizes = [3, 64], strides = [1, 1]} : vector<16x64xf32> to vector<3x64xf32>
    %825 = tpu.concatenate %823, %824 in 0 : vector<13x64xf32>, vector<3x64xf32> -> vector<16x64xf32>
    %826 = vector.extract_strided_slice %0 {offsets = [6, 0, 0], sizes = [1, 16, 1], strides = [1, 1, 1]} : vector<9x16x1xf32> to vector<1x16x1xf32>
    %827 = vector.shape_cast %826 : vector<1x16x1xf32> to vector<16x1xf32>
    %828 = vector.broadcast %827 : vector<16x1xf32> to vector<16x64xf32>
    %829 = arith.mulf %825, %828 : vector<16x64xf32>
    %830 = vector.extract_strided_slice %787 {offsets = [4, 0], sizes = [12, 64], strides = [1, 1]} : vector<16x64xf32> to vector<12x64xf32>
    %831 = vector.extract_strided_slice %787 {offsets = [0, 0], sizes = [4, 64], strides = [1, 1]} : vector<16x64xf32> to vector<4x64xf32>
    %832 = tpu.concatenate %830, %831 in 0 : vector<12x64xf32>, vector<4x64xf32> -> vector<16x64xf32>
    %833 = vector.extract_strided_slice %0 {offsets = [7, 0, 0], sizes = [1, 16, 1], strides = [1, 1, 1]} : vector<9x16x1xf32> to vector<1x16x1xf32>
    %834 = vector.shape_cast %833 : vector<1x16x1xf32> to vector<16x1xf32>
    %835 = vector.broadcast %834 : vector<16x1xf32> to vector<16x64xf32>
    %836 = arith.mulf %832, %835 : vector<16x64xf32>
    %837 = vector.extract_strided_slice %787 {offsets = [5, 0], sizes = [11, 64], strides = [1, 1]} : vector<16x64xf32> to vector<11x64xf32>
    %838 = vector.extract_strided_slice %787 {offsets = [0, 0], sizes = [5, 64], strides = [1, 1]} : vector<16x64xf32> to vector<5x64xf32>
    %839 = tpu.concatenate %837, %838 in 0 : vector<11x64xf32>, vector<5x64xf32> -> vector<16x64xf32>
    %840 = vector.extract_strided_slice %0 {offsets = [8, 0, 0], sizes = [1, 16, 1], strides = [1, 1, 1]} : vector<9x16x1xf32> to vector<1x16x1xf32>
    %841 = vector.shape_cast %840 : vector<1x16x1xf32> to vector<16x1xf32>
    %842 = vector.broadcast %841 : vector<16x1xf32> to vector<16x64xf32>
    %843 = arith.mulf %839, %842 : vector<16x64xf32>
    %844 = tpu.concatenate %794, %801, %808, %815, %787, %822, %829, %836, %843 in 1 : vector<16x64xf32>, vector<16x64xf32>, vector<16x64xf32>, vector<16x64xf32>, vector<16x64xf32>, vector<16x64xf32>, vector<16x64xf32>, vector<16x64xf32>, vector<16x64xf32> -> vector<16x576xf32>
    %c8 = arith.constant 8 : index
    %c0_142 = arith.constant 0 : index
    %c0_143 = arith.constant 0 : index
    %845 = vector.load %arg11[%c8, %c0_142, %c0_143] : memref<12x576x64xbf16, #tpu.memory_space<vmem>>, vector<1x576x64xbf16>
    %846 = vector.shape_cast %845 : vector<1x576x64xbf16> to vector<576x64xbf16>
    %847 = arith.truncf %844 : vector<16x576xf32> to vector<16x576xbf16>
    %cst_144 = arith.constant dense<0.000000e+00> : vector<16x64xf32>
    %848 = tpu.matmul %847, %846, %cst_144 {dimension_numbers = #tpu.dot_dimension_numbers<[1], [0], [0], [1], [0, 0, 1, 1], [], []>} : vector<16x576xbf16>, vector<576x64xbf16>, vector<16x64xf32> -> vector<16x64xf32>
    %cst_145 = arith.constant 0.000000e+00 : f32
    %849 = vector.broadcast %cst_145 : f32 to vector<16x64xf32>
    %850 = arith.maximumf %848, %849 : vector<16x64xf32>
    %c8_146 = arith.constant 8 : index
    %c0_147 = arith.constant 0 : index
    %c0_148 = arith.constant 0 : index
    %851 = vector.load %arg12[%c8_146, %c0_147, %c0_148] : memref<12x64x64xbf16, #tpu.memory_space<vmem>>, vector<1x64x64xbf16>
    %852 = vector.shape_cast %851 : vector<1x64x64xbf16> to vector<64x64xbf16>
    %853 = arith.truncf %850 : vector<16x64xf32> to vector<16x64xbf16>
    %cst_149 = arith.constant dense<0.000000e+00> : vector<16x64xf32>
    %854 = tpu.matmul %853, %852, %cst_149 {dimension_numbers = #tpu.dot_dimension_numbers<[1], [0], [0], [1], [0, 0, 1, 1], [], []>} : vector<16x64xbf16>, vector<64x64xbf16>, vector<16x64xf32> -> vector<16x64xf32>
    %855 = arith.addf %787, %854 : vector<16x64xf32>
    %856 = vector.extract_strided_slice %855 {offsets = [11, 0], sizes = [5, 64], strides = [1, 1]} : vector<16x64xf32> to vector<5x64xf32>
    %857 = vector.extract_strided_slice %855 {offsets = [0, 0], sizes = [11, 64], strides = [1, 1]} : vector<16x64xf32> to vector<11x64xf32>
    %858 = tpu.concatenate %856, %857 in 0 : vector<5x64xf32>, vector<11x64xf32> -> vector<16x64xf32>
    %859 = vector.extract_strided_slice %0 {offsets = [0, 0, 0], sizes = [1, 16, 1], strides = [1, 1, 1]} : vector<9x16x1xf32> to vector<1x16x1xf32>
    %860 = vector.shape_cast %859 : vector<1x16x1xf32> to vector<16x1xf32>
    %861 = vector.broadcast %860 : vector<16x1xf32> to vector<16x64xf32>
    %862 = arith.mulf %858, %861 : vector<16x64xf32>
    %863 = vector.extract_strided_slice %855 {offsets = [12, 0], sizes = [4, 64], strides = [1, 1]} : vector<16x64xf32> to vector<4x64xf32>
    %864 = vector.extract_strided_slice %855 {offsets = [0, 0], sizes = [12, 64], strides = [1, 1]} : vector<16x64xf32> to vector<12x64xf32>
    %865 = tpu.concatenate %863, %864 in 0 : vector<4x64xf32>, vector<12x64xf32> -> vector<16x64xf32>
    %866 = vector.extract_strided_slice %0 {offsets = [1, 0, 0], sizes = [1, 16, 1], strides = [1, 1, 1]} : vector<9x16x1xf32> to vector<1x16x1xf32>
    %867 = vector.shape_cast %866 : vector<1x16x1xf32> to vector<16x1xf32>
    %868 = vector.broadcast %867 : vector<16x1xf32> to vector<16x64xf32>
    %869 = arith.mulf %865, %868 : vector<16x64xf32>
    %870 = vector.extract_strided_slice %855 {offsets = [13, 0], sizes = [3, 64], strides = [1, 1]} : vector<16x64xf32> to vector<3x64xf32>
    %871 = vector.extract_strided_slice %855 {offsets = [0, 0], sizes = [13, 64], strides = [1, 1]} : vector<16x64xf32> to vector<13x64xf32>
    %872 = tpu.concatenate %870, %871 in 0 : vector<3x64xf32>, vector<13x64xf32> -> vector<16x64xf32>
    %873 = vector.extract_strided_slice %0 {offsets = [2, 0, 0], sizes = [1, 16, 1], strides = [1, 1, 1]} : vector<9x16x1xf32> to vector<1x16x1xf32>
    %874 = vector.shape_cast %873 : vector<1x16x1xf32> to vector<16x1xf32>
    %875 = vector.broadcast %874 : vector<16x1xf32> to vector<16x64xf32>
    %876 = arith.mulf %872, %875 : vector<16x64xf32>
    %877 = vector.extract_strided_slice %855 {offsets = [15, 0], sizes = [1, 64], strides = [1, 1]} : vector<16x64xf32> to vector<1x64xf32>
    %878 = vector.extract_strided_slice %855 {offsets = [0, 0], sizes = [15, 64], strides = [1, 1]} : vector<16x64xf32> to vector<15x64xf32>
    %879 = tpu.concatenate %877, %878 in 0 : vector<1x64xf32>, vector<15x64xf32> -> vector<16x64xf32>
    %880 = vector.extract_strided_slice %0 {offsets = [3, 0, 0], sizes = [1, 16, 1], strides = [1, 1, 1]} : vector<9x16x1xf32> to vector<1x16x1xf32>
    %881 = vector.shape_cast %880 : vector<1x16x1xf32> to vector<16x1xf32>
    %882 = vector.broadcast %881 : vector<16x1xf32> to vector<16x64xf32>
    %883 = arith.mulf %879, %882 : vector<16x64xf32>
    %884 = vector.extract_strided_slice %855 {offsets = [1, 0], sizes = [15, 64], strides = [1, 1]} : vector<16x64xf32> to vector<15x64xf32>
    %885 = vector.extract_strided_slice %855 {offsets = [0, 0], sizes = [1, 64], strides = [1, 1]} : vector<16x64xf32> to vector<1x64xf32>
    %886 = tpu.concatenate %884, %885 in 0 : vector<15x64xf32>, vector<1x64xf32> -> vector<16x64xf32>
    %887 = vector.extract_strided_slice %0 {offsets = [5, 0, 0], sizes = [1, 16, 1], strides = [1, 1, 1]} : vector<9x16x1xf32> to vector<1x16x1xf32>
    %888 = vector.shape_cast %887 : vector<1x16x1xf32> to vector<16x1xf32>
    %889 = vector.broadcast %888 : vector<16x1xf32> to vector<16x64xf32>
    %890 = arith.mulf %886, %889 : vector<16x64xf32>
    %891 = vector.extract_strided_slice %855 {offsets = [3, 0], sizes = [13, 64], strides = [1, 1]} : vector<16x64xf32> to vector<13x64xf32>
    %892 = vector.extract_strided_slice %855 {offsets = [0, 0], sizes = [3, 64], strides = [1, 1]} : vector<16x64xf32> to vector<3x64xf32>
    %893 = tpu.concatenate %891, %892 in 0 : vector<13x64xf32>, vector<3x64xf32> -> vector<16x64xf32>
    %894 = vector.extract_strided_slice %0 {offsets = [6, 0, 0], sizes = [1, 16, 1], strides = [1, 1, 1]} : vector<9x16x1xf32> to vector<1x16x1xf32>
    %895 = vector.shape_cast %894 : vector<1x16x1xf32> to vector<16x1xf32>
    %896 = vector.broadcast %895 : vector<16x1xf32> to vector<16x64xf32>
    %897 = arith.mulf %893, %896 : vector<16x64xf32>
    %898 = vector.extract_strided_slice %855 {offsets = [4, 0], sizes = [12, 64], strides = [1, 1]} : vector<16x64xf32> to vector<12x64xf32>
    %899 = vector.extract_strided_slice %855 {offsets = [0, 0], sizes = [4, 64], strides = [1, 1]} : vector<16x64xf32> to vector<4x64xf32>
    %900 = tpu.concatenate %898, %899 in 0 : vector<12x64xf32>, vector<4x64xf32> -> vector<16x64xf32>
    %901 = vector.extract_strided_slice %0 {offsets = [7, 0, 0], sizes = [1, 16, 1], strides = [1, 1, 1]} : vector<9x16x1xf32> to vector<1x16x1xf32>
    %902 = vector.shape_cast %901 : vector<1x16x1xf32> to vector<16x1xf32>
    %903 = vector.broadcast %902 : vector<16x1xf32> to vector<16x64xf32>
    %904 = arith.mulf %900, %903 : vector<16x64xf32>
    %905 = vector.extract_strided_slice %855 {offsets = [5, 0], sizes = [11, 64], strides = [1, 1]} : vector<16x64xf32> to vector<11x64xf32>
    %906 = vector.extract_strided_slice %855 {offsets = [0, 0], sizes = [5, 64], strides = [1, 1]} : vector<16x64xf32> to vector<5x64xf32>
    %907 = tpu.concatenate %905, %906 in 0 : vector<11x64xf32>, vector<5x64xf32> -> vector<16x64xf32>
    %908 = vector.extract_strided_slice %0 {offsets = [8, 0, 0], sizes = [1, 16, 1], strides = [1, 1, 1]} : vector<9x16x1xf32> to vector<1x16x1xf32>
    %909 = vector.shape_cast %908 : vector<1x16x1xf32> to vector<16x1xf32>
    %910 = vector.broadcast %909 : vector<16x1xf32> to vector<16x64xf32>
    %911 = arith.mulf %907, %910 : vector<16x64xf32>
    %912 = tpu.concatenate %862, %869, %876, %883, %855, %890, %897, %904, %911 in 1 : vector<16x64xf32>, vector<16x64xf32>, vector<16x64xf32>, vector<16x64xf32>, vector<16x64xf32>, vector<16x64xf32>, vector<16x64xf32>, vector<16x64xf32>, vector<16x64xf32> -> vector<16x576xf32>
    %c9 = arith.constant 9 : index
    %c0_150 = arith.constant 0 : index
    %c0_151 = arith.constant 0 : index
    %913 = vector.load %arg11[%c9, %c0_150, %c0_151] : memref<12x576x64xbf16, #tpu.memory_space<vmem>>, vector<1x576x64xbf16>
    %914 = vector.shape_cast %913 : vector<1x576x64xbf16> to vector<576x64xbf16>
    %915 = arith.truncf %912 : vector<16x576xf32> to vector<16x576xbf16>
    %cst_152 = arith.constant dense<0.000000e+00> : vector<16x64xf32>
    %916 = tpu.matmul %915, %914, %cst_152 {dimension_numbers = #tpu.dot_dimension_numbers<[1], [0], [0], [1], [0, 0, 1, 1], [], []>} : vector<16x576xbf16>, vector<576x64xbf16>, vector<16x64xf32> -> vector<16x64xf32>
    %cst_153 = arith.constant 0.000000e+00 : f32
    %917 = vector.broadcast %cst_153 : f32 to vector<16x64xf32>
    %918 = arith.maximumf %916, %917 : vector<16x64xf32>
    %c9_154 = arith.constant 9 : index
    %c0_155 = arith.constant 0 : index
    %c0_156 = arith.constant 0 : index
    %919 = vector.load %arg12[%c9_154, %c0_155, %c0_156] : memref<12x64x64xbf16, #tpu.memory_space<vmem>>, vector<1x64x64xbf16>
    %920 = vector.shape_cast %919 : vector<1x64x64xbf16> to vector<64x64xbf16>
    %921 = arith.truncf %918 : vector<16x64xf32> to vector<16x64xbf16>
    %cst_157 = arith.constant dense<0.000000e+00> : vector<16x64xf32>
    %922 = tpu.matmul %921, %920, %cst_157 {dimension_numbers = #tpu.dot_dimension_numbers<[1], [0], [0], [1], [0, 0, 1, 1], [], []>} : vector<16x64xbf16>, vector<64x64xbf16>, vector<16x64xf32> -> vector<16x64xf32>
    %923 = arith.addf %855, %922 : vector<16x64xf32>
    %924 = vector.extract_strided_slice %923 {offsets = [11, 0], sizes = [5, 64], strides = [1, 1]} : vector<16x64xf32> to vector<5x64xf32>
    %925 = vector.extract_strided_slice %923 {offsets = [0, 0], sizes = [11, 64], strides = [1, 1]} : vector<16x64xf32> to vector<11x64xf32>
    %926 = tpu.concatenate %924, %925 in 0 : vector<5x64xf32>, vector<11x64xf32> -> vector<16x64xf32>
    %927 = vector.extract_strided_slice %0 {offsets = [0, 0, 0], sizes = [1, 16, 1], strides = [1, 1, 1]} : vector<9x16x1xf32> to vector<1x16x1xf32>
    %928 = vector.shape_cast %927 : vector<1x16x1xf32> to vector<16x1xf32>
    %929 = vector.broadcast %928 : vector<16x1xf32> to vector<16x64xf32>
    %930 = arith.mulf %926, %929 : vector<16x64xf32>
    %931 = vector.extract_strided_slice %923 {offsets = [12, 0], sizes = [4, 64], strides = [1, 1]} : vector<16x64xf32> to vector<4x64xf32>
    %932 = vector.extract_strided_slice %923 {offsets = [0, 0], sizes = [12, 64], strides = [1, 1]} : vector<16x64xf32> to vector<12x64xf32>
    %933 = tpu.concatenate %931, %932 in 0 : vector<4x64xf32>, vector<12x64xf32> -> vector<16x64xf32>
    %934 = vector.extract_strided_slice %0 {offsets = [1, 0, 0], sizes = [1, 16, 1], strides = [1, 1, 1]} : vector<9x16x1xf32> to vector<1x16x1xf32>
    %935 = vector.shape_cast %934 : vector<1x16x1xf32> to vector<16x1xf32>
    %936 = vector.broadcast %935 : vector<16x1xf32> to vector<16x64xf32>
    %937 = arith.mulf %933, %936 : vector<16x64xf32>
    %938 = vector.extract_strided_slice %923 {offsets = [13, 0], sizes = [3, 64], strides = [1, 1]} : vector<16x64xf32> to vector<3x64xf32>
    %939 = vector.extract_strided_slice %923 {offsets = [0, 0], sizes = [13, 64], strides = [1, 1]} : vector<16x64xf32> to vector<13x64xf32>
    %940 = tpu.concatenate %938, %939 in 0 : vector<3x64xf32>, vector<13x64xf32> -> vector<16x64xf32>
    %941 = vector.extract_strided_slice %0 {offsets = [2, 0, 0], sizes = [1, 16, 1], strides = [1, 1, 1]} : vector<9x16x1xf32> to vector<1x16x1xf32>
    %942 = vector.shape_cast %941 : vector<1x16x1xf32> to vector<16x1xf32>
    %943 = vector.broadcast %942 : vector<16x1xf32> to vector<16x64xf32>
    %944 = arith.mulf %940, %943 : vector<16x64xf32>
    %945 = vector.extract_strided_slice %923 {offsets = [15, 0], sizes = [1, 64], strides = [1, 1]} : vector<16x64xf32> to vector<1x64xf32>
    %946 = vector.extract_strided_slice %923 {offsets = [0, 0], sizes = [15, 64], strides = [1, 1]} : vector<16x64xf32> to vector<15x64xf32>
    %947 = tpu.concatenate %945, %946 in 0 : vector<1x64xf32>, vector<15x64xf32> -> vector<16x64xf32>
    %948 = vector.extract_strided_slice %0 {offsets = [3, 0, 0], sizes = [1, 16, 1], strides = [1, 1, 1]} : vector<9x16x1xf32> to vector<1x16x1xf32>
    %949 = vector.shape_cast %948 : vector<1x16x1xf32> to vector<16x1xf32>
    %950 = vector.broadcast %949 : vector<16x1xf32> to vector<16x64xf32>
    %951 = arith.mulf %947, %950 : vector<16x64xf32>
    %952 = vector.extract_strided_slice %923 {offsets = [1, 0], sizes = [15, 64], strides = [1, 1]} : vector<16x64xf32> to vector<15x64xf32>
    %953 = vector.extract_strided_slice %923 {offsets = [0, 0], sizes = [1, 64], strides = [1, 1]} : vector<16x64xf32> to vector<1x64xf32>
    %954 = tpu.concatenate %952, %953 in 0 : vector<15x64xf32>, vector<1x64xf32> -> vector<16x64xf32>
    %955 = vector.extract_strided_slice %0 {offsets = [5, 0, 0], sizes = [1, 16, 1], strides = [1, 1, 1]} : vector<9x16x1xf32> to vector<1x16x1xf32>
    %956 = vector.shape_cast %955 : vector<1x16x1xf32> to vector<16x1xf32>
    %957 = vector.broadcast %956 : vector<16x1xf32> to vector<16x64xf32>
    %958 = arith.mulf %954, %957 : vector<16x64xf32>
    %959 = vector.extract_strided_slice %923 {offsets = [3, 0], sizes = [13, 64], strides = [1, 1]} : vector<16x64xf32> to vector<13x64xf32>
    %960 = vector.extract_strided_slice %923 {offsets = [0, 0], sizes = [3, 64], strides = [1, 1]} : vector<16x64xf32> to vector<3x64xf32>
    %961 = tpu.concatenate %959, %960 in 0 : vector<13x64xf32>, vector<3x64xf32> -> vector<16x64xf32>
    %962 = vector.extract_strided_slice %0 {offsets = [6, 0, 0], sizes = [1, 16, 1], strides = [1, 1, 1]} : vector<9x16x1xf32> to vector<1x16x1xf32>
    %963 = vector.shape_cast %962 : vector<1x16x1xf32> to vector<16x1xf32>
    %964 = vector.broadcast %963 : vector<16x1xf32> to vector<16x64xf32>
    %965 = arith.mulf %961, %964 : vector<16x64xf32>
    %966 = vector.extract_strided_slice %923 {offsets = [4, 0], sizes = [12, 64], strides = [1, 1]} : vector<16x64xf32> to vector<12x64xf32>
    %967 = vector.extract_strided_slice %923 {offsets = [0, 0], sizes = [4, 64], strides = [1, 1]} : vector<16x64xf32> to vector<4x64xf32>
    %968 = tpu.concatenate %966, %967 in 0 : vector<12x64xf32>, vector<4x64xf32> -> vector<16x64xf32>
    %969 = vector.extract_strided_slice %0 {offsets = [7, 0, 0], sizes = [1, 16, 1], strides = [1, 1, 1]} : vector<9x16x1xf32> to vector<1x16x1xf32>
    %970 = vector.shape_cast %969 : vector<1x16x1xf32> to vector<16x1xf32>
    %971 = vector.broadcast %970 : vector<16x1xf32> to vector<16x64xf32>
    %972 = arith.mulf %968, %971 : vector<16x64xf32>
    %973 = vector.extract_strided_slice %923 {offsets = [5, 0], sizes = [11, 64], strides = [1, 1]} : vector<16x64xf32> to vector<11x64xf32>
    %974 = vector.extract_strided_slice %923 {offsets = [0, 0], sizes = [5, 64], strides = [1, 1]} : vector<16x64xf32> to vector<5x64xf32>
    %975 = tpu.concatenate %973, %974 in 0 : vector<11x64xf32>, vector<5x64xf32> -> vector<16x64xf32>
    %976 = vector.extract_strided_slice %0 {offsets = [8, 0, 0], sizes = [1, 16, 1], strides = [1, 1, 1]} : vector<9x16x1xf32> to vector<1x16x1xf32>
    %977 = vector.shape_cast %976 : vector<1x16x1xf32> to vector<16x1xf32>
    %978 = vector.broadcast %977 : vector<16x1xf32> to vector<16x64xf32>
    %979 = arith.mulf %975, %978 : vector<16x64xf32>
    %980 = tpu.concatenate %930, %937, %944, %951, %923, %958, %965, %972, %979 in 1 : vector<16x64xf32>, vector<16x64xf32>, vector<16x64xf32>, vector<16x64xf32>, vector<16x64xf32>, vector<16x64xf32>, vector<16x64xf32>, vector<16x64xf32>, vector<16x64xf32> -> vector<16x576xf32>
    %c10 = arith.constant 10 : index
    %c0_158 = arith.constant 0 : index
    %c0_159 = arith.constant 0 : index
    %981 = vector.load %arg11[%c10, %c0_158, %c0_159] : memref<12x576x64xbf16, #tpu.memory_space<vmem>>, vector<1x576x64xbf16>
    %982 = vector.shape_cast %981 : vector<1x576x64xbf16> to vector<576x64xbf16>
    %983 = arith.truncf %980 : vector<16x576xf32> to vector<16x576xbf16>
    %cst_160 = arith.constant dense<0.000000e+00> : vector<16x64xf32>
    %984 = tpu.matmul %983, %982, %cst_160 {dimension_numbers = #tpu.dot_dimension_numbers<[1], [0], [0], [1], [0, 0, 1, 1], [], []>} : vector<16x576xbf16>, vector<576x64xbf16>, vector<16x64xf32> -> vector<16x64xf32>
    %cst_161 = arith.constant 0.000000e+00 : f32
    %985 = vector.broadcast %cst_161 : f32 to vector<16x64xf32>
    %986 = arith.maximumf %984, %985 : vector<16x64xf32>
    %c10_162 = arith.constant 10 : index
    %c0_163 = arith.constant 0 : index
    %c0_164 = arith.constant 0 : index
    %987 = vector.load %arg12[%c10_162, %c0_163, %c0_164] : memref<12x64x64xbf16, #tpu.memory_space<vmem>>, vector<1x64x64xbf16>
    %988 = vector.shape_cast %987 : vector<1x64x64xbf16> to vector<64x64xbf16>
    %989 = arith.truncf %986 : vector<16x64xf32> to vector<16x64xbf16>
    %cst_165 = arith.constant dense<0.000000e+00> : vector<16x64xf32>
    %990 = tpu.matmul %989, %988, %cst_165 {dimension_numbers = #tpu.dot_dimension_numbers<[1], [0], [0], [1], [0, 0, 1, 1], [], []>} : vector<16x64xbf16>, vector<64x64xbf16>, vector<16x64xf32> -> vector<16x64xf32>
    %991 = arith.addf %923, %990 : vector<16x64xf32>
    %992 = vector.extract_strided_slice %991 {offsets = [11, 0], sizes = [5, 64], strides = [1, 1]} : vector<16x64xf32> to vector<5x64xf32>
    %993 = vector.extract_strided_slice %991 {offsets = [0, 0], sizes = [11, 64], strides = [1, 1]} : vector<16x64xf32> to vector<11x64xf32>
    %994 = tpu.concatenate %992, %993 in 0 : vector<5x64xf32>, vector<11x64xf32> -> vector<16x64xf32>
    %995 = vector.extract_strided_slice %0 {offsets = [0, 0, 0], sizes = [1, 16, 1], strides = [1, 1, 1]} : vector<9x16x1xf32> to vector<1x16x1xf32>
    %996 = vector.shape_cast %995 : vector<1x16x1xf32> to vector<16x1xf32>
    %997 = vector.broadcast %996 : vector<16x1xf32> to vector<16x64xf32>
    %998 = arith.mulf %994, %997 : vector<16x64xf32>
    %999 = vector.extract_strided_slice %991 {offsets = [12, 0], sizes = [4, 64], strides = [1, 1]} : vector<16x64xf32> to vector<4x64xf32>
    %1000 = vector.extract_strided_slice %991 {offsets = [0, 0], sizes = [12, 64], strides = [1, 1]} : vector<16x64xf32> to vector<12x64xf32>
    %1001 = tpu.concatenate %999, %1000 in 0 : vector<4x64xf32>, vector<12x64xf32> -> vector<16x64xf32>
    %1002 = vector.extract_strided_slice %0 {offsets = [1, 0, 0], sizes = [1, 16, 1], strides = [1, 1, 1]} : vector<9x16x1xf32> to vector<1x16x1xf32>
    %1003 = vector.shape_cast %1002 : vector<1x16x1xf32> to vector<16x1xf32>
    %1004 = vector.broadcast %1003 : vector<16x1xf32> to vector<16x64xf32>
    %1005 = arith.mulf %1001, %1004 : vector<16x64xf32>
    %1006 = vector.extract_strided_slice %991 {offsets = [13, 0], sizes = [3, 64], strides = [1, 1]} : vector<16x64xf32> to vector<3x64xf32>
    %1007 = vector.extract_strided_slice %991 {offsets = [0, 0], sizes = [13, 64], strides = [1, 1]} : vector<16x64xf32> to vector<13x64xf32>
    %1008 = tpu.concatenate %1006, %1007 in 0 : vector<3x64xf32>, vector<13x64xf32> -> vector<16x64xf32>
    %1009 = vector.extract_strided_slice %0 {offsets = [2, 0, 0], sizes = [1, 16, 1], strides = [1, 1, 1]} : vector<9x16x1xf32> to vector<1x16x1xf32>
    %1010 = vector.shape_cast %1009 : vector<1x16x1xf32> to vector<16x1xf32>
    %1011 = vector.broadcast %1010 : vector<16x1xf32> to vector<16x64xf32>
    %1012 = arith.mulf %1008, %1011 : vector<16x64xf32>
    %1013 = vector.extract_strided_slice %991 {offsets = [15, 0], sizes = [1, 64], strides = [1, 1]} : vector<16x64xf32> to vector<1x64xf32>
    %1014 = vector.extract_strided_slice %991 {offsets = [0, 0], sizes = [15, 64], strides = [1, 1]} : vector<16x64xf32> to vector<15x64xf32>
    %1015 = tpu.concatenate %1013, %1014 in 0 : vector<1x64xf32>, vector<15x64xf32> -> vector<16x64xf32>
    %1016 = vector.extract_strided_slice %0 {offsets = [3, 0, 0], sizes = [1, 16, 1], strides = [1, 1, 1]} : vector<9x16x1xf32> to vector<1x16x1xf32>
    %1017 = vector.shape_cast %1016 : vector<1x16x1xf32> to vector<16x1xf32>
    %1018 = vector.broadcast %1017 : vector<16x1xf32> to vector<16x64xf32>
    %1019 = arith.mulf %1015, %1018 : vector<16x64xf32>
    %1020 = vector.extract_strided_slice %991 {offsets = [1, 0], sizes = [15, 64], strides = [1, 1]} : vector<16x64xf32> to vector<15x64xf32>
    %1021 = vector.extract_strided_slice %991 {offsets = [0, 0], sizes = [1, 64], strides = [1, 1]} : vector<16x64xf32> to vector<1x64xf32>
    %1022 = tpu.concatenate %1020, %1021 in 0 : vector<15x64xf32>, vector<1x64xf32> -> vector<16x64xf32>
    %1023 = vector.extract_strided_slice %0 {offsets = [5, 0, 0], sizes = [1, 16, 1], strides = [1, 1, 1]} : vector<9x16x1xf32> to vector<1x16x1xf32>
    %1024 = vector.shape_cast %1023 : vector<1x16x1xf32> to vector<16x1xf32>
    %1025 = vector.broadcast %1024 : vector<16x1xf32> to vector<16x64xf32>
    %1026 = arith.mulf %1022, %1025 : vector<16x64xf32>
    %1027 = vector.extract_strided_slice %991 {offsets = [3, 0], sizes = [13, 64], strides = [1, 1]} : vector<16x64xf32> to vector<13x64xf32>
    %1028 = vector.extract_strided_slice %991 {offsets = [0, 0], sizes = [3, 64], strides = [1, 1]} : vector<16x64xf32> to vector<3x64xf32>
    %1029 = tpu.concatenate %1027, %1028 in 0 : vector<13x64xf32>, vector<3x64xf32> -> vector<16x64xf32>
    %1030 = vector.extract_strided_slice %0 {offsets = [6, 0, 0], sizes = [1, 16, 1], strides = [1, 1, 1]} : vector<9x16x1xf32> to vector<1x16x1xf32>
    %1031 = vector.shape_cast %1030 : vector<1x16x1xf32> to vector<16x1xf32>
    %1032 = vector.broadcast %1031 : vector<16x1xf32> to vector<16x64xf32>
    %1033 = arith.mulf %1029, %1032 : vector<16x64xf32>
    %1034 = vector.extract_strided_slice %991 {offsets = [4, 0], sizes = [12, 64], strides = [1, 1]} : vector<16x64xf32> to vector<12x64xf32>
    %1035 = vector.extract_strided_slice %991 {offsets = [0, 0], sizes = [4, 64], strides = [1, 1]} : vector<16x64xf32> to vector<4x64xf32>
    %1036 = tpu.concatenate %1034, %1035 in 0 : vector<12x64xf32>, vector<4x64xf32> -> vector<16x64xf32>
    %1037 = vector.extract_strided_slice %0 {offsets = [7, 0, 0], sizes = [1, 16, 1], strides = [1, 1, 1]} : vector<9x16x1xf32> to vector<1x16x1xf32>
    %1038 = vector.shape_cast %1037 : vector<1x16x1xf32> to vector<16x1xf32>
    %1039 = vector.broadcast %1038 : vector<16x1xf32> to vector<16x64xf32>
    %1040 = arith.mulf %1036, %1039 : vector<16x64xf32>
    %1041 = vector.extract_strided_slice %991 {offsets = [5, 0], sizes = [11, 64], strides = [1, 1]} : vector<16x64xf32> to vector<11x64xf32>
    %1042 = vector.extract_strided_slice %991 {offsets = [0, 0], sizes = [5, 64], strides = [1, 1]} : vector<16x64xf32> to vector<5x64xf32>
    %1043 = tpu.concatenate %1041, %1042 in 0 : vector<11x64xf32>, vector<5x64xf32> -> vector<16x64xf32>
    %1044 = vector.extract_strided_slice %0 {offsets = [8, 0, 0], sizes = [1, 16, 1], strides = [1, 1, 1]} : vector<9x16x1xf32> to vector<1x16x1xf32>
    %1045 = vector.shape_cast %1044 : vector<1x16x1xf32> to vector<16x1xf32>
    %1046 = vector.broadcast %1045 : vector<16x1xf32> to vector<16x64xf32>
    %1047 = arith.mulf %1043, %1046 : vector<16x64xf32>
    %1048 = tpu.concatenate %998, %1005, %1012, %1019, %991, %1026, %1033, %1040, %1047 in 1 : vector<16x64xf32>, vector<16x64xf32>, vector<16x64xf32>, vector<16x64xf32>, vector<16x64xf32>, vector<16x64xf32>, vector<16x64xf32>, vector<16x64xf32>, vector<16x64xf32> -> vector<16x576xf32>
    %c11 = arith.constant 11 : index
    %c0_166 = arith.constant 0 : index
    %c0_167 = arith.constant 0 : index
    %1049 = vector.load %arg11[%c11, %c0_166, %c0_167] : memref<12x576x64xbf16, #tpu.memory_space<vmem>>, vector<1x576x64xbf16>
    %1050 = vector.shape_cast %1049 : vector<1x576x64xbf16> to vector<576x64xbf16>
    %1051 = arith.truncf %1048 : vector<16x576xf32> to vector<16x576xbf16>
    %cst_168 = arith.constant dense<0.000000e+00> : vector<16x64xf32>
    %1052 = tpu.matmul %1051, %1050, %cst_168 {dimension_numbers = #tpu.dot_dimension_numbers<[1], [0], [0], [1], [0, 0, 1, 1], [], []>} : vector<16x576xbf16>, vector<576x64xbf16>, vector<16x64xf32> -> vector<16x64xf32>
    %cst_169 = arith.constant 0.000000e+00 : f32
    %1053 = vector.broadcast %cst_169 : f32 to vector<16x64xf32>
    %1054 = arith.maximumf %1052, %1053 : vector<16x64xf32>
    %c11_170 = arith.constant 11 : index
    %c0_171 = arith.constant 0 : index
    %c0_172 = arith.constant 0 : index
    %1055 = vector.load %arg12[%c11_170, %c0_171, %c0_172] : memref<12x64x64xbf16, #tpu.memory_space<vmem>>, vector<1x64x64xbf16>
    %1056 = vector.shape_cast %1055 : vector<1x64x64xbf16> to vector<64x64xbf16>
    %1057 = arith.truncf %1054 : vector<16x64xf32> to vector<16x64xbf16>
    %cst_173 = arith.constant dense<0.000000e+00> : vector<16x64xf32>
    %1058 = tpu.matmul %1057, %1056, %cst_173 {dimension_numbers = #tpu.dot_dimension_numbers<[1], [0], [0], [1], [0, 0, 1, 1], [], []>} : vector<16x64xbf16>, vector<64x64xbf16>, vector<16x64xf32> -> vector<16x64xf32>
    %1059 = arith.addf %991, %1058 : vector<16x64xf32>
    %cst_174 = arith.constant 0.000000e+00 : f32
    %1060 = vector.broadcast %cst_174 : f32 to vector<16x64xf32>
    %1061 = arith.cmpf ogt, %1059, %1060 : vector<16x64xf32>
    %cst_175 = arith.constant 0.00999999977 : f32
    %1062 = vector.broadcast %cst_175 : f32 to vector<16x64xf32>
    %1063 = arith.mulf %1062, %1059 : vector<16x64xf32>
    %1064 = arith.select %1061, %1059, %1063 : vector<16x64xi1>, vector<16x64xf32>
    %1065 = vector.extract_strided_slice %1064 {offsets = [11, 0], sizes = [5, 64], strides = [1, 1]} : vector<16x64xf32> to vector<5x64xf32>
    %1066 = vector.extract_strided_slice %1064 {offsets = [0, 0], sizes = [11, 64], strides = [1, 1]} : vector<16x64xf32> to vector<11x64xf32>
    %1067 = tpu.concatenate %1065, %1066 in 0 : vector<5x64xf32>, vector<11x64xf32> -> vector<16x64xf32>
    %1068 = vector.extract_strided_slice %0 {offsets = [0, 0, 0], sizes = [1, 16, 1], strides = [1, 1, 1]} : vector<9x16x1xf32> to vector<1x16x1xf32>
    %1069 = vector.shape_cast %1068 : vector<1x16x1xf32> to vector<16x1xf32>
    %1070 = vector.broadcast %1069 : vector<16x1xf32> to vector<16x64xf32>
    %1071 = arith.mulf %1067, %1070 : vector<16x64xf32>
    %1072 = vector.extract_strided_slice %1064 {offsets = [12, 0], sizes = [4, 64], strides = [1, 1]} : vector<16x64xf32> to vector<4x64xf32>
    %1073 = vector.extract_strided_slice %1064 {offsets = [0, 0], sizes = [12, 64], strides = [1, 1]} : vector<16x64xf32> to vector<12x64xf32>
    %1074 = tpu.concatenate %1072, %1073 in 0 : vector<4x64xf32>, vector<12x64xf32> -> vector<16x64xf32>
    %1075 = vector.extract_strided_slice %0 {offsets = [1, 0, 0], sizes = [1, 16, 1], strides = [1, 1, 1]} : vector<9x16x1xf32> to vector<1x16x1xf32>
    %1076 = vector.shape_cast %1075 : vector<1x16x1xf32> to vector<16x1xf32>
    %1077 = vector.broadcast %1076 : vector<16x1xf32> to vector<16x64xf32>
    %1078 = arith.mulf %1074, %1077 : vector<16x64xf32>
    %1079 = vector.extract_strided_slice %1064 {offsets = [13, 0], sizes = [3, 64], strides = [1, 1]} : vector<16x64xf32> to vector<3x64xf32>
    %1080 = vector.extract_strided_slice %1064 {offsets = [0, 0], sizes = [13, 64], strides = [1, 1]} : vector<16x64xf32> to vector<13x64xf32>
    %1081 = tpu.concatenate %1079, %1080 in 0 : vector<3x64xf32>, vector<13x64xf32> -> vector<16x64xf32>
    %1082 = vector.extract_strided_slice %0 {offsets = [2, 0, 0], sizes = [1, 16, 1], strides = [1, 1, 1]} : vector<9x16x1xf32> to vector<1x16x1xf32>
    %1083 = vector.shape_cast %1082 : vector<1x16x1xf32> to vector<16x1xf32>
    %1084 = vector.broadcast %1083 : vector<16x1xf32> to vector<16x64xf32>
    %1085 = arith.mulf %1081, %1084 : vector<16x64xf32>
    %1086 = vector.extract_strided_slice %1064 {offsets = [15, 0], sizes = [1, 64], strides = [1, 1]} : vector<16x64xf32> to vector<1x64xf32>
    %1087 = vector.extract_strided_slice %1064 {offsets = [0, 0], sizes = [15, 64], strides = [1, 1]} : vector<16x64xf32> to vector<15x64xf32>
    %1088 = tpu.concatenate %1086, %1087 in 0 : vector<1x64xf32>, vector<15x64xf32> -> vector<16x64xf32>
    %1089 = vector.extract_strided_slice %0 {offsets = [3, 0, 0], sizes = [1, 16, 1], strides = [1, 1, 1]} : vector<9x16x1xf32> to vector<1x16x1xf32>
    %1090 = vector.shape_cast %1089 : vector<1x16x1xf32> to vector<16x1xf32>
    %1091 = vector.broadcast %1090 : vector<16x1xf32> to vector<16x64xf32>
    %1092 = arith.mulf %1088, %1091 : vector<16x64xf32>
    %1093 = vector.extract_strided_slice %1064 {offsets = [1, 0], sizes = [15, 64], strides = [1, 1]} : vector<16x64xf32> to vector<15x64xf32>
    %1094 = vector.extract_strided_slice %1064 {offsets = [0, 0], sizes = [1, 64], strides = [1, 1]} : vector<16x64xf32> to vector<1x64xf32>
    %1095 = tpu.concatenate %1093, %1094 in 0 : vector<15x64xf32>, vector<1x64xf32> -> vector<16x64xf32>
    %1096 = vector.extract_strided_slice %0 {offsets = [5, 0, 0], sizes = [1, 16, 1], strides = [1, 1, 1]} : vector<9x16x1xf32> to vector<1x16x1xf32>
    %1097 = vector.shape_cast %1096 : vector<1x16x1xf32> to vector<16x1xf32>
    %1098 = vector.broadcast %1097 : vector<16x1xf32> to vector<16x64xf32>
    %1099 = arith.mulf %1095, %1098 : vector<16x64xf32>
    %1100 = vector.extract_strided_slice %1064 {offsets = [3, 0], sizes = [13, 64], strides = [1, 1]} : vector<16x64xf32> to vector<13x64xf32>
    %1101 = vector.extract_strided_slice %1064 {offsets = [0, 0], sizes = [3, 64], strides = [1, 1]} : vector<16x64xf32> to vector<3x64xf32>
    %1102 = tpu.concatenate %1100, %1101 in 0 : vector<13x64xf32>, vector<3x64xf32> -> vector<16x64xf32>
    %1103 = vector.extract_strided_slice %0 {offsets = [6, 0, 0], sizes = [1, 16, 1], strides = [1, 1, 1]} : vector<9x16x1xf32> to vector<1x16x1xf32>
    %1104 = vector.shape_cast %1103 : vector<1x16x1xf32> to vector<16x1xf32>
    %1105 = vector.broadcast %1104 : vector<16x1xf32> to vector<16x64xf32>
    %1106 = arith.mulf %1102, %1105 : vector<16x64xf32>
    %1107 = vector.extract_strided_slice %1064 {offsets = [4, 0], sizes = [12, 64], strides = [1, 1]} : vector<16x64xf32> to vector<12x64xf32>
    %1108 = vector.extract_strided_slice %1064 {offsets = [0, 0], sizes = [4, 64], strides = [1, 1]} : vector<16x64xf32> to vector<4x64xf32>
    %1109 = tpu.concatenate %1107, %1108 in 0 : vector<12x64xf32>, vector<4x64xf32> -> vector<16x64xf32>
    %1110 = vector.extract_strided_slice %0 {offsets = [7, 0, 0], sizes = [1, 16, 1], strides = [1, 1, 1]} : vector<9x16x1xf32> to vector<1x16x1xf32>
    %1111 = vector.shape_cast %1110 : vector<1x16x1xf32> to vector<16x1xf32>
    %1112 = vector.broadcast %1111 : vector<16x1xf32> to vector<16x64xf32>
    %1113 = arith.mulf %1109, %1112 : vector<16x64xf32>
    %1114 = vector.extract_strided_slice %1064 {offsets = [5, 0], sizes = [11, 64], strides = [1, 1]} : vector<16x64xf32> to vector<11x64xf32>
    %1115 = vector.extract_strided_slice %1064 {offsets = [0, 0], sizes = [5, 64], strides = [1, 1]} : vector<16x64xf32> to vector<5x64xf32>
    %1116 = tpu.concatenate %1114, %1115 in 0 : vector<11x64xf32>, vector<5x64xf32> -> vector<16x64xf32>
    %1117 = vector.extract_strided_slice %0 {offsets = [8, 0, 0], sizes = [1, 16, 1], strides = [1, 1, 1]} : vector<9x16x1xf32> to vector<1x16x1xf32>
    %1118 = vector.shape_cast %1117 : vector<1x16x1xf32> to vector<16x1xf32>
    %1119 = vector.broadcast %1118 : vector<16x1xf32> to vector<16x64xf32>
    %1120 = arith.mulf %1116, %1119 : vector<16x64xf32>
    %1121 = tpu.concatenate %1071, %1078, %1085, %1092, %1064, %1099, %1106, %1113, %1120 in 1 : vector<16x64xf32>, vector<16x64xf32>, vector<16x64xf32>, vector<16x64xf32>, vector<16x64xf32>, vector<16x64xf32>, vector<16x64xf32>, vector<16x64xf32>, vector<16x64xf32> -> vector<16x576xf32>
    %c0_176 = arith.constant 0 : index
    %c0_177 = arith.constant 0 : index
    %1122 = vector.load %arg19[%c0_176, %c0_177] : memref<576x128xbf16, #tpu.memory_space<vmem>>, vector<576x128xbf16>
    %1123 = arith.truncf %1121 : vector<16x576xf32> to vector<16x576xbf16>
    %cst_178 = arith.constant dense<0.000000e+00> : vector<16x128xf32>
    %1124 = tpu.matmul %1123, %1122, %cst_178 {dimension_numbers = #tpu.dot_dimension_numbers<[1], [0], [0], [1], [0, 0, 1, 1], [], []>} : vector<16x576xbf16>, vector<576x128xbf16>, vector<16x128xf32> -> vector<16x128xf32>
    %c0_179 = arith.constant 0 : index
    %c0_180 = arith.constant 0 : index
    %1125 = vector.load %arg20[%c0_179, %c0_180] : memref<1x128xf32, #tpu.memory_space<vmem>>, vector<1x128xf32>
    %1126 = vector.broadcast %1125 : vector<1x128xf32> to vector<16x128xf32>
    %1127 = arith.addf %1124, %1126 : vector<16x128xf32>
    %cst_181 = arith.constant 0.000000e+00 : f32
    %1128 = vector.broadcast %cst_181 : f32 to vector<16x128xf32>
    %1129 = arith.cmpf ogt, %1127, %1128 : vector<16x128xf32>
    %cst_182 = arith.constant 0.00999999977 : f32
    %1130 = vector.broadcast %cst_182 : f32 to vector<16x128xf32>
    %1131 = arith.mulf %1130, %1127 : vector<16x128xf32>
    %1132 = arith.select %1129, %1127, %1131 : vector<16x128xi1>, vector<16x128xf32>
    %c0_183 = arith.constant 0 : index
    %c0_184 = arith.constant 0 : index
    %c0_185 = arith.constant 0 : index
    %1133 = vector.load %arg21[%c0_183, %c0_184, %c0_185] : memref<4x64x16xbf16, #tpu.memory_space<vmem>>, vector<1x64x16xbf16>
    %1134 = vector.shape_cast %1133 : vector<1x64x16xbf16> to vector<64x16xbf16>
    %1135 = vector.extract_strided_slice %1132 {offsets = [0, 0], sizes = [16, 32], strides = [1, 1]} : vector<16x128xf32> to vector<16x32xf32>
    %1136 = arith.truncf %1135 : vector<16x32xf32> to vector<16x32xbf16>
    %cst_186 = arith.constant dense<0.000000e+00> : vector<64x32xf32>
    %1137 = tpu.matmul %1134, %1136, %cst_186 {dimension_numbers = #tpu.dot_dimension_numbers<[1], [0], [0], [1], [0, 0, 1, 1], [], []>} : vector<64x16xbf16>, vector<16x32xbf16>, vector<64x32xf32> -> vector<64x32xf32>
    %c1_187 = arith.constant 1 : index
    %c0_188 = arith.constant 0 : index
    %c0_189 = arith.constant 0 : index
    %1138 = vector.load %arg21[%c1_187, %c0_188, %c0_189] : memref<4x64x16xbf16, #tpu.memory_space<vmem>>, vector<1x64x16xbf16>
    %1139 = vector.shape_cast %1138 : vector<1x64x16xbf16> to vector<64x16xbf16>
    %1140 = vector.extract_strided_slice %1132 {offsets = [0, 32], sizes = [16, 32], strides = [1, 1]} : vector<16x128xf32> to vector<16x32xf32>
    %1141 = arith.truncf %1140 : vector<16x32xf32> to vector<16x32xbf16>
    %cst_190 = arith.constant dense<0.000000e+00> : vector<64x32xf32>
    %1142 = tpu.matmul %1139, %1141, %cst_190 {dimension_numbers = #tpu.dot_dimension_numbers<[1], [0], [0], [1], [0, 0, 1, 1], [], []>} : vector<64x16xbf16>, vector<16x32xbf16>, vector<64x32xf32> -> vector<64x32xf32>
    %1143 = arith.addf %1137, %1142 : vector<64x32xf32>
    %c2_191 = arith.constant 2 : index
    %c0_192 = arith.constant 0 : index
    %c0_193 = arith.constant 0 : index
    %1144 = vector.load %arg21[%c2_191, %c0_192, %c0_193] : memref<4x64x16xbf16, #tpu.memory_space<vmem>>, vector<1x64x16xbf16>
    %1145 = vector.shape_cast %1144 : vector<1x64x16xbf16> to vector<64x16xbf16>
    %1146 = vector.extract_strided_slice %1132 {offsets = [0, 64], sizes = [16, 32], strides = [1, 1]} : vector<16x128xf32> to vector<16x32xf32>
    %1147 = arith.truncf %1146 : vector<16x32xf32> to vector<16x32xbf16>
    %cst_194 = arith.constant dense<0.000000e+00> : vector<64x32xf32>
    %1148 = tpu.matmul %1145, %1147, %cst_194 {dimension_numbers = #tpu.dot_dimension_numbers<[1], [0], [0], [1], [0, 0, 1, 1], [], []>} : vector<64x16xbf16>, vector<16x32xbf16>, vector<64x32xf32> -> vector<64x32xf32>
    %1149 = arith.addf %1143, %1148 : vector<64x32xf32>
    %c3_195 = arith.constant 3 : index
    %c0_196 = arith.constant 0 : index
    %c0_197 = arith.constant 0 : index
    %1150 = vector.load %arg21[%c3_195, %c0_196, %c0_197] : memref<4x64x16xbf16, #tpu.memory_space<vmem>>, vector<1x64x16xbf16>
    %1151 = vector.shape_cast %1150 : vector<1x64x16xbf16> to vector<64x16xbf16>
    %1152 = vector.extract_strided_slice %1132 {offsets = [0, 96], sizes = [16, 32], strides = [1, 1]} : vector<16x128xf32> to vector<16x32xf32>
    %1153 = arith.truncf %1152 : vector<16x32xf32> to vector<16x32xbf16>
    %cst_198 = arith.constant dense<0.000000e+00> : vector<64x32xf32>
    %1154 = tpu.matmul %1151, %1153, %cst_198 {dimension_numbers = #tpu.dot_dimension_numbers<[1], [0], [0], [1], [0, 0, 1, 1], [], []>} : vector<64x16xbf16>, vector<16x32xbf16>, vector<64x32xf32> -> vector<64x32xf32>
    %1155 = arith.addf %1149, %1154 : vector<64x32xf32>
    %1156 = vector.extract_strided_slice %1155 {offsets = [55, 0], sizes = [9, 32], strides = [1, 1]} : vector<64x32xf32> to vector<9x32xf32>
    %1157 = vector.extract_strided_slice %1155 {offsets = [0, 0], sizes = [55, 32], strides = [1, 1]} : vector<64x32xf32> to vector<55x32xf32>
    %1158 = tpu.concatenate %1156, %1157 in 0 : vector<9x32xf32>, vector<55x32xf32> -> vector<64x32xf32>
    %1159 = vector.extract_strided_slice %1 {offsets = [0, 0, 0], sizes = [1, 64, 1], strides = [1, 1, 1]} : vector<9x64x1xf32> to vector<1x64x1xf32>
    %1160 = vector.shape_cast %1159 : vector<1x64x1xf32> to vector<64x1xf32>
    %1161 = vector.broadcast %1160 : vector<64x1xf32> to vector<64x32xf32>
    %1162 = arith.mulf %1158, %1161 : vector<64x32xf32>
    %1163 = vector.extract_strided_slice %1155 {offsets = [56, 0], sizes = [8, 32], strides = [1, 1]} : vector<64x32xf32> to vector<8x32xf32>
    %1164 = vector.extract_strided_slice %1155 {offsets = [0, 0], sizes = [56, 32], strides = [1, 1]} : vector<64x32xf32> to vector<56x32xf32>
    %1165 = tpu.concatenate %1163, %1164 in 0 : vector<8x32xf32>, vector<56x32xf32> -> vector<64x32xf32>
    %1166 = vector.extract_strided_slice %1 {offsets = [1, 0, 0], sizes = [1, 64, 1], strides = [1, 1, 1]} : vector<9x64x1xf32> to vector<1x64x1xf32>
    %1167 = vector.shape_cast %1166 : vector<1x64x1xf32> to vector<64x1xf32>
    %1168 = vector.broadcast %1167 : vector<64x1xf32> to vector<64x32xf32>
    %1169 = arith.mulf %1165, %1168 : vector<64x32xf32>
    %1170 = vector.extract_strided_slice %1155 {offsets = [57, 0], sizes = [7, 32], strides = [1, 1]} : vector<64x32xf32> to vector<7x32xf32>
    %1171 = vector.extract_strided_slice %1155 {offsets = [0, 0], sizes = [57, 32], strides = [1, 1]} : vector<64x32xf32> to vector<57x32xf32>
    %1172 = tpu.concatenate %1170, %1171 in 0 : vector<7x32xf32>, vector<57x32xf32> -> vector<64x32xf32>
    %1173 = vector.extract_strided_slice %1 {offsets = [2, 0, 0], sizes = [1, 64, 1], strides = [1, 1, 1]} : vector<9x64x1xf32> to vector<1x64x1xf32>
    %1174 = vector.shape_cast %1173 : vector<1x64x1xf32> to vector<64x1xf32>
    %1175 = vector.broadcast %1174 : vector<64x1xf32> to vector<64x32xf32>
    %1176 = arith.mulf %1172, %1175 : vector<64x32xf32>
    %1177 = vector.extract_strided_slice %1155 {offsets = [63, 0], sizes = [1, 32], strides = [1, 1]} : vector<64x32xf32> to vector<1x32xf32>
    %1178 = vector.extract_strided_slice %1155 {offsets = [0, 0], sizes = [63, 32], strides = [1, 1]} : vector<64x32xf32> to vector<63x32xf32>
    %1179 = tpu.concatenate %1177, %1178 in 0 : vector<1x32xf32>, vector<63x32xf32> -> vector<64x32xf32>
    %1180 = vector.extract_strided_slice %1 {offsets = [3, 0, 0], sizes = [1, 64, 1], strides = [1, 1, 1]} : vector<9x64x1xf32> to vector<1x64x1xf32>
    %1181 = vector.shape_cast %1180 : vector<1x64x1xf32> to vector<64x1xf32>
    %1182 = vector.broadcast %1181 : vector<64x1xf32> to vector<64x32xf32>
    %1183 = arith.mulf %1179, %1182 : vector<64x32xf32>
    %1184 = vector.extract_strided_slice %1155 {offsets = [1, 0], sizes = [63, 32], strides = [1, 1]} : vector<64x32xf32> to vector<63x32xf32>
    %1185 = vector.extract_strided_slice %1155 {offsets = [0, 0], sizes = [1, 32], strides = [1, 1]} : vector<64x32xf32> to vector<1x32xf32>
    %1186 = tpu.concatenate %1184, %1185 in 0 : vector<63x32xf32>, vector<1x32xf32> -> vector<64x32xf32>
    %1187 = vector.extract_strided_slice %1 {offsets = [5, 0, 0], sizes = [1, 64, 1], strides = [1, 1, 1]} : vector<9x64x1xf32> to vector<1x64x1xf32>
    %1188 = vector.shape_cast %1187 : vector<1x64x1xf32> to vector<64x1xf32>
    %1189 = vector.broadcast %1188 : vector<64x1xf32> to vector<64x32xf32>
    %1190 = arith.mulf %1186, %1189 : vector<64x32xf32>
    %1191 = vector.extract_strided_slice %1155 {offsets = [7, 0], sizes = [57, 32], strides = [1, 1]} : vector<64x32xf32> to vector<57x32xf32>
    %1192 = vector.extract_strided_slice %1155 {offsets = [0, 0], sizes = [7, 32], strides = [1, 1]} : vector<64x32xf32> to vector<7x32xf32>
    %1193 = tpu.concatenate %1191, %1192 in 0 : vector<57x32xf32>, vector<7x32xf32> -> vector<64x32xf32>
    %1194 = vector.extract_strided_slice %1 {offsets = [6, 0, 0], sizes = [1, 64, 1], strides = [1, 1, 1]} : vector<9x64x1xf32> to vector<1x64x1xf32>
    %1195 = vector.shape_cast %1194 : vector<1x64x1xf32> to vector<64x1xf32>
    %1196 = vector.broadcast %1195 : vector<64x1xf32> to vector<64x32xf32>
    %1197 = arith.mulf %1193, %1196 : vector<64x32xf32>
    %1198 = vector.extract_strided_slice %1155 {offsets = [8, 0], sizes = [56, 32], strides = [1, 1]} : vector<64x32xf32> to vector<56x32xf32>
    %1199 = vector.extract_strided_slice %1155 {offsets = [0, 0], sizes = [8, 32], strides = [1, 1]} : vector<64x32xf32> to vector<8x32xf32>
    %1200 = tpu.concatenate %1198, %1199 in 0 : vector<56x32xf32>, vector<8x32xf32> -> vector<64x32xf32>
    %1201 = vector.extract_strided_slice %1 {offsets = [7, 0, 0], sizes = [1, 64, 1], strides = [1, 1, 1]} : vector<9x64x1xf32> to vector<1x64x1xf32>
    %1202 = vector.shape_cast %1201 : vector<1x64x1xf32> to vector<64x1xf32>
    %1203 = vector.broadcast %1202 : vector<64x1xf32> to vector<64x32xf32>
    %1204 = arith.mulf %1200, %1203 : vector<64x32xf32>
    %1205 = vector.extract_strided_slice %1155 {offsets = [9, 0], sizes = [55, 32], strides = [1, 1]} : vector<64x32xf32> to vector<55x32xf32>
    %1206 = vector.extract_strided_slice %1155 {offsets = [0, 0], sizes = [9, 32], strides = [1, 1]} : vector<64x32xf32> to vector<9x32xf32>
    %1207 = tpu.concatenate %1205, %1206 in 0 : vector<55x32xf32>, vector<9x32xf32> -> vector<64x32xf32>
    %1208 = vector.extract_strided_slice %1 {offsets = [8, 0, 0], sizes = [1, 64, 1], strides = [1, 1, 1]} : vector<9x64x1xf32> to vector<1x64x1xf32>
    %1209 = vector.shape_cast %1208 : vector<1x64x1xf32> to vector<64x1xf32>
    %1210 = vector.broadcast %1209 : vector<64x1xf32> to vector<64x32xf32>
    %1211 = arith.mulf %1207, %1210 : vector<64x32xf32>
    %1212 = tpu.concatenate %1162, %1169, %1176, %1183, %1155, %1190, %1197, %1204, %1211 in 1 : vector<64x32xf32>, vector<64x32xf32>, vector<64x32xf32>, vector<64x32xf32>, vector<64x32xf32>, vector<64x32xf32>, vector<64x32xf32>, vector<64x32xf32>, vector<64x32xf32> -> vector<64x288xf32>
    %c0_199 = arith.constant 0 : index
    %c0_200 = arith.constant 0 : index
    %1213 = vector.load %arg23[%c0_199, %c0_200] : memref<288x16xbf16, #tpu.memory_space<vmem>>, vector<288x16xbf16>
    %1214 = arith.truncf %1212 : vector<64x288xf32> to vector<64x288xbf16>
    %cst_201 = arith.constant dense<0.000000e+00> : vector<64x16xf32>
    %1215 = tpu.matmul %1214, %1213, %cst_201 {dimension_numbers = #tpu.dot_dimension_numbers<[1], [0], [0], [1], [0, 0, 1, 1], [], []>} : vector<64x288xbf16>, vector<288x16xbf16>, vector<64x16xf32> -> vector<64x16xf32>
    %c0_202 = arith.constant 0 : index
    %c0_203 = arith.constant 0 : index
    %1216 = vector.load %arg24[%c0_202, %c0_203] : memref<1x16xf32, #tpu.memory_space<vmem>>, vector<1x16xf32>
    %1217 = vector.broadcast %1216 : vector<1x16xf32> to vector<64x16xf32>
    %1218 = arith.addf %1215, %1217 : vector<64x16xf32>
    %cst_204 = arith.constant 0.000000e+00 : f32
    %1219 = vector.broadcast %cst_204 : f32 to vector<64x16xf32>
    %1220 = arith.subf %1219, %1218 : vector<64x16xf32>
    %1221 = math.exp %1220 : vector<64x16xf32>
    %cst_205 = arith.constant 1.000000e+00 : f32
    %1222 = vector.broadcast %cst_205 : f32 to vector<64x16xf32>
    %1223 = arith.addf %1222, %1221 : vector<64x16xf32>
    %cst_206 = arith.constant 1.000000e+00 : f32
    %1224 = vector.broadcast %cst_206 : f32 to vector<64x16xf32>
    %1225 = arith.divf %1224, %1223 : vector<64x16xf32>
    %c0_207 = arith.constant 0 : index
    %c0_208 = arith.constant 0 : index
    %c0_209 = arith.constant 0 : index
    %1226 = vector.load %arg25[%c0_207, %c0_208, %c0_209] : memref<1x64x16xf32, #tpu.memory_space<vmem>>, vector<1x64x16xf32>
    %1227 = vector.shape_cast %1226 : vector<1x64x16xf32> to vector<64x16xf32>
    %1228 = vector.shape_cast %1225 : vector<64x16xf32> to vector<1x64x16xf32>
    tpu.vector_store %arg25[%c0_207, %c0_208, %c0_209], %1228 {strides = array<i32>} : memref<1x64x16xf32, #tpu.memory_space<vmem>>, vector<1x64x16xf32>,
    return
  }
  func.func @transform_0(%arg0: i32) -> (i32, i32, i32) {
    %c0_i32 = arith.constant 0 : i32
    %c0_i32_0 = arith.constant 0 : i32
    %c0_i32_1 = arith.constant 0 : i32
    return %arg0, %c0_i32, %c0_i32_0 : i32, i32, i32
  }
  func.func @transform_1(%arg0: i32) -> (i32, i32) {
    %c0_i32 = arith.constant 0 : i32
    %c0_i32_0 = arith.constant 0 : i32
    %c0_i32_1 = arith.constant 0 : i32
    return %c0_i32, %c0_i32_0 : i32, i32
  }
  func.func @transform_2(%arg0: i32) -> (i32, i32) {
    %c0_i32 = arith.constant 0 : i32
    %c0_i32_0 = arith.constant 0 : i32
    %c0_i32_1 = arith.constant 0 : i32
    return %c0_i32, %c0_i32_0 : i32, i32
  }
  func.func @transform_3(%arg0: i32) -> (i32, i32, i32) {
    %c0_i32 = arith.constant 0 : i32
    %c0_i32_0 = arith.constant 0 : i32
    %c0_i32_1 = arith.constant 0 : i32
    %c0_i32_2 = arith.constant 0 : i32
    return %c0_i32, %c0_i32_0, %c0_i32_1 : i32, i32, i32
  }
  func.func @transform_4(%arg0: i32) -> (i32, i32) {
    %c0_i32 = arith.constant 0 : i32
    %c0_i32_0 = arith.constant 0 : i32
    %c0_i32_1 = arith.constant 0 : i32
    return %c0_i32, %c0_i32_0 : i32, i32
  }
  func.func @transform_5(%arg0: i32) -> (i32, i32) {
    %c0_i32 = arith.constant 0 : i32
    %c0_i32_0 = arith.constant 0 : i32
    %c0_i32_1 = arith.constant 0 : i32
    return %c0_i32, %c0_i32_0 : i32, i32
  }
  func.func @transform_6(%arg0: i32) -> (i32, i32) {
    %c0_i32 = arith.constant 0 : i32
    %c0_i32_0 = arith.constant 0 : i32
    %c0_i32_1 = arith.constant 0 : i32
    return %c0_i32, %c0_i32_0 : i32, i32
  }
  func.func @transform_7(%arg0: i32) -> (i32, i32, i32) {
    %c0_i32 = arith.constant 0 : i32
    %c0_i32_0 = arith.constant 0 : i32
    %c0_i32_1 = arith.constant 0 : i32
    %c0_i32_2 = arith.constant 0 : i32
    return %c0_i32, %c0_i32_0, %c0_i32_1 : i32, i32, i32
  }
  func.func @transform_8(%arg0: i32) -> (i32, i32) {
    %c0_i32 = arith.constant 0 : i32
    %c0_i32_0 = arith.constant 0 : i32
    %c0_i32_1 = arith.constant 0 : i32
    return %c0_i32, %c0_i32_0 : i32, i32
  }
  func.func @transform_9(%arg0: i32) -> (i32, i32) {
    %c0_i32 = arith.constant 0 : i32
    %c0_i32_0 = arith.constant 0 : i32
    %c0_i32_1 = arith.constant 0 : i32
    return %c0_i32, %c0_i32_0 : i32, i32
  }
  func.func @transform_10(%arg0: i32) -> (i32, i32, i32) {
    %c0_i32 = arith.constant 0 : i32
    %c0_i32_0 = arith.constant 0 : i32
    %c0_i32_1 = arith.constant 0 : i32
    %c0_i32_2 = arith.constant 0 : i32
    return %c0_i32, %c0_i32_0, %c0_i32_1 : i32, i32, i32
  }
  func.func @transform_11(%arg0: i32) -> (i32, i32, i32) {
    %c0_i32 = arith.constant 0 : i32
    %c0_i32_0 = arith.constant 0 : i32
    %c0_i32_1 = arith.constant 0 : i32
    %c0_i32_2 = arith.constant 0 : i32
    return %c0_i32, %c0_i32_0, %c0_i32_1 : i32, i32, i32
  }
  func.func @transform_12(%arg0: i32) -> (i32, i32) {
    %c0_i32 = arith.constant 0 : i32
    %c0_i32_0 = arith.constant 0 : i32
    %c0_i32_1 = arith.constant 0 : i32
    return %c0_i32, %c0_i32_0 : i32, i32
  }
  func.func @transform_13(%arg0: i32) -> (i32, i32) {
    %c0_i32 = arith.constant 0 : i32
    %c0_i32_0 = arith.constant 0 : i32
    %c0_i32_1 = arith.constant 0 : i32
    return %c0_i32, %c0_i32_0 : i32, i32
  }
  func.func @transform_14(%arg0: i32) -> (i32, i32) {
    %c0_i32 = arith.constant 0 : i32
    %c0_i32_0 = arith.constant 0 : i32
    %c0_i32_1 = arith.constant 0 : i32
    return %c0_i32, %c0_i32_0 : i32, i32
  }
  func.func @transform_15(%arg0: i32) -> (i32, i32) {
    %c0_i32 = arith.constant 0 : i32
    %c0_i32_0 = arith.constant 0 : i32
    %c0_i32_1 = arith.constant 0 : i32
    return %c0_i32, %c0_i32_0 : i32, i32
  }
  func.func @transform_16(%arg0: i32) -> (i32, i32) {
    %c0_i32 = arith.constant 0 : i32
    %c0_i32_0 = arith.constant 0 : i32
    %c0_i32_1 = arith.constant 0 : i32
    return %c0_i32, %c0_i32_0 : i32, i32
  }
  func.func @transform_17(%arg0: i32) -> (i32, i32) {
    %c0_i32 = arith.constant 0 : i32
    %c0_i32_0 = arith.constant 0 : i32
    %c0_i32_1 = arith.constant 0 : i32
    return %c0_i32, %c0_i32_0 : i32, i32
  }
  func.func @transform_18(%arg0: i32) -> (i32, i32) {
    %c0_i32 = arith.constant 0 : i32
    %c0_i32_0 = arith.constant 0 : i32
    %c0_i32_1 = arith.constant 0 : i32
    return %c0_i32, %c0_i32_0 : i32, i32
  }
  func.func @transform_19(%arg0: i32) -> (i32, i32) {
    %c0_i32 = arith.constant 0 : i32
    %c0_i32_0 = arith.constant 0 : i32
    %c0_i32_1 = arith.constant 0 : i32
    return %c0_i32, %c0_i32_0 : i32, i32
  }
  func.func @transform_20(%arg0: i32) -> (i32, i32, i32) {
    %c0_i32 = arith.constant 0 : i32
    %c0_i32_0 = arith.constant 0 : i32
    %c0_i32_1 = arith.constant 0 : i32
    %c0_i32_2 = arith.constant 0 : i32
    return %c0_i32, %c0_i32_0, %c0_i32_1 : i32, i32, i32
  }
  func.func @transform_21(%arg0: i32) -> (i32, i32, i32) {
    %c0_i32 = arith.constant 0 : i32
    %c0_i32_0 = arith.constant 0 : i32
    %c0_i32_1 = arith.constant 0 : i32
    %c0_i32_2 = arith.constant 0 : i32
    return %c0_i32, %c0_i32_0, %c0_i32_1 : i32, i32, i32
  }
  func.func @transform_22(%arg0: i32) -> (i32, i32) {
    %c0_i32 = arith.constant 0 : i32
    %c0_i32_0 = arith.constant 0 : i32
    %c0_i32_1 = arith.constant 0 : i32
    return %c0_i32, %c0_i32_0 : i32, i32
  }
  func.func @transform_23(%arg0: i32) -> (i32, i32) {
    %c0_i32 = arith.constant 0 : i32
    %c0_i32_0 = arith.constant 0 : i32
    %c0_i32_1 = arith.constant 0 : i32
    return %c0_i32, %c0_i32_0 : i32, i32
  }
  func.func @transform_24(%arg0: i32) -> (i32, i32, i32) {
    %c0_i32 = arith.constant 0 : i32
    %c0_i32_0 = arith.constant 0 : i32
    %c0_i32_1 = arith.constant 0 : i32
    return %arg0, %c0_i32, %c0_i32_0 : i32, i32, i32
  }
  func.func @transform_25(%arg0: i32) -> (i32, i32, i32) {
    %c0_i32 = arith.constant 0 : i32
    %c0_i32_0 = arith.constant 0 : i32
    %c0_i32_1 = arith.constant 0 : i32
    return %arg0, %c0_i32, %c0_i32_0 : i32, i32, i32
  }
}

</mosaic_0001>

<bundles_post_ra>
// kernel: tpu_custom_call.1
= control target key start
LH: loop header
LB: loop body
LE: loop exit
PB: predicated region body
PF: predicated region fallthrough
CT: control target
= control target key end

     0   :  { %6 = vsyncpa [#allocation3], 0  ;;  %s148_s0 = inlined_call_operand.hbm [shape: f32[16,64], index: 0, kind: input, shape index: {}]   ;;  %s149_s1 = inlined_call_operand.hbm [shape: f32[16,64], index: 1, kind: output, shape index: {}]  }
   0x1   :  { %7 = vsyncpa [#allocation4], 0  ;;  %s104_s6 = smov [#allocation2]   ;;  %s56_s10 = scalar_lea.hbm %s148_s0, 256 }
   0x2   :  { %s13_s7 = sshll.u32 %s104_s6, 4  ;;  %p57_p0 = scmp.ne.s32.totalorder %s148_s0, %s56_s10  ;;  %s14_s7 = int_to_ptr.vmem [resolvable:$true] %s13_s7 }
   0x3   :  { %p60_p1 = scmp.lt.u32.totalorder %s56_s10, %s148_s0 }
   0x5   :  { %p62_p2 = pnand %p60_p1, %p57_p0 }
   0x7   :  { %65 = shalt.err (!%p62_p2)
}
   0x8   :  { %s66_s15 = scalar_lea.vmem %s14_s7, 256  ;;  %p71_p4 = scmp.lt.s32.totalorder %s14_s7, %s14_s7 }
   0x9   :  { %p67_p3 = scmp.ne.s32.totalorder %s14_s7, %s66_s15  ;;  %p72_p5 = scmp.lt.s32.totalorder %s66_s15, %s66_s15 }
   0xb   :  { %p73_p6 = por %p72_p5, %p71_p4 }
   0xd   :  { %p74_p7 = pnand %p73_p6, %p67_p3 }
   0xf   :  { %77 = shalt.err (!%p74_p7)
}
  0x10   :  { %s105_s16 = smov 128   ;;  %s106_s17 = smov 8  }
  0x11   :  { %19 = dma.hbm_to_vmem [thread:$0]  %s148_s0, 256, %s14_s7, [#allocation3], %s105_s16, %s105_s16, %s106_s17  }
  0x12   :  { %100 = dma.done.wait [#allocation3], 256  }
  0x13   :  { %101 = vsyncadd [#allocation3], 4294967040  ;;  %v27_v0 = vlaneseq  ;;  %s107_s20 = smov [#allocation5]   ;;  %v23_v2 = vld [vmem:[#allocation2] sm:$0xff]  ;;  %v24_v3 = vld [vmem:[#allocation2 + $0x8] sm:$0xff]  ;;  %vm32_vm1 = vcmask 523264  }
  0x14   :  { %s40_s21 = sshll.u32 %s107_s20, 4  ;;  %v25_v4 = vrot.slane %v23_v2, 3  ;;  %v26_v5 = vrot.slane %v24_v3, 3  ;;  %s41_s21 = int_to_ptr.vmem [resolvable:$true] %s40_s21 }
  0x15   :  { %v28_v1 = vshrl.u32 %v27_v0, 7  ;;  %s78_s22 = scalar_lea.vmem %s41_s21, 256  ;;  %p83_p9 = scmp.lt.s32.totalorder %s41_s21, %s41_s21 }
  0x16   :  { %p79_p8 = scmp.ne.s32.totalorder %s41_s21, %s78_s22  ;;  %p84_p10 = scmp.lt.s32.totalorder %s78_s22, %s78_s22 }
  0x17   :  { %vm29_vm0 = vcmp.lt.s32.totalorder %v28_v1, 5 }
  0x18   :  { %v31_v6 = vsel %vm29_vm0, %v26_v5, %v25_v4  ;;  %v30_v7 = vsel %vm29_vm0, %v25_v4, %v26_v5  ;;  %p85_p11 = por %p84_p10, %p83_p9 }
  0x19   :  { %33 = vst.msk [vmem:[#allocation5] sm:$0xff] %vm32_vm1, %v31_v6  ;;  %34 = vst.msk [vmem:[#allocation5 + $0x8] sm:$0xff] %vm32_vm1, %v30_v7 }
  0x1a   :  { %p86_p12 = pnand %p85_p11, %p79_p8 }
  0x1c   :  { %89 = shalt.err (!%p86_p12)
}
  0x1d   :  { %s90_s24 = scalar_lea.hbm %s149_s1, 256 }
  0x1e   :  { %p91_p13 = scmp.ne.s32.totalorder %s149_s1, %s90_s24  ;;  %p94_p0 = scmp.lt.u32.totalorder %s90_s24, %s149_s1 }
  0x20   :  { %p96_p1 = pnand %p94_p0, %p91_p13 }
  0x22   :  { %99 = shalt.err (!%p96_p1)
}
  0x23   :  { %46 = dma.vmem_to_hbm [thread:$0]  %s41_s21, 256, %s149_s1, [#allocation4], %s105_s16, %s105_s16, %s106_s17  }
  0x24   :  { %102 = dma.done.wait [#allocation4], 256  }
  0x25   :  { %103 = vsyncadd [#allocation4], 4294967040 }
  0x26   :  { %50 = vsyncpa [#allocation3], 1 }
  0x27   :  { %51 = vsyncpa [#allocation4], 1 }

// kernel: vqvae_forward.1
= control target key start
LH: loop header
LB: loop body
LE: loop exit
PB: predicated region body
PF: predicated region fallthrough
CT: control target
= control target key end

     0   :  { %s17273_s29 = smov 0   ;;  %s21410_s0 = inlined_call_operand.vmem [shape: f32[2,81,16], index: 0, kind: input, shape index: {}]   ;;  %s21411_s1 = inlined_call_operand.vmem [shape: bf16[64,32], index: 1, kind: input, shape index: {}]   ;;  %s21412_s2 = inlined_call_operand.vmem [shape: f32[1,32], index: 2, kind: input, shape index: {}]   ;;  %s21413_s3 = inlined_call_operand.vmem [shape: bf16[4,25,71], index: 3, kind: input, shape index: {}]   ;;  %s21414_s4 = inlined_call_operand.vmem [shape: bf16[512,64], index: 4, kind: input, shape index: {}]   ;;  %s21415_s5 = inlined_call_operand.vmem [shape: f32[1,64], index: 5, kind: input, shape index: {}]   ;;  %s21416_s6 = inlined_call_operand.vmem [shape: bf16[16,19], index: 6, kind: input, shape index: {}]   ;;  %s21417_s7 = inlined_call_operand.vmem [shape: f32[9,16,1], index: 7, kind: input, shape index: {}]   ;;  %s21418_s8 = inlined_call_operand.vmem [shape: bf16[576,64], index: 8, kind: input, shape index: {}]   ;;  %s21419_s9 = inlined_call_operand.vmem [shape: f32[1,64], index: 9, kind: input, shape index: {}]   ;;  %s21420_s10 = inlined_call_operand.vmem [shape: bf16[12,576,64], index: 10, kind: input, shape index: {}]   ;;  %s21421_s11 = inlined_call_operand.vmem [shape: bf16[12,64,64], index: 11, kind: input, shape index: {}]   ;;  %s21422_s12 = inlined_call_operand.vmem [shape: bf16[64,32], index: 12, kind: input, shape index: {}]   ;;  %s21423_s13 = inlined_call_operand.vmem [shape: f32[1,32], index: 13, kind: input, shape index: {}]   ;;  %s21424_s14 = inlined_call_operand.vmem [shape: f32[128,32], index: 14, kind: input, shape index: {}]   ;;  %s21425_s15 = inlined_call_operand.vmem [shape: f32[1,128], index: 15, kind: input, shape index: {}]   ;;  %s21426_s16 = inlined_call_operand.vmem [shape: bf16[288,64], index: 16, kind: input, shape index: {}]   ;;  %s21427_s17 = inlined_call_operand.vmem [shape: f32[1,64], index: 17, kind: input, shape index: {}]   ;;  %s21428_s18 = inlined_call_operand.vmem [shape: bf16[576,128], index: 18, kind: input, shape index: {}]   ;;  %s21429_s19 = inlined_call_operand.vmem [shape: f32[1,128], index: 19, kind: input, shape index: {}]   ;;  %s21430_s20 = inlined_call_operand.vmem [shape: bf16[4,64,16], index: 20, kind: input, shape index: {}]   ;;  %s21431_s21 = inlined_call_operand.vmem [shape: f32[9,64,1], index: 21, kind: input, shape index: {}]   ;;  %s21432_s22 = inlined_call_operand.vmem [shape: bf16[288,16], index: 22, kind: input, shape index: {}]   ;;  %s21433_s23 = inlined_call_operand.vmem [shape: f32[1,16], index: 23, kind: input, shape index: {}]   ;;  %s21434_s24 = inlined_call_operand.vmem [shape: f32[2,64,16], index: 24, kind: output, shape index: {0}]   ;;  %s21435_s25 = inlined_call_operand.vmem [shape: f32[2,1,1], index: 25, kind: output, shape index: {1}]  }
   0x1   :  { %21453 = sst [smem:[#allocation24_spill]] %s21410_s0 }
   0x2   :  { %21454 = sst [smem:[#allocation25_spill]] %s21411_s1 }
   0x3   :  { %21455 = sst [smem:[#allocation26_spill]] %s21412_s2 }
   0x4   :  { %21456 = sst [smem:[#allocation27_spill]] %s21413_s3 }
   0x5   :  { %21457 = sst [smem:[#allocation28_spill]] %s21414_s4 }
   0x6   :  { %21458 = sst [smem:[#allocation29_spill]] %s21415_s5 }
   0x7   :  { %21459 = sst [smem:[#allocation30_spill]] %s21416_s6 }
   0x8   :  { %21460 = sst [smem:[#allocation31_spill]] %s21417_s7 }
   0x9   :  { %21461 = sst [smem:[#allocation32_spill]] %s21418_s8 }
   0xa   :  { %21462 = sst [smem:[#allocation33_spill]] %s21419_s9 }
   0xb   :  { %21463 = sst [smem:[#allocation34_spill]] %s21422_s12 }
   0xc LB: > { %21464 = sst [smem:[#allocation2_spill]] %s17131_s29  ;;  %s12613_s2 = sadd.s32 4294967295, %s17131_s29   ;;  %s17131_s29 = sphi %s17273_s29, %s36_s29  }
   0xd   : > { %p12617_p0 = scmp.ge.s32.totalorder %s17131_s29, 1  ;;  %p690_p1 = scmp.lt.s32.totalorder %s17131_s29, 3 }
   0xf   : > { %p691_p2 = pnand %p12617_p0, %p690_p1 }
  0x11   : > { %694 = sbr.rel (%p691_p2) target bundleno = 11206 (0x2bc6), region = 116 }
  0x18   : > { %p761_p3 = scmp.lt.s32.totalorder %s12613_s2, 1  ;;  %s21465_s7 = sld [smem:[#allocation25_spill]]  ;;  %v17133_v1 = vmov 0.0   ;;  %vm875_vm0 = vcmask 1046528   ;;  %vm951_vm1 = vcmask 1045504   ;;  %vm17134_vm2 = vmmov 0  }
  0x19   : > { %15259 = vmatprep.subr.bf16.mxu0 %v17133_v1  ;;  %s21466_s4 = sld [smem:[#allocation24_spill]]  ;;  %15267 = vmatprep.mubr.msk.bf16.mxu0 %vm17134_vm2, %v17133_v1  ;;  %s17135_s30 = smov 16   ;;  %vm998_vm3 = vcmask 130048   ;;  %vm1008_vm4 = vcmask 261120   ;;  %vm1018_vm5 = vcmask 392192   ;;  %vm1072_vm6 = vcmask 523264  }
  0x1a   : > { %s21527_s2 = smov (!%p761_p3, %s12613_s2), 1  ;;  %s17136_s3 = smov 48   ;;  %vm1206_vm7 = vcmask 580608   ;;  %vm1213_vm14 = vcmask 1042432   ;;  %vm1214_vm15 = vcmask 1043456  }
  0x1b   : > { %s15909_s1 = smul.u32 88, %s21527_s2  ;;  %s21443_s26 = smov 32  }
  0x1c   : > { %s21467_s27 = sld [smem:[#allocation27_spill]]  ;;  %s21468_s0 = sld [smem:[#allocation26_spill]] }
  0x1d   : > { %s21473_s8 = sld [smem:[#allocation29_spill]]  ;;  %s21474_s5 = sld [smem:[#allocation30_spill]] }
  0x1e   : > { %v16437_v0 = vld [vmem:[%s21465_s7] sm:$0xff]   ;;  %v16438_v2 = vld [vmem:[%s21465_s7 + $0x8] sm:$0xff]   ;;  %v16439_v3 = vld [vmem:[%s21465_s7 + $0x10] sm:$0xff]   ;;  %s21477_s12 = sld [smem:[#allocation34_spill]]  ;;  %s21481_s29 = smov 96  }
  0x1f   : > { %15260 = vmatpush3.bf16.msra.mxu0 %v16437_v0  ;;  %s17295_s28 = scalar_lea.vmem %s21466_s4, %s15909_s1  ;;  %v16440_v22 = vld [vmem:[%s21465_s7 + $0x18] sm:$0xff]   ;;  %s21469_s4 = sld [smem:[#allocation28_spill]] }
  0x20   : > { %15261 = vmatprep.subr.bf16.mxu0 %v17133_v1  ;;  %v17301_v4 = vld [vmem:[%s17295_s28 + $0x8] sm:$0xff]  ;;  %v17304_v5 = vld [vmem:[%s17295_s28 + $0x10] sm:$0xff]  ;;  %v17307_v6 = vld [vmem:[%s17295_s28 + $0x18] sm:$0xff]  ;;  %s21471_s1 = smov 64   ;;  %s21476_s7 = sld [smem:[#allocation33_spill]] }
  0x21   : > { %v877_v7 = vrot.slane %v17301_v4, 1  ;;  %v879_v8 = vrot.slane %v17304_v5, 1  ;;  %v881_v9 = vrot.slane %v17307_v6, 1  ;;  %v17314_v10 = vld [vmem:[%s17295_s28] sm:$0xff]  ;;  %v952_v11 = vrot.slane %v17301_v4, 2  ;;  %v17327_v17 = vld [vmem:[%s17295_s28 + $0x28] sm:$0xff] }
  0x22   : > { %v17318_v12 = vld [vmem:[%s17295_s28 + $0x20] sm:$0xff]  ;;  %v876_v13 = vrot.slane %v17314_v10, 1  ;;  %v953_v14 = vrot.slane %v17304_v5, 2  ;;  %v955_v15 = vrot.slane %v17307_v6, 2  ;;  %v885_v20 = vrot.slane %v17327_v17, 1  ;;  %v861_v21 = vld [vmem:[%s17295_s28 + $0x30] sm:$0xff] }
  0x23   : > { %15262 = vmatpush3.bf16.msra.mxu0 %v16438_v2  ;;  %v883_v16 = vrot.slane %v17318_v12, 1  ;;  %v880_v18 = vsel %vm875_vm0, %v877_v7, %v879_v8  ;;  %v882_v19 = vsel %vm875_vm0, %v879_v8, %v881_v9  ;;  %v957_v26 = vrot.slane %v17318_v12, 2  ;;  %v862_v27 = vld [vmem:[%s17295_s28 + $0x38] sm:$0xff]  ;;  %v863_v39 = vld [vmem:[%s17295_s28 + $0x40] sm:$0xff]  ;;  %v864_v40 = vld [vmem:[%s17295_s28 + $0x48] sm:$0xff]  ;;  %s14284_s9 = sshll.u32 %s21527_s2, 6 }
  0x24   : > { %15263 = vmatprep.subr.bf16.mxu0 %v17133_v1  ;;  %v878_v23 = vsel %vm875_vm0, %v876_v13, %v877_v7  ;;  %v954_v24 = vsel %vm951_vm1, %v952_v11, %v953_v14  ;;  %v956_v25 = vsel %vm951_vm1, %v953_v14, %v955_v15  ;;  %v959_v31 = vrot.slane %v17327_v17, 2  ;;  %v865_v61 = vld [vmem:[%s17295_s28 + $0x50] sm:$0x1] }
  0x25   : > { %v15930_v28 = vpack.i.bf16 %v880_v18, %v878_v23  ;;  %v15940_v29 = vpack.i.bf16 %v956_v25, %v954_v24  ;;  %v884_v30 = vsel %vm875_vm0, %v881_v9, %v883_v16  ;;  %v15935_v32 = vpack.i.bf16 %v882_v19, %v880_v18 }
  0x26   : > { %v15945_v33 = vpack.i.bf16 %v884_v30, %v882_v19  ;;  %v886_v34 = vsel %vm875_vm0, %v883_v16, %v885_v20  ;;  %v958_v35 = vsel %vm951_vm1, %v955_v15, %v957_v26  ;;  %v960_v36 = vsel %vm951_vm1, %v957_v26, %v959_v31 }
  0x27   : > { %15264 = vmatpush3.bf16.msra.mxu0 %v16439_v3  ;;  %15931 = vrot.lane.b32.xlu0 %v15930_v28, %s17135_s30  ;;  %v887_v37 = vrot.slane %v861_v21, 1  ;;  %v889_v38 = vrot.slane %v862_v27, 1  ;;  %v15950_v41 = vpack.i.bf16 %v886_v34, %v884_v30  ;;  %v15955_v42 = vpack.i.bf16 %v960_v36, %v958_v35 }
  0x28   : > { %15265 = vmatprep.subr.bf16.mxu0 %v17133_v1  ;;  %15941 = vrot.lane.b32.xlu1 %v15940_v29, %s17136_s3  ;;  %v961_v43 = vrot.slane %v861_v21, 2  ;;  %v963_v44 = vrot.slane %v862_v27, 2  ;;  %v891_v47 = vrot.slane %v863_v39, 1  ;;  %v921_v48 = vrot.slane %v864_v40, 1 }
  0x29   : > { %v888_v45 = vsel %vm875_vm0, %v885_v20, %v887_v37  ;;  %v890_v46 = vsel %vm875_vm0, %v887_v37, %v889_v38  ;;  %v965_v51 = vrot.slane %v863_v39, 2  ;;  %v967_v52 = vrot.slane %v864_v40, 2 }
  0x2a   : > { %v15960_v49 = vpack.i.bf16 %v888_v45, %v886_v34  ;;  %v15965_v50 = vpack.i.bf16 %v890_v46, %v888_v45  ;;  %v962_v53 = vsel %vm951_vm1, %v959_v31, %v961_v43  ;;  %v964_v54 = vsel %vm951_vm1, %v961_v43, %v963_v44 }
  0x2b   : > { %15266 = vmatpush3.bf16.msra.mxu0 %v16440_v22  ;;  %15936 = vrot.lane.b32.xlu0 %v15935_v32, %s21443_s26  ;;  %v892_v55 = vsel %vm875_vm0, %v889_v38, %v891_v47  ;;  %v15970_v56 = vpack.i.bf16 %v964_v54, %v962_v53  ;;  %v922_v58 = vsel %vm875_vm0, %v891_v47, %v921_v48  ;;  %v969_v0 = vrot.slane %v865_v61, 2 }
  0x2c   : > { %15946 = vrot.lane.b32.xlu1 %v15945_v33, %s17135_s30  ;;  %v15975_v57 = vpack.i.bf16 %v892_v55, %v890_v46  ;;  %v966_v59 = vsel %vm951_vm1, %v963_v44, %v965_v51  ;;  %v968_v60 = vsel %vm951_vm1, %v965_v51, %v967_v52  ;;  %v15980_v62 = vpack.i.bf16 %v922_v58, %v892_v55 }
  0x2d   : > { %v15985_v63 = vpack.i.bf16 %v968_v60, %v966_v59  ;;  %v970_v2 = vsel %vm951_vm1, %v967_v52, %v969_v0  ;;  %v17123_v59 = vld [vmem:[%s17295_s28 + $0x30] sm:$0xff] }
  0x2f   : > { %15951 = vrot.lane.b32.xlu0 %v15950_v41, %s21443_s26 }
  0x30   : > { %15956 = vrot.lane.b32.xlu1 %v15955_v42, %s17136_s3 }
  0x33   : > { %15961 = vrot.lane.b32.xlu0 %v15960_v49, %s17135_s30 }
  0x34   : > { %15966 = vrot.lane.b32.xlu1 %v15965_v50, %s21443_s26 }
  0x37   : > { %15971 = vrot.lane.b32.xlu0 %v15970_v56, %s17136_s3 }
  0x38   : > { %15976 = vrot.lane.b32.xlu1 %v15975_v57, %s17135_s30  ;;  %v17122_v57 = vld [vmem:[%s17295_s28 + $0x38] sm:$0xff] }
  0x3b   : > { %15981 = vrot.lane.b32.xlu0 %v15980_v62, %s21443_s26 }
  0x3c   : > { %15986 = vrot.lane.b32.xlu1 %v15985_v63, %s17136_s3 }
  0x3f   : > { %909 = vrot.lane.b32.xlu0 %v891_v47, %s17135_s30 }
  0x40   : > { %939 = vrot.lane.b32.xlu1 %v921_v48, %s21443_s26 }
  0x43   : > { %987 = vrot.lane.b32.xlu0 %v970_v2, %s17136_s3  ;;  %s21441_s3 = smov 64  }
  0x99   : > { %v15932_v3 = vpop.permute.xlu0 %15931 }
  0x9a   : > { %v15942_v7 = vpop.permute.xlu1 %15941  ;;  %v15934_v8 = vunpack.i.h.bf16 %v15932_v3  ;;  %v15933_v9 = vunpack.i.l.bf16 %v15932_v3 }
  0x9b   : > { %v15944_v11 = vunpack.i.h.bf16 %v15942_v7  ;;  %v15943_v13 = vunpack.i.l.bf16 %v15942_v7 }
  0x9c   : > { %v1000_v21 = vsel %vm998_vm3, %v17301_v4, %v15934_v8  ;;  %v999_v22 = vsel %vm998_vm3, %v17314_v10, %v15933_v9  ;;  %v17124_v9 = vld [vmem:[%s17295_s28 + $0x40] sm:$0xff]  ;;  %s21470_s28 = smov 32  }
  0x9d   : > { %v15937_v14 = vpop.permute.xlu0 %15936 }
  0x9e   : > { %v15947_v15 = vpop.permute.xlu1 %15946  ;;  %v15939_v16 = vunpack.i.h.bf16 %v15937_v14  ;;  %v15938_v18 = vunpack.i.l.bf16 %v15937_v14 }
  0x9f   : > { %v15949_v19 = vunpack.i.h.bf16 %v15947_v15  ;;  %v15948_v20 = vunpack.i.l.bf16 %v15947_v15 }
  0xa0   : > { %v1009_v23 = vsel %vm1008_vm4, %v999_v22, %v15938_v18  ;;  %v1010_v24 = vsel %vm1008_vm4, %v1000_v21, %v15939_v16  ;;  %v16443_v21 = vld [vmem:[%s21467_s27 + $0x20] sm:$0xff]  }
  0xa1   : > { %v15952_v25 = vpop.permute.xlu0 %15951  ;;  %v1019_v27 = vsel %vm1018_vm5, %v1009_v23, %v15943_v13  ;;  %v1020_v28 = vsel %vm1018_vm5, %v1010_v24, %v15944_v11  ;;  %v1002_v29 = vsel %vm998_vm3, %v17307_v6, %v15949_v19  ;;  %v1001_v30 = vsel %vm998_vm3, %v17304_v5, %v15948_v20  ;;  %v16441_v20 = vld [vmem:[%s21467_s27] sm:$0xff]  }
  0xa2   : > { %v15957_v26 = vpop.permute.xlu1 %15956  ;;  %v15954_v4 = vunpack.i.h.bf16 %v15952_v25  ;;  %v15953_v31 = vunpack.i.l.bf16 %v15952_v25  ;;  %v1036_v32 = vpack.c.bf16 %v1020_v28, %v1019_v27  ;;  %15297 = vmatprep.mubr.msk.bf16.mxu1 %vm1206_vm7, %v16441_v20  ;;  %v17434_v22 = vld [vmem:[%s21468_s0] ss:$0 sm:$0xff]  ;;  %v16447_v20 = vld [vmem:[%s21467_s27 + $0x30] sm:$0xff]   ;;  %s21475_s0 = sld [smem:[#allocation32_spill]] }
  0xa3   : > { %v15959_v10 = vunpack.i.h.bf16 %v15957_v26  ;;  %v15958_v33 = vunpack.i.l.bf16 %v15957_v26 }
  0xa4   : > { %v1012_v34 = vsel %vm1008_vm4, %v1002_v29, %v15954_v4  ;;  %v1011_v35 = vsel %vm1008_vm4, %v1001_v30, %v15953_v31  ;;  %15268 = vmatmul.mubr.msk.bf16.vlgmr.msra.gmra.mrb[0].mxu0 %vm1072_vm6, %v1036_v32 }
  0xa5   : > { %v15962_v36 = vpop.permute.xlu0 %15961  ;;  %15271 = vmatprep.mubr.msk.bf16.mxu0 %vm17134_vm2, %v17133_v1  ;;  %v1021_v5 = vsel %vm1018_vm5, %v1011_v35, %v15958_v33  ;;  %v1022_v6 = vsel %vm1018_vm5, %v1012_v34, %v15959_v10 }
  0xa6   : > { %v15967_v37 = vpop.permute.xlu1 %15966  ;;  %v15964_v38 = vunpack.i.h.bf16 %v15962_v36  ;;  %v15963_v39 = vunpack.i.l.bf16 %v15962_v36  ;;  %v1037_v45 = vpack.c.bf16 %v1022_v6, %v1021_v5 }
  0xa7   : > { %v15969_v40 = vunpack.i.h.bf16 %v15967_v37  ;;  %v15968_v41 = vunpack.i.l.bf16 %v15967_v37 }
  0xa8   : > { %v1004_v43 = vsel %vm998_vm3, %v17327_v17, %v15964_v38  ;;  %v1003_v44 = vsel %vm998_vm3, %v17318_v12, %v15963_v39 }
  0xa9   : > { %v15972_v42 = vpop.permute.xlu0 %15971  ;;  %v1013_v49 = vsel %vm1008_vm4, %v1003_v44, %v15968_v41  ;;  %v1014_v50 = vsel %vm1008_vm4, %v1004_v43, %v15969_v40 }
  0xaa   : > { %v15977_v46 = vpop.permute.xlu1 %15976  ;;  %v15974_v47 = vunpack.i.h.bf16 %v15972_v42  ;;  %v15973_v48 = vunpack.i.l.bf16 %v15972_v42 }
  0xab   : > { %v15979_v51 = vunpack.i.h.bf16 %v15977_v46  ;;  %v15978_v52 = vunpack.i.l.bf16 %v15977_v46 }
  0xac   : > { %15272 = vmatmul.mubr.msk.bf16.gmra.mrb[4].mxu0 %vm1072_vm6, %v1037_v45  ;;  %v1023_v12 = vsel %vm1018_vm5, %v1013_v49, %v15973_v48  ;;  %v1024_v17 = vsel %vm1018_vm5, %v1014_v50, %v15974_v47 }
  0xad   : > { %v15982_v53 = vpop.permute.xlu0 %15981  ;;  %15275 = vmatprep.mubr.msk.bf16.mxu0 %vm17134_vm2, %v17133_v1  ;;  %v1006_v58 = vsel %vm998_vm3, %v17122_v57, %v15979_v51  ;;  %v1005_v60 = vsel %vm998_vm3, %v17123_v59, %v15978_v52  ;;  %v1038_v61 = vpack.c.bf16 %v1024_v17, %v1023_v12 }
  0xae   : > { %v15984_v54 = vunpack.i.h.bf16 %v15982_v53  ;;  %v15983_v55 = vunpack.i.l.bf16 %v15982_v53  ;;  %v15987_v56 = vpop.permute.xlu1 %15986 }
  0xaf   : > { %v15989_v62 = vunpack.i.h.bf16 %v15987_v56  ;;  %v15988_v63 = vunpack.i.l.bf16 %v15987_v56 }
  0xb0   : > { %v1016_v0 = vsel %vm1008_vm4, %v1006_v58, %v15984_v54  ;;  %v1015_v2 = vsel %vm1008_vm4, %v1005_v60, %v15983_v55  ;;  %v17138_v58 = vmov 65535  }
  0xb1   : > { %v910_v3 = vpop.permute.xlu0 %909  ;;  %v1025_v7 = vsel %vm1018_vm5, %v1015_v2, %v15988_v63  ;;  %v1026_v8 = vsel %vm1018_vm5, %v1016_v0, %v15989_v62  ;;  %v1215_v59 = vsel %vm1213_vm14, 4294967295, %v17138_v58 }
  0xb2   : > { %v1007_v11 = vsel %vm998_vm3, %v17124_v9, %v910_v3  ;;  %v940_v13 = vpop.permute.xlu1 %939  ;;  %v1039_v14 = vpack.c.bf16 %v1026_v8, %v1025_v7  ;;  %v1216_v3 = vsel %vm1214_vm15, %v1215_v59, 0  ;;  %v16477_v59 = vld [vmem:[%s21469_s4 + $0x78] sm:$0xff]  }
  0xb3   : > { %v1017_v15 = vsel %vm1008_vm4, %v1007_v11, %v940_v13 }
  0xb4   : > { %15276 = vmatmul.mubr.msk.bf16.gmra.mrb[8].mxu0 %vm1072_vm6, %v1038_v61 }
  0xb5   : > { %15279 = vmatprep.mubr.msk.bf16.mxu0 %vm17134_vm2, %v17133_v1  ;;  %v988_v16 = vpop.permute.xlu0 %987 }
  0xb6   : > { %v1027_v18 = vsel %vm1018_vm5, %v1017_v15, %v988_v16  ;;  %v16442_v15 = vld [vmem:[%s21467_s27 + $0x8] sm:$0x1f]  }
  0xb7   : > { %v1040_v19 = vpack.c.bf16 %v1027_v18, %v1027_v18  ;;  %v16444_v16 = vld [vmem:[%s21467_s27 + $0x28] sm:$0x1f]   ;;  %v16445_v18 = vld [vmem:[%s21467_s27 + $0x10] sm:$0xff]  }
  0xbc   : > { %15280 = vmatmul.mubr.msk.bf16.gmra.mrb[12].mxu0 %vm1072_vm6, %v1039_v14 }
  0xbd   : > { %15283 = vmatprep.mubr.msk.bf16.mxu0 %vm17134_vm2, %v17133_v1 }
  0xc4   : > { %15284 = vmatmul.mubr.msk.bf16.gmra.mrb[16].mxu0 %vm1072_vm6, %v1040_v19  ;;  %v16446_v19 = vld [vmem:[%s21467_s27 + $0x18] sm:$0x1f]  }
  0xc5   : > { %15325 = vmatprep.mubr.msk.bf16.mxu0 %vm1206_vm7, %v16443_v21  ;;  %v16448_v21 = vld [vmem:[%s21467_s27 + $0x38] sm:$0x1f]   ;;  %s21472_s27 = sld [smem:[#allocation31_spill]] }
 0x177   : > { %v1122_v23 = vpop.f32.mrb[0].mxu0 }
 0x178   : > { %v1123_v24 = vadd.f32 %v17434_v22, %v1122_v23  ;;  %v15269_v25 = vpop.f32.mrb[1].mxu0 }
 0x179   : > { %v1125_v26 = vpop.f32.mrb[2].mxu0 }
 0x17a   : > { %vm1160_vm8 = vcmp.gt.f32.partialorder %v1123_v24, 0.0  ;;  %v1169_v27 = vmul.f32 0.01, %v1123_v24  ;;  %v1126_v28 = vadd.f32 %v17434_v22, %v1125_v26  ;;  %v15270_v29 = vpop.f32.mrb[3].mxu0 }
 0x17c   : > { %vm1161_vm9 = vcmp.gt.f32.partialorder %v1126_v28, 0.0  ;;  %v1170_v30 = vmul.f32 0.01, %v1126_v28  ;;  %v1178_v4 = vsel %vm1160_vm8, %v1123_v24, %v1169_v27 }
 0x17e   : > { %v1179_v31 = vsel %vm1161_vm9, %v1126_v28, %v1170_v30  ;;  %vm1560_vm9 = vcmask 1041408  }
 0x17f   : > { %v17438_v32 = vpack.c.bf16 %v1179_v31, %v1178_v4  ;;  %v1130_v10 = vpop.f32.mrb[4].mxu0  ;;  %v16449_v4 = vld [vmem:[%s21469_s4 + $0x40] sm:$0xff]  }
 0x180   : > { %v1131_v33 = vadd.f32 %v17434_v22, %v1130_v10  ;;  %v15273_v34 = vpop.f32.mrb[5].mxu0  ;;  %v16450_v31 = vld [vmem:[%s21469_s4 + $0xc0] sm:$0xff]  }
 0x181   : > { %v1133_v35 = vpop.f32.mrb[6].mxu0  ;;  %15287 = vmatprep.subr.bf16.mxu1 %v17438_v32  ;;  %15315 = vmatprep.subr.bf16.mxu0 %v17438_v32  ;;  %v16452_v10 = vld [vmem:[%s21469_s4 + $0x80] sm:$0xff]   ;;  %v16454_v34 = vld [vmem:[%s21469_s4 + $0xc8] sm:$0xff]  }
 0x182   : > { %vm1162_vm10 = vcmp.gt.f32.partialorder %v1131_v33, 0.0  ;;  %v1171_v36 = vmul.f32 0.01, %v1131_v33  ;;  %v1134_v37 = vadd.f32 %v17434_v22, %v1133_v35  ;;  %v15274_v38 = vpop.f32.mrb[7].mxu0  ;;  %15288 = vmatpush3.bf16.msra.mxu1 %v17438_v32  ;;  %15316 = vmatpush3.bf16.msra.mxu0 %v17438_v32  ;;  %v16455_v35 = vld [vmem:[%s21469_s4 + $0x8] sm:$0xff]  }
 0x183   : > { %v16458_v38 = vld [vmem:[%s21469_s4 + $0xd0] sm:$0xff]  }
 0x184   : > { %vm1163_vm11 = vcmp.gt.f32.partialorder %v1134_v37, 0.0  ;;  %v1172_v39 = vmul.f32 0.01, %v1134_v37  ;;  %v1180_v5 = vsel %vm1162_vm10, %v1131_v33, %v1171_v36  ;;  %v16453_v33 = vld [vmem:[%s21469_s4 + $0x48] sm:$0xff]  }
 0x185   : > { %v16456_v36 = vld [vmem:[%s21469_s4 + $0x88] sm:$0xff]  }
 0x186   : > { %v1181_v6 = vsel %vm1163_vm11, %v1134_v37, %v1172_v39  ;;  %v16457_v37 = vld [vmem:[%s21469_s4 + $0x50] sm:$0xff]  }
 0x187   : > { %v17446_v40 = vpack.c.bf16 %v1181_v6, %v1180_v5  ;;  %v1138_v41 = vpop.f32.mrb[8].mxu0  ;;  %v16459_v39 = vld [vmem:[%s21469_s4 + $0x10] sm:$0xff]   ;;  %v16461_v6 = vld [vmem:[%s21469_s4 + $0x58] sm:$0xff]  }
 0x188   : > { %v1139_v42 = vadd.f32 %v17434_v22, %v1138_v41  ;;  %v15277_v43 = vpop.f32.mrb[9].mxu0  ;;  %v16460_v5 = vld [vmem:[%s21469_s4 + $0x90] sm:$0xff]   ;;  %v16463_v41 = vld [vmem:[%s21469_s4 + $0x18] sm:$0xff]  }
 0x189   : > { %v1141_v44 = vpop.f32.mrb[10].mxu0  ;;  %15289 = vmatprep.subr.bf16.mxu1 %v17446_v40  ;;  %15317 = vmatprep.subr.bf16.mxu0 %v17446_v40 }
 0x18a   : > { %vm1164_vm12 = vcmp.gt.f32.partialorder %v1139_v42, 0.0  ;;  %v1173_v45 = vmul.f32 0.01, %v1139_v42  ;;  %v1142_v46 = vadd.f32 %v17434_v22, %v1141_v44  ;;  %v15278_v47 = vpop.f32.mrb[11].mxu0  ;;  %15290 = vmatpush3.bf16.msra.mxu1 %v17446_v40  ;;  %15318 = vmatpush3.bf16.msra.mxu0 %v17446_v40  ;;  %v16465_v44 = vld [vmem:[%s21469_s4 + $0x60] sm:$0xff]  }
 0x18c   : > { %vm1165_vm13 = vcmp.gt.f32.partialorder %v1142_v46, 0.0  ;;  %v1174_v48 = vmul.f32 0.01, %v1142_v46  ;;  %v1182_v49 = vsel %vm1164_vm12, %v1139_v42, %v1173_v45  ;;  %v16464_v42 = vld [vmem:[%s21469_s4 + $0x98] sm:$0xff]   ;;  %v16466_v45 = vld [vmem:[%s21469_s4 + $0xe0] sm:$0xff]   ;;  %vm1960_vm12 = vcmask 1040384  }
 0x18e   : > { %v1183_v50 = vsel %vm1165_vm13, %v1142_v46, %v1174_v48 }
 0x18f   : > { %v17454_v51 = vpack.c.bf16 %v1183_v50, %v1182_v49  ;;  %v1146_v52 = vpop.f32.mrb[12].mxu0  ;;  %v16467_v49 = vld [vmem:[%s21469_s4 + $0x20] sm:$0xff]  }
 0x190   : > { %v1147_v53 = vadd.f32 %v17434_v22, %v1146_v52  ;;  %v15281_v12 = vpop.f32.mrb[13].mxu0  ;;  %v16468_v50 = vld [vmem:[%s21469_s4 + $0xa0] sm:$0xff]   ;;  %v16469_v52 = vld [vmem:[%s21469_s4 + $0x68] sm:$0xff]  }
 0x191   : > { %v1149_v17 = vpop.f32.mrb[14].mxu0  ;;  %15291 = vmatprep.subr.bf16.mxu1 %v17454_v51  ;;  %15319 = vmatprep.subr.bf16.mxu0 %v17454_v51  ;;  %v16471_v12 = vld [vmem:[%s21469_s4 + $0x28] sm:$0xff]  }
 0x192   : > { %vm1166_vm1 = vcmp.gt.f32.partialorder %v1147_v53, 0.0  ;;  %v1175_v54 = vmul.f32 0.01, %v1147_v53  ;;  %v1150_v55 = vadd.f32 %v17434_v22, %v1149_v17  ;;  %v15282_v56 = vpop.f32.mrb[15].mxu0  ;;  %15292 = vmatpush3.bf16.msra.mxu1 %v17454_v51  ;;  %15320 = vmatpush3.bf16.msra.mxu0 %v17454_v51  ;;  %v16472_v17 = vld [vmem:[%s21469_s4 + $0xa8] sm:$0xff]  }
 0x193   : > { %v16475_v56 = vld [vmem:[%s21469_s4 + $0x30] sm:$0xff]  }
 0x194   : > { %vm1167_vm5 = vcmp.gt.f32.partialorder %v1150_v55, 0.0  ;;  %v1176_v57 = vmul.f32 0.01, %v1150_v55  ;;  %v1184_v60 = vsel %vm1166_vm1, %v1147_v53, %v1175_v54  ;;  %v16470_v53 = vld [vmem:[%s21469_s4 + $0xe8] sm:$0xff]   ;;  %v16473_v54 = vld [vmem:[%s21469_s4 + $0x70] sm:$0xff]   ;;  %vm1956_vm1 = vcmask 154624  }
 0x196   : > { %v1185_v61 = vsel %vm1167_vm5, %v1150_v55, %v1176_v57  ;;  %v16474_v55 = vld [vmem:[%s21469_s4 + $0xf0] sm:$0xff]   ;;  %vm2011_vm5 = vcmask 1044480  }
 0x197   : > { %v1194_v62 = vpack.c.bf16 %v1185_v61, %v1184_v60  ;;  %v1154_v63 = vpop.f32.mrb[16].mxu0  ;;  %v16476_v57 = vld [vmem:[%s21469_s4 + $0xb0] sm:$0xff]   ;;  %v16478_v60 = vld [vmem:[%s21469_s4 + $0xf8] sm:$0xff]  }
 0x198   : > { %v1155_v0 = vadd.f32 %v17434_v22, %v1154_v63  ;;  %v15285_v2 = vpop.f32.mrb[17].mxu0  ;;  %v16479_v61 = vld [vmem:[%s21469_s4 + $0x38] sm:$0xff]  }
 0x199   : > { %v1157_v7 = vpop.f32.mrb[18].mxu0  ;;  %15293 = vmatprep.subr.bf16.mxu1 %v1194_v62  ;;  %15321 = vmatprep.subr.bf16.mxu0 %v1194_v62 }
 0x19a   : > { %vm1168_vm8 = vcmp.gt.f32.partialorder %v1155_v0, 0.0  ;;  %v1177_v8 = vmul.f32 0.01, %v1155_v0  ;;  %v15286_v9 = vpop.f32.mrb[19].mxu0  ;;  %15294 = vmatpush3.bf16.msra.mxu1 %v1194_v62  ;;  %15322 = vmatpush3.bf16.msra.mxu0 %v1194_v62 }
 0x19c   : > { %v1186_v11 = vsel %vm1168_vm8, %v1155_v0, %v1177_v8 }
 0x19d   : > { %v1195_v13 = vpack.c.bf16 %v1186_v11, %v1186_v11 }
 0x19f   : > { %v1218_v14 = vand.u32 %v1216_v3, %v1195_v13 }
 0x1a1   : > { %15295 = vmatprep.subr.bf16.mxu1 %v1218_v14  ;;  %15323 = vmatprep.subr.bf16.mxu0 %v1218_v14 }
 0x1a2   : > { %15296 = vmatpush3.bf16.msra.mxu1 %v1218_v14  ;;  %15324 = vmatpush3.bf16.msra.mxu0 %v1218_v14 }
 0x1a3   : > { %15301 = vmatprep.subr.bf16.mxu1 %v17438_v32  ;;  %14322 = vmatprep.subr.bf16.mxu0 %v16449_v4 }
 0x1a5   : > { %15298 = vmatmul.mubr.msk.bf16.vlgmr.msra.gmra.mrb[0].mxu1 %vm1206_vm7, %v16442_v15  ;;  %15326 = vmatmul.mubr.msk.bf16.vlgmr.msra.gmra.mrb[20].mxu0 %vm1206_vm7, %v16444_v16 }
 0x1a6   : > { %15302 = vmatpush3.bf16.msra.mxu1 %v17438_v32  ;;  %15311 = vmatprep.mubr.msk.bf16.mxu1 %vm1206_vm7, %v16445_v18 }
 0x1a7   : > { %15303 = vmatprep.subr.bf16.mxu1 %v17446_v40 }
 0x1aa   : > { %15304 = vmatpush3.bf16.msra.mxu1 %v17446_v40 }
 0x1ab   : > { %15305 = vmatprep.subr.bf16.mxu1 %v17454_v51 }
 0x1ae   : > { %15306 = vmatpush3.bf16.msra.mxu1 %v17454_v51 }
 0x1af   : > { %15307 = vmatprep.subr.bf16.mxu1 %v1194_v62 }
 0x1b2   : > { %15308 = vmatpush3.bf16.msra.mxu1 %v1194_v62 }
 0x1b3   : > { %15309 = vmatprep.subr.bf16.mxu1 %v1218_v14 }
 0x1b6   : > { %15310 = vmatpush3.bf16.msra.mxu1 %v1218_v14 }
 0x1b7   : > { %15329 = vmatprep.subr.bf16.mxu1 %v17438_v32 }
 0x1b9   : > { %15312 = vmatmul.mubr.msk.bf16.vlgmr.msra.gmra.mrb[4].mxu1 %vm1206_vm7, %v16446_v19 }
 0x1ba   : > { %15330 = vmatpush3.bf16.msra.mxu1 %v17438_v32  ;;  %15339 = vmatprep.mubr.msk.bf16.mxu1 %vm1206_vm7, %v16447_v20  ;;  %v16451_v32 = vld [vmem:[%s21469_s4] sm:$0xff]  }
 0x1bb   : > { %15331 = vmatprep.subr.bf16.mxu1 %v17446_v40  ;;  %14323 = vmatpush3.bf16.msra.mxu0 %v16451_v32 }
 0x1bc   : > { %14324 = vmatprep.subr.bf16.mxu0 %v16453_v33 }
 0x1be   : > { %15332 = vmatpush3.bf16.msra.mxu1 %v17446_v40  ;;  %v16462_v40 = vld [vmem:[%s21469_s4 + $0xd8] sm:$0xff]  }
 0x1bf   : > { %15333 = vmatprep.subr.bf16.mxu1 %v17454_v51  ;;  %14325 = vmatpush3.bf16.msra.mxu0 %v16455_v35 }
 0x1c0   : > { %14326 = vmatprep.subr.bf16.mxu0 %v16457_v37 }
 0x1c2   : > { %15334 = vmatpush3.bf16.msra.mxu1 %v17454_v51 }
 0x1c3   : > { %15335 = vmatprep.subr.bf16.mxu1 %v1194_v62  ;;  %14327 = vmatpush3.bf16.msra.mxu0 %v16459_v39 }
 0x1c4   : > { %14328 = vmatprep.subr.bf16.mxu0 %v16461_v6 }
 0x1c6   : > { %15336 = vmatpush3.bf16.msra.mxu1 %v1194_v62  ;;  %v16480_v62 = vld [vmem:[%s21469_s4 + $0xb8] sm:$0xff]   ;;  %s21385_s4 = scalar_lea.vmem %s21434_s24, %s14284_s9 }
 0x1c7   : > { %15337 = vmatprep.subr.bf16.mxu1 %v1218_v14  ;;  %14329 = vmatpush3.bf16.msra.mxu0 %v16463_v41 }
 0x1c8   : > { %14330 = vmatprep.subr.bf16.mxu0 %v16465_v44 }
 0x1ca   : > { %15338 = vmatpush3.bf16.msra.mxu1 %v1218_v14 }
 0x1cb   : > { %14350 = vmatprep.subr.bf16.mxu1 %v16450_v31  ;;  %14331 = vmatpush3.bf16.msra.mxu0 %v16467_v49 }
 0x1cc   : > { %14332 = vmatprep.subr.bf16.mxu0 %v16469_v52 }
 0x1cd   : > { %15340 = vmatmul.mubr.msk.bf16.vlgmr.msra.gmra.mrb[8].mxu1 %vm1206_vm7, %v16448_v21  ;;  %vm1535_vm7 = vcmask 785408  }
 0x1ce   : > { %14351 = vmatpush3.bf16.msra.mxu1 %v16452_v10 }
 0x1cf   : > { %14352 = vmatprep.subr.bf16.mxu1 %v16454_v34  ;;  %14333 = vmatpush3.bf16.msra.mxu0 %v16471_v12 }
 0x1d0   : > { %14334 = vmatprep.subr.bf16.mxu0 %v16473_v54 }
 0x1d2   : > { %14353 = vmatpush3.bf16.msra.mxu1 %v16456_v36 }
 0x1d3   : > { %14354 = vmatprep.subr.bf16.mxu1 %v16458_v38  ;;  %14335 = vmatpush3.bf16.msra.mxu0 %v16475_v56 }
 0x1d4   : > { %14336 = vmatprep.subr.bf16.mxu0 %v16477_v59  ;;  %v782_v59 = vld [vmem:[%s21472_s27 + $0x38] sm:$0xff] }
 0x1d6   : > { %14355 = vmatpush3.bf16.msra.mxu1 %v16460_v5 }
 0x1d7   : > { %14356 = vmatprep.subr.bf16.mxu1 %v16462_v40  ;;  %14337 = vmatpush3.bf16.msra.mxu0 %v16479_v61  ;;  %v778_v61 = vld [vmem:[%s21472_s27 + $0x18] sm:$0xff] }
 0x1d8   : > { %15343 = vmatprep.subr.bf16.mxu0 %v17133_v1 }
 0x1da   : > { %14357 = vmatpush3.bf16.msra.mxu1 %v16464_v42 }
 0x1db   : > { %14358 = vmatprep.subr.bf16.mxu1 %v16466_v45 }
 0x1de   : > { %14359 = vmatpush3.bf16.msra.mxu1 %v16468_v50 }
 0x1df   : > { %14360 = vmatprep.subr.bf16.mxu1 %v16470_v53 }
 0x1e2   : > { %14361 = vmatpush3.bf16.msra.mxu1 %v16472_v17 }
 0x1e3   : > { %14362 = vmatprep.subr.bf16.mxu1 %v16474_v55 }
 0x1e6   : > { %14363 = vmatpush3.bf16.msra.mxu1 %v16476_v57  ;;  %v781_v57 = vld [vmem:[%s21472_s27 + $0x30] sm:$0xff] }
 0x1e7   : > { %14364 = vmatprep.subr.bf16.mxu1 %v16478_v60  ;;  %v17141_v60 = vmov 0  }
 0x1e8   : > { %16005 = vset.pattern.permute.xlu0 %v17141_v60  ;;  %16006 = vset.pattern.permute.xlu1 %v17141_v60  ;;  %v16491_v60 = vld [vmem:[%s21475_s0 + $0x20] sm:$0xff]  }
 0x1ea   : > { %14365 = vmatpush3.bf16.msra.mxu1 %v16480_v62  ;;  %v777_v62 = vld [vmem:[%s21472_s27 + $0x10] sm:$0xff] }
 0x278   : > { %v17502_v22 = vpop.f32.mrb[0].mxu1  ;;  %v15327_v23 = vpop.f32.mrb[20].mxu0 }
 0x279   : > { %v17504_v24 = vpop.f32.mrb[1].mxu1  ;;  %1503 = vrot.lane.b32.xlu0 %v15327_v23, %s21441_s3  ;;  %v1394_v25 = vpop.f32.mrb[21].mxu0 }
 0x27a   : > { %v17507_v26 = vpop.f32.mrb[2].mxu1  ;;  %v17509_v27 = vpop.f32.mrb[22].mxu0 }
 0x27b   : > { %v17511_v28 = vpop.f32.mrb[3].mxu1  ;;  %v1397_v29 = vpop.f32.mrb[23].mxu0 }
 0x27c   : > { %v15990_v30 = vpack.i.bf16 %v1397_v29, %v1394_v25 }
 0x27e   : > { %15991 = vrot.lane.b32.xlu1 %v15990_v30, %s21441_s3  ;;  %s21447_s3 = smov 96  }
 0x28c   : > { %v15313_v43 = vpop.f32.mrb[4].mxu1 }
 0x28d   : > { %v1324_v46 = vpop.f32.mrb[5].mxu1  ;;  %1487 = vrot.lane.b32.xlu0 %v15313_v43, %s21470_s28 }
 0x28e   : > { %v15314_v47 = vpop.f32.mrb[6].mxu1 }
 0x28f   : > { %v1327_v48 = vpop.f32.mrb[7].mxu1 }
 0x290   : > { %v15995_v51 = vpack.i.bf16 %v1327_v48, %v1324_v46 }
 0x292   : > { %15996 = vrot.lane.b32.xlu1 %v15995_v51, %s21470_s28 }
 0x2a0   : > { %v15341_v63 = vpop.f32.mrb[8].mxu1 }
 0x2a1   : > { %v1464_v0 = vpop.f32.mrb[9].mxu1  ;;  %1519 = vrot.lane.b32.xlu0 %v15341_v63, %s21447_s3  ;;  %v788_v63 = vld [vmem:[%s21472_s27 + $0x78] sm:$0xff] }
 0x2a2   : > { %v15342_v2 = vpop.f32.mrb[10].mxu1 }
 0x2a3   : > { %v1467_v3 = vpop.f32.mrb[11].mxu1 }
 0x2a4   : > { %v16000_v7 = vpack.i.bf16 %v1467_v3, %v1464_v0  ;;  %v787_v0 = vld [vmem:[%s21472_s27 + $0x70] sm:$0xff] }
 0x2a5   : > { %1505 = vrot.lane.b32.xlu0 %v17509_v27, %s21471_s1  ;;  %v783_v3 = vld [vmem:[%s21472_s27 + $0x50] sm:$0xff] }
 0x2a6   : > { %16001 = vrot.lane.b32.xlu1 %v16000_v7, %s21447_s3  ;;  %v780_v7 = vld [vmem:[%s21472_s27 + $0x28] sm:$0xff] }
 0x2a9   : > { %2076 = vperm.xlu0 %16005, %v781_v57   ;;  %v16489_v57 = vld [vmem:[%s21475_s0 + $0x18] sm:$0xff]  }
 0x2aa   : > { %1489 = vrot.lane.b32.xlu1 %v15314_v47, %s21470_s28 }
 0x2ad   : > { %2043 = vperm.xlu0 %16005, %v778_v61   ;;  %v16492_v61 = vld [vmem:[%s21475_s0 + $0x68] sm:$0xff]  }
 0x2ae   : > { %1521 = vrot.lane.b32.xlu1 %v15342_v2, %s21447_s3  ;;  %v784_v2 = vld [vmem:[%s21472_s27 + $0x58] sm:$0xff] }
 0x2b1   : > { %2124 = vperm.xlu0 %16005, %v788_v63   ;;  %v16494_v63 = vld [vmem:[%s21475_s0 + $0x70] sm:$0xff]  }
 0x2b2   : > { %2081 = vperm.xlu1 %16006, %v782_v59   ;;  %v16490_v59 = vld [vmem:[%s21475_s0 + $0x60] sm:$0xff]  }
 0x2b5   : > { %2100 = vperm.xlu0 %16005, %v784_v2  }
 0x2b6   : > { %2038 = vperm.xlu1 %16006, %v777_v62   ;;  %v16493_v62 = vld [vmem:[%s21475_s0 + $0x28] sm:$0xff]  }
 0x2b9   : > { %2062 = vperm.xlu0 %16005, %v780_v7  }
 0x2ba   : > { %2119 = vperm.xlu1 %16006, %v787_v0   ;;  %v16495_v0 = vld [vmem:[%s21475_s0 + $0x30] sm:$0xff]  }
 0x2be   : > { %2095 = vperm.xlu1 %16006, %v783_v3  }
 0x2eb   : > { %v1504_v8 = vpop.permute.xlu0 %1503 }
 0x2f0   : > { %v15992_v9 = vpop.permute.xlu1 %15991 }
 0x2f1   : > { %v15994_v19 = vunpack.i.h.bf16 %v15992_v9  ;;  %v15993_v20 = vunpack.i.l.bf16 %v15992_v9  ;;  %v776_v9 = vld [vmem:[%s21472_s27 + $0x8] sm:$0xff] }
 0x2f2   : > { %2024 = vperm.xlu0 %16005, %v776_v9   ;;  %v16497_v9 = vld [vmem:[%s21475_s0 + $0x80] sm:$0xff]  }
 0x2ff   : > { %v1488_v11 = vpop.permute.xlu0 %1487 }
 0x300   : > { %v1529_v14 = vsel %vm1008_vm4, %v17502_v22, %v1488_v11  ;;  %v775_v11 = vld [vmem:[%s21472_s27] sm:$0xff] }
 0x301   : > { %v1533_v21 = vsel %vm1072_vm6, %v1529_v14, %v1504_v8  ;;  %v779_v8 = vld [vmem:[%s21472_s27 + $0x20] sm:$0xff] }
 0x302   : > { %2057 = vperm.xlu1 %16006, %v779_v8  }
 0x304   : > { %v15997_v13 = vpop.permute.xlu1 %15996 }
 0x305   : > { %v15999_v15 = vunpack.i.h.bf16 %v15997_v13  ;;  %v15998_v16 = vunpack.i.l.bf16 %v15997_v13  ;;  %v785_v13 = vld [vmem:[%s21472_s27 + $0x60] sm:$0xff] }
 0x306   : > { %2019 = vperm.xlu1 %16006, %v775_v11   ;;  %2107 = vperm.xlu0 %16005, %v785_v13  }
 0x307   : > { %v1528_v23 = vsel %vm1008_vm4, %v17511_v28, %v15999_v15  ;;  %v1527_v25 = vsel %vm1008_vm4, %v17504_v24, %v15998_v16  ;;  %v12659_v16 = vld [vmem:[%s21473_s8] ss:$0 sm:$0xff] }
 0x308   : > { %v1531_v31 = vsel %vm1072_vm6, %v1527_v25, %v15993_v20  ;;  %v1532_v32 = vsel %vm1072_vm6, %v1528_v23, %v15994_v19 }
 0x313   : > { %v1520_v18 = vpop.permute.xlu0 %1519 }
 0x314   : > { %v1538_v27 = vsel %vm1535_vm7, %v1533_v21, %v1520_v18 }
 0x315   : > { %v1546_v22 = vrot.slane %v1538_v27, 1  ;;  %v1554_v10 = vrot.slane %v1538_v27, 5  ;;  %v1564_v33 = vrot.slane %v1538_v27, 6  ;;  %v1639_v55 = vpack.c.bf16 %v1538_v27, %v1538_v27 }
 0x317   : > { %v1506_v44 = vpop.permute.xlu0 %1505  ;;  %v1640_v53 = vpack.c.bf16 %v1546_v22, %v1546_v22  ;;  %v1641_v56 = vpack.c.bf16 %v1554_v10, %v1554_v10 }
 0x318   : > { %v16002_v29 = vpop.permute.xlu1 %16001 }
 0x319   : > { %v16004_v30 = vunpack.i.h.bf16 %v16002_v29  ;;  %v16003_v4 = vunpack.i.l.bf16 %v16002_v29 }
 0x31b   : > { %v1536_v34 = vsel %vm1535_vm7, %v1531_v31, %v16003_v4  ;;  %v1537_v28 = vsel %vm1535_vm7, %v1532_v32, %v16004_v30 }
 0x31c   : > { %v1551_v35 = vrot.slane %v1536_v34, 5  ;;  %v1552_v36 = vrot.slane %v1537_v28, 5  ;;  %v1490_v24 = vpop.permute.xlu1 %1489  ;;  %v1543_v37 = vrot.slane %v1536_v34, 1  ;;  %v1544_v38 = vrot.slane %v1537_v28, 1 }
 0x31d   : > { %v1530_v39 = vsel %vm1008_vm4, %v17507_v26, %v1490_v24  ;;  %v1561_v5 = vrot.slane %v1536_v34, 6  ;;  %v1562_v6 = vrot.slane %v1537_v28, 6  ;;  %v1635_v40 = vpack.c.bf16 %v1537_v28, %v1536_v34 }
 0x31e   : > { %v1545_v41 = vsel %vm875_vm0, %v1543_v37, %v1544_v38  ;;  %v1547_v42 = vsel %vm875_vm0, %v1544_v38, %v1546_v22  ;;  %v1553_v43 = vsel %vm1213_vm14, %v1551_v35, %v1552_v36  ;;  %v1555_v48 = vsel %vm1213_vm14, %v1552_v36, %v1554_v10 }
 0x31f   : > { %v1636_v45 = vpack.c.bf16 %v1547_v42, %v1545_v41  ;;  %v1563_v46 = vsel %vm1560_vm9, %v1561_v5, %v1562_v6  ;;  %v1565_v47 = vsel %vm1560_vm9, %v1562_v6, %v1564_v33  ;;  %v1534_v49 = vsel %vm1072_vm6, %v1530_v39, %v1506_v44 }
 0x320   : > { %v1522_v26 = vpop.permute.xlu1 %1521  ;;  %v1638_v50 = vpack.c.bf16 %v1565_v47, %v1563_v46  ;;  %v1637_v51 = vpack.c.bf16 %v1555_v48, %v1553_v43  ;;  %v1961_v46 = vsel %vm1960_vm12, 4294967295, %v17138_v58  ;;  %v16482_v58 = vld [vmem:[%s21475_s0 + $0x40] sm:$0xff]  }
 0x321   : > { %v1539_v52 = vsel %vm1535_vm7, %v1534_v49, %v1522_v26  ;;  %1874 = vmatprep.mubr.bf16.mxu0 %v1636_v45  ;;  %v1962_v49 = vsel %vm1560_vm9, %v1961_v46, 0  ;;  %14381 = vmatprep.subr.bf16.mxu1 %v16482_v58  ;;  %v16505_v46 = vld [vmem:[%s21475_s0 + $0xd8] sm:$0xff]  }
 0x322   : > { %v1566_v12 = vrot.slane %v1539_v52, 6  ;;  %1922 = vmatprep.mubr.bf16.mxu1 %v1638_v50  ;;  %1875 = vmatmul.mubr.bf16.vlgmr.msra.gmra.mrb[24].mxu0 %v1635_v40  ;;  %v16483_v52 = vld [vmem:[%s21475_s0] sm:$0xff]  }
 0x323   : > { %1923 = vmatmul.mubr.bf16.vlgmr.msra.gmra.mrb[12].mxu1 %v1637_v51  ;;  %1882 = vmatprep.mubr.bf16.mxu0 %v1640_v53  ;;  %v16481_v51 = vld [vmem:[%s21474_s5] sm:$0xff]   ;;  %v16484_v53 = vld [vmem:[%s21475_s0 + $0x48] sm:$0xff]  }
 0x324   : > { %v1567_v17 = vsel %vm1560_vm9, %v1564_v33, %v1566_v12  ;;  %14382 = vmatpush3.bf16.msra.mxu1 %v16483_v52  ;;  %v16485_v12 = vld [vmem:[%s21475_s0 + $0x8] sm:$0xff]  }
 0x325   : > { %v1642_v54 = vpack.c.bf16 %v1567_v17, %v1567_v17  ;;  %14383 = vmatprep.subr.bf16.mxu1 %v16484_v53  ;;  %v16486_v17 = vld [vmem:[%s21475_s0 + $0x50] sm:$0xff]   ;;  %v16506_v53 = vld [vmem:[%s21475_s0 + $0x98] sm:$0xff]  }
 0x327   : > { %1930 = vmatprep.mubr.bf16.mxu1 %v1642_v54  ;;  %v16496_v54 = vld [vmem:[%s21475_s0 + $0xc0] sm:$0xff]  }
 0x328   : > { %14384 = vmatpush3.bf16.msra.mxu1 %v16485_v12  ;;  %v17738_v2 = vpop.permute.xlu0 %2076 }
 0x329   : > { %14385 = vmatprep.subr.bf16.mxu1 %v16486_v17  ;;  %v786_v17 = vld [vmem:[%s21472_s27 + $0x68] sm:$0xff] }
 0x32a   : > { %1883 = vmatmul.mubr.bf16.gmra.mrb[28].mxu0 %v1639_v55  ;;  %v16487_v55 = vld [vmem:[%s21475_s0 + $0x10] sm:$0xff]  }
 0x32b   : > { %1931 = vmatmul.mubr.bf16.gmra.mrb[16].mxu1 %v1641_v56  ;;  %15347 = vmatprep.mubr.msk.bf16.mxu0 %vm17134_vm2, %v17133_v1  ;;  %v16488_v56 = vld [vmem:[%s21475_s0 + $0x58] sm:$0xff]  }
 0x32c   : > { %14386 = vmatpush3.bf16.msra.mxu1 %v16487_v55  ;;  %v17742_v7 = vpop.permute.xlu0 %2043 }
 0x32d   : > { %14387 = vmatprep.subr.bf16.mxu1 %v16488_v56  ;;  %v16508_v56 = vld [vmem:[%s21475_s0 + $0xe0] sm:$0xff]  }
 0x330   : > { %14388 = vmatpush3.bf16.msra.mxu1 %v16489_v57  ;;  %v17749_v11 = vpop.permute.xlu0 %2124  ;;  %v16509_v57 = vld [vmem:[%s21475_s0 + $0xa0] sm:$0xff]  }
 0x331   : > { %14389 = vmatprep.subr.bf16.mxu1 %v16490_v59  ;;  %v17740_v3 = vpop.permute.xlu1 %2081  ;;  %v789_v59 = vld [vmem:[%s21472_s27 + $0x80] sm:$0xff] }
 0x334   : > { %14390 = vmatpush3.bf16.msra.mxu1 %v16491_v60  ;;  %v16511_v60 = vld [vmem:[%s21475_s0 + $0xe8] sm:$0xff]  }
 0x335   : > { %14391 = vmatprep.subr.bf16.mxu1 %v16492_v61  ;;  %v17744_v8 = vpop.permute.xlu1 %2038  ;;  %v16512_v61 = vld [vmem:[%s21475_s0 + $0xa8] sm:$0xff]  }
 0x338   : > { %14392 = vmatpush3.bf16.msra.mxu1 %v16493_v62  ;;  %v16514_v62 = vld [vmem:[%s21475_s0 + $0xf0] sm:$0xff]  }
 0x339   : > { %14393 = vmatprep.subr.bf16.mxu1 %v16494_v63  ;;  %v16515_v63 = vld [vmem:[%s21475_s0 + $0xb0] sm:$0xff]  }
 0x33c   : > { %14394 = vmatpush3.bf16.msra.mxu1 %v16495_v0  ;;  %v16516_v0 = vld [vmem:[%s21475_s0 + $0xf8] sm:$0xff]  }
 0x3f5   : > { %v14338_v14 = vpop.f32.mrb[24].mxu0 }
 0x3f6   : > { %v14366_v15 = vpop.f32.mrb[12].mxu1  ;;  %v14339_v18 = vpop.f32.mrb[25].mxu0 }
 0x3f7   : > { %v14340_v19 = vadd.f32 %v14339_v18, %v14338_v14  ;;  %v14367_v20 = vpop.f32.mrb[13].mxu1  ;;  %v14341_v21 = vpop.f32.mrb[26].mxu0  ;;  %v16498_v14 = vld [vmem:[%s21475_s0 + $0x78] sm:$0xff]  }
 0x3f8   : > { %v14368_v23 = vadd.f32 %v14367_v20, %v14366_v15  ;;  %v14369_v25 = vpop.f32.mrb[14].mxu1  ;;  %v14342_v27 = vpop.f32.mrb[27].mxu0  ;;  %v16499_v15 = vld [vmem:[%s21475_s0 + $0x38] sm:$0xff]   ;;  %v16501_v20 = vld [vmem:[%s21475_s0 + $0x88] sm:$0xff]   ;;  %14395 = vmatprep.subr.bf16.mxu1 %v16498_v14 }
 0x3f9   : > { %v1877_v29 = vadd.f32 %v14340_v19, %v12659_v16  ;;  %v14343_v30 = vadd.f32 %v14342_v27, %v14341_v21  ;;  %v14370_v4 = vpop.f32.mrb[15].mxu1  ;;  %v17762_v18 = vpop.permute.xlu1 %2119  ;;  %14396 = vmatpush3.bf16.msra.mxu1 %v16499_v15 }
 0x3fa   : > { %v14371_v22 = vadd.f32 %v14370_v4, %v14369_v25  ;;  %15351 = vmatprep.subr.bf16.mxu1 %v17133_v1 }
 0x3fb   : > { %v1925_v31 = vadd.f32 %v14368_v23, %v1877_v29  ;;  %v1880_v32 = vadd.f32 %v14343_v30, %v12659_v16 }
 0x3fd   : > { %v1941_v10 = vmul.f32 0.01, %v1925_v31  ;;  %v1928_v33 = vadd.f32 %v14371_v22, %v1880_v32  ;;  %v14344_v34 = vpop.f32.mrb[28].mxu0  ;;  %vm1938_vm10 = vcmp.gt.f32.partialorder %v1925_v31, 0.0 }
 0x3fe   : > { %v14372_v28 = vpop.f32.mrb[16].mxu1  ;;  %v14345_v35 = vpop.f32.mrb[29].mxu0 }
 0x3ff   : > { %vm1939_vm11 = vcmp.gt.f32.partialorder %v1928_v33, 0.0  ;;  %v1942_v36 = vmul.f32 0.01, %v1928_v33  ;;  %v14346_v24 = vadd.f32 %v14345_v35, %v14344_v34  ;;  %v14373_v37 = vpop.f32.mrb[17].mxu1  ;;  %v14347_v38 = vpop.f32.mrb[30].mxu0  ;;  %v1944_v40 = vsel %vm1938_vm10, %v1925_v31, %v1941_v10  ;;  %v16502_v31 = vld [vmem:[%s21475_s0 + $0xd0] sm:$0xff]   ;;  %vm19086_vm10 = vmpackc.low %vm1008_vm4, %vm1008_vm4 }
 0x400   : > { %v14374_v39 = vadd.f32 %v14373_v37, %v14372_v28  ;;  %v14375_v5 = vpop.f32.mrb[18].mxu1  ;;  %v14348_v6 = vpop.f32.mrb[31].mxu0  ;;  %v16503_v37 = vld [vmem:[%s21475_s0 + $0x90] sm:$0xff]  }
 0x401   : > { %v1945_v41 = vsel %vm1939_vm11, %v1928_v33, %v1942_v36  ;;  %v1885_v42 = vadd.f32 %v14346_v24, %v12659_v16  ;;  %v14376_v43 = vpop.f32.mrb[19].mxu1  ;;  %v16500_v16 = vld [vmem:[%s21475_s0 + $0xc8] sm:$0xff]  }
 0x402   : > { %v1949_v44 = vpack.c.bf16 %v1945_v41, %v1944_v40  ;;  %v17794_v40 = vpop.permute.xlu0 %2100  ;;  %v17796_v41 = vpop.permute.xlu1 %2095 }
 0x403   : > { %v1933_v45 = vadd.f32 %v14374_v39, %v1885_v42 }
 0x404   : > { %15344 = vmatpush3.bf16.msra.mxu0 %v1949_v44 }
 0x405   : > { %vm1940_vm13 = vcmp.gt.f32.partialorder %v1933_v45, 0.0  ;;  %v1943_v47 = vmul.f32 0.01, %v1933_v45  ;;  %15345 = vmatprep.subr.bf16.mxu0 %v17133_v1 }
 0x406   : > { %v17859_v14 = vpop.permute.xlu0 %2062 }
 0x407   : > { %v1946_v48 = vsel %vm1940_vm13, %v1933_v45, %v1943_v47 }
 0x408   : > { %v1950_v26 = vpack.c.bf16 %v1946_v48, %v1946_v48 }
 0x40a   : > { %v1964_v50 = vand.u32 %v1962_v49, %v1950_v26  ;;  %v17861_v15 = vpop.permute.xlu0 %2024 }
 0x40c   : > { %15346 = vmatpush3.bf16.msra.mxu0 %v1964_v50 }
 0x40d   : > { %14403 = vmatprep.subr.bf16.mxu0 %v16496_v54  ;;  %v790_v54 = vld [vmem:[%s21472_s27 + $0x88] sm:$0xff] }
 0x40f   : > { %15348 = vmatmul.mubr.msk.bf16.vlgmr.msra.gmra.mrb[32].mxu0 %vm1956_vm1, %v16481_v51 }
 0x410   : > { %14404 = vmatpush3.bf16.msra.mxu0 %v16497_v9  ;;  %v16517_v9 = vld [vmem:[%s21475_s0 + $0xb8] sm:$0xff]  }
 0x411   : > { %14405 = vmatprep.subr.bf16.mxu0 %v16500_v16  ;;  %v17863_v16 = vpop.permute.xlu1 %2057 }
 0x414   : > { %14406 = vmatpush3.bf16.msra.mxu0 %v16501_v20 }
 0x415   : > { %14407 = vmatprep.subr.bf16.mxu0 %v16502_v31  ;;  %v17867_v20 = vpop.permute.xlu1 %2019 }
 0x418   : > { %14408 = vmatpush3.bf16.msra.mxu0 %v16503_v37  ;;  %v16504_v37 = vld [vmem:[%s21475_s0 + $0x100] sm:$0xff]  }
 0x419   : > { %14409 = vmatprep.subr.bf16.mxu0 %v16505_v46 }
 0x41c   : > { %14410 = vmatpush3.bf16.msra.mxu0 %v16506_v53 }
 0x41d   : > { %14411 = vmatprep.subr.bf16.mxu0 %v16508_v56 }
 0x420   : > { %14412 = vmatpush3.bf16.msra.mxu0 %v16509_v57 }
 0x421   : > { %14413 = vmatprep.subr.bf16.mxu0 %v16511_v60  ;;  %v16523_v60 = vld [vmem:[%s21420_s10 + $0x80] sm:$0xff]  }
 0x424   : > { %14414 = vmatpush3.bf16.msra.mxu0 %v16512_v61  ;;  %v16526_v61 = vld [vmem:[%s21420_s10 + $0xc8] sm:$0xff]  }
 0x425   : > { %14415 = vmatprep.subr.bf16.mxu0 %v16514_v62  ;;  %v16521_v62 = vld [vmem:[%s21420_s10 + $0x8] sm:$0xff]  }
 0x428   : > { %14416 = vmatpush3.bf16.msra.mxu0 %v16515_v63  ;;  %v16524_v63 = vld [vmem:[%s21420_s10 + $0x50] sm:$0xff]  }
 0x429   : > { %14417 = vmatprep.subr.bf16.mxu0 %v16516_v0  ;;  %v16527_v0 = vld [vmem:[%s21420_s10 + $0x88] sm:$0xff]  }
 0x42c   : > { %14418 = vmatpush3.bf16.msra.mxu0 %v16517_v9  ;;  %v16530_v9 = vld [vmem:[%s21420_s10 + $0xd0] sm:$0xff]  }
 0x4e2   : > { %v17751_v13 = vpop.f32.mrb[32].mxu0 }
 0x4e3   : > { %v15349_v19 = vpop.f32.mrb[33].mxu0  ;;  %v2012_v21 = vrot.slane %v17751_v13, 3  ;;  %v2050_v23 = vrot.slane %v17751_v13, 5  ;;  %v2069_v30 = vrot.slane %v17751_v13, 7  ;;  %v2031_v22 = vrot.slane %v17751_v13, 4 }
 0x4e4   : > { %v17769_v25 = vpop.f32.mrb[34].mxu0  ;;  %v2086_v33 = vrot.slane %v17751_v13, 1  ;;  %v17865_v19 = vpop.permute.xlu0 %2107 }
 0x4e5   : > { %v15350_v27 = vpop.f32.mrb[35].mxu0  ;;  %v2067_v29 = vrot.slane %v17769_v25, 7  ;;  %v2029_v4 = vrot.slane %v17769_v25, 4  ;;  %v2008_v32 = vrot.slane %v17769_v25, 3  ;;  %v2048_v10 = vrot.slane %v17769_v25, 5 }
 0x4e6   : > { %v2087_v34 = vrot.slane %v17769_v25, 1 }
 0x4e7   : > { %v2070_v28 = vsel %vm1960_vm12, %v2069_v30, %v2067_v29  ;;  %v2073_v35 = vsel %vm1960_vm12, %v2067_v29, %v2069_v30  ;;  %v2032_v36 = vsel %vm1214_vm15, %v2031_v22, %v2029_v4  ;;  %v2035_v24 = vsel %vm1214_vm15, %v2029_v4, %v2031_v22 }
 0x4e8   : > { %v2084_v38 = vmul.f32 %v17738_v2, %v2073_v35  ;;  %v2085_v39 = vmul.f32 %v17740_v3, %v2070_v28  ;;  %v2046_v5 = vmul.f32 %v17744_v8, %v2035_v24  ;;  %v2047_v6 = vmul.f32 %v17742_v7, %v2032_v36 }
 0x4e9   : > { %v2088_v42 = vsel %vm875_vm0, %v2086_v33, %v2087_v34  ;;  %v2092_v43 = vsel %vm875_vm0, %v2087_v34, %v2086_v33  ;;  %v2127_v44 = vmul.f32 %v17762_v18, %v2032_v36  ;;  %v2128_v45 = vmul.f32 %v17749_v11, %v2035_v24 }
 0x4ea   : > { %v16007_v47 = vpack.i.bf16 %v2085_v39, %v2084_v38  ;;  %v16012_v48 = vpack.i.bf16 %v2047_v6, %v2046_v5  ;;  %v2103_v49 = vmul.f32 %v17796_v41, %v2088_v42  ;;  %v2104_v26 = vmul.f32 %v17794_v40, %v2092_v43  ;;  %v16507_v38 = vld [vmem:[%s21475_s0 + $0x108] sm:$0xff]   ;;  %v16510_v39 = vld [vmem:[%s21475_s0 + $0x110] sm:$0xff]   ;;  %v16513_v5 = vld [vmem:[%s21475_s0 + $0x118] sm:$0xff]  }
 0x4eb   : > { %v16017_v50 = vpack.i.bf16 %v2128_v45, %v2127_v44  ;;  %v17808_v51 = vsel %vm2011_vm5, %v2012_v21, %v2008_v32  ;;  %v17811_v58 = vsel %vm2011_vm5, %v2008_v32, %v2012_v21  ;;  %v17814_v52 = vsel %vm1213_vm14, %v2050_v23, %v2048_v10 }
 0x4ec   : > { %16008 = vrot.lane.b32.xlu1 %v16007_v47, %s21471_s1  ;;  %16013 = vrot.lane.b32.xlu0 %v16012_v48, %s21471_s1  ;;  %v16022_v12 = vpack.i.bf16 %v2104_v26, %v2103_v49  ;;  %v17828_v55 = vsel %vm1213_vm14, %v2048_v10, %v2050_v23  ;;  %v2027_v27 = vmul.f32 %v17867_v20, %v17811_v58 }
 0x4ed   : > { %v2028_v29 = vmul.f32 %v17861_v15, %v17808_v51  ;;  %v2065_v30 = vmul.f32 %v17863_v16, %v17828_v55  ;;  %v2066_v4 = vmul.f32 %v17859_v14, %v17814_v52  ;;  %v2115_v56 = vmul.f32 %v17865_v19, %v17808_v51  ;;  %v16520_v51 = vld [vmem:[%s21420_s10 + $0x48] sm:$0xff]  }
 0x4f0   : > { %2112 = vperm.xlu1 %16006, %v786_v17   ;;  %2136 = vperm.xlu0 %16005, %v790_v54  }
 0x4f4   : > { %2131 = vperm.xlu1 %16006, %v789_v59   ;;  %16023 = vrot.lane.b32.xlu0 %v16022_v12, %s21471_s1  ;;  %v16519_v59 = vld [vmem:[%s21420_s10] sm:$0xff]  }
 0x4f8   : > { %16018 = vrot.lane.b32.xlu1 %v16017_v50, %s21471_s1 }
 0x55e   : > { %v16009_v21 = vpop.permute.xlu1 %16008  ;;  %v16014_v23 = vpop.permute.xlu0 %16013 }
 0x55f   : > { %v16011_v22 = vunpack.i.h.bf16 %v16009_v21  ;;  %v16010_v31 = vunpack.i.l.bf16 %v16009_v21  ;;  %v16016_v32 = vunpack.i.h.bf16 %v16014_v23  ;;  %v16015_v10 = vunpack.i.l.bf16 %v16014_v23  ;;  %v16525_v21 = vld [vmem:[%s21420_s10 + $0x10] sm:$0xff]   ;;  %v16528_v23 = vld [vmem:[%s21420_s10 + $0x58] sm:$0xff]  }
 0x561   : > { %v2173_v33 = vsel %vm1072_vm6, %v2027_v27, %v16015_v10  ;;  %v2174_v34 = vsel %vm1072_vm6, %v2028_v29, %v16016_v32  ;;  %v2175_v28 = vsel %vm1072_vm6, %v2065_v30, %v16010_v31  ;;  %v2176_v35 = vsel %vm1072_vm6, %v2066_v4, %v16011_v22  ;;  %v16531_v27 = vld [vmem:[%s21420_s10 + $0x90] sm:$0xff]   ;;  %v16534_v29 = vld [vmem:[%s21420_s10 + $0xd8] sm:$0xff]   ;;  %v16532_v4 = vld [vmem:[%s21420_s10 + $0x60] sm:$0xff]  }
 0x562   : > { %v2253_v36 = vpack.c.bf16 %v2174_v34, %v2173_v33  ;;  %v2254_v24 = vpack.c.bf16 %v2176_v35, %v2175_v28  ;;  %v16529_v30 = vld [vmem:[%s21420_s10 + $0x18] sm:$0xff]   ;;  %v16538_v31 = vld [vmem:[%s21420_s10 + $0xe0] sm:$0xff]   ;;  %v16536_v10 = vld [vmem:[%s21420_s10 + $0x68] sm:$0xff]  }
 0x563   : > { %v16535_v22 = vld [vmem:[%s21420_s10 + $0x98] sm:$0xff]   ;;  %v16533_v32 = vld [vmem:[%s21420_s10 + $0x20] sm:$0xff]   ;;  %v16542_v34 = vld [vmem:[%s21420_s10 + $0xe8] sm:$0xff]  }
 0x564   : > { %2516 = vmatprep.mubr.bf16.mxu1 %v2254_v24  ;;  %v16539_v33 = vld [vmem:[%s21420_s10 + $0xa0] sm:$0xff]   ;;  %v16537_v28 = vld [vmem:[%s21420_s10 + $0x28] sm:$0xff]   ;;  %v16540_v35 = vld [vmem:[%s21420_s10 + $0x70] sm:$0xff]  }
 0x565   : > { %2517 = vmatmul.mubr.bf16.vlgmr.msra.gmra.mrb[20].mxu1 %v2253_v36  ;;  %v16543_v36 = vld [vmem:[%s21420_s10 + $0xa8] sm:$0xff]   ;;  %v16541_v24 = vld [vmem:[%s21420_s10 + $0x30] sm:$0xff]  }
 0x566   : > { %15352 = vmatpush3.bf16.msra.mxu1 %v16504_v37  ;;  %15359 = vmatprep.mubr.msk.bf16.mxu1 %vm17134_vm2, %v17133_v1 }
 0x567   : > { %15353 = vmatprep.subr.bf16.mxu1 %v17133_v1 }
 0x56a   : > { %15354 = vmatpush3.bf16.msra.mxu1 %v16507_v38 }
 0x56b   : > { %15355 = vmatprep.subr.bf16.mxu1 %v17133_v1 }
 0x56e   : > { %15356 = vmatpush3.bf16.msra.mxu1 %v16510_v39 }
 0x56f   : > { %v17897_v6 = vpop.permute.xlu1 %2112  ;;  %v17899_v42 = vpop.permute.xlu0 %2136  ;;  %15357 = vmatprep.subr.bf16.mxu1 %v17133_v1 }
 0x570   : > { %v2140_v48 = vmul.f32 %v17899_v42, %v17828_v55 }
 0x572   : > { %15358 = vmatpush3.bf16.msra.mxu1 %v16513_v5 }
 0x573   : > { %v17902_v43 = vpop.permute.xlu1 %2131  ;;  %v16024_v44 = vpop.permute.xlu0 %16023 }
 0x574   : > { %v16026_v45 = vunpack.i.h.bf16 %v16024_v44  ;;  %v16025_v46 = vunpack.i.l.bf16 %v16024_v44  ;;  %v2139_v47 = vmul.f32 %v17902_v43, %v17814_v52  ;;  %v2116_v52 = vmul.f32 %v17897_v6, %v17811_v58  ;;  %v16522_v58 = vld [vmem:[%s21420_s10 + $0xc0] sm:$0xff]  }
 0x575   : > { %14452 = vmatprep.subr.bf16.mxu1 %v16522_v58  ;;  %v16544_v58 = vld [vmem:[%s21420_s10 + $0x78] sm:$0xff]  }
 0x576   : > { %v2178_v49 = vsel %vm1072_vm6, %v17769_v25, %v16026_v45  ;;  %v2177_v26 = vsel %vm1072_vm6, %v17751_v13, %v16025_v46  ;;  %v2257_v50 = vpack.c.bf16 %v2140_v48, %v2139_v47  ;;  %v16518_v13 = vld [vmem:[%s21420_s10 + $0x40] sm:$0xff]  }
 0x577   : > { %v16019_v53 = vpop.permute.xlu1 %16018  ;;  %v2255_v12 = vpack.c.bf16 %v2178_v49, %v2177_v26  ;;  %14430 = vmatprep.subr.bf16.mxu0 %v16518_v13  ;;  %v12694_v26 = vld [vmem:[%s21476_s7] ss:$0 sm:$0xff] }
 0x578   : > { %v16021_v17 = vunpack.i.h.bf16 %v16019_v53  ;;  %v16020_v54 = vunpack.i.l.bf16 %v16019_v53  ;;  %15360 = vmatmul.mubr.msk.bf16.vlgmr.msra.gmra.mrb[24].mxu1 %vm1072_vm6, %v2257_v50 }
 0x579   : > { %14453 = vmatpush3.bf16.msra.mxu1 %v16523_v60  ;;  %v16545_v60 = vld [vmem:[%s21420_s10 + $0x38] sm:$0xff]  }
 0x57a   : > { %v2179_v55 = vsel %vm1072_vm6, %v2115_v56, %v16020_v54  ;;  %v2180_v25 = vsel %vm1072_vm6, %v2116_v52, %v16021_v17  ;;  %14454 = vmatprep.subr.bf16.mxu1 %v16526_v61  ;;  %v16546_v61 = vld [vmem:[%s21420_s10 + $0xf0] sm:$0xff]  }
 0x57b   : > { %v2256_v57 = vpack.c.bf16 %v2180_v25, %v2179_v55 }
 0x57d   : > { %2557 = vmatprep.mubr.bf16.mxu0 %v2256_v57  ;;  %14455 = vmatpush3.bf16.msra.mxu1 %v16527_v0  ;;  %v16547_v0 = vld [vmem:[%s21420_s10 + $0xb0] sm:$0xff]  }
 0x57e   : > { %2558 = vmatmul.mubr.bf16.vlgmr.msra.gmra.mrb[36].mxu0 %v2255_v12  ;;  %14456 = vmatprep.subr.bf16.mxu1 %v16530_v9 }
 0x57f   : > { %14431 = vmatpush3.bf16.msra.mxu0 %v16519_v59 }
 0x580   : > { %14432 = vmatprep.subr.bf16.mxu0 %v16520_v51 }
 0x581   : > { %14457 = vmatpush3.bf16.msra.mxu1 %v16531_v27 }
 0x582   : > { %14458 = vmatprep.subr.bf16.mxu1 %v16534_v29 }
 0x583   : > { %14433 = vmatpush3.bf16.msra.mxu0 %v16521_v62 }
 0x584   : > { %14434 = vmatprep.subr.bf16.mxu0 %v16524_v63 }
 0x585   : > { %14459 = vmatpush3.bf16.msra.mxu1 %v16535_v22 }
 0x586   : > { %14460 = vmatprep.subr.bf16.mxu1 %v16538_v31  ;;  %v16550_v31 = vld [vmem:[%s21420_s10 + $0xb8] sm:$0xff]  }
 0x587   : > { %14435 = vmatpush3.bf16.msra.mxu0 %v16525_v21 }
 0x588   : > { %14436 = vmatprep.subr.bf16.mxu0 %v16528_v23 }
 0x589   : > { %14461 = vmatpush3.bf16.msra.mxu1 %v16539_v33 }
 0x58a   : > { %14462 = vmatprep.subr.bf16.mxu1 %v16542_v34 }
 0x58b   : > { %14437 = vmatpush3.bf16.msra.mxu0 %v16529_v30 }
 0x58c   : > { %14438 = vmatprep.subr.bf16.mxu0 %v16532_v4  ;;  %v16548_v4 = vld [vmem:[%s21420_s10 + $0xf8] sm:$0xff]  }
 0x58d   : > { %14463 = vmatpush3.bf16.msra.mxu1 %v16543_v36 }
 0x58e   : > { %14464 = vmatprep.subr.bf16.mxu1 %v16546_v61 }
 0x58f   : > { %14439 = vmatpush3.bf16.msra.mxu0 %v16533_v32 }
 0x590   : > { %14440 = vmatprep.subr.bf16.mxu0 %v16536_v10 }
 0x591   : > { %14465 = vmatpush3.bf16.msra.mxu1 %v16547_v0 }
 0x592   : > { %14466 = vmatprep.subr.bf16.mxu1 %v16548_v4 }
 0x593   : > { %14441 = vmatpush3.bf16.msra.mxu0 %v16537_v28 }
 0x594   : > { %14442 = vmatprep.subr.bf16.mxu0 %v16540_v35 }
 0x595   : > { %14467 = vmatpush3.bf16.msra.mxu1 %v16550_v31  ;;  %v16549_v31 = vld [vmem:[%s21420_s10 + $0x100] sm:$0xff]  }
 0x596   : > { %15375 = vmatprep.subr.bf16.mxu1 %v17133_v1 }
 0x597   : > { %14443 = vmatpush3.bf16.msra.mxu0 %v16541_v24 }
 0x598   : > { %14444 = vmatprep.subr.bf16.mxu0 %v16544_v58 }
 0x59b   : > { %14445 = vmatpush3.bf16.msra.mxu0 %v16545_v60 }
 0x59c   : > { %15363 = vmatprep.subr.bf16.mxu0 %v17133_v1 }
 0x638   : > { %v14397_v37 = vpop.f32.mrb[20].mxu1 }
 0x639   : > { %v14398_v38 = vpop.f32.mrb[21].mxu1 }
 0x63a   : > { %v14399_v39 = vadd.f32 %v14398_v38, %v14397_v37  ;;  %v14400_v5 = vpop.f32.mrb[22].mxu1 }
 0x63b   : > { %v14401_v44 = vpop.f32.mrb[23].mxu1 }
 0x63c   : > { %v14402_v45 = vadd.f32 %v14401_v44, %v14400_v5  ;;  %v2519_v12 = vadd.f32 %v14399_v39, %v12694_v26 }
 0x63e   : > { %v2522_v52 = vadd.f32 %v14402_v45, %v12694_v26 }
 0x64b   : > { %v2600_v46 = vpop.f32.mrb[24].mxu1 }
 0x64c   : > { %v15361_v47 = vpop.f32.mrb[25].mxu1 }
 0x64d   : > { %v2603_v48 = vpop.f32.mrb[26].mxu1 }
 0x64e   : > { %v15362_v49 = vpop.f32.mrb[27].mxu1 }
 0x651   : > { %v14419_v50 = vpop.f32.mrb[36].mxu0 }
 0x652   : > { %v14420_v53 = vpop.f32.mrb[37].mxu0 }
 0x653   : > { %v14421_v17 = vadd.f32 %v14420_v53, %v14419_v50  ;;  %v14422_v54 = vpop.f32.mrb[38].mxu0 }
 0x654   : > { %v14423_v56 = vpop.f32.mrb[39].mxu0 }
 0x655   : > { %v2560_v55 = vadd.f32 %v14421_v17, %v2519_v12  ;;  %v14424_v25 = vadd.f32 %v14423_v56, %v14422_v54 }
 0x657   : > { %v2601_v57 = vadd.f32 %v2600_v46, %v2560_v55  ;;  %v2563_v13 = vadd.f32 %v14424_v25, %v2522_v52 }
 0x659   : > { %vm2607_vm8 = vcmp.gt.f32.partialorder %v2601_v57, 0.0  ;;  %v2609_v59 = vmul.f32 0.01, %v2601_v57  ;;  %v2604_v51 = vadd.f32 %v2603_v48, %v2563_v13 }
 0x65b   : > { %v18009_v62 = vsel %vm2607_vm8, %v2601_v57, %v2609_v59  ;;  %vm2608_vm9 = vcmp.gt.f32.partialorder %v2604_v51, 0.0  ;;  %v2610_v63 = vmul.f32 0.01, %v2604_v51 }
 0x65c   : > { %v2644_v21 = vrot.slane %v18009_v62, 7  ;;  %v2626_v29 = vrot.slane %v18009_v62, 4  ;;  %v2651_v22 = vrot.slane %v18009_v62, 1  ;;  %v2617_v53 = vrot.slane %v18009_v62, 3 }
 0x65d   : > { %v18014_v9 = vsel %vm2608_vm9, %v2604_v51, %v2610_v63  ;;  %v2635_v12 = vrot.slane %v18009_v62, 5 }
 0x65e   : > { %v2642_v23 = vrot.slane %v18014_v9, 7  ;;  %v2624_v27 = vrot.slane %v18014_v9, 4  ;;  %v2652_v30 = vrot.slane %v18014_v9, 1  ;;  %v2614_v26 = vrot.slane %v18014_v9, 3 }
 0x65f   : > { %v2633_v50 = vrot.slane %v18014_v9, 5 }
 0x660   : > { %v2645_v32 = vsel %vm1960_vm12, %v2644_v21, %v2642_v23  ;;  %v2648_v10 = vsel %vm1960_vm12, %v2642_v23, %v2644_v21  ;;  %v2627_v33 = vsel %vm1214_vm15, %v2626_v29, %v2624_v27  ;;  %v2630_v34 = vsel %vm1214_vm15, %v2624_v27, %v2626_v29 }
 0x661   : > { %v2649_v28 = vmul.f32 %v2648_v10, %v17738_v2  ;;  %v2650_v35 = vmul.f32 %v2645_v32, %v17740_v3  ;;  %v2631_v36 = vmul.f32 %v2630_v34, %v17744_v8  ;;  %v2632_v24 = vmul.f32 %v2627_v33, %v17742_v7 }
 0x662   : > { %v2662_v37 = vmul.f32 %v2627_v33, %v17762_v18  ;;  %v2663_v38 = vmul.f32 %v2630_v34, %v17749_v11  ;;  %v2653_v39 = vsel %vm875_vm0, %v2651_v22, %v2652_v30  ;;  %v2657_v5 = vsel %vm875_vm0, %v2652_v30, %v2651_v22 }
 0x663   : > { %v16027_v44 = vpack.i.bf16 %v2650_v35, %v2649_v28  ;;  %v16032_v45 = vpack.i.bf16 %v2632_v24, %v2631_v36  ;;  %v2658_v46 = vmul.f32 %v2653_v39, %v17796_v41  ;;  %v2659_v47 = vmul.f32 %v2657_v5, %v17794_v40 }
 0x664   : > { %v16037_v48 = vpack.i.bf16 %v2663_v38, %v2662_v37  ;;  %v2618_v17 = vsel %vm2011_vm5, %v2617_v53, %v2614_v26  ;;  %v2621_v54 = vsel %vm2011_vm5, %v2614_v26, %v2617_v53  ;;  %v2636_v56 = vsel %vm1213_vm14, %v2635_v12, %v2633_v50  ;;  %v16554_v26 = vld [vmem:[%s21421_s11] sm:$0xff]   ;;  %v16556_v53 = vld [vmem:[%s21421_s11 + $0x10] sm:$0xff]  }
 0x665   : > { %16028 = vrot.lane.b32.xlu1 %v16027_v44, %s21471_s1  ;;  %16033 = vrot.lane.b32.xlu0 %v16032_v45, %s21471_s1  ;;  %v16042_v49 = vpack.i.bf16 %v2659_v47, %v2658_v46  ;;  %v2639_v52 = vsel %vm1213_vm14, %v2633_v50, %v2635_v12  ;;  %v2622_v57 = vmul.f32 %v2621_v54, %v17867_v20  ;;  %v16551_v44 = vld [vmem:[%s21420_s10 + $0x108] sm:$0xff]   ;;  %v16552_v45 = vld [vmem:[%s21420_s10 + $0x110] sm:$0xff]  }
 0x666   : > { %v2623_v13 = vmul.f32 %v2618_v17, %v17861_v15  ;;  %v2640_v59 = vmul.f32 %v2639_v52, %v17863_v16  ;;  %v2641_v51 = vmul.f32 %v2636_v56, %v17859_v14  ;;  %v2660_v32 = vmul.f32 %v2618_v17, %v17865_v19  ;;  %v16553_v46 = vld [vmem:[%s21420_s10 + $0x118] sm:$0xff]   ;;  %v16555_v50 = vld [vmem:[%s21421_s11 + $0x8] sm:$0xff]  }
 0x667   : > { %v2661_v10 = vmul.f32 %v2621_v54, %v17897_v6  ;;  %v2664_v47 = vmul.f32 %v2636_v56, %v17902_v43  ;;  %v16557_v12 = vld [vmem:[%s21421_s11 + $0x18] sm:$0xff]  }
 0x669   : > { %16038 = vrot.lane.b32.xlu1 %v16037_v48, %s21471_s1  ;;  %16043 = vrot.lane.b32.xlu0 %v16042_v49, %s21471_s1  ;;  %v2665_v48 = vmul.f32 %v2639_v52, %v17899_v42 }
 0x66b   : > { %v2782_v49 = vpack.c.bf16 %v2665_v48, %v2664_v47  ;;  %v16572_v47 = vld [vmem:[%s21420_s10 + $0x180] sm:$0xff]   ;;  %v16575_v48 = vld [vmem:[%s21420_s10 + $0x1b8] sm:$0xff]  }
 0x6d7   : > { %v16029_v55 = vpop.permute.xlu1 %16028  ;;  %v16034_v25 = vpop.permute.xlu0 %16033 }
 0x6d8   : > { %v16031_v58 = vunpack.i.h.bf16 %v16029_v55  ;;  %v16030_v60 = vunpack.i.l.bf16 %v16029_v55  ;;  %v16036_v61 = vunpack.i.h.bf16 %v16034_v25  ;;  %v16035_v63 = vunpack.i.l.bf16 %v16034_v25 }
 0x6da   : > { %v2698_v0 = vsel %vm1072_vm6, %v2622_v57, %v16035_v63  ;;  %v2699_v21 = vsel %vm1072_vm6, %v2623_v13, %v16036_v61  ;;  %v2700_v23 = vsel %vm1072_vm6, %v2640_v59, %v16030_v60  ;;  %v2701_v27 = vsel %vm1072_vm6, %v2641_v51, %v16031_v58 }
 0x6db   : > { %v16039_v29 = vpop.permute.xlu1 %16038  ;;  %v16044_v30 = vpop.permute.xlu0 %16043  ;;  %v2779_v4 = vpack.c.bf16 %v2701_v27, %v2700_v23  ;;  %v2778_v22 = vpack.c.bf16 %v2699_v21, %v2698_v0 }
 0x6dc   : > { %v16041_v33 = vunpack.i.h.bf16 %v16039_v29  ;;  %v16040_v34 = vunpack.i.l.bf16 %v16039_v29  ;;  %v16046_v28 = vunpack.i.h.bf16 %v16044_v30  ;;  %v16045_v35 = vunpack.i.l.bf16 %v16044_v30 }
 0x6dd   : > { %3034 = vmatprep.mubr.bf16.mxu0 %v2779_v4 }
 0x6de   : > { %v2703_v36 = vsel %vm1072_vm6, %v18014_v9, %v16046_v28  ;;  %v2702_v24 = vsel %vm1072_vm6, %v18009_v62, %v16045_v35  ;;  %3035 = vmatmul.mubr.bf16.vlgmr.msra.gmra.mrb[40].mxu0 %v2778_v22  ;;  %v2704_v37 = vsel %vm1072_vm6, %v2660_v32, %v16040_v34  ;;  %v2705_v38 = vsel %vm1072_vm6, %v2661_v10, %v16041_v33  ;;  %v16558_v32 = vld [vmem:[%s21420_s10 + $0x160] sm:$0xff]   ;;  %v16560_v33 = vld [vmem:[%s21420_s10 + $0x168] sm:$0xff]  }
 0x6df   : > { %15364 = vmatpush3.bf16.msra.mxu0 %v16549_v31  ;;  %v2781_v39 = vpack.c.bf16 %v2705_v38, %v2704_v37  ;;  %v2780_v5 = vpack.c.bf16 %v2703_v36, %v2702_v24  ;;  %15371 = vmatprep.mubr.msk.bf16.mxu0 %vm17134_vm2, %v17133_v1  ;;  %v16559_v10 = vld [vmem:[%s21420_s10 + $0x120] sm:$0xff]   ;;  %v16566_v35 = vld [vmem:[%s21420_s10 + $0x1e8] sm:$0xff]   ;;  %v16564_v24 = vld [vmem:[%s21420_s10 + $0x170] sm:$0xff]  }
 0x6e0   : > { %15365 = vmatprep.subr.bf16.mxu0 %v17133_v1  ;;  %v16562_v34 = vld [vmem:[%s21420_s10 + $0x1e0] sm:$0xff]   ;;  %v16561_v36 = vld [vmem:[%s21420_s10 + $0x128] sm:$0xff]   ;;  %v16570_v38 = vld [vmem:[%s21420_s10 + $0x1f0] sm:$0xff]  }
 0x6e1   : > { %3075 = vmatprep.mubr.bf16.mxu1 %v2781_v39  ;;  %v16563_v28 = vld [vmem:[%s21420_s10 + $0x1a0] sm:$0xff]   ;;  %v16567_v37 = vld [vmem:[%s21420_s10 + $0x1a8] sm:$0xff]   ;;  %v16565_v39 = vld [vmem:[%s21420_s10 + $0x130] sm:$0xff]  }
 0x6e2   : > { %3076 = vmatmul.mubr.bf16.vlgmr.msra.gmra.mrb[28].mxu1 %v2780_v5  ;;  %v16568_v5 = vld [vmem:[%s21420_s10 + $0x178] sm:$0xff]  }
 0x6e3   : > { %15366 = vmatpush3.bf16.msra.mxu0 %v16551_v44  ;;  %15383 = vmatprep.mubr.msk.bf16.mxu1 %vm17134_vm2, %v17133_v1  ;;  %v16571_v44 = vld [vmem:[%s21420_s10 + $0x1b0] sm:$0xff]  }
 0x6e4   : > { %15367 = vmatprep.subr.bf16.mxu0 %v17133_v1  ;;  %15376 = vmatpush3.bf16.msra.mxu1 %v16554_v26  ;;  %v16573_v26 = vld [vmem:[%s21420_s10 + $0x140] sm:$0xff]  }
 0x6e5   : > { %15377 = vmatprep.subr.bf16.mxu1 %v17133_v1 }
 0x6e7   : > { %15368 = vmatpush3.bf16.msra.mxu0 %v16552_v45  ;;  %v16574_v45 = vld [vmem:[%s21420_s10 + $0x1f8] sm:$0xff]  }
 0x6e8   : > { %15369 = vmatprep.subr.bf16.mxu0 %v17133_v1  ;;  %15378 = vmatpush3.bf16.msra.mxu1 %v16555_v50  ;;  %v16576_v50 = vld [vmem:[%s21420_s10 + $0x188] sm:$0xff]  }
 0x6e9   : > { %15379 = vmatprep.subr.bf16.mxu1 %v17133_v1 }
 0x6eb   : > { %15370 = vmatpush3.bf16.msra.mxu0 %v16553_v46  ;;  %v16569_v46 = vld [vmem:[%s21420_s10 + $0x138] sm:$0xff]  }
 0x6ec   : > { %15380 = vmatpush3.bf16.msra.mxu1 %v16556_v53  ;;  %14484 = vmatprep.subr.bf16.mxu0 %v16558_v32  ;;  %v16579_v53 = vld [vmem:[%s21420_s10 + $0x1c0] sm:$0xff]  }
 0x6ed   : > { %15381 = vmatprep.subr.bf16.mxu1 %v17133_v1 }
 0x6ee   : > { %15372 = vmatmul.mubr.msk.bf16.vlgmr.msra.gmra.mrb[44].mxu0 %vm1072_vm6, %v2782_v49  ;;  %v16578_v49 = vld [vmem:[%s21420_s10 + $0x200] sm:$0xff]  }
 0x6ef   : > { %14485 = vmatpush3.bf16.msra.mxu0 %v16559_v10 }
 0x6f0   : > { %15382 = vmatpush3.bf16.msra.mxu1 %v16557_v12  ;;  %14486 = vmatprep.subr.bf16.mxu0 %v16560_v33  ;;  %v16582_v12 = vld [vmem:[%s21420_s10 + $0x208] sm:$0xff]  }
 0x6f1   : > { %14506 = vmatprep.subr.bf16.mxu1 %v16562_v34 }
 0x6f3   : > { %14487 = vmatpush3.bf16.msra.mxu0 %v16561_v36 }
 0x6f4   : > { %14488 = vmatprep.subr.bf16.mxu0 %v16564_v24 }
 0x6f7   : > { %14489 = vmatpush3.bf16.msra.mxu0 %v16565_v39 }
 0x6f8   : > { %14490 = vmatprep.subr.bf16.mxu0 %v16568_v5 }
 0x6fb   : > { %14491 = vmatpush3.bf16.msra.mxu0 %v16569_v46 }
 0x6fc   : > { %14492 = vmatprep.subr.bf16.mxu0 %v16572_v47 }
 0x6ff   : > { %14493 = vmatpush3.bf16.msra.mxu0 %v16573_v26 }
 0x700   : > { %14494 = vmatprep.subr.bf16.mxu0 %v16576_v50 }
 0x7b1   : > { %v14446_v17 = vpop.f32.mrb[40].mxu0 }
 0x7b2   : > { %v14447_v54 = vpop.f32.mrb[41].mxu0 }
 0x7b3   : > { %v14448_v56 = vadd.f32 %v14447_v54, %v14446_v17  ;;  %v14449_v52 = vpop.f32.mrb[42].mxu0  ;;  %v16577_v17 = vld [vmem:[%s21420_s10 + $0x148] sm:$0xff]   ;;  %v16580_v54 = vld [vmem:[%s21420_s10 + $0x190] sm:$0xff]  }
 0x7b4   : > { %v14450_v55 = vpop.f32.mrb[43].mxu0  ;;  %14495 = vmatpush3.bf16.msra.mxu0 %v16577_v17 }
 0x7b5   : > { %v14451_v25 = vadd.f32 %v14450_v55, %v14449_v52  ;;  %v14468_v57 = vpop.f32.mrb[28].mxu1  ;;  %v16581_v52 = vld [vmem:[%s21420_s10 + $0x150] sm:$0xff]   ;;  %14496 = vmatprep.subr.bf16.mxu0 %v16580_v54 }
 0x7b6   : > { %v14469_v13 = vpop.f32.mrb[29].mxu1 }
 0x7b7   : > { %v14470_v59 = vadd.f32 %v14469_v13, %v14468_v57  ;;  %v14471_v51 = vpop.f32.mrb[30].mxu1  ;;  %v16584_v13 = vld [vmem:[%s21420_s10 + $0x198] sm:$0xff]  }
 0x7b8   : > { %v14472_v58 = vpop.f32.mrb[31].mxu1  ;;  %14497 = vmatpush3.bf16.msra.mxu0 %v16581_v52 }
 0x7b9   : > { %v14473_v60 = vadd.f32 %v14472_v58, %v14471_v51  ;;  %v3078_v61 = vadd.f32 %v14470_v59, %v14448_v56  ;;  %v16583_v56 = vld [vmem:[%s21420_s10 + $0x1c8] sm:$0xff]   ;;  %v16585_v59 = vld [vmem:[%s21420_s10 + $0x158] sm:$0xff]   ;;  %v16586_v51 = vld [vmem:[%s21420_s10 + $0x210] sm:$0xff]   ;;  %14498 = vmatprep.subr.bf16.mxu0 %v16584_v13 }
 0x7bb   : > { %v3081_v63 = vadd.f32 %v14473_v60, %v14451_v25  ;;  %v16587_v60 = vld [vmem:[%s21420_s10 + $0x1d0] sm:$0xff]  }
 0x7bc   : > { %14499 = vmatpush3.bf16.msra.mxu0 %v16585_v59 }
 0x7bd   : > { %15387 = vmatprep.subr.bf16.mxu0 %v17133_v1 }
 0x7c1   : > { %v3118_v0 = vpop.f32.mrb[44].mxu0 }
 0x7c2   : > { %v3119_v21 = vadd.f32 %v3118_v0, %v3078_v61  ;;  %v15373_v23 = vpop.f32.mrb[45].mxu0 }
 0x7c3   : > { %v3121_v27 = vpop.f32.mrb[46].mxu0 }
 0x7c4   : > { %v3122_v29 = vadd.f32 %v3121_v27, %v3081_v63  ;;  %v15374_v30 = vpop.f32.mrb[47].mxu0  ;;  %v3125_v4 = vmax.f32 %v3119_v21, 0.0 }
 0x7c5   : > { %v16590_v30 = vld [vmem:[%s21420_s10 + $0x1d8] sm:$0xff]  }
 0x7c6   : > { %v3126_v22 = vmax.f32 %v3122_v29, 0.0 }
 0x7c8   : > { %v3135_v31 = vpack.c.bf16 %v3126_v22, %v3125_v4 }
 0x7ca   : > { %15384 = vmatmul.mubr.msk.bf16.vlgmr.msra.gmra.mrb[32].mxu1 %vm1072_vm6, %v3135_v31 }
 0x7cb   : > { %14507 = vmatpush3.bf16.msra.mxu1 %v16563_v28 }
 0x7cc   : > { %14508 = vmatprep.subr.bf16.mxu1 %v16566_v35 }
 0x7cf   : > { %14509 = vmatpush3.bf16.msra.mxu1 %v16567_v37 }
 0x7d0   : > { %14510 = vmatprep.subr.bf16.mxu1 %v16570_v38 }
 0x7d3   : > { %14511 = vmatpush3.bf16.msra.mxu1 %v16571_v44 }
 0x7d4   : > { %14512 = vmatprep.subr.bf16.mxu1 %v16574_v45 }
 0x7d7   : > { %14513 = vmatpush3.bf16.msra.mxu1 %v16575_v48 }
 0x7d8   : > { %14514 = vmatprep.subr.bf16.mxu1 %v16578_v49 }
 0x7db   : > { %14515 = vmatpush3.bf16.msra.mxu1 %v16579_v53 }
 0x7dc   : > { %14516 = vmatprep.subr.bf16.mxu1 %v16582_v12 }
 0x7df   : > { %14517 = vmatpush3.bf16.msra.mxu1 %v16583_v56 }
 0x7e0   : > { %14518 = vmatprep.subr.bf16.mxu1 %v16586_v51 }
 0x7e3   : > { %14519 = vmatpush3.bf16.msra.mxu1 %v16587_v60 }
 0x89d   : > { %v3197_v55 = vpop.f32.mrb[32].mxu1 }
 0x89e   : > { %v18189_v25 = vadd.f32 %v3197_v55, %v18009_v62  ;;  %v15385_v57 = vpop.f32.mrb[33].mxu1 }
 0x89f   : > { %v3200_v58 = vpop.f32.mrb[34].mxu1 }
 0x8a0   : > { %v18204_v62 = vadd.f32 %v3200_v58, %v18014_v9  ;;  %v15386_v61 = vpop.f32.mrb[35].mxu1  ;;  %v3237_v63 = vrot.slane %v18189_v25, 7  ;;  %v3219_v23 = vrot.slane %v18189_v25, 4  ;;  %v16588_v9 = vld [vmem:[%s21420_s10 + $0x218] sm:$0xff]   ;;  %v3244_v29 = vrot.slane %v18189_v25, 1 }
 0x8a1   : > { %14520 = vmatprep.subr.bf16.mxu1 %v16588_v9  ;;  %v3210_v49 = vrot.slane %v18189_v25, 3  ;;  %v3228_v26 = vrot.slane %v18189_v25, 5 }
 0x8a2   : > { %v3235_v0 = vrot.slane %v18204_v62, 7  ;;  %v3217_v21 = vrot.slane %v18204_v62, 4  ;;  %v3245_v27 = vrot.slane %v18204_v62, 1  ;;  %14521 = vmatpush3.bf16.msra.mxu1 %v16590_v30  ;;  %v3207_v47 = vrot.slane %v18204_v62, 3  ;;  %v16589_v30 = vld [vmem:[%s21420_s10 + $0x220] sm:$0xff]  }
 0x8a3   : > { %15399 = vmatprep.subr.bf16.mxu1 %v17133_v1  ;;  %v3226_v48 = vrot.slane %v18204_v62, 5 }
 0x8a4   : > { %v3238_v4 = vsel %vm1960_vm12, %v3237_v63, %v3235_v0  ;;  %v3241_v22 = vsel %vm1960_vm12, %v3235_v0, %v3237_v63  ;;  %v3220_v31 = vsel %vm1214_vm15, %v3219_v23, %v3217_v21  ;;  %v3223_v32 = vsel %vm1214_vm15, %v3217_v21, %v3219_v23 }
 0x8a5   : > { %v3242_v10 = vmul.f32 %v3241_v22, %v17738_v2  ;;  %v3243_v33 = vmul.f32 %v3238_v4, %v17740_v3  ;;  %v3224_v34 = vmul.f32 %v3223_v32, %v17744_v8  ;;  %v3225_v28 = vmul.f32 %v3220_v31, %v17742_v7 }
 0x8a6   : > { %v3255_v35 = vmul.f32 %v3220_v31, %v17762_v18  ;;  %v3256_v36 = vmul.f32 %v3223_v32, %v17749_v11  ;;  %v3246_v24 = vsel %vm875_vm0, %v3244_v29, %v3245_v27  ;;  %v3250_v37 = vsel %vm875_vm0, %v3245_v27, %v3244_v29 }
 0x8a7   : > { %v16047_v38 = vpack.i.bf16 %v3243_v33, %v3242_v10  ;;  %v16052_v39 = vpack.i.bf16 %v3225_v28, %v3224_v34  ;;  %v3251_v5 = vmul.f32 %v3246_v24, %v17796_v41  ;;  %v3252_v44 = vmul.f32 %v3250_v37, %v17794_v40 }
 0x8a8   : > { %v16057_v45 = vpack.i.bf16 %v3256_v36, %v3255_v35  ;;  %v3211_v50 = vsel %vm2011_vm5, %v3210_v49, %v3207_v47  ;;  %v3214_v53 = vsel %vm2011_vm5, %v3207_v47, %v3210_v49  ;;  %v3229_v12 = vsel %vm1213_vm14, %v3228_v26, %v3226_v48  ;;  %v16594_v47 = vld [vmem:[%s21421_s11 + $0x20] sm:$0xff]   ;;  %v16596_v49 = vld [vmem:[%s21421_s11 + $0x30] sm:$0xff]  }
 0x8a9   : > { %16048 = vrot.lane.b32.xlu1 %v16047_v38, %s21471_s1  ;;  %16053 = vrot.lane.b32.xlu0 %v16052_v39, %s21471_s1  ;;  %v16062_v46 = vpack.i.bf16 %v3252_v44, %v3251_v5  ;;  %v3232_v17 = vsel %vm1213_vm14, %v3226_v48, %v3228_v26  ;;  %v3215_v52 = vmul.f32 %v3214_v53, %v17867_v20  ;;  %v16591_v38 = vld [vmem:[%s21420_s10 + $0x228] sm:$0xff]   ;;  %v16592_v39 = vld [vmem:[%s21420_s10 + $0x230] sm:$0xff]  }
 0x8aa   : > { %v3216_v55 = vmul.f32 %v3211_v50, %v17861_v15  ;;  %v3233_v57 = vmul.f32 %v3232_v17, %v17863_v16  ;;  %v3234_v13 = vmul.f32 %v3229_v12, %v17859_v14  ;;  %v3253_v4 = vmul.f32 %v3211_v50, %v17865_v19  ;;  %v16593_v5 = vld [vmem:[%s21420_s10 + $0x238] sm:$0xff]   ;;  %v16595_v48 = vld [vmem:[%s21421_s11 + $0x28] sm:$0xff]  }
 0x8ab   : > { %v3254_v22 = vmul.f32 %v3214_v53, %v17897_v6  ;;  %v3257_v44 = vmul.f32 %v3229_v12, %v17902_v43  ;;  %v16597_v26 = vld [vmem:[%s21421_s11 + $0x38] sm:$0xff]  }
 0x8ad   : > { %16058 = vrot.lane.b32.xlu1 %v16057_v45, %s21471_s1  ;;  %16063 = vrot.lane.b32.xlu0 %v16062_v46, %s21471_s1  ;;  %v3258_v45 = vmul.f32 %v3232_v17, %v17899_v42 }
 0x8af   : > { %v3376_v46 = vpack.c.bf16 %v3258_v45, %v3257_v44  ;;  %v16612_v44 = vld [vmem:[%s21420_s10 + $0x2a0] sm:$0xff]   ;;  %v16615_v45 = vld [vmem:[%s21420_s10 + $0x2d8] sm:$0xff]  }
 0x91b   : > { %v16049_v54 = vpop.permute.xlu1 %16048  ;;  %v16054_v56 = vpop.permute.xlu0 %16053 }
 0x91c   : > { %v16051_v59 = vunpack.i.h.bf16 %v16049_v54  ;;  %v16050_v51 = vunpack.i.l.bf16 %v16049_v54  ;;  %v16056_v58 = vunpack.i.h.bf16 %v16054_v56  ;;  %v16055_v60 = vunpack.i.l.bf16 %v16054_v56 }
 0x91e   : > { %v3291_v61 = vsel %vm1072_vm6, %v3215_v52, %v16055_v60  ;;  %v3292_v63 = vsel %vm1072_vm6, %v3216_v55, %v16056_v58  ;;  %v3293_v0 = vsel %vm1072_vm6, %v3233_v57, %v16050_v51  ;;  %v3294_v21 = vsel %vm1072_vm6, %v3234_v13, %v16051_v59 }
 0x91f   : > { %v16059_v23 = vpop.permute.xlu1 %16058  ;;  %v16064_v27 = vpop.permute.xlu0 %16063  ;;  %v3373_v9 = vpack.c.bf16 %v3294_v21, %v3293_v0  ;;  %v3372_v29 = vpack.c.bf16 %v3292_v63, %v3291_v61 }
 0x920   : > { %v16061_v31 = vunpack.i.h.bf16 %v16059_v23  ;;  %v16060_v32 = vunpack.i.l.bf16 %v16059_v23  ;;  %v16066_v10 = vunpack.i.h.bf16 %v16064_v27  ;;  %v16065_v33 = vunpack.i.l.bf16 %v16064_v27 }
 0x921   : > { %3628 = vmatprep.mubr.bf16.mxu0 %v3373_v9 }
 0x922   : > { %v3296_v34 = vsel %vm1072_vm6, %v18204_v62, %v16066_v10  ;;  %v3295_v28 = vsel %vm1072_vm6, %v18189_v25, %v16065_v33  ;;  %3629 = vmatmul.mubr.bf16.vlgmr.msra.gmra.mrb[48].mxu0 %v3372_v29  ;;  %v3297_v35 = vsel %vm1072_vm6, %v3253_v4, %v16060_v32  ;;  %v3298_v36 = vsel %vm1072_vm6, %v3254_v22, %v16061_v31  ;;  %v16598_v4 = vld [vmem:[%s21420_s10 + $0x280] sm:$0xff]   ;;  %v16600_v31 = vld [vmem:[%s21420_s10 + $0x288] sm:$0xff]  }
 0x923   : > { %15388 = vmatpush3.bf16.msra.mxu0 %v16589_v30  ;;  %v3375_v24 = vpack.c.bf16 %v3298_v36, %v3297_v35  ;;  %v3374_v37 = vpack.c.bf16 %v3296_v34, %v3295_v28  ;;  %15395 = vmatprep.mubr.msk.bf16.mxu0 %vm17134_vm2, %v17133_v1  ;;  %v16599_v22 = vld [vmem:[%s21420_s10 + $0x240] sm:$0xff]   ;;  %v16606_v33 = vld [vmem:[%s21420_s10 + $0x308] sm:$0xff]   ;;  %v16604_v28 = vld [vmem:[%s21420_s10 + $0x290] sm:$0xff]  }
 0x924   : > { %15389 = vmatprep.subr.bf16.mxu0 %v17133_v1  ;;  %v16602_v32 = vld [vmem:[%s21420_s10 + $0x300] sm:$0xff]   ;;  %v16601_v34 = vld [vmem:[%s21420_s10 + $0x248] sm:$0xff]   ;;  %v16610_v36 = vld [vmem:[%s21420_s10 + $0x310] sm:$0xff]  }
 0x925   : > { %3669 = vmatprep.mubr.bf16.mxu1 %v3375_v24  ;;  %v16603_v10 = vld [vmem:[%s21420_s10 + $0x2c0] sm:$0xff]   ;;  %v16607_v35 = vld [vmem:[%s21420_s10 + $0x2c8] sm:$0xff]   ;;  %v16605_v24 = vld [vmem:[%s21420_s10 + $0x250] sm:$0xff]  }
 0x926   : > { %3670 = vmatmul.mubr.bf16.vlgmr.msra.gmra.mrb[36].mxu1 %v3374_v37  ;;  %v16608_v37 = vld [vmem:[%s21420_s10 + $0x298] sm:$0xff]  }
 0x927   : > { %15390 = vmatpush3.bf16.msra.mxu0 %v16591_v38  ;;  %15407 = vmatprep.mubr.msk.bf16.mxu1 %vm17134_vm2, %v17133_v1  ;;  %v16611_v38 = vld [vmem:[%s21420_s10 + $0x2d0] sm:$0xff]  }
 0x928   : > { %15391 = vmatprep.subr.bf16.mxu0 %v17133_v1  ;;  %15400 = vmatpush3.bf16.msra.mxu1 %v16594_v47  ;;  %v16613_v47 = vld [vmem:[%s21420_s10 + $0x260] sm:$0xff]  }
 0x929   : > { %15401 = vmatprep.subr.bf16.mxu1 %v17133_v1 }
 0x92b   : > { %15392 = vmatpush3.bf16.msra.mxu0 %v16592_v39  ;;  %v16614_v39 = vld [vmem:[%s21420_s10 + $0x318] sm:$0xff]  }
 0x92c   : > { %15393 = vmatprep.subr.bf16.mxu0 %v17133_v1  ;;  %15402 = vmatpush3.bf16.msra.mxu1 %v16595_v48  ;;  %v16616_v48 = vld [vmem:[%s21420_s10 + $0x2a8] sm:$0xff]  }
 0x92d   : > { %15403 = vmatprep.subr.bf16.mxu1 %v17133_v1 }
 0x92f   : > { %15394 = vmatpush3.bf16.msra.mxu0 %v16593_v5  ;;  %v16609_v5 = vld [vmem:[%s21420_s10 + $0x258] sm:$0xff]  }
 0x930   : > { %15404 = vmatpush3.bf16.msra.mxu1 %v16596_v49  ;;  %14538 = vmatprep.subr.bf16.mxu0 %v16598_v4  ;;  %v16619_v49 = vld [vmem:[%s21420_s10 + $0x2e0] sm:$0xff]  }
 0x931   : > { %15405 = vmatprep.subr.bf16.mxu1 %v17133_v1 }
 0x932   : > { %15396 = vmatmul.mubr.msk.bf16.vlgmr.msra.gmra.mrb[52].mxu0 %vm1072_vm6, %v3376_v46  ;;  %v16618_v46 = vld [vmem:[%s21420_s10 + $0x320] sm:$0xff]  }
 0x933   : > { %14539 = vmatpush3.bf16.msra.mxu0 %v16599_v22 }
 0x934   : > { %15406 = vmatpush3.bf16.msra.mxu1 %v16597_v26  ;;  %14540 = vmatprep.subr.bf16.mxu0 %v16600_v31  ;;  %v16622_v26 = vld [vmem:[%s21420_s10 + $0x328] sm:$0xff]  }
 0x935   : > { %14560 = vmatprep.subr.bf16.mxu1 %v16602_v32 }
 0x937   : > { %14541 = vmatpush3.bf16.msra.mxu0 %v16601_v34 }
 0x938   : > { %14542 = vmatprep.subr.bf16.mxu0 %v16604_v28 }
 0x93b   : > { %14543 = vmatpush3.bf16.msra.mxu0 %v16605_v24 }
 0x93c   : > { %14544 = vmatprep.subr.bf16.mxu0 %v16608_v37 }
 0x93f   : > { %14545 = vmatpush3.bf16.msra.mxu0 %v16609_v5 }
 0x940   : > { %14546 = vmatprep.subr.bf16.mxu0 %v16612_v44 }
 0x943   : > { %14547 = vmatpush3.bf16.msra.mxu0 %v16613_v47 }
 0x944   : > { %14548 = vmatprep.subr.bf16.mxu0 %v16616_v48 }
 0x9f5   : > { %v14500_v50 = vpop.f32.mrb[48].mxu0 }
 0x9f6   : > { %v14501_v53 = vpop.f32.mrb[49].mxu0 }
 0x9f7   : > { %v14502_v12 = vadd.f32 %v14501_v53, %v14500_v50  ;;  %v14503_v17 = vpop.f32.mrb[50].mxu0  ;;  %v16617_v50 = vld [vmem:[%s21420_s10 + $0x268] sm:$0xff]   ;;  %v16620_v53 = vld [vmem:[%s21420_s10 + $0x2b0] sm:$0xff]  }
 0x9f8   : > { %v14504_v54 = vpop.f32.mrb[51].mxu0  ;;  %14549 = vmatpush3.bf16.msra.mxu0 %v16617_v50 }
 0x9f9   : > { %v14505_v56 = vadd.f32 %v14504_v54, %v14503_v17  ;;  %v14522_v52 = vpop.f32.mrb[36].mxu1  ;;  %v16621_v17 = vld [vmem:[%s21420_s10 + $0x270] sm:$0xff]   ;;  %14550 = vmatprep.subr.bf16.mxu0 %v16620_v53 }
 0x9fa   : > { %v14523_v55 = vpop.f32.mrb[37].mxu1 }
 0x9fb   : > { %v14524_v57 = vadd.f32 %v14523_v55, %v14522_v52  ;;  %v14525_v13 = vpop.f32.mrb[38].mxu1  ;;  %v16624_v55 = vld [vmem:[%s21420_s10 + $0x2b8] sm:$0xff]  }
 0x9fc   : > { %v14526_v59 = vpop.f32.mrb[39].mxu1  ;;  %14551 = vmatpush3.bf16.msra.mxu0 %v16621_v17 }
 0x9fd   : > { %v14527_v51 = vadd.f32 %v14526_v59, %v14525_v13  ;;  %v3672_v58 = vadd.f32 %v14524_v57, %v14502_v12  ;;  %v16623_v12 = vld [vmem:[%s21420_s10 + $0x2e8] sm:$0xff]   ;;  %v16625_v57 = vld [vmem:[%s21420_s10 + $0x278] sm:$0xff]   ;;  %v16626_v13 = vld [vmem:[%s21420_s10 + $0x330] sm:$0xff]   ;;  %14552 = vmatprep.subr.bf16.mxu0 %v16624_v55 }
 0x9ff   : > { %v3675_v60 = vadd.f32 %v14527_v51, %v14505_v56  ;;  %v16627_v51 = vld [vmem:[%s21420_s10 + $0x2f0] sm:$0xff]  }
 0xa00   : > { %14553 = vmatpush3.bf16.msra.mxu0 %v16625_v57 }
 0xa01   : > { %15411 = vmatprep.subr.bf16.mxu0 %v17133_v1 }
 0xa05   : > { %v3712_v61 = vpop.f32.mrb[52].mxu0 }
 0xa06   : > { %v3713_v63 = vadd.f32 %v3712_v61, %v3672_v58  ;;  %v15397_v0 = vpop.f32.mrb[53].mxu0 }
 0xa07   : > { %v3715_v21 = vpop.f32.mrb[54].mxu0 }
 0xa08   : > { %v3716_v23 = vadd.f32 %v3715_v21, %v3675_v60  ;;  %v15398_v27 = vpop.f32.mrb[55].mxu0  ;;  %v3719_v9 = vmax.f32 %v3713_v63, 0.0 }
 0xa09   : > { %v16630_v27 = vld [vmem:[%s21420_s10 + $0x2f8] sm:$0xff]  }
 0xa0a   : > { %v3720_v29 = vmax.f32 %v3716_v23, 0.0 }
 0xa0c   : > { %v3730_v30 = vpack.c.bf16 %v3720_v29, %v3719_v9 }
 0xa0e   : > { %15408 = vmatmul.mubr.msk.bf16.vlgmr.msra.gmra.mrb[40].mxu1 %vm1072_vm6, %v3730_v30 }
 0xa0f   : > { %14561 = vmatpush3.bf16.msra.mxu1 %v16603_v10 }
 0xa10   : > { %14562 = vmatprep.subr.bf16.mxu1 %v16606_v33 }
 0xa13   : > { %14563 = vmatpush3.bf16.msra.mxu1 %v16607_v35 }
 0xa14   : > { %14564 = vmatprep.subr.bf16.mxu1 %v16610_v36 }
 0xa17   : > { %14565 = vmatpush3.bf16.msra.mxu1 %v16611_v38 }
 0xa18   : > { %14566 = vmatprep.subr.bf16.mxu1 %v16614_v39 }
 0xa1b   : > { %14567 = vmatpush3.bf16.msra.mxu1 %v16615_v45 }
 0xa1c   : > { %14568 = vmatprep.subr.bf16.mxu1 %v16618_v46 }
 0xa1f   : > { %14569 = vmatpush3.bf16.msra.mxu1 %v16619_v49 }
 0xa20   : > { %14570 = vmatprep.subr.bf16.mxu1 %v16622_v26 }
 0xa23   : > { %14571 = vmatpush3.bf16.msra.mxu1 %v16623_v12 }
 0xa24   : > { %14572 = vmatprep.subr.bf16.mxu1 %v16626_v13 }
 0xa27   : > { %14573 = vmatpush3.bf16.msra.mxu1 %v16627_v51 }
 0xae1   : > { %v3792_v54 = vpop.f32.mrb[40].mxu1 }
 0xae2   : > { %v18379_v56 = vadd.f32 %v3792_v54, %v18189_v25  ;;  %v15409_v52 = vpop.f32.mrb[41].mxu1 }
 0xae3   : > { %v3795_v59 = vpop.f32.mrb[42].mxu1 }
 0xae4   : > { %v18394_v25 = vadd.f32 %v3795_v59, %v18204_v62  ;;  %v15410_v58 = vpop.f32.mrb[43].mxu1  ;;  %v3832_v60 = vrot.slane %v18379_v56, 7  ;;  %v3814_v0 = vrot.slane %v18379_v56, 4  ;;  %v16628_v62 = vld [vmem:[%s21420_s10 + $0x338] sm:$0xff]   ;;  %v3839_v23 = vrot.slane %v18379_v56, 1 }
 0xae5   : > { %14574 = vmatprep.subr.bf16.mxu1 %v16628_v62  ;;  %v3805_v46 = vrot.slane %v18379_v56, 3  ;;  %v3823_v47 = vrot.slane %v18379_v56, 5 }
 0xae6   : > { %v3830_v61 = vrot.slane %v18394_v25, 7  ;;  %v3812_v63 = vrot.slane %v18394_v25, 4  ;;  %v3840_v21 = vrot.slane %v18394_v25, 1  ;;  %14575 = vmatpush3.bf16.msra.mxu1 %v16630_v27  ;;  %v3802_v44 = vrot.slane %v18394_v25, 3  ;;  %v16629_v27 = vld [vmem:[%s21420_s10 + $0x340] sm:$0xff]  }
 0xae7   : > { %15423 = vmatprep.subr.bf16.mxu1 %v17133_v1  ;;  %v3821_v45 = vrot.slane %v18394_v25, 5 }
 0xae8   : > { %v3833_v9 = vsel %vm1960_vm12, %v3832_v60, %v3830_v61  ;;  %v3836_v29 = vsel %vm1960_vm12, %v3830_v61, %v3832_v60  ;;  %v3815_v30 = vsel %vm1214_vm15, %v3814_v0, %v3812_v63  ;;  %v3818_v4 = vsel %vm1214_vm15, %v3812_v63, %v3814_v0 }
 0xae9   : > { %v3837_v22 = vmul.f32 %v3836_v29, %v17738_v2  ;;  %v3838_v31 = vmul.f32 %v3833_v9, %v17740_v3  ;;  %v3819_v32 = vmul.f32 %v3818_v4, %v17744_v8  ;;  %v3820_v10 = vmul.f32 %v3815_v30, %v17742_v7 }
 0xaea   : > { %v3850_v33 = vmul.f32 %v3815_v30, %v17762_v18  ;;  %v3851_v34 = vmul.f32 %v3818_v4, %v17749_v11  ;;  %v3841_v28 = vsel %vm875_vm0, %v3839_v23, %v3840_v21  ;;  %v3845_v35 = vsel %vm875_vm0, %v3840_v21, %v3839_v23 }
 0xaeb   : > { %v16067_v36 = vpack.i.bf16 %v3838_v31, %v3837_v22  ;;  %v16072_v24 = vpack.i.bf16 %v3820_v10, %v3819_v32  ;;  %v3846_v37 = vmul.f32 %v3841_v28, %v17796_v41  ;;  %v3847_v38 = vmul.f32 %v3845_v35, %v17794_v40 }
 0xaec   : > { %v16077_v39 = vpack.i.bf16 %v3851_v34, %v3850_v33  ;;  %v3806_v48 = vsel %vm2011_vm5, %v3805_v46, %v3802_v44  ;;  %v3809_v49 = vsel %vm2011_vm5, %v3802_v44, %v3805_v46  ;;  %v3824_v26 = vsel %vm1213_vm14, %v3823_v47, %v3821_v45  ;;  %v16634_v44 = vld [vmem:[%s21421_s11 + $0x40] sm:$0xff]   ;;  %v16636_v46 = vld [vmem:[%s21421_s11 + $0x50] sm:$0xff]  }
 0xaed   : > { %16068 = vrot.lane.b32.xlu1 %v16067_v36, %s21471_s1  ;;  %16073 = vrot.lane.b32.xlu0 %v16072_v24, %s21471_s1  ;;  %v16082_v5 = vpack.i.bf16 %v3847_v38, %v3846_v37  ;;  %v3827_v50 = vsel %vm1213_vm14, %v3821_v45, %v3823_v47  ;;  %v3810_v17 = vmul.f32 %v3809_v49, %v17867_v20  ;;  %v16631_v36 = vld [vmem:[%s21420_s10 + $0x348] sm:$0xff]   ;;  %v16632_v24 = vld [vmem:[%s21420_s10 + $0x350] sm:$0xff]  }
 0xaee   : > { %v3811_v54 = vmul.f32 %v3806_v48, %v17861_v15  ;;  %v3828_v52 = vmul.f32 %v3827_v50, %v17863_v16  ;;  %v3829_v55 = vmul.f32 %v3824_v26, %v17859_v14  ;;  %v3848_v9 = vmul.f32 %v3806_v48, %v17865_v19  ;;  %v16633_v37 = vld [vmem:[%s21420_s10 + $0x358] sm:$0xff]   ;;  %v16635_v45 = vld [vmem:[%s21421_s11 + $0x48] sm:$0xff]  }
 0xaef   : > { %v3849_v29 = vmul.f32 %v3809_v49, %v17897_v6  ;;  %v3852_v38 = vmul.f32 %v3824_v26, %v17902_v43  ;;  %v16637_v47 = vld [vmem:[%s21421_s11 + $0x58] sm:$0xff]  }
 0xaf1   : > { %16078 = vrot.lane.b32.xlu1 %v16077_v39, %s21471_s1  ;;  %16083 = vrot.lane.b32.xlu0 %v16082_v5, %s21471_s1  ;;  %v3853_v39 = vmul.f32 %v3827_v50, %v17899_v42 }
 0xaf3   : > { %v3971_v5 = vpack.c.bf16 %v3853_v39, %v3852_v38  ;;  %v16652_v38 = vld [vmem:[%s21420_s10 + $0x3c0] sm:$0xff]   ;;  %v16655_v39 = vld [vmem:[%s21420_s10 + $0x3f8] sm:$0xff]  }
 0xb5f   : > { %v16069_v53 = vpop.permute.xlu1 %16068  ;;  %v16074_v12 = vpop.permute.xlu0 %16073 }
 0xb60   : > { %v16071_v57 = vunpack.i.h.bf16 %v16069_v53  ;;  %v16070_v13 = vunpack.i.l.bf16 %v16069_v53  ;;  %v16076_v59 = vunpack.i.h.bf16 %v16074_v12  ;;  %v16075_v51 = vunpack.i.l.bf16 %v16074_v12 }
 0xb62   : > { %v3886_v58 = vsel %vm1072_vm6, %v3810_v17, %v16075_v51  ;;  %v3887_v60 = vsel %vm1072_vm6, %v3811_v54, %v16076_v59  ;;  %v3888_v61 = vsel %vm1072_vm6, %v3828_v52, %v16070_v13  ;;  %v3889_v63 = vsel %vm1072_vm6, %v3829_v55, %v16071_v57 }
 0xb63   : > { %v16079_v0 = vpop.permute.xlu1 %16078  ;;  %v16084_v21 = vpop.permute.xlu0 %16083  ;;  %v3968_v62 = vpack.c.bf16 %v3889_v63, %v3888_v61  ;;  %v3967_v23 = vpack.c.bf16 %v3887_v60, %v3886_v58 }
 0xb64   : > { %v16081_v30 = vunpack.i.h.bf16 %v16079_v0  ;;  %v16080_v4 = vunpack.i.l.bf16 %v16079_v0  ;;  %v16086_v22 = vunpack.i.h.bf16 %v16084_v21  ;;  %v16085_v31 = vunpack.i.l.bf16 %v16084_v21 }
 0xb65   : > { %4223 = vmatprep.mubr.bf16.mxu0 %v3968_v62 }
 0xb66   : > { %v3891_v32 = vsel %vm1072_vm6, %v18394_v25, %v16086_v22  ;;  %v3890_v10 = vsel %vm1072_vm6, %v18379_v56, %v16085_v31  ;;  %4224 = vmatmul.mubr.bf16.vlgmr.msra.gmra.mrb[56].mxu0 %v3967_v23  ;;  %v3892_v33 = vsel %vm1072_vm6, %v3848_v9, %v16080_v4  ;;  %v3893_v34 = vsel %vm1072_vm6, %v3849_v29, %v16081_v30  ;;  %v16638_v9 = vld [vmem:[%s21420_s10 + $0x3a0] sm:$0xff]   ;;  %v16640_v30 = vld [vmem:[%s21420_s10 + $0x3a8] sm:$0xff]  }
 0xb67   : > { %15412 = vmatpush3.bf16.msra.mxu0 %v16629_v27  ;;  %v3970_v28 = vpack.c.bf16 %v3893_v34, %v3892_v33  ;;  %v3969_v35 = vpack.c.bf16 %v3891_v32, %v3890_v10  ;;  %15419 = vmatprep.mubr.msk.bf16.mxu0 %vm17134_vm2, %v17133_v1  ;;  %v16639_v29 = vld [vmem:[%s21420_s10 + $0x360] sm:$0xff]   ;;  %v16646_v31 = vld [vmem:[%s21420_s10 + $0x428] sm:$0xff]   ;;  %v16644_v10 = vld [vmem:[%s21420_s10 + $0x3b0] sm:$0xff]  }
 0xb68   : > { %15413 = vmatprep.subr.bf16.mxu0 %v17133_v1  ;;  %v16642_v4 = vld [vmem:[%s21420_s10 + $0x420] sm:$0xff]   ;;  %v16641_v32 = vld [vmem:[%s21420_s10 + $0x368] sm:$0xff]   ;;  %v16650_v34 = vld [vmem:[%s21420_s10 + $0x430] sm:$0xff]  }
 0xb69   : > { %4264 = vmatprep.mubr.bf16.mxu1 %v3970_v28  ;;  %v16643_v22 = vld [vmem:[%s21420_s10 + $0x3e0] sm:$0xff]   ;;  %v16647_v33 = vld [vmem:[%s21420_s10 + $0x3e8] sm:$0xff]   ;;  %v16645_v28 = vld [vmem:[%s21420_s10 + $0x370] sm:$0xff]  }
 0xb6a   : > { %4265 = vmatmul.mubr.bf16.vlgmr.msra.gmra.mrb[44].mxu1 %v3969_v35  ;;  %v16648_v35 = vld [vmem:[%s21420_s10 + $0x3b8] sm:$0xff]  }
 0xb6b   : > { %15414 = vmatpush3.bf16.msra.mxu0 %v16631_v36  ;;  %15431 = vmatprep.mubr.msk.bf16.mxu1 %vm17134_vm2, %v17133_v1  ;;  %v16651_v36 = vld [vmem:[%s21420_s10 + $0x3f0] sm:$0xff]  }
 0xb6c   : > { %15415 = vmatprep.subr.bf16.mxu0 %v17133_v1  ;;  %15424 = vmatpush3.bf16.msra.mxu1 %v16634_v44  ;;  %v16653_v44 = vld [vmem:[%s21420_s10 + $0x380] sm:$0xff]  }
 0xb6d   : > { %15425 = vmatprep.subr.bf16.mxu1 %v17133_v1 }
 0xb6f   : > { %15416 = vmatpush3.bf16.msra.mxu0 %v16632_v24  ;;  %v16654_v24 = vld [vmem:[%s21420_s10 + $0x438] sm:$0xff]  }
 0xb70   : > { %15417 = vmatprep.subr.bf16.mxu0 %v17133_v1  ;;  %15426 = vmatpush3.bf16.msra.mxu1 %v16635_v45  ;;  %v16656_v45 = vld [vmem:[%s21420_s10 + $0x3c8] sm:$0xff]  }
 0xb71   : > { %15427 = vmatprep.subr.bf16.mxu1 %v17133_v1 }
 0xb73   : > { %15418 = vmatpush3.bf16.msra.mxu0 %v16633_v37  ;;  %v16649_v37 = vld [vmem:[%s21420_s10 + $0x378] sm:$0xff]  }
 0xb74   : > { %15428 = vmatpush3.bf16.msra.mxu1 %v16636_v46  ;;  %14592 = vmatprep.subr.bf16.mxu0 %v16638_v9  ;;  %v16659_v46 = vld [vmem:[%s21420_s10 + $0x400] sm:$0xff]  }
 0xb75   : > { %15429 = vmatprep.subr.bf16.mxu1 %v17133_v1 }
 0xb76   : > { %15420 = vmatmul.mubr.msk.bf16.vlgmr.msra.gmra.mrb[60].mxu0 %vm1072_vm6, %v3971_v5  ;;  %v16658_v5 = vld [vmem:[%s21420_s10 + $0x440] sm:$0xff]  }
 0xb77   : > { %14593 = vmatpush3.bf16.msra.mxu0 %v16639_v29 }
 0xb78   : > { %15430 = vmatpush3.bf16.msra.mxu1 %v16637_v47  ;;  %14594 = vmatprep.subr.bf16.mxu0 %v16640_v30  ;;  %v16662_v47 = vld [vmem:[%s21420_s10 + $0x448] sm:$0xff]  }
 0xb79   : > { %14614 = vmatprep.subr.bf16.mxu1 %v16642_v4 }
 0xb7b   : > { %14595 = vmatpush3.bf16.msra.mxu0 %v16641_v32 }
 0xb7c   : > { %14596 = vmatprep.subr.bf16.mxu0 %v16644_v10 }
 0xb7f   : > { %14597 = vmatpush3.bf16.msra.mxu0 %v16645_v28 }
 0xb80   : > { %14598 = vmatprep.subr.bf16.mxu0 %v16648_v35 }
 0xb83   : > { %14599 = vmatpush3.bf16.msra.mxu0 %v16649_v37 }
 0xb84   : > { %14600 = vmatprep.subr.bf16.mxu0 %v16652_v38 }
 0xb87   : > { %14601 = vmatpush3.bf16.msra.mxu0 %v16653_v44 }
 0xb88   : > { %14602 = vmatprep.subr.bf16.mxu0 %v16656_v45 }
 0xc39   : > { %v14554_v48 = vpop.f32.mrb[56].mxu0 }
 0xc3a   : > { %v14555_v49 = vpop.f32.mrb[57].mxu0 }
 0xc3b   : > { %v14556_v26 = vadd.f32 %v14555_v49, %v14554_v48  ;;  %v14557_v50 = vpop.f32.mrb[58].mxu0  ;;  %v16657_v48 = vld [vmem:[%s21420_s10 + $0x388] sm:$0xff]   ;;  %v16660_v49 = vld [vmem:[%s21420_s10 + $0x3d0] sm:$0xff]  }
 0xc3c   : > { %v14558_v53 = vpop.f32.mrb[59].mxu0  ;;  %14603 = vmatpush3.bf16.msra.mxu0 %v16657_v48 }
 0xc3d   : > { %v14559_v12 = vadd.f32 %v14558_v53, %v14557_v50  ;;  %v14576_v17 = vpop.f32.mrb[44].mxu1  ;;  %v16661_v50 = vld [vmem:[%s21420_s10 + $0x390] sm:$0xff]   ;;  %14604 = vmatprep.subr.bf16.mxu0 %v16660_v49 }
 0xc3e   : > { %v14577_v54 = vpop.f32.mrb[45].mxu1 }
 0xc3f   : > { %v14578_v52 = vadd.f32 %v14577_v54, %v14576_v17  ;;  %v14579_v55 = vpop.f32.mrb[46].mxu1  ;;  %v16664_v54 = vld [vmem:[%s21420_s10 + $0x3d8] sm:$0xff]  }
 0xc40   : > { %v14580_v57 = vpop.f32.mrb[47].mxu1  ;;  %14605 = vmatpush3.bf16.msra.mxu0 %v16661_v50 }
 0xc41   : > { %v14581_v13 = vadd.f32 %v14580_v57, %v14579_v55  ;;  %v4267_v59 = vadd.f32 %v14578_v52, %v14556_v26  ;;  %v16663_v26 = vld [vmem:[%s21420_s10 + $0x408] sm:$0xff]   ;;  %v16665_v52 = vld [vmem:[%s21420_s10 + $0x398] sm:$0xff]   ;;  %v16666_v55 = vld [vmem:[%s21420_s10 + $0x450] sm:$0xff]   ;;  %14606 = vmatprep.subr.bf16.mxu0 %v16664_v54 }
 0xc43   : > { %v4270_v51 = vadd.f32 %v14581_v13, %v14559_v12  ;;  %v16667_v13 = vld [vmem:[%s21420_s10 + $0x410] sm:$0xff]  }
 0xc44   : > { %14607 = vmatpush3.bf16.msra.mxu0 %v16665_v52 }
 0xc45   : > { %15435 = vmatprep.subr.bf16.mxu0 %v17133_v1 }
 0xc49   : > { %v4307_v58 = vpop.f32.mrb[60].mxu0 }
 0xc4a   : > { %v4308_v60 = vadd.f32 %v4307_v58, %v4267_v59  ;;  %v15421_v61 = vpop.f32.mrb[61].mxu0 }
 0xc4b   : > { %v4310_v63 = vpop.f32.mrb[62].mxu0 }
 0xc4c   : > { %v4311_v0 = vadd.f32 %v4310_v63, %v4270_v51  ;;  %v15422_v21 = vpop.f32.mrb[63].mxu0  ;;  %v4314_v62 = vmax.f32 %v4308_v60, 0.0 }
 0xc4d   : > { %v16670_v21 = vld [vmem:[%s21420_s10 + $0x418] sm:$0xff]  }
 0xc4e   : > { %v4315_v23 = vmax.f32 %v4311_v0, 0.0 }
 0xc50   : > { %v4325_v27 = vpack.c.bf16 %v4315_v23, %v4314_v62 }
 0xc52   : > { %15432 = vmatmul.mubr.msk.bf16.vlgmr.msra.gmra.mrb[48].mxu1 %vm1072_vm6, %v4325_v27 }
 0xc53   : > { %14615 = vmatpush3.bf16.msra.mxu1 %v16643_v22 }
 0xc54   : > { %14616 = vmatprep.subr.bf16.mxu1 %v16646_v31 }
 0xc57   : > { %14617 = vmatpush3.bf16.msra.mxu1 %v16647_v33 }
 0xc58   : > { %14618 = vmatprep.subr.bf16.mxu1 %v16650_v34 }
 0xc5b   : > { %14619 = vmatpush3.bf16.msra.mxu1 %v16651_v36 }
 0xc5c   : > { %14620 = vmatprep.subr.bf16.mxu1 %v16654_v24 }
 0xc5f   : > { %14621 = vmatpush3.bf16.msra.mxu1 %v16655_v39 }
 0xc60   : > { %14622 = vmatprep.subr.bf16.mxu1 %v16658_v5 }
 0xc63   : > { %14623 = vmatpush3.bf16.msra.mxu1 %v16659_v46 }
 0xc64   : > { %14624 = vmatprep.subr.bf16.mxu1 %v16662_v47 }
 0xc67   : > { %14625 = vmatpush3.bf16.msra.mxu1 %v16663_v26 }
 0xc68   : > { %14626 = vmatprep.subr.bf16.mxu1 %v16666_v55 }
 0xc6b   : > { %14627 = vmatpush3.bf16.msra.mxu1 %v16667_v13 }
 0xd25   : > { %v4387_v53 = vpop.f32.mrb[48].mxu1 }
 0xd26   : > { %v18569_v12 = vadd.f32 %v4387_v53, %v18379_v56  ;;  %v15433_v17 = vpop.f32.mrb[49].mxu1 }
 0xd27   : > { %v4390_v57 = vpop.f32.mrb[50].mxu1 }
 0xd28   : > { %v18584_v56 = vadd.f32 %v4390_v57, %v18394_v25  ;;  %v15434_v59 = vpop.f32.mrb[51].mxu1  ;;  %v4427_v51 = vrot.slane %v18569_v12, 7  ;;  %v4409_v61 = vrot.slane %v18569_v12, 4  ;;  %v16668_v25 = vld [vmem:[%s21420_s10 + $0x458] sm:$0xff]   ;;  %v4434_v0 = vrot.slane %v18569_v12, 1 }
 0xd29   : > { %14628 = vmatprep.subr.bf16.mxu1 %v16668_v25  ;;  %v4400_v5 = vrot.slane %v18569_v12, 3  ;;  %v4418_v44 = vrot.slane %v18569_v12, 5 }
 0xd2a   : > { %v4425_v58 = vrot.slane %v18584_v56, 7  ;;  %v4407_v60 = vrot.slane %v18584_v56, 4  ;;  %v4435_v63 = vrot.slane %v18584_v56, 1  ;;  %14629 = vmatpush3.bf16.msra.mxu1 %v16670_v21  ;;  %v4397_v38 = vrot.slane %v18584_v56, 3  ;;  %v16669_v21 = vld [vmem:[%s21420_s10 + $0x460] sm:$0xff]  }
 0xd2b   : > { %15447 = vmatprep.subr.bf16.mxu1 %v17133_v1  ;;  %v4416_v39 = vrot.slane %v18584_v56, 5 }
 0xd2c   : > { %v4428_v62 = vsel %vm1960_vm12, %v4427_v51, %v4425_v58  ;;  %v4431_v23 = vsel %vm1960_vm12, %v4425_v58, %v4427_v51  ;;  %v4410_v27 = vsel %vm1214_vm15, %v4409_v61, %v4407_v60  ;;  %v4413_v9 = vsel %vm1214_vm15, %v4407_v60, %v4409_v61 }
 0xd2d   : > { %v4432_v29 = vmul.f32 %v4431_v23, %v17738_v2  ;;  %v4433_v30 = vmul.f32 %v4428_v62, %v17740_v3  ;;  %v4414_v4 = vmul.f32 %v4413_v9, %v17744_v8  ;;  %v4415_v22 = vmul.f32 %v4410_v27, %v17742_v7 }
 0xd2e   : > { %v4445_v31 = vmul.f32 %v4410_v27, %v17762_v18  ;;  %v4446_v32 = vmul.f32 %v4413_v9, %v17749_v11  ;;  %v4436_v10 = vsel %vm875_vm0, %v4434_v0, %v4435_v63  ;;  %v4440_v33 = vsel %vm875_vm0, %v4435_v63, %v4434_v0 }
 0xd2f   : > { %v16087_v34 = vpack.i.bf16 %v4433_v30, %v4432_v29  ;;  %v16092_v28 = vpack.i.bf16 %v4415_v22, %v4414_v4  ;;  %v4441_v35 = vmul.f32 %v4436_v10, %v17796_v41  ;;  %v4442_v36 = vmul.f32 %v4440_v33, %v17794_v40 }
 0xd30   : > { %v16097_v24 = vpack.i.bf16 %v4446_v32, %v4445_v31  ;;  %v4401_v45 = vsel %vm2011_vm5, %v4400_v5, %v4397_v38  ;;  %v4404_v46 = vsel %vm2011_vm5, %v4397_v38, %v4400_v5  ;;  %v4419_v47 = vsel %vm1213_vm14, %v4418_v44, %v4416_v39  ;;  %v16674_v38 = vld [vmem:[%s21421_s11 + $0x60] sm:$0xff]   ;;  %v16676_v5 = vld [vmem:[%s21421_s11 + $0x70] sm:$0xff]  }
 0xd31   : > { %16088 = vrot.lane.b32.xlu1 %v16087_v34, %s21471_s1  ;;  %16093 = vrot.lane.b32.xlu0 %v16092_v28, %s21471_s1  ;;  %v16102_v37 = vpack.i.bf16 %v4442_v36, %v4441_v35  ;;  %v4422_v48 = vsel %vm1213_vm14, %v4416_v39, %v4418_v44  ;;  %v4405_v50 = vmul.f32 %v4404_v46, %v17867_v20  ;;  %v16671_v34 = vld [vmem:[%s21420_s10 + $0x468] sm:$0xff]   ;;  %v16672_v28 = vld [vmem:[%s21420_s10 + $0x470] sm:$0xff]  }
 0xd32   : > { %v4406_v53 = vmul.f32 %v4401_v45, %v17861_v15  ;;  %v4423_v17 = vmul.f32 %v4422_v48, %v17863_v16  ;;  %v4424_v54 = vmul.f32 %v4419_v47, %v17859_v14  ;;  %v4443_v62 = vmul.f32 %v4401_v45, %v17865_v19  ;;  %v16673_v35 = vld [vmem:[%s21420_s10 + $0x478] sm:$0xff]   ;;  %v16675_v39 = vld [vmem:[%s21421_s11 + $0x68] sm:$0xff]  }
 0xd33   : > { %v4444_v23 = vmul.f32 %v4404_v46, %v17897_v6  ;;  %v4447_v36 = vmul.f32 %v4419_v47, %v17902_v43  ;;  %v16677_v44 = vld [vmem:[%s21421_s11 + $0x78] sm:$0xff]  }
 0xd35   : > { %16098 = vrot.lane.b32.xlu1 %v16097_v24, %s21471_s1  ;;  %16103 = vrot.lane.b32.xlu0 %v16102_v37, %s21471_s1  ;;  %v4448_v24 = vmul.f32 %v4422_v48, %v17899_v42 }
 0xd37   : > { %v4566_v37 = vpack.c.bf16 %v4448_v24, %v4447_v36  ;;  %v16692_v36 = vld [vmem:[%s21420_s10 + $0x4e0] sm:$0xff]   ;;  %v16695_v24 = vld [vmem:[%s21420_s10 + $0x518] sm:$0xff]  }
 0xda3   : > { %v16089_v49 = vpop.permute.xlu1 %16088  ;;  %v16094_v26 = vpop.permute.xlu0 %16093 }
 0xda4   : > { %v16091_v52 = vunpack.i.h.bf16 %v16089_v49  ;;  %v16090_v55 = vunpack.i.l.bf16 %v16089_v49  ;;  %v16096_v57 = vunpack.i.h.bf16 %v16094_v26  ;;  %v16095_v13 = vunpack.i.l.bf16 %v16094_v26 }
 0xda6   : > { %v4481_v59 = vsel %vm1072_vm6, %v4405_v50, %v16095_v13  ;;  %v4482_v51 = vsel %vm1072_vm6, %v4406_v53, %v16096_v57  ;;  %v4483_v58 = vsel %vm1072_vm6, %v4423_v17, %v16090_v55  ;;  %v4484_v60 = vsel %vm1072_vm6, %v4424_v54, %v16091_v52 }
 0xda7   : > { %v16099_v61 = vpop.permute.xlu1 %16098  ;;  %v16104_v63 = vpop.permute.xlu0 %16103  ;;  %v4563_v25 = vpack.c.bf16 %v4484_v60, %v4483_v58  ;;  %v4562_v0 = vpack.c.bf16 %v4482_v51, %v4481_v59 }
 0xda8   : > { %v16101_v27 = vunpack.i.h.bf16 %v16099_v61  ;;  %v16100_v9 = vunpack.i.l.bf16 %v16099_v61  ;;  %v16106_v29 = vunpack.i.h.bf16 %v16104_v63  ;;  %v16105_v30 = vunpack.i.l.bf16 %v16104_v63 }
 0xda9   : > { %4818 = vmatprep.mubr.bf16.mxu0 %v4563_v25 }
 0xdaa   : > { %v4486_v4 = vsel %vm1072_vm6, %v18584_v56, %v16106_v29  ;;  %v4485_v22 = vsel %vm1072_vm6, %v18569_v12, %v16105_v30  ;;  %4819 = vmatmul.mubr.bf16.vlgmr.msra.gmra.mrb[64].mxu0 %v4562_v0  ;;  %v4487_v31 = vsel %vm1072_vm6, %v4443_v62, %v16100_v9  ;;  %v4488_v32 = vsel %vm1072_vm6, %v4444_v23, %v16101_v27  ;;  %v16678_v62 = vld [vmem:[%s21420_s10 + $0x4c0] sm:$0xff]   ;;  %v16680_v27 = vld [vmem:[%s21420_s10 + $0x4c8] sm:$0xff]  }
 0xdab   : > { %15436 = vmatpush3.bf16.msra.mxu0 %v16669_v21  ;;  %v4565_v10 = vpack.c.bf16 %v4488_v32, %v4487_v31  ;;  %v4564_v33 = vpack.c.bf16 %v4486_v4, %v4485_v22  ;;  %15443 = vmatprep.mubr.msk.bf16.mxu0 %vm17134_vm2, %v17133_v1  ;;  %v16679_v23 = vld [vmem:[%s21420_s10 + $0x480] sm:$0xff]   ;;  %v16686_v30 = vld [vmem:[%s21420_s10 + $0x548] sm:$0xff]   ;;  %v16684_v22 = vld [vmem:[%s21420_s10 + $0x4d0] sm:$0xff]  }
 0xdac   : > { %15437 = vmatprep.subr.bf16.mxu0 %v17133_v1  ;;  %v16682_v9 = vld [vmem:[%s21420_s10 + $0x540] sm:$0xff]   ;;  %v16681_v4 = vld [vmem:[%s21420_s10 + $0x488] sm:$0xff]   ;;  %v16690_v32 = vld [vmem:[%s21420_s10 + $0x550] sm:$0xff]  }
 0xdad   : > { %4859 = vmatprep.mubr.bf16.mxu1 %v4565_v10  ;;  %v16683_v29 = vld [vmem:[%s21420_s10 + $0x500] sm:$0xff]   ;;  %v16687_v31 = vld [vmem:[%s21420_s10 + $0x508] sm:$0xff]   ;;  %v16685_v10 = vld [vmem:[%s21420_s10 + $0x490] sm:$0xff]  }
 0xdae   : > { %4860 = vmatmul.mubr.bf16.vlgmr.msra.gmra.mrb[52].mxu1 %v4564_v33  ;;  %v16688_v33 = vld [vmem:[%s21420_s10 + $0x4d8] sm:$0xff]  }
 0xdaf   : > { %15438 = vmatpush3.bf16.msra.mxu0 %v16671_v34  ;;  %15455 = vmatprep.mubr.msk.bf16.mxu1 %vm17134_vm2, %v17133_v1  ;;  %v16691_v34 = vld [vmem:[%s21420_s10 + $0x510] sm:$0xff]  }
 0xdb0   : > { %15439 = vmatprep.subr.bf16.mxu0 %v17133_v1  ;;  %15448 = vmatpush3.bf16.msra.mxu1 %v16674_v38  ;;  %v16693_v38 = vld [vmem:[%s21420_s10 + $0x4a0] sm:$0xff]  }
 0xdb1   : > { %15449 = vmatprep.subr.bf16.mxu1 %v17133_v1 }
 0xdb3   : > { %15440 = vmatpush3.bf16.msra.mxu0 %v16672_v28  ;;  %v16694_v28 = vld [vmem:[%s21420_s10 + $0x558] sm:$0xff]  }
 0xdb4   : > { %15441 = vmatprep.subr.bf16.mxu0 %v17133_v1  ;;  %15450 = vmatpush3.bf16.msra.mxu1 %v16675_v39  ;;  %v16696_v39 = vld [vmem:[%s21420_s10 + $0x4e8] sm:$0xff]  }
 0xdb5   : > { %15451 = vmatprep.subr.bf16.mxu1 %v17133_v1 }
 0xdb7   : > { %15442 = vmatpush3.bf16.msra.mxu0 %v16673_v35  ;;  %v16689_v35 = vld [vmem:[%s21420_s10 + $0x498] sm:$0xff]  }
 0xdb8   : > { %15452 = vmatpush3.bf16.msra.mxu1 %v16676_v5  ;;  %14646 = vmatprep.subr.bf16.mxu0 %v16678_v62  ;;  %v16699_v5 = vld [vmem:[%s21420_s10 + $0x520] sm:$0xff]  }
 0xdb9   : > { %15453 = vmatprep.subr.bf16.mxu1 %v17133_v1 }
 0xdba   : > { %15444 = vmatmul.mubr.msk.bf16.vlgmr.msra.gmra.mrb[68].mxu0 %vm1072_vm6, %v4566_v37  ;;  %v16698_v37 = vld [vmem:[%s21420_s10 + $0x560] sm:$0xff]  }
 0xdbb   : > { %14647 = vmatpush3.bf16.msra.mxu0 %v16679_v23 }
 0xdbc   : > { %15454 = vmatpush3.bf16.msra.mxu1 %v16677_v44  ;;  %14648 = vmatprep.subr.bf16.mxu0 %v16680_v27  ;;  %v16702_v44 = vld [vmem:[%s21420_s10 + $0x568] sm:$0xff]  }
 0xdbd   : > { %14668 = vmatprep.subr.bf16.mxu1 %v16682_v9 }
 0xdbf   : > { %14649 = vmatpush3.bf16.msra.mxu0 %v16681_v4 }
 0xdc0   : > { %14650 = vmatprep.subr.bf16.mxu0 %v16684_v22 }
 0xdc3   : > { %14651 = vmatpush3.bf16.msra.mxu0 %v16685_v10 }
 0xdc4   : > { %14652 = vmatprep.subr.bf16.mxu0 %v16688_v33 }
 0xdc7   : > { %14653 = vmatpush3.bf16.msra.mxu0 %v16689_v35 }
 0xdc8   : > { %14654 = vmatprep.subr.bf16.mxu0 %v16692_v36 }
 0xdcb   : > { %14655 = vmatpush3.bf16.msra.mxu0 %v16693_v38 }
 0xdcc   : > { %14656 = vmatprep.subr.bf16.mxu0 %v16696_v39 }
 0xe7d   : > { %v14608_v45 = vpop.f32.mrb[64].mxu0 }
 0xe7e   : > { %v14609_v46 = vpop.f32.mrb[65].mxu0 }
 0xe7f   : > { %v14610_v47 = vadd.f32 %v14609_v46, %v14608_v45  ;;  %v14611_v48 = vpop.f32.mrb[66].mxu0  ;;  %v16697_v45 = vld [vmem:[%s21420_s10 + $0x4a8] sm:$0xff]   ;;  %v16700_v46 = vld [vmem:[%s21420_s10 + $0x4f0] sm:$0xff]  }
 0xe80   : > { %v14612_v49 = vpop.f32.mrb[67].mxu0  ;;  %14657 = vmatpush3.bf16.msra.mxu0 %v16697_v45 }
 0xe81   : > { %v14613_v26 = vadd.f32 %v14612_v49, %v14611_v48  ;;  %v14630_v50 = vpop.f32.mrb[52].mxu1  ;;  %v16701_v48 = vld [vmem:[%s21420_s10 + $0x4b0] sm:$0xff]   ;;  %14658 = vmatprep.subr.bf16.mxu0 %v16700_v46 }
 0xe82   : > { %v14631_v53 = vpop.f32.mrb[53].mxu1 }
 0xe83   : > { %v14632_v17 = vadd.f32 %v14631_v53, %v14630_v50  ;;  %v14633_v54 = vpop.f32.mrb[54].mxu1  ;;  %v16704_v53 = vld [vmem:[%s21420_s10 + $0x4f8] sm:$0xff]  }
 0xe84   : > { %v14634_v52 = vpop.f32.mrb[55].mxu1  ;;  %14659 = vmatpush3.bf16.msra.mxu0 %v16701_v48 }
 0xe85   : > { %v14635_v55 = vadd.f32 %v14634_v52, %v14633_v54  ;;  %v4862_v57 = vadd.f32 %v14632_v17, %v14610_v47  ;;  %v16703_v47 = vld [vmem:[%s21420_s10 + $0x528] sm:$0xff]   ;;  %v16705_v17 = vld [vmem:[%s21420_s10 + $0x4b8] sm:$0xff]   ;;  %v16706_v54 = vld [vmem:[%s21420_s10 + $0x570] sm:$0xff]   ;;  %14660 = vmatprep.subr.bf16.mxu0 %v16704_v53 }
 0xe87   : > { %v4865_v13 = vadd.f32 %v14635_v55, %v14613_v26  ;;  %v16707_v55 = vld [vmem:[%s21420_s10 + $0x530] sm:$0xff]  }
 0xe88   : > { %14661 = vmatpush3.bf16.msra.mxu0 %v16705_v17 }
 0xe89   : > { %15459 = vmatprep.subr.bf16.mxu0 %v17133_v1 }
 0xe8d   : > { %v4902_v59 = vpop.f32.mrb[68].mxu0 }
 0xe8e   : > { %v4903_v51 = vadd.f32 %v4902_v59, %v4862_v57  ;;  %v15445_v58 = vpop.f32.mrb[69].mxu0 }
 0xe8f   : > { %v4905_v60 = vpop.f32.mrb[70].mxu0 }
 0xe90   : > { %v4906_v61 = vadd.f32 %v4905_v60, %v4865_v13  ;;  %v15446_v63 = vpop.f32.mrb[71].mxu0  ;;  %v4909_v25 = vmax.f32 %v4903_v51, 0.0 }
 0xe91   : > { %v16710_v63 = vld [vmem:[%s21420_s10 + $0x538] sm:$0xff]  }
 0xe92   : > { %v4910_v0 = vmax.f32 %v4906_v61, 0.0 }
 0xe94   : > { %v4920_v21 = vpack.c.bf16 %v4910_v0, %v4909_v25 }
 0xe96   : > { %15456 = vmatmul.mubr.msk.bf16.vlgmr.msra.gmra.mrb[56].mxu1 %vm1072_vm6, %v4920_v21 }
 0xe97   : > { %14669 = vmatpush3.bf16.msra.mxu1 %v16683_v29 }
 0xe98   : > { %14670 = vmatprep.subr.bf16.mxu1 %v16686_v30 }
 0xe9b   : > { %14671 = vmatpush3.bf16.msra.mxu1 %v16687_v31 }
 0xe9c   : > { %14672 = vmatprep.subr.bf16.mxu1 %v16690_v32 }
 0xe9f   : > { %14673 = vmatpush3.bf16.msra.mxu1 %v16691_v34 }
 0xea0   : > { %14674 = vmatprep.subr.bf16.mxu1 %v16694_v28 }
 0xea3   : > { %14675 = vmatpush3.bf16.msra.mxu1 %v16695_v24 }
 0xea4   : > { %14676 = vmatprep.subr.bf16.mxu1 %v16698_v37 }
 0xea7   : > { %14677 = vmatpush3.bf16.msra.mxu1 %v16699_v5 }
 0xea8   : > { %14678 = vmatprep.subr.bf16.mxu1 %v16702_v44 }
 0xeab   : > { %14679 = vmatpush3.bf16.msra.mxu1 %v16703_v47 }
 0xeac   : > { %14680 = vmatprep.subr.bf16.mxu1 %v16706_v54 }
 0xeaf   : > { %14681 = vmatpush3.bf16.msra.mxu1 %v16707_v55 }
 0xf69   : > { %v4982_v49 = vpop.f32.mrb[56].mxu1 }
 0xf6a   : > { %v18759_v26 = vadd.f32 %v4982_v49, %v18569_v12  ;;  %v15457_v50 = vpop.f32.mrb[57].mxu1 }
 0xf6b   : > { %v4985_v52 = vpop.f32.mrb[58].mxu1 }
 0xf6c   : > { %v18774_v12 = vadd.f32 %v4985_v52, %v18584_v56  ;;  %v15458_v57 = vpop.f32.mrb[59].mxu1  ;;  %v5022_v13 = vrot.slane %v18759_v26, 7  ;;  %v5004_v58 = vrot.slane %v18759_v26, 4  ;;  %v16708_v56 = vld [vmem:[%s21420_s10 + $0x578] sm:$0xff]   ;;  %v5029_v61 = vrot.slane %v18759_v26, 1 }
 0xf6d   : > { %14682 = vmatprep.subr.bf16.mxu1 %v16708_v56  ;;  %v4995_v37 = vrot.slane %v18759_v26, 3  ;;  %v5013_v38 = vrot.slane %v18759_v26, 5 }
 0xf6e   : > { %v5020_v59 = vrot.slane %v18774_v12, 7  ;;  %v5002_v51 = vrot.slane %v18774_v12, 4  ;;  %v5030_v60 = vrot.slane %v18774_v12, 1  ;;  %14683 = vmatpush3.bf16.msra.mxu1 %v16710_v63  ;;  %v4992_v36 = vrot.slane %v18774_v12, 3  ;;  %v16709_v63 = vld [vmem:[%s21420_s10 + $0x580] sm:$0xff]  }
 0xf6f   : > { %15471 = vmatprep.subr.bf16.mxu1 %v17133_v1  ;;  %v5011_v24 = vrot.slane %v18774_v12, 5 }
 0xf70   : > { %v5023_v25 = vsel %vm1960_vm12, %v5022_v13, %v5020_v59  ;;  %v5026_v0 = vsel %vm1960_vm12, %v5020_v59, %v5022_v13  ;;  %v5005_v21 = vsel %vm1214_vm15, %v5004_v58, %v5002_v51  ;;  %v5008_v62 = vsel %vm1214_vm15, %v5002_v51, %v5004_v58 }
 0xf71   : > { %v5027_v23 = vmul.f32 %v5026_v0, %v17738_v2  ;;  %v5028_v27 = vmul.f32 %v5023_v25, %v17740_v3  ;;  %v5009_v9 = vmul.f32 %v5008_v62, %v17744_v8  ;;  %v5010_v29 = vmul.f32 %v5005_v21, %v17742_v7 }
 0xf72   : > { %v5040_v30 = vmul.f32 %v5005_v21, %v17762_v18  ;;  %v5041_v4 = vmul.f32 %v5008_v62, %v17749_v11  ;;  %v5031_v22 = vsel %vm875_vm0, %v5029_v61, %v5030_v60  ;;  %v5035_v31 = vsel %vm875_vm0, %v5030_v60, %v5029_v61 }
 0xf73   : > { %v16107_v32 = vpack.i.bf16 %v5028_v27, %v5027_v23  ;;  %v16112_v10 = vpack.i.bf16 %v5010_v29, %v5009_v9  ;;  %v5036_v33 = vmul.f32 %v5031_v22, %v17796_v41  ;;  %v5037_v34 = vmul.f32 %v5035_v31, %v17794_v40 }
 0xf74   : > { %v16117_v28 = vpack.i.bf16 %v5041_v4, %v5040_v30  ;;  %v4996_v39 = vsel %vm2011_vm5, %v4995_v37, %v4992_v36  ;;  %v4999_v5 = vsel %vm2011_vm5, %v4992_v36, %v4995_v37  ;;  %v5014_v44 = vsel %vm1213_vm14, %v5013_v38, %v5011_v24  ;;  %v16714_v36 = vld [vmem:[%s21421_s11 + $0x80] sm:$0xff]   ;;  %v16716_v37 = vld [vmem:[%s21421_s11 + $0x90] sm:$0xff]  }
 0xf75   : > { %16108 = vrot.lane.b32.xlu1 %v16107_v32, %s21471_s1  ;;  %16113 = vrot.lane.b32.xlu0 %v16112_v10, %s21471_s1  ;;  %v16122_v35 = vpack.i.bf16 %v5037_v34, %v5036_v33  ;;  %v5017_v45 = vsel %vm1213_vm14, %v5011_v24, %v5013_v38  ;;  %v5000_v48 = vmul.f32 %v4999_v5, %v17867_v20  ;;  %v16711_v32 = vld [vmem:[%s21420_s10 + $0x588] sm:$0xff]   ;;  %v16712_v10 = vld [vmem:[%s21420_s10 + $0x590] sm:$0xff]  }
 0xf76   : > { %v5001_v49 = vmul.f32 %v4996_v39, %v17861_v15  ;;  %v5018_v50 = vmul.f32 %v5017_v45, %v17863_v16  ;;  %v5019_v53 = vmul.f32 %v5014_v44, %v17859_v14  ;;  %v5038_v25 = vmul.f32 %v4996_v39, %v17865_v19  ;;  %v16713_v33 = vld [vmem:[%s21420_s10 + $0x598] sm:$0xff]   ;;  %v16715_v24 = vld [vmem:[%s21421_s11 + $0x88] sm:$0xff]  }
 0xf77   : > { %v5039_v0 = vmul.f32 %v4999_v5, %v17897_v6  ;;  %v5042_v34 = vmul.f32 %v5014_v44, %v17902_v43  ;;  %v16717_v38 = vld [vmem:[%s21421_s11 + $0x98] sm:$0xff]  }
 0xf79   : > { %16118 = vrot.lane.b32.xlu1 %v16117_v28, %s21471_s1  ;;  %16123 = vrot.lane.b32.xlu0 %v16122_v35, %s21471_s1  ;;  %v5043_v28 = vmul.f32 %v5017_v45, %v17899_v42 }
 0xf7b   : > { %v5161_v35 = vpack.c.bf16 %v5043_v28, %v5042_v34  ;;  %v16732_v34 = vld [vmem:[%s21420_s10 + $0x600] sm:$0xff]   ;;  %v16735_v28 = vld [vmem:[%s21420_s10 + $0x638] sm:$0xff]  }
 0xfe7   : > { %v16109_v46 = vpop.permute.xlu1 %16108  ;;  %v16114_v47 = vpop.permute.xlu0 %16113 }
 0xfe8   : > { %v16111_v17 = vunpack.i.h.bf16 %v16109_v46  ;;  %v16110_v54 = vunpack.i.l.bf16 %v16109_v46  ;;  %v16116_v52 = vunpack.i.h.bf16 %v16114_v47  ;;  %v16115_v55 = vunpack.i.l.bf16 %v16114_v47 }
 0xfea   : > { %v5076_v57 = vsel %vm1072_vm6, %v5000_v48, %v16115_v55  ;;  %v5077_v13 = vsel %vm1072_vm6, %v5001_v49, %v16116_v52  ;;  %v5078_v59 = vsel %vm1072_vm6, %v5018_v50, %v16110_v54  ;;  %v5079_v51 = vsel %vm1072_vm6, %v5019_v53, %v16111_v17 }
 0xfeb   : > { %v16119_v58 = vpop.permute.xlu1 %16118  ;;  %v16124_v60 = vpop.permute.xlu0 %16123  ;;  %v5158_v56 = vpack.c.bf16 %v5079_v51, %v5078_v59  ;;  %v5157_v61 = vpack.c.bf16 %v5077_v13, %v5076_v57 }
 0xfec   : > { %v16121_v21 = vunpack.i.h.bf16 %v16119_v58  ;;  %v16120_v62 = vunpack.i.l.bf16 %v16119_v58  ;;  %v16126_v23 = vunpack.i.h.bf16 %v16124_v60  ;;  %v16125_v27 = vunpack.i.l.bf16 %v16124_v60 }
 0xfed   : > { %5413 = vmatprep.mubr.bf16.mxu0 %v5158_v56 }
 0xfee   : > { %v5081_v9 = vsel %vm1072_vm6, %v18774_v12, %v16126_v23  ;;  %v5080_v29 = vsel %vm1072_vm6, %v18759_v26, %v16125_v27  ;;  %5414 = vmatmul.mubr.bf16.vlgmr.msra.gmra.mrb[72].mxu0 %v5157_v61  ;;  %v5082_v30 = vsel %vm1072_vm6, %v5038_v25, %v16120_v62  ;;  %v5083_v4 = vsel %vm1072_vm6, %v5039_v0, %v16121_v21  ;;  %v16718_v25 = vld [vmem:[%s21420_s10 + $0x5e0] sm:$0xff]   ;;  %v16720_v21 = vld [vmem:[%s21420_s10 + $0x5e8] sm:$0xff]  }
 0xfef   : > { %15460 = vmatpush3.bf16.msra.mxu0 %v16709_v63  ;;  %v5160_v22 = vpack.c.bf16 %v5083_v4, %v5082_v30  ;;  %v5159_v31 = vpack.c.bf16 %v5081_v9, %v5080_v29  ;;  %15467 = vmatprep.mubr.msk.bf16.mxu0 %vm17134_vm2, %v17133_v1  ;;  %v16719_v0 = vld [vmem:[%s21420_s10 + $0x5a0] sm:$0xff]   ;;  %v16726_v27 = vld [vmem:[%s21420_s10 + $0x668] sm:$0xff]   ;;  %v16724_v29 = vld [vmem:[%s21420_s10 + $0x5f0] sm:$0xff]  }
 0xff0   : > { %15461 = vmatprep.subr.bf16.mxu0 %v17133_v1  ;;  %v16722_v62 = vld [vmem:[%s21420_s10 + $0x660] sm:$0xff]   ;;  %v16721_v9 = vld [vmem:[%s21420_s10 + $0x5a8] sm:$0xff]   ;;  %v16730_v4 = vld [vmem:[%s21420_s10 + $0x670] sm:$0xff]  }
 0xff1   : > { %5454 = vmatprep.mubr.bf16.mxu1 %v5160_v22  ;;  %v16723_v23 = vld [vmem:[%s21420_s10 + $0x620] sm:$0xff]   ;;  %v16727_v30 = vld [vmem:[%s21420_s10 + $0x628] sm:$0xff]   ;;  %v16725_v22 = vld [vmem:[%s21420_s10 + $0x5b0] sm:$0xff]  }
 0xff2   : > { %5455 = vmatmul.mubr.bf16.vlgmr.msra.gmra.mrb[60].mxu1 %v5159_v31  ;;  %v16728_v31 = vld [vmem:[%s21420_s10 + $0x5f8] sm:$0xff]  }
 0xff3   : > { %15462 = vmatpush3.bf16.msra.mxu0 %v16711_v32  ;;  %15479 = vmatprep.mubr.msk.bf16.mxu1 %vm17134_vm2, %v17133_v1  ;;  %v16731_v32 = vld [vmem:[%s21420_s10 + $0x630] sm:$0xff]  }
 0xff4   : > { %15463 = vmatprep.subr.bf16.mxu0 %v17133_v1  ;;  %15472 = vmatpush3.bf16.msra.mxu1 %v16714_v36  ;;  %v16733_v36 = vld [vmem:[%s21420_s10 + $0x5c0] sm:$0xff]  }
 0xff5   : > { %15473 = vmatprep.subr.bf16.mxu1 %v17133_v1 }
 0xff7   : > { %15464 = vmatpush3.bf16.msra.mxu0 %v16712_v10  ;;  %v16734_v10 = vld [vmem:[%s21420_s10 + $0x678] sm:$0xff]  }
 0xff8   : > { %15465 = vmatprep.subr.bf16.mxu0 %v17133_v1  ;;  %15474 = vmatpush3.bf16.msra.mxu1 %v16715_v24  ;;  %v16736_v24 = vld [vmem:[%s21420_s10 + $0x608] sm:$0xff]  }
 0xff9   : > { %15475 = vmatprep.subr.bf16.mxu1 %v17133_v1 }
 0xffb   : > { %15466 = vmatpush3.bf16.msra.mxu0 %v16713_v33  ;;  %v16729_v33 = vld [vmem:[%s21420_s10 + $0x5b8] sm:$0xff]  }
 0xffc   : > { %15476 = vmatpush3.bf16.msra.mxu1 %v16716_v37  ;;  %14700 = vmatprep.subr.bf16.mxu0 %v16718_v25  ;;  %v16739_v37 = vld [vmem:[%s21420_s10 + $0x640] sm:$0xff]  }
 0xffd   : > { %15477 = vmatprep.subr.bf16.mxu1 %v17133_v1 }
 0xffe   : > { %15468 = vmatmul.mubr.msk.bf16.vlgmr.msra.gmra.mrb[76].mxu0 %vm1072_vm6, %v5161_v35  ;;  %v16738_v35 = vld [vmem:[%s21420_s10 + $0x680] sm:$0xff]  }
 0xfff   : > { %14701 = vmatpush3.bf16.msra.mxu0 %v16719_v0 }
0x1000   : > { %15478 = vmatpush3.bf16.msra.mxu1 %v16717_v38  ;;  %14702 = vmatprep.subr.bf16.mxu0 %v16720_v21  ;;  %v16742_v38 = vld [vmem:[%s21420_s10 + $0x688] sm:$0xff]  }
0x1001   : > { %14722 = vmatprep.subr.bf16.mxu1 %v16722_v62 }
0x1003   : > { %14703 = vmatpush3.bf16.msra.mxu0 %v16721_v9 }
0x1004   : > { %14704 = vmatprep.subr.bf16.mxu0 %v16724_v29 }
0x1007   : > { %14705 = vmatpush3.bf16.msra.mxu0 %v16725_v22 }
0x1008   : > { %14706 = vmatprep.subr.bf16.mxu0 %v16728_v31 }
0x100b   : > { %14707 = vmatpush3.bf16.msra.mxu0 %v16729_v33 }
0x100c   : > { %14708 = vmatprep.subr.bf16.mxu0 %v16732_v34 }
0x100f   : > { %14709 = vmatpush3.bf16.msra.mxu0 %v16733_v36 }
0x1010   : > { %14710 = vmatprep.subr.bf16.mxu0 %v16736_v24 }
0x10c1   : > { %v14662_v39 = vpop.f32.mrb[72].mxu0 }
0x10c2   : > { %v14663_v5 = vpop.f32.mrb[73].mxu0 }
0x10c3   : > { %v14664_v44 = vadd.f32 %v14663_v5, %v14662_v39  ;;  %v14665_v45 = vpop.f32.mrb[74].mxu0  ;;  %v16737_v39 = vld [vmem:[%s21420_s10 + $0x5c8] sm:$0xff]   ;;  %v16740_v5 = vld [vmem:[%s21420_s10 + $0x610] sm:$0xff]  }
0x10c4   : > { %v14666_v46 = vpop.f32.mrb[75].mxu0  ;;  %14711 = vmatpush3.bf16.msra.mxu0 %v16737_v39 }
0x10c5   : > { %v14667_v47 = vadd.f32 %v14666_v46, %v14665_v45  ;;  %v14684_v48 = vpop.f32.mrb[60].mxu1  ;;  %v16741_v45 = vld [vmem:[%s21420_s10 + $0x5d0] sm:$0xff]   ;;  %14712 = vmatprep.subr.bf16.mxu0 %v16740_v5 }
0x10c6   : > { %v14685_v49 = vpop.f32.mrb[61].mxu1 }
0x10c7   : > { %v14686_v50 = vadd.f32 %v14685_v49, %v14684_v48  ;;  %v14687_v53 = vpop.f32.mrb[62].mxu1  ;;  %v16744_v49 = vld [vmem:[%s21420_s10 + $0x618] sm:$0xff]  }
0x10c8   : > { %v14688_v17 = vpop.f32.mrb[63].mxu1  ;;  %14713 = vmatpush3.bf16.msra.mxu0 %v16741_v45 }
0x10c9   : > { %v14689_v54 = vadd.f32 %v14688_v17, %v14687_v53  ;;  %v5457_v52 = vadd.f32 %v14686_v50, %v14664_v44  ;;  %v16743_v44 = vld [vmem:[%s21420_s10 + $0x648] sm:$0xff]   ;;  %v16745_v50 = vld [vmem:[%s21420_s10 + $0x5d8] sm:$0xff]   ;;  %v16746_v53 = vld [vmem:[%s21420_s10 + $0x690] sm:$0xff]   ;;  %14714 = vmatprep.subr.bf16.mxu0 %v16744_v49 }
0x10cb   : > { %v5460_v55 = vadd.f32 %v14689_v54, %v14667_v47  ;;  %v16747_v54 = vld [vmem:[%s21420_s10 + $0x650] sm:$0xff]  }
0x10cc   : > { %14715 = vmatpush3.bf16.msra.mxu0 %v16745_v50 }
0x10cd   : > { %15483 = vmatprep.subr.bf16.mxu0 %v17133_v1 }
0x10d1   : > { %v5497_v57 = vpop.f32.mrb[76].mxu0 }
0x10d2   : > { %v5498_v13 = vadd.f32 %v5497_v57, %v5457_v52  ;;  %v15469_v59 = vpop.f32.mrb[77].mxu0 }
0x10d3   : > { %v5500_v51 = vpop.f32.mrb[78].mxu0 }
0x10d4   : > { %v5501_v58 = vadd.f32 %v5500_v51, %v5460_v55  ;;  %v15470_v60 = vpop.f32.mrb[79].mxu0  ;;  %v5504_v56 = vmax.f32 %v5498_v13, 0.0 }
0x10d5   : > { %v16750_v60 = vld [vmem:[%s21420_s10 + $0x658] sm:$0xff]  }
0x10d6   : > { %v5505_v61 = vmax.f32 %v5501_v58, 0.0 }
0x10d8   : > { %v5515_v63 = vpack.c.bf16 %v5505_v61, %v5504_v56 }
0x10da   : > { %15480 = vmatmul.mubr.msk.bf16.vlgmr.msra.gmra.mrb[64].mxu1 %vm1072_vm6, %v5515_v63 }
0x10db   : > { %14723 = vmatpush3.bf16.msra.mxu1 %v16723_v23 }
0x10dc   : > { %14724 = vmatprep.subr.bf16.mxu1 %v16726_v27 }
0x10df   : > { %14725 = vmatpush3.bf16.msra.mxu1 %v16727_v30 }
0x10e0   : > { %14726 = vmatprep.subr.bf16.mxu1 %v16730_v4 }
0x10e3   : > { %14727 = vmatpush3.bf16.msra.mxu1 %v16731_v32 }
0x10e4   : > { %14728 = vmatprep.subr.bf16.mxu1 %v16734_v10 }
0x10e7   : > { %14729 = vmatpush3.bf16.msra.mxu1 %v16735_v28 }
0x10e8   : > { %14730 = vmatprep.subr.bf16.mxu1 %v16738_v35 }
0x10eb   : > { %14731 = vmatpush3.bf16.msra.mxu1 %v16739_v37 }
0x10ec   : > { %14732 = vmatprep.subr.bf16.mxu1 %v16742_v38 }
0x10ef   : > { %14733 = vmatpush3.bf16.msra.mxu1 %v16743_v44 }
0x10f0   : > { %14734 = vmatprep.subr.bf16.mxu1 %v16746_v53 }
0x10f3   : > { %14735 = vmatpush3.bf16.msra.mxu1 %v16747_v54 }
0x11ad   : > { %v5577_v46 = vpop.f32.mrb[64].mxu1 }
0x11ae   : > { %v18949_v47 = vadd.f32 %v5577_v46, %v18759_v26  ;;  %v15481_v48 = vpop.f32.mrb[65].mxu1 }
0x11af   : > { %v5580_v17 = vpop.f32.mrb[66].mxu1 }
0x11b0   : > { %v18964_v26 = vadd.f32 %v5580_v17, %v18774_v12  ;;  %v15482_v52 = vpop.f32.mrb[67].mxu1  ;;  %v5617_v55 = vrot.slane %v18949_v47, 7  ;;  %v5599_v59 = vrot.slane %v18949_v47, 4  ;;  %v16748_v12 = vld [vmem:[%s21420_s10 + $0x698] sm:$0xff]   ;;  %v5624_v58 = vrot.slane %v18949_v47, 1 }
0x11b1   : > { %14736 = vmatprep.subr.bf16.mxu1 %v16748_v12  ;;  %v5590_v35 = vrot.slane %v18949_v47, 3  ;;  %v5608_v36 = vrot.slane %v18949_v47, 5 }
0x11b2   : > { %v5615_v57 = vrot.slane %v18964_v26, 7  ;;  %v5597_v13 = vrot.slane %v18964_v26, 4  ;;  %v5625_v51 = vrot.slane %v18964_v26, 1  ;;  %14737 = vmatpush3.bf16.msra.mxu1 %v16750_v60  ;;  %v5587_v34 = vrot.slane %v18964_v26, 3  ;;  %v16749_v60 = vld [vmem:[%s21420_s10 + $0x6a0] sm:$0xff]  }
0x11b3   : > { %15495 = vmatprep.subr.bf16.mxu1 %v17133_v1  ;;  %v5606_v28 = vrot.slane %v18964_v26, 5 }
0x11b4   : > { %v5618_v56 = vsel %vm1960_vm12, %v5617_v55, %v5615_v57  ;;  %v5621_v61 = vsel %vm1960_vm12, %v5615_v57, %v5617_v55  ;;  %v5600_v63 = vsel %vm1214_vm15, %v5599_v59, %v5597_v13  ;;  %v5603_v25 = vsel %vm1214_vm15, %v5597_v13, %v5599_v59 }
0x11b5   : > { %v5622_v0 = vmul.f32 %v5621_v61, %v17738_v2  ;;  %v5623_v21 = vmul.f32 %v5618_v56, %v17740_v3  ;;  %v5604_v62 = vmul.f32 %v5603_v25, %v17744_v8  ;;  %v5605_v23 = vmul.f32 %v5600_v63, %v17742_v7 }
0x11b6   : > { %v5635_v27 = vmul.f32 %v5600_v63, %v17762_v18  ;;  %v5636_v9 = vmul.f32 %v5603_v25, %v17749_v11  ;;  %v5626_v29 = vsel %vm875_vm0, %v5624_v58, %v5625_v51  ;;  %v5630_v30 = vsel %vm875_vm0, %v5625_v51, %v5624_v58 }
0x11b7   : > { %v16127_v4 = vpack.i.bf16 %v5623_v21, %v5622_v0  ;;  %v16132_v22 = vpack.i.bf16 %v5605_v23, %v5604_v62  ;;  %v5631_v31 = vmul.f32 %v5626_v29, %v17796_v41  ;;  %v5632_v32 = vmul.f32 %v5630_v30, %v17794_v40 }
0x11b8   : > { %v16137_v10 = vpack.i.bf16 %v5636_v9, %v5635_v27  ;;  %v5591_v24 = vsel %vm2011_vm5, %v5590_v35, %v5587_v34  ;;  %v5594_v37 = vsel %vm2011_vm5, %v5587_v34, %v5590_v35  ;;  %v5609_v38 = vsel %vm1213_vm14, %v5608_v36, %v5606_v28  ;;  %v16754_v34 = vld [vmem:[%s21421_s11 + $0xa0] sm:$0xff]   ;;  %v16756_v35 = vld [vmem:[%s21421_s11 + $0xb0] sm:$0xff]  }
0x11b9   : > { %16128 = vrot.lane.b32.xlu1 %v16127_v4, %s21471_s1  ;;  %16133 = vrot.lane.b32.xlu0 %v16132_v22, %s21471_s1  ;;  %v16142_v33 = vpack.i.bf16 %v5632_v32, %v5631_v31  ;;  %v5612_v39 = vsel %vm1213_vm14, %v5606_v28, %v5608_v36  ;;  %v5595_v45 = vmul.f32 %v5594_v37, %v17867_v20  ;;  %v16751_v4 = vld [vmem:[%s21420_s10 + $0x6a8] sm:$0xff]   ;;  %v16752_v22 = vld [vmem:[%s21420_s10 + $0x6b0] sm:$0xff]  }
0x11ba   : > { %v5596_v46 = vmul.f32 %v5591_v24, %v17861_v15  ;;  %v5613_v48 = vmul.f32 %v5612_v39, %v17863_v16  ;;  %v5614_v49 = vmul.f32 %v5609_v38, %v17859_v14  ;;  %v5633_v56 = vmul.f32 %v5591_v24, %v17865_v19  ;;  %v16753_v31 = vld [vmem:[%s21420_s10 + $0x6b8] sm:$0xff]   ;;  %v16755_v28 = vld [vmem:[%s21421_s11 + $0xa8] sm:$0xff]   ;;  %v16758_v24 = vld [vmem:[%s21477_s12] sm:$0xff]  }
0x11bb   : > { %v5634_v61 = vmul.f32 %v5594_v37, %v17897_v6  ;;  %v5637_v32 = vmul.f32 %v5609_v38, %v17902_v43  ;;  %v16757_v36 = vld [vmem:[%s21421_s11 + $0xb8] sm:$0xff]   ;;  %v16759_v37 = vld [vmem:[%s21477_s12 + $0x8] sm:$0xff]  }
0x11bd   : > { %16138 = vrot.lane.b32.xlu1 %v16137_v10, %s21471_s1  ;;  %16143 = vrot.lane.b32.xlu0 %v16142_v33, %s21471_s1  ;;  %v5638_v10 = vmul.f32 %v5612_v39, %v17899_v42 }
0x11bf   : > { %v5756_v33 = vpack.c.bf16 %v5638_v10, %v5637_v32  ;;  %v6284_v32 = vld [vmem:[%s21424_s14 + $0x38] sm:$0xff] }
0x122b   : > { %v16129_v5 = vpop.permute.xlu1 %16128  ;;  %v16134_v44 = vpop.permute.xlu0 %16133 }
0x122c   : > { %v16131_v50 = vunpack.i.h.bf16 %v16129_v5  ;;  %v16130_v53 = vunpack.i.l.bf16 %v16129_v5  ;;  %v16136_v17 = vunpack.i.h.bf16 %v16134_v44  ;;  %v16135_v54 = vunpack.i.l.bf16 %v16134_v44 }
0x122e   : > { %v5671_v52 = vsel %vm1072_vm6, %v5595_v45, %v16135_v54  ;;  %v5672_v55 = vsel %vm1072_vm6, %v5596_v46, %v16136_v17  ;;  %v5673_v57 = vsel %vm1072_vm6, %v5613_v48, %v16130_v53  ;;  %v5674_v13 = vsel %vm1072_vm6, %v5614_v49, %v16131_v50 }
0x122f   : > { %v16139_v59 = vpop.permute.xlu1 %16138  ;;  %v16144_v51 = vpop.permute.xlu0 %16143  ;;  %v5753_v12 = vpack.c.bf16 %v5674_v13, %v5673_v57  ;;  %v5752_v58 = vpack.c.bf16 %v5672_v55, %v5671_v52 }
0x1230   : > { %v16141_v63 = vunpack.i.h.bf16 %v16139_v59  ;;  %v16140_v25 = vunpack.i.l.bf16 %v16139_v59  ;;  %v16146_v0 = vunpack.i.h.bf16 %v16144_v51  ;;  %v16145_v21 = vunpack.i.l.bf16 %v16144_v51 }
0x1231   : > { %6008 = vmatprep.mubr.bf16.mxu0 %v5753_v12 }
0x1232   : > { %v5676_v62 = vsel %vm1072_vm6, %v18964_v26, %v16146_v0  ;;  %v5675_v23 = vsel %vm1072_vm6, %v18949_v47, %v16145_v21  ;;  %6009 = vmatmul.mubr.bf16.vlgmr.msra.gmra.mrb[80].mxu0 %v5752_v58  ;;  %v5677_v27 = vsel %vm1072_vm6, %v5633_v56, %v16140_v25  ;;  %v5678_v9 = vsel %vm1072_vm6, %v5634_v61, %v16141_v63  ;;  %v16760_v63 = vld [vmem:[%s21477_s12 + $0x10] sm:$0xff]   ;;  %v16761_v25 = vld [vmem:[%s21477_s12 + $0x18] sm:$0xff]   ;;  %v6277_v0 = vld [vmem:[%s21424_s14] sm:$0xff] }
0x1233   : > { %15484 = vmatpush3.bf16.msra.mxu0 %v16749_v60  ;;  %v5755_v29 = vpack.c.bf16 %v5678_v9, %v5677_v27  ;;  %v5754_v30 = vpack.c.bf16 %v5676_v62, %v5675_v23  ;;  %15491 = vmatprep.mubr.msk.bf16.mxu0 %vm17134_vm2, %v17133_v1  ;;  %v6278_v21 = vld [vmem:[%s21424_s14 + $0x8] sm:$0xff]  ;;  %v6279_v27 = vld [vmem:[%s21424_s14 + $0x10] sm:$0xff]  ;;  %v6280_v9 = vld [vmem:[%s21424_s14 + $0x18] sm:$0xff] }
0x1234   : > { %15485 = vmatprep.subr.bf16.mxu0 %v17133_v1  ;;  %v15805_v23 = vpack.c.bf16 %v6278_v21, %v6277_v0 }
0x1235   : > { %6049 = vmatprep.mubr.bf16.mxu1 %v5755_v29  ;;  %v15811_v29 = vpack.c.bf16 %v6280_v9, %v6279_v27  ;;  %v13408_v9 = vld [vmem:[%s21425_s15] ss:$0 sm:$0xff] }
0x1236   : > { %6050 = vmatmul.mubr.bf16.vlgmr.msra.gmra.mrb[68].mxu1 %v5754_v30  ;;  %v6281_v30 = vld [vmem:[%s21424_s14 + $0x20] sm:$0xff] }
0x1237   : > { %15486 = vmatpush3.bf16.msra.mxu0 %v16751_v4  ;;  %15503 = vmatprep.mubr.msk.bf16.mxu1 %vm17134_vm2, %v17133_v1  ;;  %v6282_v4 = vld [vmem:[%s21424_s14 + $0x28] sm:$0xff] }
0x1238   : > { %15487 = vmatprep.subr.bf16.mxu0 %v17133_v1  ;;  %15496 = vmatpush3.bf16.msra.mxu1 %v16754_v34  ;;  %v6286_v34 = vld [vmem:[%s21424_s14 + $0x48] sm:$0xff] }
0x1239   : > { %15497 = vmatprep.subr.bf16.mxu1 %v17133_v1 }
0x123b   : > { %15488 = vmatpush3.bf16.msra.mxu0 %v16752_v22  ;;  %v15817_v22 = vpack.c.bf16 %v6282_v4, %v6281_v30 }
0x123c   : > { %15489 = vmatprep.subr.bf16.mxu0 %v17133_v1  ;;  %15498 = vmatpush3.bf16.msra.mxu1 %v16755_v28 }
0x123d   : > { %15499 = vmatprep.subr.bf16.mxu1 %v17133_v1 }
0x123f   : > { %15490 = vmatpush3.bf16.msra.mxu0 %v16753_v31  ;;  %v6283_v31 = vld [vmem:[%s21424_s14 + $0x30] sm:$0xff] }
0x1240   : > { %15507 = vmatprep.subr.bf16.mxu0 %v17133_v1  ;;  %15500 = vmatpush3.bf16.msra.mxu1 %v16756_v35  ;;  %v15823_v10 = vpack.c.bf16 %v6284_v32, %v6283_v31  ;;  %v6287_v35 = vld [vmem:[%s21424_s14 + $0x50] sm:$0xff] }
0x1241   : > { %15501 = vmatprep.subr.bf16.mxu1 %v17133_v1 }
0x1242   : > { %15492 = vmatmul.mubr.msk.bf16.vlgmr.msra.gmra.mrb[84].mxu0 %vm1072_vm6, %v5756_v33  ;;  %v6285_v33 = vld [vmem:[%s21424_s14 + $0x40] sm:$0xff] }
0x1243   : > { %15515 = vmatprep.mubr.msk.bf16.mxu0 %vm17134_vm2, %v17133_v1  ;;  %15508 = vmatpush3.bf16.msra.mxu0 %v16758_v24  ;;  %v15829_v28 = vpack.c.bf16 %v6286_v34, %v6285_v33 }
0x1244   : > { %15502 = vmatpush3.bf16.msra.mxu1 %v16757_v36  ;;  %15509 = vmatprep.subr.bf16.mxu0 %v17133_v1  ;;  %v6288_v36 = vld [vmem:[%s21424_s14 + $0x58] sm:$0xff] }
0x1245   : > { %15807 = vmatprep.subr.msk.bf16.mxu1 %vm19086_vm10, %v15805_v23  ;;  %v15835_v24 = vpack.c.bf16 %v6288_v36, %v6287_v35 }
0x1247   : > { %15510 = vmatpush3.bf16.msra.mxu0 %v16759_v37  ;;  %v6289_v37 = vld [vmem:[%s21424_s14 + $0x60] sm:$0xff] }
0x1248   : > { %15511 = vmatprep.subr.bf16.mxu0 %v17133_v1 }
0x124b   : > { %15512 = vmatpush3.bf16.msra.mxu0 %v16760_v63 }
0x124c   : > { %15513 = vmatprep.subr.bf16.mxu0 %v17133_v1 }
0x124f   : > { %15514 = vmatpush3.bf16.msra.mxu0 %v16761_v25 }
0x1250   : > { %15854 = vmatprep.subr.bf16.mxu0 %v15805_v23 }
0x1305   : > { %v14716_v38 = vpop.f32.mrb[80].mxu0 }
0x1306   : > { %v14717_v39 = vpop.f32.mrb[81].mxu0 }
0x1307   : > { %v14718_v5 = vadd.f32 %v14717_v39, %v14716_v38  ;;  %v14719_v44 = vpop.f32.mrb[82].mxu0  ;;  %v6290_v38 = vld [vmem:[%s21424_s14 + $0x68] sm:$0xff] }
0x1308   : > { %v14720_v45 = vpop.f32.mrb[83].mxu0  ;;  %v15841_v39 = vpack.c.bf16 %v6290_v38, %v6289_v37 }
0x1309   : > { %v14721_v46 = vadd.f32 %v14720_v45, %v14719_v44  ;;  %v14738_v48 = vpop.f32.mrb[68].mxu1 }
0x130a   : > { %v14739_v49 = vpop.f32.mrb[69].mxu1 }
0x130b   : > { %v14740_v50 = vadd.f32 %v14739_v49, %v14738_v48  ;;  %v14741_v53 = vpop.f32.mrb[70].mxu1 }
0x130c   : > { %v14742_v17 = vpop.f32.mrb[71].mxu1 }
0x130d   : > { %v14743_v54 = vadd.f32 %v14742_v17, %v14741_v53  ;;  %v6052_v52 = vadd.f32 %v14740_v50, %v14718_v5 }
0x130f   : > { %v6055_v55 = vadd.f32 %v14743_v54, %v14721_v46 }
0x1315   : > { %v6092_v57 = vpop.f32.mrb[84].mxu0 }
0x1316   : > { %v6093_v13 = vadd.f32 %v6092_v57, %v6052_v52  ;;  %v15493_v59 = vpop.f32.mrb[85].mxu0  ;;  %v13384_v57 = vld [vmem:[%s21423_s13] ss:$0 sm:$0xff] }
0x1317   : > { %v6095_v51 = vpop.f32.mrb[86].mxu0 }
0x1318   : > { %v6096_v12 = vadd.f32 %v6095_v51, %v6055_v55  ;;  %v15494_v58 = vpop.f32.mrb[87].mxu0  ;;  %v6099_v60 = vmax.f32 %v6093_v13, 0.0 }
0x131a   : > { %v6100_v56 = vmax.f32 %v6096_v12, 0.0 }
0x131c   : > { %v6110_v61 = vpack.c.bf16 %v6100_v56, %v6099_v60 }
0x131e   : > { %15504 = vmatmul.mubr.msk.bf16.vlgmr.msra.gmra.mrb[72].mxu1 %vm1072_vm6, %v6110_v61 }
0x131f   : > { %15810 = vmatpush3.bf16.xpose.msk.msra.mxu1 %vm19086_vm10, %v15805_v23 }
0x1320   : > { %15813 = vmatprep.subr.msk.bf16.mxu1 %vm19086_vm10, %v15811_v29 }
0x1327   : > { %15816 = vmatpush3.bf16.xpose.msk.msra.mxu1 %vm19086_vm10, %v15811_v29 }
0x1328   : > { %15819 = vmatprep.subr.msk.bf16.mxu1 %vm19086_vm10, %v15817_v22 }
0x132f   : > { %15822 = vmatpush3.bf16.xpose.msk.msra.mxu1 %vm19086_vm10, %v15817_v22 }
0x1330   : > { %15825 = vmatprep.subr.msk.bf16.mxu1 %vm19086_vm10, %v15823_v10 }
0x1337   : > { %15828 = vmatpush3.bf16.xpose.msk.msra.mxu1 %vm19086_vm10, %v15823_v10 }
0x1338   : > { %15831 = vmatprep.subr.msk.bf16.mxu1 %vm19086_vm10, %v15829_v28 }
0x133f   : > { %15834 = vmatpush3.bf16.xpose.msk.msra.mxu1 %vm19086_vm10, %v15829_v28 }
0x1340   : > { %15837 = vmatprep.subr.msk.bf16.mxu1 %vm19086_vm10, %v15835_v24 }
0x1347   : > { %15840 = vmatpush3.bf16.xpose.msk.msra.mxu1 %vm19086_vm10, %v15835_v24 }
0x1348   : > { %15843 = vmatprep.subr.msk.bf16.mxu1 %vm19086_vm10, %v15841_v39 }
0x134f   : > { %15846 = vmatpush3.bf16.xpose.msk.msra.mxu1 %vm19086_vm10, %v15841_v39 }
0x13f1   : > { %v6172_v5 = vpop.f32.mrb[72].mxu1 }
0x13f2   : > { %v6179_v44 = vadd.f32 %v6172_v5, %v18949_v47  ;;  %v15505_v45 = vpop.f32.mrb[73].mxu1  ;;  %v6291_v47 = vld [vmem:[%s21424_s14 + $0x70] sm:$0xff] }
0x13f3   : > { %v6175_v46 = vpop.f32.mrb[74].mxu1 }
0x13f4   : > { %v6183_v48 = vmul.f32 0.01, %v6179_v44  ;;  %v6180_v49 = vadd.f32 %v6175_v46, %v18964_v26  ;;  %v15506_v50 = vpop.f32.mrb[75].mxu1  ;;  %vm6181_vm11 = vcmp.gt.f32.partialorder %v6179_v44, 0.0  ;;  %v6292_v26 = vld [vmem:[%s21424_s14 + $0x78] sm:$0xff] }
0x13f5   : > { %v15847_v55 = vpack.c.bf16 %v6292_v26, %v6291_v47 }
0x13f6   : > { %vm6182_vm13 = vcmp.gt.f32.partialorder %v6180_v49, 0.0  ;;  %v6184_v53 = vmul.f32 0.01, %v6180_v49  ;;  %v6185_v17 = vsel %vm6181_vm11, %v6179_v44, %v6183_v48 }
0x13f7   : > { %15849 = vmatprep.subr.msk.bf16.mxu1 %vm19086_vm10, %v15847_v55 }
0x13f8   : > { %v6186_v54 = vsel %vm6182_vm13, %v6180_v49, %v6184_v53  ;;  %15852 = vmatpush3.bf16.xpose.msk.msra.mxu1 %vm19086_vm10, %v15847_v55 }
0x13f9   : > { %v6195_v52 = vpack.c.bf16 %v6186_v54, %v6185_v17 }
0x13fb   : > { %15516 = vmatmul.mubr.msk.bf16.vlgmr.msra.gmra.mrb[88].mxu0 %vm1072_vm6, %v6195_v52 }
0x13fc   : > { %15856 = vmatpush3.bf16.msra.mxu0 %v15805_v23 }
0x13fd   : > { %15858 = vmatprep.subr.bf16.mxu0 %v15811_v29 }
0x1400   : > { %15860 = vmatpush3.bf16.msra.mxu0 %v15811_v29 }
0x1401   : > { %15862 = vmatprep.subr.bf16.mxu0 %v15817_v22 }
0x1404   : > { %15864 = vmatpush3.bf16.msra.mxu0 %v15817_v22 }
0x1405   : > { %15866 = vmatprep.subr.bf16.mxu0 %v15823_v10 }
0x1408   : > { %15868 = vmatpush3.bf16.msra.mxu0 %v15823_v10 }
0x1409   : > { %15870 = vmatprep.subr.bf16.mxu0 %v15829_v28 }
0x140c   : > { %15872 = vmatpush3.bf16.msra.mxu0 %v15829_v28  ;;  %v6447_v28 = vlaneseq }
0x140d   : > { %15874 = vmatprep.subr.bf16.mxu0 %v15835_v24 }
0x140e   : > { %v6448_v35 = vand.u32 127, %v6447_v28 }
0x1410   : > { %15876 = vmatpush3.bf16.msra.mxu0 %v15835_v24 }
0x1411   : > { %15878 = vmatprep.subr.bf16.mxu0 %v15841_v39 }
0x1414   : > { %15880 = vmatpush3.bf16.msra.mxu0 %v15841_v39 }
0x1415   : > { %15882 = vmatprep.subr.bf16.mxu0 %v15847_v55 }
0x1418   : > { %15884 = vmatpush3.bf16.msra.mxu0 %v15847_v55 }
0x14ce   : > { %v6264_v13 = vpop.f32.mrb[88].mxu0 }
0x14cf   : > { %v6265_v59 = vadd.f32 %v13384_v57, %v6264_v13  ;;  %v15517_v51 = vpop.f32.mrb[89].mxu0 }
0x14d0   : > { %v6267_v12 = vpop.f32.mrb[90].mxu0 }
0x14d1   : > { %vm6271_vm1 = vcmp.gt.f32.partialorder %v6265_v59, 0.0  ;;  %v6273_v58 = vmul.f32 0.01, %v6265_v59  ;;  %v6268_v60 = vadd.f32 %v13384_v57, %v6267_v12  ;;  %v15518_v56 = vpop.f32.mrb[91].mxu0 }
0x14d2   : > { %v17142_v56 = vmov 1.0  }
0x14d3   : > { %vm6272_vm8 = vcmp.gt.f32.partialorder %v6268_v60, 0.0  ;;  %v6274_v61 = vmul.f32 0.01, %v6268_v60  ;;  %v19170_v63 = vsel %vm6271_vm1, %v6265_v59, %v6273_v58 }
0x14d4   : > { %15551 = vmatprep.mubr.msk.f32.mxu1 %vm1008_vm4, %v19170_v63  ;;  %v6293_v25 = vmul.f32 %v19170_v63, %v19170_v63 }
0x14d5   : > { %v19176_v0 = vsel %vm6272_vm8, %v6268_v60, %v6274_v61  ;;  %v16762_v61 = vld [vmem:[%s21426_s16 + $0x40] sm:$0xff]  }
0x14d6   : > { %15552 = vmatmul.mubr.msk.f32.vlgmr.msra.gmra.mrb[76].mxu1 %vm1008_vm4, %v19176_v0  ;;  %v6295_v21 = vsel %vm1008_vm4, %v6293_v25, 0.0  ;;  %v6294_v62 = vmul.f32 %v19176_v0, %v19176_v0  ;;  %v16763_v25 = vld [vmem:[%s21426_s16] sm:$0xff]   ;;  %14795 = vmatprep.subr.bf16.mxu0 %v16762_v61 }
0x14d7   : > { %6296 = vadd.xlane.f32.xlu1 %v6295_v21  ;;  %v16764_v21 = vld [vmem:[%s21426_s16 + $0x48] sm:$0xff]  }
0x14d8   : > { %v6298_v23 = vsel %vm1008_vm4, %v6294_v62, 0.0  ;;  %v16765_v62 = vld [vmem:[%s21426_s16 + $0x8] sm:$0xff]  }
0x14d9   : > { %6299 = vadd.xlane.f32.xlu0 %v6298_v23  ;;  %v16766_v23 = vld [vmem:[%s21426_s16 + $0x50] sm:$0xff]  }
0x1564   : > { %v6297_v29 = vpop.xlane.xlu1 %6296 }
0x1565   : > { %v6437_v32 = vadd.f32 %v13408_v9, %v6297_v29  ;;  %v16769_v29 = vld [vmem:[%s21426_s16 + $0x18] sm:$0xff]  }
0x1566   : > { %v6300_v27 = vpop.xlane.xlu0 %6299 }
0x1567   : > { %v6438_v4 = vadd.f32 %v13408_v9, %v6300_v27  ;;  %v16767_v27 = vld [vmem:[%s21426_s16 + $0x10] sm:$0xff]   ;;  %v16768_v9 = vld [vmem:[%s21426_s16 + $0x58] sm:$0xff]  }
0x15a9   : > { %v15553_v30 = vpop.f32.mrb[76].mxu1 }
0x15aa   : > { %v6440_v22 = vmul.f32 2.0, %v15553_v30  ;;  %v6421_v31 = vpop.f32.mrb[77].mxu1  ;;  %v16770_v30 = vld [vmem:[%s21426_s16 + $0x60] sm:$0xff]  }
0x15ab   : > { %v6439_v10 = vmul.f32 2.0, %v6421_v31  ;;  %v16773_v31 = vld [vmem:[%s21426_s16 + $0x28] sm:$0xff]  }
0x15ac   : > { %v6442_v33 = vsub.f32 %v6438_v4, %v6440_v22  ;;  %v16771_v4 = vld [vmem:[%s21426_s16 + $0x20] sm:$0xff]   ;;  %v16772_v22 = vld [vmem:[%s21426_s16 + $0x68] sm:$0xff]  }
0x15ad   : > { %v6441_v34 = vsub.f32 %v6437_v32, %v6439_v10 }
0x15ae   : > { %6445 = vmin.xlane.f32.xlu1 %v6442_v33 }
0x15af   : > { %6443 = vmin.xlane.f32.xlu0 %v6441_v34 }
0x163b   : > { %v6446_v36 = vpop.xlane.xlu1 %6445 }
0x163c   : > { %vm6450_vm9 = vcmp.le.f32.partialorder %v6442_v33, %v6446_v36  ;;  %v6444_v24 = vpop.xlane.xlu0 %6443 }
0x163d   : > { %v6452_v37 = vsel %vm6450_vm9, %v6448_v35, 128  ;;  %vm6449_vm10 = vcmp.le.f32.partialorder %v6441_v34, %v6444_v24 }
0x163e   : > { %v6451_v38 = vsel %vm6449_vm10, %v6448_v35, 128  ;;  %v6468_v39 = vshra.s32 %v6452_v37, 16  ;;  %v6467_v46 = vand.u32 65535, %v6452_v37 }
0x163f   : > { %v6454_v5 = vshra.s32 %v6451_v38, 16  ;;  %v6453_v48 = vand.u32 65535, %v6451_v38 }
0x1640   : > { %v6470_v44 = vcvt.s32.f32 %v6468_v39  ;;  %v6469_v50 = vcvt.s32.f32 %v6467_v46  ;;  %v16774_v39 = vld [vmem:[%s21426_s16 + $0x70] sm:$0xff]  }
0x1641   : > { %v6456_v45 = vcvt.s32.f32 %v6454_v5  ;;  %v6455_v17 = vcvt.s32.f32 %v6453_v48  ;;  %v16775_v5 = vld [vmem:[%s21426_s16 + $0x30] sm:$0xff]  }
0x1642   : > { %6471 = vmin.xlane.f32.xlu1 %v6470_v44 }
0x1643   : > { %6457 = vmin.xlane.f32.xlu0 %v6456_v45 }
0x16cf   : > { %v6472_v49 = vpop.xlane.xlu1 %6471 }
0x16d0   : > { %v6458_v53 = vpop.xlane.xlu0 %6457  ;;  %vm6473_vm11 = vcmp.eq.f32.partialorder %v6470_v44, %v6472_v49  ;;  %v6478_v47 = vcvt.f32.s32 %v6472_v49 }
0x16d1   : > { %v6474_v54 = vsel %vm6473_vm11, %v6469_v50, inf  ;;  %vm6459_vm13 = vcmp.eq.f32.partialorder %v6456_v45, %v6458_v53  ;;  %v6464_v26 = vcvt.f32.s32 %v6458_v53 }
0x16d2   : > { %6475 = vmin.xlane.f32.xlu1 %v6474_v54  ;;  %v6460_v52 = vsel %vm6459_vm13, %v6455_v17, inf  ;;  %v6479_v57 = vshll.u32 %v6478_v47, 16 }
0x16d3   : > { %6461 = vmin.xlane.f32.xlu0 %v6460_v52  ;;  %v6465_v51 = vshll.u32 %v6464_v26, 16 }
0x175f   : > { %v6476_v55 = vpop.xlane.xlu1 %6475 }
0x1760   : > { %v6477_v13 = vcvt.f32.s32 %v6476_v55  ;;  %v6462_v59 = vpop.xlane.xlu0 %6461 }
0x1761   : > { %v6463_v12 = vcvt.f32.s32 %v6462_v59  ;;  %v16777_v59 = vld [vmem:[%s21426_s16 + $0x38] sm:$0xff]  }
0x1762   : > { %v6480_v58 = vadd.s32 %v6479_v57, %v6477_v13  ;;  %v16776_v13 = vld [vmem:[%s21426_s16 + $0x78] sm:$0xff]  }
0x1763   : > { %v6466_v60 = vadd.s32 %v6465_v51, %v6463_v12 }
0x1764   : > { %vm6482_vm8 = vcmp.eq.s32.totalorder %v6448_v35, %v6480_v58 }
0x1765   : > { %vm6481_vm1 = vcmp.eq.s32.totalorder %v6448_v35, %v6466_v60 }
0x1766   : > { %15586 = vmatprep.mubr.msk.f32.mxu0 %vm6481_vm1, %v17142_v56 }
0x1767   : > { %15587 = vmatmul.mubr.msk.f32.vlgmr.msra.gmra.mrb[92].mxu0 %vm6482_vm8, %v17142_v56 }
0x1768   : > { %14796 = vmatpush3.bf16.msra.mxu0 %v16763_v25 }
0x1769   : > { %14797 = vmatprep.subr.bf16.mxu0 %v16764_v21 }
0x176c   : > { %14798 = vmatpush3.bf16.msra.mxu0 %v16765_v62 }
0x176d   : > { %14799 = vmatprep.subr.bf16.mxu0 %v16766_v23 }
0x1770   : > { %14800 = vmatpush3.bf16.msra.mxu0 %v16767_v27 }
0x1771   : > { %14801 = vmatprep.subr.bf16.mxu0 %v16768_v9 }
0x1774   : > { %14802 = vmatpush3.bf16.msra.mxu0 %v16769_v29 }
0x1775   : > { %14803 = vmatprep.subr.bf16.mxu0 %v16770_v30 }
0x1778   : > { %14804 = vmatpush3.bf16.msra.mxu0 %v16771_v4 }
0x1779   : > { %14805 = vmatprep.subr.bf16.mxu0 %v16772_v22 }
0x177c   : > { %14806 = vmatpush3.bf16.msra.mxu0 %v16773_v31 }
0x177d   : > { %14807 = vmatprep.subr.bf16.mxu0 %v16774_v39 }
0x1780   : > { %14808 = vmatpush3.bf16.msra.mxu0 %v16775_v5 }
0x1781   : > { %14809 = vmatprep.subr.bf16.mxu0 %v16776_v13 }
0x1784   : > { %14810 = vmatpush3.bf16.msra.mxu0 %v16777_v59 }
0x1785   : > { %15589 = vmatprep.subr.bf16.mxu0 %v17133_v1 }
0x183a   : > { %v19223_v32 = vpop.f32.mrb[92].mxu0 }
0x183b   : > { %v19225_v10 = vpop.f32.mrb[93].mxu0  ;;  %v6620_v33 = vrot.slane %v19223_v32, 1  ;;  %v6592_v34 = vrot.slane %v19223_v32, 4  ;;  %v6601_v28 = vrot.slane %v19223_v32, 5  ;;  %v6582_v35 = vrot.slane %v19223_v32, 3 }
0x183c   : > { %v6619_v36 = vrot.slane %v19225_v10, 1  ;;  %v6594_v24 = vrot.slane %v19225_v10, 4  ;;  %v6603_v37 = vrot.slane %v19225_v10, 5  ;;  %v6585_v38 = vrot.slane %v19225_v10, 3 }
0x183d   : > { %v6610_v44 = vrot.slane %v19223_v32, 7  ;;  %v6612_v45 = vrot.slane %v19225_v10, 7  ;;  %v6562_v46 = vsub.f32 %v19225_v10, %v19170_v63  ;;  %v6563_v21 = vsub.f32 %v19223_v32, %v19176_v0 }
0x183e   : > { %v6621_v48 = vsel %vm875_vm0, %v6619_v36, %v6620_v33  ;;  %v6625_v49 = vsel %vm875_vm0, %v6620_v33, %v6619_v36  ;;  %v6595_v50 = vsel %vm1214_vm15, %v6594_v24, %v6592_v34  ;;  %v6598_v53 = vsel %vm1214_vm15, %v6592_v34, %v6594_v24 }
0x183f   : > { %v6626_v17 = vmul.f32 %v6621_v48, %v17796_v41  ;;  %v6627_v54 = vmul.f32 %v6625_v49, %v17794_v40  ;;  %v6599_v52 = vmul.f32 %v6598_v53, %v17744_v8  ;;  %v6600_v47 = vmul.f32 %v6595_v50, %v17742_v7 }
0x1840   : > { %v6604_v63 = vsel %vm1213_vm14, %v6603_v37, %v6601_v28  ;;  %v6607_v26 = vsel %vm1213_vm14, %v6601_v28, %v6603_v37  ;;  %v6586_v55 = vsel %vm2011_vm5, %v6585_v38, %v6582_v35  ;;  %v6589_v57 = vsel %vm2011_vm5, %v6582_v35, %v6585_v38 }
0x1841   : > { %v16147_v51 = vpack.i.bf16 %v6627_v54, %v6626_v17  ;;  %v16152_v12 = vpack.i.bf16 %v6600_v47, %v6599_v52  ;;  %v6608_v58 = vmul.f32 %v6607_v26, %v17863_v16  ;;  %v6609_v60 = vmul.f32 %v6604_v63, %v17859_v14 }
0x1842   : > { %v19266_v56 = vmul.f32 %v6604_v63, %v17902_v43  ;;  %v19269_v61 = vmul.f32 %v6607_v26, %v17899_v42  ;;  %v6628_v25 = vmul.f32 %v6586_v55, %v17865_v19  ;;  %v6629_v23 = vmul.f32 %v6589_v57, %v17897_v6 }
0x1843   : > { %16148 = vrot.lane.b32.xlu0 %v16147_v51, %s21470_s28  ;;  %16153 = vrot.lane.b32.xlu1 %v16152_v12, %s21470_s28  ;;  %v16162_v62 = vpack.i.bf16 %v6609_v60, %v6608_v58  ;;  %v6613_v9 = vsel %vm1960_vm12, %v6612_v45, %v6610_v44  ;;  %v6616_v29 = vsel %vm1960_vm12, %v6610_v44, %v6612_v45 }
0x1844   : > { %v6732_v27 = vpack.c.bf16 %v19269_v61, %v19266_v56  ;;  %v6630_v30 = vmul.f32 %v6595_v50, %v17762_v18  ;;  %v16157_v4 = vpack.i.bf16 %v6629_v23, %v6628_v25  ;;  %v6617_v0 = vmul.f32 %v6616_v29, %v17738_v2  ;;  %v16785_v56 = vld [vmem:[%s21420_s10 + $0x740] sm:$0xff]   ;;  %v16788_v61 = vld [vmem:[%s21420_s10 + $0x788] sm:$0xff]  }
0x1845   : > { %v6618_v22 = vmul.f32 %v6613_v9, %v17740_v3  ;;  %v6631_v31 = vmul.f32 %v6598_v53, %v17749_v11  ;;  %v6564_v33 = vmul.f32 %v6562_v46, %v6562_v46  ;;  %v6565_v34 = vmul.f32 %v6563_v21, %v6563_v21 }
0x1846   : > { %v6590_v50 = vmul.f32 %v6589_v57, %v17867_v20  ;;  %v6591_v53 = vmul.f32 %v6586_v55, %v17861_v15 }
0x1847   : > { %16163 = vrot.lane.b32.xlu0 %v16162_v62, %s21471_s1  ;;  %16158 = vrot.lane.b32.xlu1 %v16157_v4, %s21471_s1  ;;  %v16172_v28 = vpack.i.bf16 %v6618_v22, %v6617_v0  ;;  %v16167_v35 = vpack.i.bf16 %v6631_v31, %v6630_v30  ;;  %v6566_v36 = vsel %vm1008_vm4, %v6564_v33, 0.0  ;;  %v6567_v24 = vsel %vm1008_vm4, %v6565_v34, 0.0  ;;  %v16778_v0 = vld [vmem:[%s21426_s16 + $0x80] sm:$0xff]   ;;  %v16779_v22 = vld [vmem:[%s21426_s16 + $0x88] sm:$0xff]  }
0x1848   : > { %v19290_v37 = vadd.f32 %v6567_v24, %v6566_v36  ;;  %v16780_v31 = vld [vmem:[%s21420_s10 + $0x700] sm:$0xff]   ;;  %v16782_v34 = vld [vmem:[%s21420_s10 + $0x708] sm:$0xff]   ;;  %v16792_v24 = vld [vmem:[%s21420_s10 + $0x790] sm:$0xff]  }
0x1849   : > { %v16781_v33 = vld [vmem:[%s21420_s10 + $0x6c0] sm:$0xff]   ;;  %14820 = vmatprep.subr.bf16.mxu1 %v16780_v31  ;;  %v16789_v36 = vld [vmem:[%s21420_s10 + $0x748] sm:$0xff]  }
0x184a   : > { %21480 = vst [vmem:[#allocation3_spill] sm:$0xff] %v19290_v37  ;;  %14821 = vmatpush3.bf16.msra.mxu1 %v16781_v33  ;;  %v16809_v33 = vld [vmem:[%s21420_s10 + $0x770] sm:$0xff]  }
0x184b   : > { %16173 = vrot.lane.b32.xlu0 %v16172_v28, %s21481_s29  ;;  %16168 = vrot.lane.b32.xlu1 %v16167_v35, %s21481_s29  ;;  %v16784_v28 = vld [vmem:[%s21420_s10 + $0x780] sm:$0xff]   ;;  %v16786_v35 = vld [vmem:[%s21420_s10 + $0x710] sm:$0xff]  }
0x184c   : > { %14822 = vmatprep.subr.bf16.mxu1 %v16782_v34 }
0x18b5   : > { %v16149_v38 = vpop.permute.xlu0 %16148  ;;  %v16154_v39 = vpop.permute.xlu1 %16153 }
0x18b6   : > { %v16151_v5 = vunpack.i.h.bf16 %v16149_v38  ;;  %v16150_v44 = vunpack.i.l.bf16 %v16149_v38  ;;  %v16156_v45 = vunpack.i.h.bf16 %v16154_v39  ;;  %v16155_v46 = vunpack.i.l.bf16 %v16154_v39  ;;  %v16787_v38 = vld [vmem:[%s21420_s10 + $0x6d0] sm:$0xff]   ;;  %v16790_v39 = vld [vmem:[%s21420_s10 + $0x718] sm:$0xff]  }
0x18b8   : > { %v6689_v63 = vsel %vm1008_vm4, %v19223_v32, %v16151_v5  ;;  %v6688_v26 = vsel %vm1008_vm4, %v19225_v10, %v16150_v44  ;;  %v6682_v13 = vsel %vm1008_vm4, %v6590_v50, %v16155_v46  ;;  %v6683_v59 = vsel %vm1008_vm4, %v6591_v53, %v16156_v45  ;;  %v16793_v5 = vld [vmem:[%s21420_s10 + $0x750] sm:$0xff]   ;;  %v16796_v44 = vld [vmem:[%s21420_s10 + $0x798] sm:$0xff]   ;;  %v16794_v46 = vld [vmem:[%s21420_s10 + $0x720] sm:$0xff]  }
0x18b9   : > { %v16164_v48 = vpop.permute.xlu0 %16163  ;;  %v16159_v49 = vpop.permute.xlu1 %16158  ;;  %v16791_v45 = vld [vmem:[%s21420_s10 + $0x6d8] sm:$0xff]   ;;  %v16795_v50 = vld [vmem:[%s21420_s10 + $0x6e0] sm:$0xff]   ;;  %v16798_v53 = vld [vmem:[%s21420_s10 + $0x728] sm:$0xff]  }
0x18ba   : > { %v16166_v17 = vunpack.i.h.bf16 %v16164_v48  ;;  %v16165_v54 = vunpack.i.l.bf16 %v16164_v48  ;;  %v16161_v52 = vunpack.i.h.bf16 %v16159_v49  ;;  %v16160_v47 = vunpack.i.l.bf16 %v16159_v49  ;;  %v16797_v48 = vld [vmem:[%s21420_s10 + $0x758] sm:$0xff]   ;;  %v16800_v49 = vld [vmem:[%s21420_s10 + $0x7a0] sm:$0xff]  }
0x18bc   : > { %v6684_v25 = vsel %vm1072_vm6, %v6682_v13, %v16165_v54  ;;  %v6685_v21 = vsel %vm1072_vm6, %v6683_v59, %v16166_v17  ;;  %v6690_v62 = vsel %vm1072_vm6, %v6688_v26, %v16160_v47  ;;  %v6691_v32 = vsel %vm1072_vm6, %v6689_v63, %v16161_v52  ;;  %v16801_v17 = vld [vmem:[%s21420_s10 + $0x760] sm:$0xff]   ;;  %v16804_v54 = vld [vmem:[%s21420_s10 + $0x7a8] sm:$0xff]   ;;  %v16802_v47 = vld [vmem:[%s21420_s10 + $0x730] sm:$0xff]  }
0x18bd   : > { %v16174_v51 = vpop.permute.xlu0 %16173  ;;  %v16169_v12 = vpop.permute.xlu1 %16168  ;;  %v16799_v52 = vld [vmem:[%s21420_s10 + $0x6e8] sm:$0xff]   ;;  %v16803_v26 = vld [vmem:[%s21420_s10 + $0x6f0] sm:$0xff]  }
0x18be   : > { %v16176_v58 = vunpack.i.h.bf16 %v16174_v51  ;;  %v16175_v57 = vunpack.i.l.bf16 %v16174_v51  ;;  %v16171_v60 = vunpack.i.h.bf16 %v16169_v12  ;;  %v16170_v55 = vunpack.i.l.bf16 %v16169_v12  ;;  %v16805_v63 = vld [vmem:[%s21420_s10 + $0x768] sm:$0xff]  }
0x18c0   : > { %v6686_v10 = vsel %vm1535_vm7, %v6684_v25, %v16175_v57  ;;  %v6687_v23 = vsel %vm1535_vm7, %v6685_v21, %v16176_v58  ;;  %v6692_v9 = vsel %vm1535_vm7, %v6690_v62, %v16170_v55  ;;  %v6693_v29 = vsel %vm1535_vm7, %v6691_v32, %v16171_v60  ;;  %v13413_v60 = vld [vmem:[%s21427_s17] ss:$0 sm:$0xff] }
0x18c1   : > { %v6731_v30 = vpack.c.bf16 %v6693_v29, %v6692_v9  ;;  %v6730_v4 = vpack.c.bf16 %v6687_v23, %v6686_v10 }
0x18c3   : > { %6883 = vmatprep.mubr.bf16.mxu0 %v6731_v30  ;;  %v16806_v30 = vld [vmem:[%s21420_s10 + $0x738] sm:$0xff]  }
0x18c4   : > { %6884 = vmatmul.mubr.bf16.vlgmr.msra.gmra.mrb[96].mxu0 %v6730_v4  ;;  %v16807_v4 = vld [vmem:[%s21420_s10 + $0x6f8] sm:$0xff]  }
0x18c5   : > { %15590 = vmatpush3.bf16.msra.mxu0 %v16778_v0  ;;  %15593 = vmatprep.mubr.msk.bf16.mxu0 %vm17134_vm2, %v17133_v1  ;;  %v16808_v0 = vld [vmem:[%s21420_s10 + $0x7b0] sm:$0xff]  }
0x18c6   : > { %15591 = vmatprep.subr.bf16.mxu0 %v17133_v1 }
0x18c9   : > { %15592 = vmatpush3.bf16.msra.mxu0 %v16779_v22 }
0x18ca   : > { %14842 = vmatprep.subr.bf16.mxu0 %v16784_v28 }
0x18cc   : > { %15594 = vmatmul.mubr.msk.bf16.vlgmr.msra.gmra.mrb[100].mxu0 %vm1008_vm4, %v6732_v27  ;;  %v16783_v27 = vld [vmem:[%s21420_s10 + $0x6c8] sm:$0xff]  }
0x18cd   : > { %14843 = vmatpush3.bf16.msra.mxu0 %v16785_v56  ;;  %14823 = vmatpush3.bf16.msra.mxu1 %v16783_v27 }
0x18ce   : > { %14844 = vmatprep.subr.bf16.mxu0 %v16788_v61  ;;  %14824 = vmatprep.subr.bf16.mxu1 %v16786_v35 }
0x18d1   : > { %14845 = vmatpush3.bf16.msra.mxu0 %v16789_v36  ;;  %14825 = vmatpush3.bf16.msra.mxu1 %v16787_v38  ;;  %v16810_v36 = vld [vmem:[%s21420_s10 + $0x7b8] sm:$0xff]  }
0x18d2   : > { %14846 = vmatprep.subr.bf16.mxu0 %v16792_v24  ;;  %14826 = vmatprep.subr.bf16.mxu1 %v16790_v39  ;;  %v16812_v38 = vld [vmem:[%s21420_s10 + $0x778] sm:$0xff]  }
0x18d5   : > { %14847 = vmatpush3.bf16.msra.mxu0 %v16793_v5  ;;  %14827 = vmatpush3.bf16.msra.mxu1 %v16791_v45 }
0x18d6   : > { %14848 = vmatprep.subr.bf16.mxu0 %v16796_v44  ;;  %14828 = vmatprep.subr.bf16.mxu1 %v16794_v46 }
0x18d9   : > { %14849 = vmatpush3.bf16.msra.mxu0 %v16797_v48  ;;  %14829 = vmatpush3.bf16.msra.mxu1 %v16795_v50 }
0x18da   : > { %14850 = vmatprep.subr.bf16.mxu0 %v16800_v49  ;;  %14830 = vmatprep.subr.bf16.mxu1 %v16798_v53 }
0x18dd   : > { %14851 = vmatpush3.bf16.msra.mxu0 %v16801_v17  ;;  %14831 = vmatpush3.bf16.msra.mxu1 %v16799_v52 }
0x18de   : > { %14852 = vmatprep.subr.bf16.mxu0 %v16804_v54  ;;  %14832 = vmatprep.subr.bf16.mxu1 %v16802_v47 }
0x18e1   : > { %14853 = vmatpush3.bf16.msra.mxu0 %v16805_v63  ;;  %14833 = vmatpush3.bf16.msra.mxu1 %v16803_v26 }
0x18e2   : > { %14834 = vmatprep.subr.bf16.mxu1 %v16806_v30  ;;  %14854 = vmatprep.subr.bf16.mxu0 %v16808_v0 }
0x18e5   : > { %14835 = vmatpush3.bf16.msra.mxu1 %v16807_v4  ;;  %14855 = vmatpush3.bf16.msra.mxu0 %v16809_v33 }
0x18e6   : > { %15597 = vmatprep.subr.bf16.mxu1 %v17133_v1  ;;  %14856 = vmatprep.subr.bf16.mxu0 %v16810_v36 }
0x18e9   : > { %14857 = vmatpush3.bf16.msra.mxu0 %v16812_v38 }
0x18ea   : > { %15609 = vmatprep.subr.bf16.mxu0 %v17133_v1 }
0x1997   : > { %v14811_v13 = vpop.f32.mrb[96].mxu0 }
0x1998   : > { %v14812_v59 = vpop.f32.mrb[97].mxu0 }
0x1999   : > { %v14813_v51 = vadd.f32 %v14812_v59, %v14811_v13  ;;  %v14814_v12 = vpop.f32.mrb[98].mxu0 }
0x199a   : > { %v14815_v58 = vpop.f32.mrb[99].mxu0 }
0x199b   : > { %v14816_v57 = vadd.f32 %v14815_v58, %v14814_v12  ;;  %v6886_v55 = vadd.f32 %v14813_v51, %v13413_v60 }
0x199d   : > { %v6889_v32 = vadd.f32 %v14816_v57, %v13413_v60 }
0x199f   : > { %v6926_v25 = vpop.f32.mrb[100].mxu0 }
0x19a0   : > { %v6927_v21 = vadd.f32 %v6926_v25, %v6886_v55  ;;  %v15595_v62 = vpop.f32.mrb[101].mxu0 }
0x19a1   : > { %v6929_v10 = vpop.f32.mrb[102].mxu0 }
0x19a2   : > { %vm6933_vm9 = vcmp.gt.f32.partialorder %v6927_v21, 0.0  ;;  %v6935_v23 = vmul.f32 0.01, %v6927_v21  ;;  %v6930_v9 = vadd.f32 %v6929_v10, %v6889_v32  ;;  %v15596_v29 = vpop.f32.mrb[103].mxu0 }
0x19a4   : > { %v19413_v22 = vsel %vm6933_vm9, %v6927_v21, %v6935_v23  ;;  %vm6934_vm10 = vcmp.gt.f32.partialorder %v6930_v9, 0.0  ;;  %v6936_v31 = vmul.f32 0.01, %v6930_v9 }
0x19a5   : > { %v6970_v28 = vrot.slane %v19413_v22, 7  ;;  %v6952_v27 = vrot.slane %v19413_v22, 4  ;;  %v6977_v24 = vrot.slane %v19413_v22, 1  ;;  %v6943_v57 = vrot.slane %v19413_v22, 3 }
0x19a6   : > { %v19418_v34 = vsel %vm6934_vm10, %v6930_v9, %v6936_v31  ;;  %v6961_v60 = vrot.slane %v19413_v22, 5 }
0x19a7   : > { %v6968_v56 = vrot.slane %v19418_v34, 7  ;;  %v6950_v61 = vrot.slane %v19418_v34, 4  ;;  %v6978_v35 = vrot.slane %v19418_v34, 1  ;;  %v6940_v12 = vrot.slane %v19418_v34, 3 }
0x19a8   : > { %v6959_v58 = vrot.slane %v19418_v34, 5 }
0x19a9   : > { %v6971_v39 = vsel %vm1960_vm12, %v6970_v28, %v6968_v56  ;;  %v6974_v5 = vsel %vm1960_vm12, %v6968_v56, %v6970_v28  ;;  %v6953_v44 = vsel %vm1214_vm15, %v6952_v27, %v6950_v61  ;;  %v6956_v45 = vsel %vm1214_vm15, %v6950_v61, %v6952_v27 }
0x19aa   : > { %v6975_v46 = vmul.f32 %v6974_v5, %v17738_v2  ;;  %v6976_v48 = vmul.f32 %v6971_v39, %v17740_v3  ;;  %v6957_v49 = vmul.f32 %v6956_v45, %v17744_v8  ;;  %v6958_v50 = vmul.f32 %v6953_v44, %v17742_v7  ;;  %v16811_v39 = vld [vmem:[%s21420_s10 + $0x7c0] sm:$0xff]  }
0x19ab   : > { %v6988_v53 = vmul.f32 %v6953_v44, %v17762_v18  ;;  %v6989_v17 = vmul.f32 %v6956_v45, %v17749_v11  ;;  %v6979_v54 = vsel %vm875_vm0, %v6977_v24, %v6978_v35  ;;  %v6983_v52 = vsel %vm875_vm0, %v6978_v35, %v6977_v24 }
0x19ac   : > { %v16177_v47 = vpack.i.bf16 %v6976_v48, %v6975_v46  ;;  %v16182_v63 = vpack.i.bf16 %v6958_v50, %v6957_v49  ;;  %v6984_v26 = vmul.f32 %v6979_v54, %v17796_v41  ;;  %v6985_v13 = vmul.f32 %v6983_v52, %v17794_v40 }
0x19ad   : > { %v16187_v59 = vpack.i.bf16 %v6989_v17, %v6988_v53  ;;  %v6944_v55 = vsel %vm2011_vm5, %v6943_v57, %v6940_v12  ;;  %v6947_v25 = vsel %vm2011_vm5, %v6940_v12, %v6943_v57  ;;  %v6962_v21 = vsel %vm1213_vm14, %v6961_v60, %v6959_v58  ;;  %v16817_v57 = vld [vmem:[%s21421_s11 + $0xc8] sm:$0xff]  }
0x19ae   : > { %16178 = vrot.lane.b32.xlu1 %v16177_v47, %s21471_s1  ;;  %16183 = vrot.lane.b32.xlu0 %v16182_v63, %s21471_s1  ;;  %v16192_v51 = vpack.i.bf16 %v6985_v13, %v6984_v26  ;;  %v6965_v62 = vsel %vm1213_vm14, %v6959_v58, %v6961_v60  ;;  %v6948_v23 = vmul.f32 %v6947_v25, %v17867_v20  ;;  %v16813_v63 = vld [vmem:[%s21420_s10 + $0x7c8] sm:$0xff]   ;;  %v16814_v26 = vld [vmem:[%s21420_s10 + $0x7d0] sm:$0xff]  }
0x19af   : > { %v6949_v9 = vmul.f32 %v6944_v55, %v17861_v15  ;;  %v6966_v29 = vmul.f32 %v6965_v62, %v17863_v16  ;;  %v6967_v30 = vmul.f32 %v6962_v21, %v17859_v14  ;;  %v6986_v5 = vmul.f32 %v6944_v55, %v17865_v19  ;;  %v16815_v13 = vld [vmem:[%s21420_s10 + $0x7d8] sm:$0xff]   ;;  %v16816_v58 = vld [vmem:[%s21421_s11 + $0xc0] sm:$0xff]   ;;  %v16818_v60 = vld [vmem:[%s21421_s11 + $0xd0] sm:$0xff]  }
0x19b0   : > { %v6987_v44 = vmul.f32 %v6947_v25, %v17897_v6  ;;  %v16819_v55 = vld [vmem:[%s21421_s11 + $0xd8] sm:$0xff]  }
0x19b2   : > { %16188 = vrot.lane.b32.xlu1 %v16187_v59, %s21471_s1  ;;  %16193 = vrot.lane.b32.xlu0 %v16192_v51, %s21471_s1  ;;  %v6990_v59 = vmul.f32 %v6962_v21, %v17902_v43  ;;  %v6991_v51 = vmul.f32 %v6965_v62, %v17899_v42 }
0x19b4   : > { %v7109_v12 = vpack.c.bf16 %v6991_v51, %v6990_v59  ;;  %v16831_v59 = vld [vmem:[%s21420_s10 + $0x7f8] sm:$0xff]   ;;  %v16834_v51 = vld [vmem:[%s21420_s10 + $0x840] sm:$0xff]  }
0x1a20   : > { %v16179_v32 = vpop.permute.xlu1 %16178  ;;  %v16184_v10 = vpop.permute.xlu0 %16183 }
0x1a21   : > { %v16181_v4 = vunpack.i.h.bf16 %v16179_v32  ;;  %v16180_v0 = vunpack.i.l.bf16 %v16179_v32  ;;  %v16186_v31 = vunpack.i.h.bf16 %v16184_v10  ;;  %v16185_v33 = vunpack.i.l.bf16 %v16184_v10 }
0x1a23   : > { %v7024_v28 = vsel %vm1072_vm6, %v6948_v23, %v16185_v33  ;;  %v7025_v56 = vsel %vm1072_vm6, %v6949_v9, %v16186_v31  ;;  %v7026_v61 = vsel %vm1072_vm6, %v6966_v29, %v16180_v0  ;;  %v7027_v27 = vsel %vm1072_vm6, %v6967_v30, %v16181_v4 }
0x1a24   : > { %v16189_v35 = vpop.permute.xlu1 %16188  ;;  %v16194_v36 = vpop.permute.xlu0 %16193  ;;  %v7106_v24 = vpack.c.bf16 %v7027_v27, %v7026_v61  ;;  %v7105_v38 = vpack.c.bf16 %v7025_v56, %v7024_v28 }
0x1a25   : > { %v16191_v45 = vunpack.i.h.bf16 %v16189_v35  ;;  %v16190_v46 = vunpack.i.l.bf16 %v16189_v35  ;;  %v16196_v48 = vunpack.i.h.bf16 %v16194_v36  ;;  %v16195_v49 = vunpack.i.l.bf16 %v16194_v36 }
0x1a26   : > { %7361 = vmatprep.mubr.bf16.mxu1 %v7106_v24 }
0x1a27   : > { %v7029_v50 = vsel %vm1072_vm6, %v19418_v34, %v16196_v48  ;;  %v7028_v53 = vsel %vm1072_vm6, %v19413_v22, %v16195_v49  ;;  %7362 = vmatmul.mubr.bf16.vlgmr.msra.gmra.mrb[80].mxu1 %v7105_v38  ;;  %v7030_v17 = vsel %vm1072_vm6, %v6986_v5, %v16190_v46  ;;  %v7031_v54 = vsel %vm1072_vm6, %v6987_v44, %v16191_v45  ;;  %v16820_v44 = vld [vmem:[%s21420_s10 + $0x820] sm:$0xff]   ;;  %v16822_v46 = vld [vmem:[%s21420_s10 + $0x828] sm:$0xff]  }
0x1a28   : > { %15598 = vmatpush3.bf16.msra.mxu1 %v16811_v39  ;;  %v7108_v52 = vpack.c.bf16 %v7031_v54, %v7030_v17  ;;  %v7107_v47 = vpack.c.bf16 %v7029_v50, %v7028_v53  ;;  %15605 = vmatprep.mubr.msk.bf16.mxu1 %vm17134_vm2, %v17133_v1  ;;  %v16821_v45 = vld [vmem:[%s21420_s10 + $0x7e0] sm:$0xff]   ;;  %v16828_v50 = vld [vmem:[%s21420_s10 + $0x8a8] sm:$0xff]   ;;  %v16826_v17 = vld [vmem:[%s21420_s10 + $0x830] sm:$0xff]  }
0x1a29   : > { %15599 = vmatprep.subr.bf16.mxu1 %v17133_v1  ;;  %v16824_v48 = vld [vmem:[%s21420_s10 + $0x8a0] sm:$0xff]   ;;  %v16823_v53 = vld [vmem:[%s21420_s10 + $0x7e8] sm:$0xff]  }
0x1a2a   : > { %7402 = vmatprep.mubr.bf16.mxu0 %v7108_v52  ;;  %v16825_v49 = vld [vmem:[%s21420_s10 + $0x860] sm:$0xff]   ;;  %v16829_v54 = vld [vmem:[%s21420_s10 + $0x868] sm:$0xff]   ;;  %v16832_v52 = vld [vmem:[%s21420_s10 + $0x8b0] sm:$0xff]  }
0x1a2b   : > { %7403 = vmatmul.mubr.bf16.vlgmr.msra.gmra.mrb[104].mxu0 %v7107_v47  ;;  %v16827_v47 = vld [vmem:[%s21420_s10 + $0x7f0] sm:$0xff]  }
0x1a2c   : > { %15600 = vmatpush3.bf16.msra.mxu1 %v16813_v63  ;;  %15617 = vmatprep.mubr.msk.bf16.mxu0 %vm17134_vm2, %v17133_v1  ;;  %v16830_v63 = vld [vmem:[%s21420_s10 + $0x838] sm:$0xff]  }
0x1a2d   : > { %15601 = vmatprep.subr.bf16.mxu1 %v17133_v1  ;;  %15610 = vmatpush3.bf16.msra.mxu0 %v16816_v58  ;;  %v16840_v58 = vld [vmem:[%s21420_s10 + $0x8c0] sm:$0xff]  }
0x1a2e   : > { %15611 = vmatprep.subr.bf16.mxu0 %v17133_v1 }
0x1a30   : > { %15602 = vmatpush3.bf16.msra.mxu1 %v16814_v26  ;;  %v16833_v26 = vld [vmem:[%s21420_s10 + $0x870] sm:$0xff]  }
0x1a31   : > { %15603 = vmatprep.subr.bf16.mxu1 %v17133_v1  ;;  %15612 = vmatpush3.bf16.msra.mxu0 %v16817_v57  ;;  %v16835_v57 = vld [vmem:[%s21420_s10 + $0x800] sm:$0xff]  }
0x1a32   : > { %15613 = vmatprep.subr.bf16.mxu0 %v17133_v1 }
0x1a34   : > { %15604 = vmatpush3.bf16.msra.mxu1 %v16815_v13  ;;  %v16836_v13 = vld [vmem:[%s21420_s10 + $0x8b8] sm:$0xff]  }
0x1a35   : > { %15614 = vmatpush3.bf16.msra.mxu0 %v16818_v60  ;;  %14874 = vmatprep.subr.bf16.mxu1 %v16820_v44  ;;  %v16838_v60 = vld [vmem:[%s21420_s10 + $0x848] sm:$0xff]  }
0x1a36   : > { %15615 = vmatprep.subr.bf16.mxu0 %v17133_v1 }
0x1a37   : > { %15606 = vmatmul.mubr.msk.bf16.vlgmr.msra.gmra.mrb[84].mxu1 %vm1072_vm6, %v7109_v12  ;;  %v16837_v12 = vld [vmem:[%s21420_s10 + $0x878] sm:$0xff]  }
0x1a38   : > { %14875 = vmatpush3.bf16.msra.mxu1 %v16821_v45 }
0x1a39   : > { %15616 = vmatpush3.bf16.msra.mxu0 %v16819_v55  ;;  %14876 = vmatprep.subr.bf16.mxu1 %v16822_v46  ;;  %v16841_v55 = vld [vmem:[%s21420_s10 + $0x880] sm:$0xff]  }
0x1a3a   : > { %14896 = vmatprep.subr.bf16.mxu0 %v16824_v48 }
0x1a3c   : > { %14877 = vmatpush3.bf16.msra.mxu1 %v16823_v53 }
0x1a3d   : > { %14878 = vmatprep.subr.bf16.mxu1 %v16826_v17 }
0x1a40   : > { %14879 = vmatpush3.bf16.msra.mxu1 %v16827_v47 }
0x1a41   : > { %14880 = vmatprep.subr.bf16.mxu1 %v16830_v63 }
0x1a44   : > { %14881 = vmatpush3.bf16.msra.mxu1 %v16831_v59 }
0x1a45   : > { %14882 = vmatprep.subr.bf16.mxu1 %v16834_v51 }
0x1a48   : > { %14883 = vmatpush3.bf16.msra.mxu1 %v16835_v57 }
0x1a49   : > { %14884 = vmatprep.subr.bf16.mxu1 %v16838_v60 }
0x1afa   : > { %v14836_v25 = vpop.f32.mrb[80].mxu1 }
0x1afb   : > { %v14837_v21 = vpop.f32.mrb[81].mxu1 }
0x1afc   : > { %v14838_v62 = vadd.f32 %v14837_v21, %v14836_v25  ;;  %v14839_v32 = vpop.f32.mrb[82].mxu1  ;;  %v16844_v25 = vld [vmem:[%s21420_s10 + $0x8c8] sm:$0xff]  }
0x1afd   : > { %v14840_v10 = vpop.f32.mrb[83].mxu1  ;;  %v16839_v21 = vld [vmem:[%s21420_s10 + $0x808] sm:$0xff]  }
0x1afe   : > { %v14841_v23 = vadd.f32 %v14840_v10, %v14839_v32  ;;  %v14858_v9 = vpop.f32.mrb[104].mxu0  ;;  %v16845_v32 = vld [vmem:[%s21420_s10 + $0x888] sm:$0xff]   ;;  %14885 = vmatpush3.bf16.msra.mxu1 %v16839_v21  ;;  %v16843_v10 = vld [vmem:[%s21420_s10 + $0x810] sm:$0xff]  }
0x1aff   : > { %v14859_v29 = vpop.f32.mrb[105].mxu0 }
0x1b00   : > { %v14860_v30 = vadd.f32 %v14859_v29, %v14858_v9  ;;  %v14861_v4 = vpop.f32.mrb[106].mxu0 }
0x1b01   : > { %v14862_v0 = vpop.f32.mrb[107].mxu0 }
0x1b02   : > { %v14863_v31 = vadd.f32 %v14862_v0, %v14861_v4  ;;  %v7405_v33 = vadd.f32 %v14860_v30, %v14838_v62  ;;  %v16842_v62 = vld [vmem:[%s21420_s10 + $0x850] sm:$0xff]   ;;  %v16846_v30 = vld [vmem:[%s21420_s10 + $0x858] sm:$0xff]  }
0x1b03   : > { %14886 = vmatprep.subr.bf16.mxu1 %v16842_v62  ;;  %v16847_v4 = vld [vmem:[%s21420_s10 + $0x818] sm:$0xff]   ;;  %v16848_v0 = vld [vmem:[%s21420_s10 + $0x8d0] sm:$0xff]  }
0x1b04   : > { %v7408_v28 = vadd.f32 %v14863_v31, %v14841_v23  ;;  %14887 = vmatpush3.bf16.msra.mxu1 %v16843_v10 }
0x1b05   : > { %14888 = vmatprep.subr.bf16.mxu1 %v16846_v30 }
0x1b08   : > { %14889 = vmatpush3.bf16.msra.mxu1 %v16847_v4 }
0x1b09   : > { %15621 = vmatprep.subr.bf16.mxu1 %v17133_v1 }
0x1b0a   : > { %v7445_v56 = vpop.f32.mrb[84].mxu1 }
0x1b0b   : > { %v7446_v61 = vadd.f32 %v7445_v56, %v7405_v33  ;;  %v15607_v27 = vpop.f32.mrb[85].mxu1  ;;  %v16849_v33 = vld [vmem:[%s21420_s10 + $0x890] sm:$0xff]  }
0x1b0c   : > { %v7448_v35 = vpop.f32.mrb[86].mxu1 }
0x1b0d   : > { %v7449_v36 = vadd.f32 %v7448_v35, %v7408_v28  ;;  %v15608_v24 = vpop.f32.mrb[87].mxu1  ;;  %v7452_v38 = vmax.f32 %v7446_v61, 0.0 }
0x1b0f   : > { %v7453_v39 = vmax.f32 %v7449_v36, 0.0 }
0x1b11   : > { %v7463_v5 = vpack.c.bf16 %v7453_v39, %v7452_v38  ;;  %v16852_v38 = vld [vmem:[%s21420_s10 + $0x898] sm:$0xff]  }
0x1b13   : > { %15618 = vmatmul.mubr.msk.bf16.vlgmr.msra.gmra.mrb[108].mxu0 %vm1072_vm6, %v7463_v5 }
0x1b14   : > { %14897 = vmatpush3.bf16.msra.mxu0 %v16825_v49 }
0x1b15   : > { %14898 = vmatprep.subr.bf16.mxu0 %v16828_v50 }
0x1b18   : > { %14899 = vmatpush3.bf16.msra.mxu0 %v16829_v54 }
0x1b19   : > { %14900 = vmatprep.subr.bf16.mxu0 %v16832_v52 }
0x1b1c   : > { %14901 = vmatpush3.bf16.msra.mxu0 %v16833_v26 }
0x1b1d   : > { %14902 = vmatprep.subr.bf16.mxu0 %v16836_v13 }
0x1b20   : > { %14903 = vmatpush3.bf16.msra.mxu0 %v16837_v12 }
0x1b21   : > { %14904 = vmatprep.subr.bf16.mxu0 %v16840_v58 }
0x1b24   : > { %14905 = vmatpush3.bf16.msra.mxu0 %v16841_v55 }
0x1b25   : > { %14906 = vmatprep.subr.bf16.mxu0 %v16844_v25 }
0x1b28   : > { %14907 = vmatpush3.bf16.msra.mxu0 %v16845_v32 }
0x1b29   : > { %14908 = vmatprep.subr.bf16.mxu0 %v16848_v0 }
0x1b2c   : > { %14909 = vmatpush3.bf16.msra.mxu0 %v16849_v33 }
0x1be6   : > { %v7525_v23 = vpop.f32.mrb[108].mxu0 }
0x1be7   : > { %v19593_v9 = vadd.f32 %v7525_v23, %v19413_v22  ;;  %v15619_v29 = vpop.f32.mrb[109].mxu0 }
0x1be8   : > { %v7528_v31 = vpop.f32.mrb[110].mxu0 }
0x1be9   : > { %v19608_v22 = vadd.f32 %v7528_v31, %v19418_v34  ;;  %v15620_v28 = vpop.f32.mrb[111].mxu0  ;;  %v7565_v56 = vrot.slane %v19593_v9, 7  ;;  %v7547_v35 = vrot.slane %v19593_v9, 4  ;;  %v16850_v34 = vld [vmem:[%s21420_s10 + $0x8d8] sm:$0xff]   ;;  %v7572_v24 = vrot.slane %v19593_v9, 1 }
0x1bea   : > { %14910 = vmatprep.subr.bf16.mxu0 %v16850_v34  ;;  %v7538_v57 = vrot.slane %v19593_v9, 3  ;;  %v7556_v60 = vrot.slane %v19593_v9, 5 }
0x1beb   : > { %v7563_v61 = vrot.slane %v19608_v22, 7  ;;  %v7545_v27 = vrot.slane %v19608_v22, 4  ;;  %v7573_v36 = vrot.slane %v19608_v22, 1  ;;  %14911 = vmatpush3.bf16.msra.mxu0 %v16852_v38  ;;  %v7535_v12 = vrot.slane %v19608_v22, 3 }
0x1bec   : > { %15633 = vmatprep.subr.bf16.mxu0 %v17133_v1  ;;  %v7554_v58 = vrot.slane %v19608_v22, 5 }
0x1bed   : > { %v7566_v39 = vsel %vm1960_vm12, %v7565_v56, %v7563_v61  ;;  %v7569_v5 = vsel %vm1960_vm12, %v7563_v61, %v7565_v56  ;;  %v7548_v44 = vsel %vm1214_vm15, %v7547_v35, %v7545_v27  ;;  %v7551_v45 = vsel %vm1214_vm15, %v7545_v27, %v7547_v35 }
0x1bee   : > { %v7570_v46 = vmul.f32 %v7569_v5, %v17738_v2  ;;  %v7571_v48 = vmul.f32 %v7566_v39, %v17740_v3  ;;  %v7552_v49 = vmul.f32 %v7551_v45, %v17744_v8  ;;  %v7553_v50 = vmul.f32 %v7548_v44, %v17742_v7  ;;  %v16851_v39 = vld [vmem:[%s21420_s10 + $0x8e0] sm:$0xff]  }
0x1bef   : > { %v7583_v53 = vmul.f32 %v7548_v44, %v17762_v18  ;;  %v7584_v17 = vmul.f32 %v7551_v45, %v17749_v11  ;;  %v7574_v54 = vsel %vm875_vm0, %v7572_v24, %v7573_v36  ;;  %v7578_v52 = vsel %vm875_vm0, %v7573_v36, %v7572_v24 }
0x1bf0   : > { %v16197_v47 = vpack.i.bf16 %v7571_v48, %v7570_v46  ;;  %v16202_v63 = vpack.i.bf16 %v7553_v50, %v7552_v49  ;;  %v7579_v26 = vmul.f32 %v7574_v54, %v17796_v41  ;;  %v7580_v13 = vmul.f32 %v7578_v52, %v17794_v40 }
0x1bf1   : > { %v16207_v59 = vpack.i.bf16 %v7584_v17, %v7583_v53  ;;  %v7539_v55 = vsel %vm2011_vm5, %v7538_v57, %v7535_v12  ;;  %v7542_v25 = vsel %vm2011_vm5, %v7535_v12, %v7538_v57  ;;  %v7557_v21 = vsel %vm1213_vm14, %v7556_v60, %v7554_v58  ;;  %v16857_v57 = vld [vmem:[%s21421_s11 + $0xe8] sm:$0xff]  }
0x1bf2   : > { %16198 = vrot.lane.b32.xlu1 %v16197_v47, %s21471_s1  ;;  %16203 = vrot.lane.b32.xlu0 %v16202_v63, %s21471_s1  ;;  %v16212_v51 = vpack.i.bf16 %v7580_v13, %v7579_v26  ;;  %v7560_v62 = vsel %vm1213_vm14, %v7554_v58, %v7556_v60  ;;  %v7543_v23 = vmul.f32 %v7542_v25, %v17867_v20  ;;  %v16853_v63 = vld [vmem:[%s21420_s10 + $0x8e8] sm:$0xff]   ;;  %v16854_v26 = vld [vmem:[%s21420_s10 + $0x8f0] sm:$0xff]  }
0x1bf3   : > { %v7544_v29 = vmul.f32 %v7539_v55, %v17861_v15  ;;  %v7561_v30 = vmul.f32 %v7560_v62, %v17863_v16  ;;  %v7562_v4 = vmul.f32 %v7557_v21, %v17859_v14  ;;  %v7581_v5 = vmul.f32 %v7539_v55, %v17865_v19  ;;  %v16855_v13 = vld [vmem:[%s21420_s10 + $0x8f8] sm:$0xff]   ;;  %v16856_v58 = vld [vmem:[%s21421_s11 + $0xe0] sm:$0xff]   ;;  %v16858_v60 = vld [vmem:[%s21421_s11 + $0xf0] sm:$0xff]  }
0x1bf4   : > { %v7582_v44 = vmul.f32 %v7542_v25, %v17897_v6  ;;  %v16859_v55 = vld [vmem:[%s21421_s11 + $0xf8] sm:$0xff]  }
0x1bf6   : > { %16208 = vrot.lane.b32.xlu1 %v16207_v59, %s21471_s1  ;;  %16213 = vrot.lane.b32.xlu0 %v16212_v51, %s21471_s1  ;;  %v7585_v59 = vmul.f32 %v7557_v21, %v17902_v43  ;;  %v7586_v51 = vmul.f32 %v7560_v62, %v17899_v42 }
0x1bf8   : > { %v7704_v12 = vpack.c.bf16 %v7586_v51, %v7585_v59  ;;  %v16871_v59 = vld [vmem:[%s21420_s10 + $0x918] sm:$0xff]   ;;  %v16874_v51 = vld [vmem:[%s21420_s10 + $0x960] sm:$0xff]  }
0x1c64   : > { %v16199_v32 = vpop.permute.xlu1 %16198  ;;  %v16204_v10 = vpop.permute.xlu0 %16203 }
0x1c65   : > { %v16201_v0 = vunpack.i.h.bf16 %v16199_v32  ;;  %v16200_v31 = vunpack.i.l.bf16 %v16199_v32  ;;  %v16206_v33 = vunpack.i.h.bf16 %v16204_v10  ;;  %v16205_v28 = vunpack.i.l.bf16 %v16204_v10 }
0x1c67   : > { %v7619_v56 = vsel %vm1072_vm6, %v7543_v23, %v16205_v28  ;;  %v7620_v61 = vsel %vm1072_vm6, %v7544_v29, %v16206_v33  ;;  %v7621_v27 = vsel %vm1072_vm6, %v7561_v30, %v16200_v31  ;;  %v7622_v35 = vsel %vm1072_vm6, %v7562_v4, %v16201_v0 }
0x1c68   : > { %v16209_v36 = vpop.permute.xlu1 %16208  ;;  %v16214_v34 = vpop.permute.xlu0 %16213  ;;  %v7701_v24 = vpack.c.bf16 %v7622_v35, %v7621_v27  ;;  %v7700_v38 = vpack.c.bf16 %v7620_v61, %v7619_v56 }
0x1c69   : > { %v16211_v45 = vunpack.i.h.bf16 %v16209_v36  ;;  %v16210_v46 = vunpack.i.l.bf16 %v16209_v36  ;;  %v16216_v48 = vunpack.i.h.bf16 %v16214_v34  ;;  %v16215_v49 = vunpack.i.l.bf16 %v16214_v34 }
0x1c6a   : > { %7956 = vmatprep.mubr.bf16.mxu1 %v7701_v24 }
0x1c6b   : > { %v7624_v50 = vsel %vm1072_vm6, %v19608_v22, %v16216_v48  ;;  %v7623_v53 = vsel %vm1072_vm6, %v19593_v9, %v16215_v49  ;;  %7957 = vmatmul.mubr.bf16.vlgmr.msra.gmra.mrb[88].mxu1 %v7700_v38  ;;  %v7625_v17 = vsel %vm1072_vm6, %v7581_v5, %v16210_v46  ;;  %v7626_v54 = vsel %vm1072_vm6, %v7582_v44, %v16211_v45  ;;  %v16860_v44 = vld [vmem:[%s21420_s10 + $0x940] sm:$0xff]   ;;  %v16862_v46 = vld [vmem:[%s21420_s10 + $0x948] sm:$0xff]  }
0x1c6c   : > { %15622 = vmatpush3.bf16.msra.mxu1 %v16851_v39  ;;  %v7703_v52 = vpack.c.bf16 %v7626_v54, %v7625_v17  ;;  %v7702_v47 = vpack.c.bf16 %v7624_v50, %v7623_v53  ;;  %15629 = vmatprep.mubr.msk.bf16.mxu1 %vm17134_vm2, %v17133_v1  ;;  %v16861_v45 = vld [vmem:[%s21420_s10 + $0x900] sm:$0xff]   ;;  %v16868_v50 = vld [vmem:[%s21420_s10 + $0x9c8] sm:$0xff]   ;;  %v16866_v17 = vld [vmem:[%s21420_s10 + $0x950] sm:$0xff]  }
0x1c6d   : > { %15623 = vmatprep.subr.bf16.mxu1 %v17133_v1  ;;  %v16864_v48 = vld [vmem:[%s21420_s10 + $0x9c0] sm:$0xff]   ;;  %v16863_v53 = vld [vmem:[%s21420_s10 + $0x908] sm:$0xff]  }
0x1c6e   : > { %7997 = vmatprep.mubr.bf16.mxu0 %v7703_v52  ;;  %v16865_v49 = vld [vmem:[%s21420_s10 + $0x980] sm:$0xff]   ;;  %v16869_v54 = vld [vmem:[%s21420_s10 + $0x988] sm:$0xff]   ;;  %v16872_v52 = vld [vmem:[%s21420_s10 + $0x9d0] sm:$0xff]  }
0x1c6f   : > { %7998 = vmatmul.mubr.bf16.vlgmr.msra.gmra.mrb[112].mxu0 %v7702_v47  ;;  %v16867_v47 = vld [vmem:[%s21420_s10 + $0x910] sm:$0xff]  }
0x1c70   : > { %15624 = vmatpush3.bf16.msra.mxu1 %v16853_v63  ;;  %15641 = vmatprep.mubr.msk.bf16.mxu0 %vm17134_vm2, %v17133_v1  ;;  %v16870_v63 = vld [vmem:[%s21420_s10 + $0x958] sm:$0xff]  }
0x1c71   : > { %15625 = vmatprep.subr.bf16.mxu1 %v17133_v1  ;;  %15634 = vmatpush3.bf16.msra.mxu0 %v16856_v58  ;;  %v16880_v58 = vld [vmem:[%s21420_s10 + $0x9e0] sm:$0xff]  }
0x1c72   : > { %15635 = vmatprep.subr.bf16.mxu0 %v17133_v1 }
0x1c74   : > { %15626 = vmatpush3.bf16.msra.mxu1 %v16854_v26  ;;  %v16873_v26 = vld [vmem:[%s21420_s10 + $0x990] sm:$0xff]  }
0x1c75   : > { %15627 = vmatprep.subr.bf16.mxu1 %v17133_v1  ;;  %15636 = vmatpush3.bf16.msra.mxu0 %v16857_v57  ;;  %v16875_v57 = vld [vmem:[%s21420_s10 + $0x920] sm:$0xff]  }
0x1c76   : > { %15637 = vmatprep.subr.bf16.mxu0 %v17133_v1 }
0x1c78   : > { %15628 = vmatpush3.bf16.msra.mxu1 %v16855_v13  ;;  %v16876_v13 = vld [vmem:[%s21420_s10 + $0x9d8] sm:$0xff]  }
0x1c79   : > { %15638 = vmatpush3.bf16.msra.mxu0 %v16858_v60  ;;  %14928 = vmatprep.subr.bf16.mxu1 %v16860_v44  ;;  %v16878_v60 = vld [vmem:[%s21420_s10 + $0x968] sm:$0xff]  }
0x1c7a   : > { %15639 = vmatprep.subr.bf16.mxu0 %v17133_v1 }
0x1c7b   : > { %15630 = vmatmul.mubr.msk.bf16.vlgmr.msra.gmra.mrb[92].mxu1 %vm1072_vm6, %v7704_v12  ;;  %v16877_v12 = vld [vmem:[%s21420_s10 + $0x998] sm:$0xff]  }
0x1c7c   : > { %14929 = vmatpush3.bf16.msra.mxu1 %v16861_v45 }
0x1c7d   : > { %15640 = vmatpush3.bf16.msra.mxu0 %v16859_v55  ;;  %14930 = vmatprep.subr.bf16.mxu1 %v16862_v46  ;;  %v16881_v55 = vld [vmem:[%s21420_s10 + $0x9a0] sm:$0xff]  }
0x1c7e   : > { %14950 = vmatprep.subr.bf16.mxu0 %v16864_v48 }
0x1c80   : > { %14931 = vmatpush3.bf16.msra.mxu1 %v16863_v53 }
0x1c81   : > { %14932 = vmatprep.subr.bf16.mxu1 %v16866_v17 }
0x1c84   : > { %14933 = vmatpush3.bf16.msra.mxu1 %v16867_v47 }
0x1c85   : > { %14934 = vmatprep.subr.bf16.mxu1 %v16870_v63 }
0x1c88   : > { %14935 = vmatpush3.bf16.msra.mxu1 %v16871_v59 }
0x1c89   : > { %14936 = vmatprep.subr.bf16.mxu1 %v16874_v51 }
0x1c8c   : > { %14937 = vmatpush3.bf16.msra.mxu1 %v16875_v57 }
0x1c8d   : > { %14938 = vmatprep.subr.bf16.mxu1 %v16878_v60 }
0x1d3e   : > { %v14890_v25 = vpop.f32.mrb[88].mxu1 }
0x1d3f   : > { %v14891_v21 = vpop.f32.mrb[89].mxu1 }
0x1d40   : > { %v14892_v62 = vadd.f32 %v14891_v21, %v14890_v25  ;;  %v14893_v32 = vpop.f32.mrb[90].mxu1  ;;  %v16884_v25 = vld [vmem:[%s21420_s10 + $0x9e8] sm:$0xff]  }
0x1d41   : > { %v14894_v10 = vpop.f32.mrb[91].mxu1  ;;  %v16879_v21 = vld [vmem:[%s21420_s10 + $0x928] sm:$0xff]  }
0x1d42   : > { %v14895_v23 = vadd.f32 %v14894_v10, %v14893_v32  ;;  %v14912_v29 = vpop.f32.mrb[112].mxu0  ;;  %v16885_v32 = vld [vmem:[%s21420_s10 + $0x9a8] sm:$0xff]   ;;  %14939 = vmatpush3.bf16.msra.mxu1 %v16879_v21  ;;  %v16883_v10 = vld [vmem:[%s21420_s10 + $0x930] sm:$0xff]  }
0x1d43   : > { %v14913_v30 = vpop.f32.mrb[113].mxu0 }
0x1d44   : > { %v14914_v4 = vadd.f32 %v14913_v30, %v14912_v29  ;;  %v14915_v0 = vpop.f32.mrb[114].mxu0 }
0x1d45   : > { %v14916_v31 = vpop.f32.mrb[115].mxu0 }
0x1d46   : > { %v14917_v33 = vadd.f32 %v14916_v31, %v14915_v0  ;;  %v8000_v28 = vadd.f32 %v14914_v4, %v14892_v62  ;;  %v16882_v62 = vld [vmem:[%s21420_s10 + $0x970] sm:$0xff]   ;;  %v16886_v4 = vld [vmem:[%s21420_s10 + $0x978] sm:$0xff]  }
0x1d47   : > { %14940 = vmatprep.subr.bf16.mxu1 %v16882_v62  ;;  %v16887_v0 = vld [vmem:[%s21420_s10 + $0x938] sm:$0xff]   ;;  %v16888_v31 = vld [vmem:[%s21420_s10 + $0x9f0] sm:$0xff]  }
0x1d48   : > { %v8003_v56 = vadd.f32 %v14917_v33, %v14895_v23  ;;  %14941 = vmatpush3.bf16.msra.mxu1 %v16883_v10 }
0x1d49   : > { %14942 = vmatprep.subr.bf16.mxu1 %v16886_v4 }
0x1d4c   : > { %14943 = vmatpush3.bf16.msra.mxu1 %v16887_v0 }
0x1d4d   : > { %15645 = vmatprep.subr.bf16.mxu1 %v17133_v1 }
0x1d4e   : > { %v8040_v61 = vpop.f32.mrb[92].mxu1 }
0x1d4f   : > { %v8041_v27 = vadd.f32 %v8040_v61, %v8000_v28  ;;  %v15631_v35 = vpop.f32.mrb[93].mxu1  ;;  %v16889_v28 = vld [vmem:[%s21420_s10 + $0x9b0] sm:$0xff]  }
0x1d50   : > { %v8043_v36 = vpop.f32.mrb[94].mxu1 }
0x1d51   : > { %v8044_v34 = vadd.f32 %v8043_v36, %v8003_v56  ;;  %v15632_v24 = vpop.f32.mrb[95].mxu1  ;;  %v8047_v38 = vmax.f32 %v8041_v27, 0.0 }
0x1d53   : > { %v8048_v39 = vmax.f32 %v8044_v34, 0.0 }
0x1d55   : > { %v8058_v5 = vpack.c.bf16 %v8048_v39, %v8047_v38  ;;  %v16892_v38 = vld [vmem:[%s21420_s10 + $0x9b8] sm:$0xff]  }
0x1d57   : > { %15642 = vmatmul.mubr.msk.bf16.vlgmr.msra.gmra.mrb[116].mxu0 %vm1072_vm6, %v8058_v5 }
0x1d58   : > { %14951 = vmatpush3.bf16.msra.mxu0 %v16865_v49 }
0x1d59   : > { %14952 = vmatprep.subr.bf16.mxu0 %v16868_v50 }
0x1d5c   : > { %14953 = vmatpush3.bf16.msra.mxu0 %v16869_v54 }
0x1d5d   : > { %14954 = vmatprep.subr.bf16.mxu0 %v16872_v52 }
0x1d60   : > { %14955 = vmatpush3.bf16.msra.mxu0 %v16873_v26 }
0x1d61   : > { %14956 = vmatprep.subr.bf16.mxu0 %v16876_v13 }
0x1d64   : > { %14957 = vmatpush3.bf16.msra.mxu0 %v16877_v12 }
0x1d65   : > { %14958 = vmatprep.subr.bf16.mxu0 %v16880_v58 }
0x1d68   : > { %14959 = vmatpush3.bf16.msra.mxu0 %v16881_v55 }
0x1d69   : > { %14960 = vmatprep.subr.bf16.mxu0 %v16884_v25 }
0x1d6c   : > { %14961 = vmatpush3.bf16.msra.mxu0 %v16885_v32 }
0x1d6d   : > { %14962 = vmatprep.subr.bf16.mxu0 %v16888_v31 }
0x1d70   : > { %14963 = vmatpush3.bf16.msra.mxu0 %v16889_v28 }
0x1e2a   : > { %v8120_v23 = vpop.f32.mrb[116].mxu0 }
0x1e2b   : > { %v19783_v29 = vadd.f32 %v8120_v23, %v19593_v9  ;;  %v15643_v30 = vpop.f32.mrb[117].mxu0 }
0x1e2c   : > { %v8123_v33 = vpop.f32.mrb[118].mxu0 }
0x1e2d   : > { %v19798_v9 = vadd.f32 %v8123_v33, %v19608_v22  ;;  %v15644_v56 = vpop.f32.mrb[119].mxu0  ;;  %v8160_v61 = vrot.slane %v19783_v29, 7  ;;  %v8142_v36 = vrot.slane %v19783_v29, 4  ;;  %v16890_v22 = vld [vmem:[%s21420_s10 + $0x9f8] sm:$0xff]   ;;  %v8167_v24 = vrot.slane %v19783_v29, 1 }
0x1e2e   : > { %14964 = vmatprep.subr.bf16.mxu0 %v16890_v22  ;;  %v8133_v57 = vrot.slane %v19783_v29, 3  ;;  %v8151_v60 = vrot.slane %v19783_v29, 5 }
0x1e2f   : > { %v8158_v27 = vrot.slane %v19798_v9, 7  ;;  %v8140_v35 = vrot.slane %v19798_v9, 4  ;;  %v8168_v34 = vrot.slane %v19798_v9, 1  ;;  %14965 = vmatpush3.bf16.msra.mxu0 %v16892_v38  ;;  %v8130_v12 = vrot.slane %v19798_v9, 3 }
0x1e30   : > { %15657 = vmatprep.subr.bf16.mxu0 %v17133_v1  ;;  %v8149_v58 = vrot.slane %v19798_v9, 5 }
0x1e31   : > { %v8161_v39 = vsel %vm1960_vm12, %v8160_v61, %v8158_v27  ;;  %v8164_v5 = vsel %vm1960_vm12, %v8158_v27, %v8160_v61  ;;  %v8143_v44 = vsel %vm1214_vm15, %v8142_v36, %v8140_v35  ;;  %v8146_v45 = vsel %vm1214_vm15, %v8140_v35, %v8142_v36 }
0x1e32   : > { %v8165_v46 = vmul.f32 %v8164_v5, %v17738_v2  ;;  %v8166_v48 = vmul.f32 %v8161_v39, %v17740_v3  ;;  %v8147_v49 = vmul.f32 %v8146_v45, %v17744_v8  ;;  %v8148_v50 = vmul.f32 %v8143_v44, %v17742_v7  ;;  %v16891_v39 = vld [vmem:[%s21420_s10 + $0xa00] sm:$0xff]  }
0x1e33   : > { %v8178_v53 = vmul.f32 %v8143_v44, %v17762_v18  ;;  %v8179_v17 = vmul.f32 %v8146_v45, %v17749_v11  ;;  %v8169_v54 = vsel %vm875_vm0, %v8167_v24, %v8168_v34  ;;  %v8173_v52 = vsel %vm875_vm0, %v8168_v34, %v8167_v24 }
0x1e34   : > { %v16217_v47 = vpack.i.bf16 %v8166_v48, %v8165_v46  ;;  %v16222_v63 = vpack.i.bf16 %v8148_v50, %v8147_v49  ;;  %v8174_v26 = vmul.f32 %v8169_v54, %v17796_v41  ;;  %v8175_v13 = vmul.f32 %v8173_v52, %v17794_v40 }
0x1e35   : > { %v16227_v59 = vpack.i.bf16 %v8179_v17, %v8178_v53  ;;  %v8134_v55 = vsel %vm2011_vm5, %v8133_v57, %v8130_v12  ;;  %v8137_v25 = vsel %vm2011_vm5, %v8130_v12, %v8133_v57  ;;  %v8152_v21 = vsel %vm1213_vm14, %v8151_v60, %v8149_v58  ;;  %v16897_v57 = vld [vmem:[%s21421_s11 + $0x108] sm:$0xff]  }
0x1e36   : > { %16218 = vrot.lane.b32.xlu1 %v16217_v47, %s21471_s1  ;;  %16223 = vrot.lane.b32.xlu0 %v16222_v63, %s21471_s1  ;;  %v16232_v51 = vpack.i.bf16 %v8175_v13, %v8174_v26  ;;  %v8155_v62 = vsel %vm1213_vm14, %v8149_v58, %v8151_v60  ;;  %v8138_v23 = vmul.f32 %v8137_v25, %v17867_v20  ;;  %v16893_v63 = vld [vmem:[%s21420_s10 + $0xa08] sm:$0xff]   ;;  %v16894_v26 = vld [vmem:[%s21420_s10 + $0xa10] sm:$0xff]  }
0x1e37   : > { %v8139_v30 = vmul.f32 %v8134_v55, %v17861_v15  ;;  %v8156_v4 = vmul.f32 %v8155_v62, %v17863_v16  ;;  %v8157_v0 = vmul.f32 %v8152_v21, %v17859_v14  ;;  %v8176_v5 = vmul.f32 %v8134_v55, %v17865_v19  ;;  %v16895_v13 = vld [vmem:[%s21420_s10 + $0xa18] sm:$0xff]   ;;  %v16896_v58 = vld [vmem:[%s21421_s11 + $0x100] sm:$0xff]   ;;  %v16898_v60 = vld [vmem:[%s21421_s11 + $0x110] sm:$0xff]  }
0x1e38   : > { %v8177_v44 = vmul.f32 %v8137_v25, %v17897_v6  ;;  %v16899_v55 = vld [vmem:[%s21421_s11 + $0x118] sm:$0xff]  }
0x1e3a   : > { %16228 = vrot.lane.b32.xlu1 %v16227_v59, %s21471_s1  ;;  %16233 = vrot.lane.b32.xlu0 %v16232_v51, %s21471_s1  ;;  %v8180_v59 = vmul.f32 %v8152_v21, %v17902_v43  ;;  %v8181_v51 = vmul.f32 %v8155_v62, %v17899_v42 }
0x1e3c   : > { %v8299_v12 = vpack.c.bf16 %v8181_v51, %v8180_v59  ;;  %v16911_v59 = vld [vmem:[%s21420_s10 + $0xa38] sm:$0xff]   ;;  %v16914_v51 = vld [vmem:[%s21420_s10 + $0xa80] sm:$0xff]  }
0x1ea8   : > { %v16219_v32 = vpop.permute.xlu1 %16218  ;;  %v16224_v10 = vpop.permute.xlu0 %16223 }
0x1ea9   : > { %v16221_v31 = vunpack.i.h.bf16 %v16219_v32  ;;  %v16220_v33 = vunpack.i.l.bf16 %v16219_v32  ;;  %v16226_v28 = vunpack.i.h.bf16 %v16224_v10  ;;  %v16225_v56 = vunpack.i.l.bf16 %v16224_v10 }
0x1eab   : > { %v8214_v61 = vsel %vm1072_vm6, %v8138_v23, %v16225_v56  ;;  %v8215_v27 = vsel %vm1072_vm6, %v8139_v30, %v16226_v28  ;;  %v8216_v35 = vsel %vm1072_vm6, %v8156_v4, %v16220_v33  ;;  %v8217_v36 = vsel %vm1072_vm6, %v8157_v0, %v16221_v31 }
0x1eac   : > { %v16229_v34 = vpop.permute.xlu1 %16228  ;;  %v16234_v22 = vpop.permute.xlu0 %16233  ;;  %v8296_v24 = vpack.c.bf16 %v8217_v36, %v8216_v35  ;;  %v8295_v38 = vpack.c.bf16 %v8215_v27, %v8214_v61 }
0x1ead   : > { %v16231_v45 = vunpack.i.h.bf16 %v16229_v34  ;;  %v16230_v46 = vunpack.i.l.bf16 %v16229_v34  ;;  %v16236_v48 = vunpack.i.h.bf16 %v16234_v22  ;;  %v16235_v49 = vunpack.i.l.bf16 %v16234_v22 }
0x1eae   : > { %8551 = vmatprep.mubr.bf16.mxu1 %v8296_v24 }
0x1eaf   : > { %v8219_v50 = vsel %vm1072_vm6, %v19798_v9, %v16236_v48  ;;  %v8218_v53 = vsel %vm1072_vm6, %v19783_v29, %v16235_v49  ;;  %8552 = vmatmul.mubr.bf16.vlgmr.msra.gmra.mrb[96].mxu1 %v8295_v38  ;;  %v8220_v17 = vsel %vm1072_vm6, %v8176_v5, %v16230_v46  ;;  %v8221_v54 = vsel %vm1072_vm6, %v8177_v44, %v16231_v45  ;;  %v16900_v44 = vld [vmem:[%s21420_s10 + $0xa60] sm:$0xff]   ;;  %v16902_v46 = vld [vmem:[%s21420_s10 + $0xa68] sm:$0xff]  }
0x1eb0   : > { %15646 = vmatpush3.bf16.msra.mxu1 %v16891_v39  ;;  %v8298_v52 = vpack.c.bf16 %v8221_v54, %v8220_v17  ;;  %v8297_v47 = vpack.c.bf16 %v8219_v50, %v8218_v53  ;;  %15653 = vmatprep.mubr.msk.bf16.mxu1 %vm17134_vm2, %v17133_v1  ;;  %v16901_v45 = vld [vmem:[%s21420_s10 + $0xa20] sm:$0xff]   ;;  %v16908_v50 = vld [vmem:[%s21420_s10 + $0xae8] sm:$0xff]   ;;  %v16906_v17 = vld [vmem:[%s21420_s10 + $0xa70] sm:$0xff]  }
0x1eb1   : > { %15647 = vmatprep.subr.bf16.mxu1 %v17133_v1  ;;  %v16904_v48 = vld [vmem:[%s21420_s10 + $0xae0] sm:$0xff]   ;;  %v16903_v53 = vld [vmem:[%s21420_s10 + $0xa28] sm:$0xff]  }
0x1eb2   : > { %8592 = vmatprep.mubr.bf16.mxu0 %v8298_v52  ;;  %v16905_v49 = vld [vmem:[%s21420_s10 + $0xaa0] sm:$0xff]   ;;  %v16909_v54 = vld [vmem:[%s21420_s10 + $0xaa8] sm:$0xff]   ;;  %v16912_v52 = vld [vmem:[%s21420_s10 + $0xaf0] sm:$0xff]  }
0x1eb3   : > { %8593 = vmatmul.mubr.bf16.vlgmr.msra.gmra.mrb[120].mxu0 %v8297_v47  ;;  %v16907_v47 = vld [vmem:[%s21420_s10 + $0xa30] sm:$0xff]  }
0x1eb4   : > { %15648 = vmatpush3.bf16.msra.mxu1 %v16893_v63  ;;  %15665 = vmatprep.mubr.msk.bf16.mxu0 %vm17134_vm2, %v17133_v1  ;;  %v16910_v63 = vld [vmem:[%s21420_s10 + $0xa78] sm:$0xff]  }
0x1eb5   : > { %15649 = vmatprep.subr.bf16.mxu1 %v17133_v1  ;;  %15658 = vmatpush3.bf16.msra.mxu0 %v16896_v58  ;;  %v16920_v58 = vld [vmem:[%s21420_s10 + $0xb00] sm:$0xff]  }
0x1eb6   : > { %15659 = vmatprep.subr.bf16.mxu0 %v17133_v1 }
0x1eb8   : > { %15650 = vmatpush3.bf16.msra.mxu1 %v16894_v26  ;;  %v16913_v26 = vld [vmem:[%s21420_s10 + $0xab0] sm:$0xff]  }
0x1eb9   : > { %15651 = vmatprep.subr.bf16.mxu1 %v17133_v1  ;;  %15660 = vmatpush3.bf16.msra.mxu0 %v16897_v57  ;;  %v16915_v57 = vld [vmem:[%s21420_s10 + $0xa40] sm:$0xff]  }
0x1eba   : > { %15661 = vmatprep.subr.bf16.mxu0 %v17133_v1 }
0x1ebc   : > { %15652 = vmatpush3.bf16.msra.mxu1 %v16895_v13  ;;  %v16916_v13 = vld [vmem:[%s21420_s10 + $0xaf8] sm:$0xff]  }
0x1ebd   : > { %15662 = vmatpush3.bf16.msra.mxu0 %v16898_v60  ;;  %14982 = vmatprep.subr.bf16.mxu1 %v16900_v44  ;;  %v16918_v60 = vld [vmem:[%s21420_s10 + $0xa88] sm:$0xff]  }
0x1ebe   : > { %15663 = vmatprep.subr.bf16.mxu0 %v17133_v1 }
0x1ebf   : > { %15654 = vmatmul.mubr.msk.bf16.vlgmr.msra.gmra.mrb[100].mxu1 %vm1072_vm6, %v8299_v12  ;;  %v16917_v12 = vld [vmem:[%s21420_s10 + $0xab8] sm:$0xff]  }
0x1ec0   : > { %14983 = vmatpush3.bf16.msra.mxu1 %v16901_v45 }
0x1ec1   : > { %15664 = vmatpush3.bf16.msra.mxu0 %v16899_v55  ;;  %14984 = vmatprep.subr.bf16.mxu1 %v16902_v46  ;;  %v16921_v55 = vld [vmem:[%s21420_s10 + $0xac0] sm:$0xff]  }
0x1ec2   : > { %15004 = vmatprep.subr.bf16.mxu0 %v16904_v48 }
0x1ec4   : > { %14985 = vmatpush3.bf16.msra.mxu1 %v16903_v53 }
0x1ec5   : > { %14986 = vmatprep.subr.bf16.mxu1 %v16906_v17 }
0x1ec8   : > { %14987 = vmatpush3.bf16.msra.mxu1 %v16907_v47 }
0x1ec9   : > { %14988 = vmatprep.subr.bf16.mxu1 %v16910_v63 }
0x1ecc   : > { %14989 = vmatpush3.bf16.msra.mxu1 %v16911_v59 }
0x1ecd   : > { %14990 = vmatprep.subr.bf16.mxu1 %v16914_v51 }
0x1ed0   : > { %14991 = vmatpush3.bf16.msra.mxu1 %v16915_v57 }
0x1ed1   : > { %14992 = vmatprep.subr.bf16.mxu1 %v16918_v60 }
0x1f82   : > { %v14944_v25 = vpop.f32.mrb[96].mxu1 }
0x1f83   : > { %v14945_v21 = vpop.f32.mrb[97].mxu1 }
0x1f84   : > { %v14946_v62 = vadd.f32 %v14945_v21, %v14944_v25  ;;  %v14947_v32 = vpop.f32.mrb[98].mxu1  ;;  %v16924_v25 = vld [vmem:[%s21420_s10 + $0xb08] sm:$0xff]  }
0x1f85   : > { %v14948_v10 = vpop.f32.mrb[99].mxu1  ;;  %v16919_v21 = vld [vmem:[%s21420_s10 + $0xa48] sm:$0xff]  }
0x1f86   : > { %v14949_v23 = vadd.f32 %v14948_v10, %v14947_v32  ;;  %v14966_v30 = vpop.f32.mrb[120].mxu0  ;;  %v16925_v32 = vld [vmem:[%s21420_s10 + $0xac8] sm:$0xff]   ;;  %14993 = vmatpush3.bf16.msra.mxu1 %v16919_v21  ;;  %v16923_v10 = vld [vmem:[%s21420_s10 + $0xa50] sm:$0xff]  }
0x1f87   : > { %v14967_v4 = vpop.f32.mrb[121].mxu0 }
0x1f88   : > { %v14968_v0 = vadd.f32 %v14967_v4, %v14966_v30  ;;  %v14969_v31 = vpop.f32.mrb[122].mxu0 }
0x1f89   : > { %v14970_v33 = vpop.f32.mrb[123].mxu0 }
0x1f8a   : > { %v14971_v28 = vadd.f32 %v14970_v33, %v14969_v31  ;;  %v8595_v56 = vadd.f32 %v14968_v0, %v14946_v62  ;;  %v16922_v62 = vld [vmem:[%s21420_s10 + $0xa90] sm:$0xff]   ;;  %v16926_v0 = vld [vmem:[%s21420_s10 + $0xa98] sm:$0xff]  }
0x1f8b   : > { %14994 = vmatprep.subr.bf16.mxu1 %v16922_v62  ;;  %v16927_v31 = vld [vmem:[%s21420_s10 + $0xa58] sm:$0xff]   ;;  %v16928_v33 = vld [vmem:[%s21420_s10 + $0xb10] sm:$0xff]  }
0x1f8c   : > { %v8598_v61 = vadd.f32 %v14971_v28, %v14949_v23  ;;  %14995 = vmatpush3.bf16.msra.mxu1 %v16923_v10 }
0x1f8d   : > { %14996 = vmatprep.subr.bf16.mxu1 %v16926_v0 }
0x1f90   : > { %14997 = vmatpush3.bf16.msra.mxu1 %v16927_v31 }
0x1f91   : > { %15669 = vmatprep.subr.bf16.mxu1 %v17133_v1 }
0x1f92   : > { %v8635_v27 = vpop.f32.mrb[100].mxu1 }
0x1f93   : > { %v8636_v35 = vadd.f32 %v8635_v27, %v8595_v56  ;;  %v15655_v36 = vpop.f32.mrb[101].mxu1  ;;  %v16929_v56 = vld [vmem:[%s21420_s10 + $0xad0] sm:$0xff]  }
0x1f94   : > { %v8638_v34 = vpop.f32.mrb[102].mxu1 }
0x1f95   : > { %v8639_v22 = vadd.f32 %v8638_v34, %v8598_v61  ;;  %v15656_v24 = vpop.f32.mrb[103].mxu1  ;;  %v8642_v38 = vmax.f32 %v8636_v35, 0.0 }
0x1f97   : > { %v8643_v39 = vmax.f32 %v8639_v22, 0.0 }
0x1f99   : > { %v8653_v5 = vpack.c.bf16 %v8643_v39, %v8642_v38  ;;  %v16932_v38 = vld [vmem:[%s21420_s10 + $0xad8] sm:$0xff]  }
0x1f9b   : > { %15666 = vmatmul.mubr.msk.bf16.vlgmr.msra.gmra.mrb[124].mxu0 %vm1072_vm6, %v8653_v5 }
0x1f9c   : > { %15005 = vmatpush3.bf16.msra.mxu0 %v16905_v49 }
0x1f9d   : > { %15006 = vmatprep.subr.bf16.mxu0 %v16908_v50 }
0x1fa0   : > { %15007 = vmatpush3.bf16.msra.mxu0 %v16909_v54 }
0x1fa1   : > { %15008 = vmatprep.subr.bf16.mxu0 %v16912_v52 }
0x1fa4   : > { %15009 = vmatpush3.bf16.msra.mxu0 %v16913_v26 }
0x1fa5   : > { %15010 = vmatprep.subr.bf16.mxu0 %v16916_v13 }
0x1fa8   : > { %15011 = vmatpush3.bf16.msra.mxu0 %v16917_v12 }
0x1fa9   : > { %15012 = vmatprep.subr.bf16.mxu0 %v16920_v58 }
0x1fac   : > { %15013 = vmatpush3.bf16.msra.mxu0 %v16921_v55 }
0x1fad   : > { %15014 = vmatprep.subr.bf16.mxu0 %v16924_v25 }
0x1fb0   : > { %15015 = vmatpush3.bf16.msra.mxu0 %v16925_v32 }
0x1fb1   : > { %15016 = vmatprep.subr.bf16.mxu0 %v16928_v33 }
0x1fb4   : > { %15017 = vmatpush3.bf16.msra.mxu0 %v16929_v56 }
0x206e   : > { %v8715_v23 = vpop.f32.mrb[124].mxu0 }
0x206f   : > { %v19973_v30 = vadd.f32 %v8715_v23, %v19783_v29  ;;  %v15667_v4 = vpop.f32.mrb[125].mxu0 }
0x2070   : > { %v8718_v28 = vpop.f32.mrb[126].mxu0 }
0x2071   : > { %v19988_v29 = vadd.f32 %v8718_v28, %v19798_v9  ;;  %v15668_v61 = vpop.f32.mrb[127].mxu0  ;;  %v8755_v27 = vrot.slane %v19973_v30, 7  ;;  %v8737_v34 = vrot.slane %v19973_v30, 4  ;;  %v16930_v9 = vld [vmem:[%s21420_s10 + $0xb18] sm:$0xff]   ;;  %v8762_v24 = vrot.slane %v19973_v30, 1 }
0x2072   : > { %15018 = vmatprep.subr.bf16.mxu0 %v16930_v9  ;;  %v8728_v57 = vrot.slane %v19973_v30, 3  ;;  %v8746_v60 = vrot.slane %v19973_v30, 5 }
0x2073   : > { %v8753_v35 = vrot.slane %v19988_v29, 7  ;;  %v8735_v36 = vrot.slane %v19988_v29, 4  ;;  %v8763_v22 = vrot.slane %v19988_v29, 1  ;;  %15019 = vmatpush3.bf16.msra.mxu0 %v16932_v38  ;;  %v8725_v12 = vrot.slane %v19988_v29, 3 }
0x2074   : > { %15681 = vmatprep.subr.bf16.mxu0 %v17133_v1  ;;  %v8744_v58 = vrot.slane %v19988_v29, 5 }
0x2075   : > { %v8756_v39 = vsel %vm1960_vm12, %v8755_v27, %v8753_v35  ;;  %v8759_v5 = vsel %vm1960_vm12, %v8753_v35, %v8755_v27  ;;  %v8738_v44 = vsel %vm1214_vm15, %v8737_v34, %v8735_v36  ;;  %v8741_v45 = vsel %vm1214_vm15, %v8735_v36, %v8737_v34 }
0x2076   : > { %v8760_v46 = vmul.f32 %v8759_v5, %v17738_v2  ;;  %v8761_v48 = vmul.f32 %v8756_v39, %v17740_v3  ;;  %v8742_v49 = vmul.f32 %v8741_v45, %v17744_v8  ;;  %v8743_v50 = vmul.f32 %v8738_v44, %v17742_v7  ;;  %v16931_v39 = vld [vmem:[%s21420_s10 + $0xb20] sm:$0xff]  }
0x2077   : > { %v8773_v53 = vmul.f32 %v8738_v44, %v17762_v18  ;;  %v8774_v17 = vmul.f32 %v8741_v45, %v17749_v11  ;;  %v8764_v54 = vsel %vm875_vm0, %v8762_v24, %v8763_v22  ;;  %v8768_v52 = vsel %vm875_vm0, %v8763_v22, %v8762_v24 }
0x2078   : > { %v16237_v47 = vpack.i.bf16 %v8761_v48, %v8760_v46  ;;  %v16242_v63 = vpack.i.bf16 %v8743_v50, %v8742_v49  ;;  %v8769_v26 = vmul.f32 %v8764_v54, %v17796_v41  ;;  %v8770_v13 = vmul.f32 %v8768_v52, %v17794_v40 }
0x2079   : > { %v16247_v59 = vpack.i.bf16 %v8774_v17, %v8773_v53  ;;  %v8729_v55 = vsel %vm2011_vm5, %v8728_v57, %v8725_v12  ;;  %v8732_v25 = vsel %vm2011_vm5, %v8725_v12, %v8728_v57  ;;  %v8747_v21 = vsel %vm1213_vm14, %v8746_v60, %v8744_v58  ;;  %v16937_v57 = vld [vmem:[%s21421_s11 + $0x128] sm:$0xff]  }
0x207a   : > { %16238 = vrot.lane.b32.xlu1 %v16237_v47, %s21471_s1  ;;  %16243 = vrot.lane.b32.xlu0 %v16242_v63, %s21471_s1  ;;  %v16252_v51 = vpack.i.bf16 %v8770_v13, %v8769_v26  ;;  %v8750_v62 = vsel %vm1213_vm14, %v8744_v58, %v8746_v60  ;;  %v8733_v23 = vmul.f32 %v8732_v25, %v17867_v20  ;;  %v16933_v63 = vld [vmem:[%s21420_s10 + $0xb28] sm:$0xff]   ;;  %v16934_v26 = vld [vmem:[%s21420_s10 + $0xb30] sm:$0xff]  }
0x207b   : > { %v8734_v4 = vmul.f32 %v8729_v55, %v17861_v15  ;;  %v8751_v0 = vmul.f32 %v8750_v62, %v17863_v16  ;;  %v8752_v31 = vmul.f32 %v8747_v21, %v17859_v14  ;;  %v8771_v5 = vmul.f32 %v8729_v55, %v17865_v19  ;;  %v16935_v13 = vld [vmem:[%s21420_s10 + $0xb38] sm:$0xff]   ;;  %v16936_v58 = vld [vmem:[%s21421_s11 + $0x120] sm:$0xff]   ;;  %v16938_v60 = vld [vmem:[%s21421_s11 + $0x130] sm:$0xff]  }
0x207c   : > { %v8772_v44 = vmul.f32 %v8732_v25, %v17897_v6  ;;  %v16939_v55 = vld [vmem:[%s21421_s11 + $0x138] sm:$0xff]  }
0x207e   : > { %16248 = vrot.lane.b32.xlu1 %v16247_v59, %s21471_s1  ;;  %16253 = vrot.lane.b32.xlu0 %v16252_v51, %s21471_s1  ;;  %v8775_v59 = vmul.f32 %v8747_v21, %v17902_v43  ;;  %v8776_v51 = vmul.f32 %v8750_v62, %v17899_v42 }
0x2080   : > { %v8894_v12 = vpack.c.bf16 %v8776_v51, %v8775_v59  ;;  %v16951_v59 = vld [vmem:[%s21420_s10 + $0xb58] sm:$0xff]   ;;  %v16954_v51 = vld [vmem:[%s21420_s10 + $0xba0] sm:$0xff]  }
0x20ec   : > { %v16239_v32 = vpop.permute.xlu1 %16238  ;;  %v16244_v10 = vpop.permute.xlu0 %16243 }
0x20ed   : > { %v16241_v33 = vunpack.i.h.bf16 %v16239_v32  ;;  %v16240_v28 = vunpack.i.l.bf16 %v16239_v32  ;;  %v16246_v56 = vunpack.i.h.bf16 %v16244_v10  ;;  %v16245_v61 = vunpack.i.l.bf16 %v16244_v10 }
0x20ef   : > { %v8809_v27 = vsel %vm1072_vm6, %v8733_v23, %v16245_v61  ;;  %v8810_v35 = vsel %vm1072_vm6, %v8734_v4, %v16246_v56  ;;  %v8811_v36 = vsel %vm1072_vm6, %v8751_v0, %v16240_v28  ;;  %v8812_v34 = vsel %vm1072_vm6, %v8752_v31, %v16241_v33 }
0x20f0   : > { %v16249_v22 = vpop.permute.xlu1 %16248  ;;  %v16254_v9 = vpop.permute.xlu0 %16253  ;;  %v8891_v24 = vpack.c.bf16 %v8812_v34, %v8811_v36  ;;  %v8890_v38 = vpack.c.bf16 %v8810_v35, %v8809_v27 }
0x20f1   : > { %v16251_v45 = vunpack.i.h.bf16 %v16249_v22  ;;  %v16250_v46 = vunpack.i.l.bf16 %v16249_v22  ;;  %v16256_v48 = vunpack.i.h.bf16 %v16254_v9  ;;  %v16255_v49 = vunpack.i.l.bf16 %v16254_v9 }
0x20f2   : > { %9146 = vmatprep.mubr.bf16.mxu1 %v8891_v24 }
0x20f3   : > { %v8814_v50 = vsel %vm1072_vm6, %v19988_v29, %v16256_v48  ;;  %v8813_v53 = vsel %vm1072_vm6, %v19973_v30, %v16255_v49  ;;  %9147 = vmatmul.mubr.bf16.vlgmr.msra.gmra.mrb[104].mxu1 %v8890_v38  ;;  %v8815_v17 = vsel %vm1072_vm6, %v8771_v5, %v16250_v46  ;;  %v8816_v54 = vsel %vm1072_vm6, %v8772_v44, %v16251_v45  ;;  %v16940_v44 = vld [vmem:[%s21420_s10 + $0xb80] sm:$0xff]   ;;  %v16942_v46 = vld [vmem:[%s21420_s10 + $0xb88] sm:$0xff]  }
0x20f4   : > { %15670 = vmatpush3.bf16.msra.mxu1 %v16931_v39  ;;  %v8893_v52 = vpack.c.bf16 %v8816_v54, %v8815_v17  ;;  %v8892_v47 = vpack.c.bf16 %v8814_v50, %v8813_v53  ;;  %15677 = vmatprep.mubr.msk.bf16.mxu1 %vm17134_vm2, %v17133_v1  ;;  %v16941_v45 = vld [vmem:[%s21420_s10 + $0xb40] sm:$0xff]   ;;  %v16948_v50 = vld [vmem:[%s21420_s10 + $0xc08] sm:$0xff]   ;;  %v16946_v17 = vld [vmem:[%s21420_s10 + $0xb90] sm:$0xff]  }
0x20f5   : > { %15671 = vmatprep.subr.bf16.mxu1 %v17133_v1  ;;  %v16944_v48 = vld [vmem:[%s21420_s10 + $0xc00] sm:$0xff]   ;;  %v16943_v53 = vld [vmem:[%s21420_s10 + $0xb48] sm:$0xff]  }
0x20f6   : > { %9187 = vmatprep.mubr.bf16.mxu0 %v8893_v52  ;;  %v16945_v49 = vld [vmem:[%s21420_s10 + $0xbc0] sm:$0xff]   ;;  %v16949_v54 = vld [vmem:[%s21420_s10 + $0xbc8] sm:$0xff]   ;;  %v16952_v52 = vld [vmem:[%s21420_s10 + $0xc10] sm:$0xff]  }
0x20f7   : > { %9188 = vmatmul.mubr.bf16.vlgmr.msra.gmra.mrb[128].mxu0 %v8892_v47  ;;  %v16947_v47 = vld [vmem:[%s21420_s10 + $0xb50] sm:$0xff]  }
0x20f8   : > { %15672 = vmatpush3.bf16.msra.mxu1 %v16933_v63  ;;  %15689 = vmatprep.mubr.msk.bf16.mxu0 %vm17134_vm2, %v17133_v1  ;;  %v16950_v63 = vld [vmem:[%s21420_s10 + $0xb98] sm:$0xff]  }
0x20f9   : > { %15673 = vmatprep.subr.bf16.mxu1 %v17133_v1  ;;  %15682 = vmatpush3.bf16.msra.mxu0 %v16936_v58  ;;  %v16960_v58 = vld [vmem:[%s21420_s10 + $0xc20] sm:$0xff]  }
0x20fa   : > { %15683 = vmatprep.subr.bf16.mxu0 %v17133_v1 }
0x20fc   : > { %15674 = vmatpush3.bf16.msra.mxu1 %v16934_v26  ;;  %v16953_v26 = vld [vmem:[%s21420_s10 + $0xbd0] sm:$0xff]  }
0x20fd   : > { %15675 = vmatprep.subr.bf16.mxu1 %v17133_v1  ;;  %15684 = vmatpush3.bf16.msra.mxu0 %v16937_v57  ;;  %v16955_v57 = vld [vmem:[%s21420_s10 + $0xb60] sm:$0xff]  }
0x20fe   : > { %15685 = vmatprep.subr.bf16.mxu0 %v17133_v1 }
0x2100   : > { %15676 = vmatpush3.bf16.msra.mxu1 %v16935_v13  ;;  %v16956_v13 = vld [vmem:[%s21420_s10 + $0xc18] sm:$0xff]  }
0x2101   : > { %15686 = vmatpush3.bf16.msra.mxu0 %v16938_v60  ;;  %15036 = vmatprep.subr.bf16.mxu1 %v16940_v44  ;;  %v16958_v60 = vld [vmem:[%s21420_s10 + $0xba8] sm:$0xff]  }
0x2102   : > { %15687 = vmatprep.subr.bf16.mxu0 %v17133_v1 }
0x2103   : > { %15678 = vmatmul.mubr.msk.bf16.vlgmr.msra.gmra.mrb[108].mxu1 %vm1072_vm6, %v8894_v12  ;;  %v16957_v12 = vld [vmem:[%s21420_s10 + $0xbd8] sm:$0xff]  }
0x2104   : > { %15037 = vmatpush3.bf16.msra.mxu1 %v16941_v45 }
0x2105   : > { %15688 = vmatpush3.bf16.msra.mxu0 %v16939_v55  ;;  %15038 = vmatprep.subr.bf16.mxu1 %v16942_v46  ;;  %v16961_v55 = vld [vmem:[%s21420_s10 + $0xbe0] sm:$0xff]  }
0x2106   : > { %15058 = vmatprep.subr.bf16.mxu0 %v16944_v48 }
0x2108   : > { %15039 = vmatpush3.bf16.msra.mxu1 %v16943_v53 }
0x2109   : > { %15040 = vmatprep.subr.bf16.mxu1 %v16946_v17 }
0x210c   : > { %15041 = vmatpush3.bf16.msra.mxu1 %v16947_v47 }
0x210d   : > { %15042 = vmatprep.subr.bf16.mxu1 %v16950_v63 }
0x2110   : > { %15043 = vmatpush3.bf16.msra.mxu1 %v16951_v59 }
0x2111   : > { %15044 = vmatprep.subr.bf16.mxu1 %v16954_v51 }
0x2114   : > { %15045 = vmatpush3.bf16.msra.mxu1 %v16955_v57 }
0x2115   : > { %15046 = vmatprep.subr.bf16.mxu1 %v16958_v60 }
0x21c6   : > { %v14998_v25 = vpop.f32.mrb[104].mxu1 }
0x21c7   : > { %v14999_v21 = vpop.f32.mrb[105].mxu1 }
0x21c8   : > { %v15000_v62 = vadd.f32 %v14999_v21, %v14998_v25  ;;  %v15001_v32 = vpop.f32.mrb[106].mxu1  ;;  %v16964_v25 = vld [vmem:[%s21420_s10 + $0xc28] sm:$0xff]  }
0x21c9   : > { %v15002_v10 = vpop.f32.mrb[107].mxu1  ;;  %v16959_v21 = vld [vmem:[%s21420_s10 + $0xb68] sm:$0xff]  }
0x21ca   : > { %v15003_v23 = vadd.f32 %v15002_v10, %v15001_v32  ;;  %v15020_v4 = vpop.f32.mrb[128].mxu0  ;;  %v16965_v32 = vld [vmem:[%s21420_s10 + $0xbe8] sm:$0xff]   ;;  %15047 = vmatpush3.bf16.msra.mxu1 %v16959_v21  ;;  %v16963_v10 = vld [vmem:[%s21420_s10 + $0xb70] sm:$0xff]  }
0x21cb   : > { %v15021_v0 = vpop.f32.mrb[129].mxu0 }
0x21cc   : > { %v15022_v31 = vadd.f32 %v15021_v0, %v15020_v4  ;;  %v15023_v33 = vpop.f32.mrb[130].mxu0 }
0x21cd   : > { %v15024_v28 = vpop.f32.mrb[131].mxu0 }
0x21ce   : > { %v15025_v56 = vadd.f32 %v15024_v28, %v15023_v33  ;;  %v9190_v61 = vadd.f32 %v15022_v31, %v15000_v62  ;;  %v16962_v62 = vld [vmem:[%s21420_s10 + $0xbb0] sm:$0xff]   ;;  %v16966_v31 = vld [vmem:[%s21420_s10 + $0xbb8] sm:$0xff]  }
0x21cf   : > { %15048 = vmatprep.subr.bf16.mxu1 %v16962_v62  ;;  %v16967_v33 = vld [vmem:[%s21420_s10 + $0xb78] sm:$0xff]   ;;  %v16968_v28 = vld [vmem:[%s21420_s10 + $0xc30] sm:$0xff]  }
0x21d0   : > { %v9193_v27 = vadd.f32 %v15025_v56, %v15003_v23  ;;  %15049 = vmatpush3.bf16.msra.mxu1 %v16963_v10 }
0x21d1   : > { %15050 = vmatprep.subr.bf16.mxu1 %v16966_v31 }
0x21d4   : > { %15051 = vmatpush3.bf16.msra.mxu1 %v16967_v33 }
0x21d5   : > { %15693 = vmatprep.subr.bf16.mxu1 %v17133_v1 }
0x21d6   : > { %v9230_v35 = vpop.f32.mrb[108].mxu1 }
0x21d7   : > { %v9231_v36 = vadd.f32 %v9230_v35, %v9190_v61  ;;  %v15679_v34 = vpop.f32.mrb[109].mxu1  ;;  %v16969_v61 = vld [vmem:[%s21420_s10 + $0xbf0] sm:$0xff]  }
0x21d8   : > { %v9233_v22 = vpop.f32.mrb[110].mxu1 }
0x21d9   : > { %v9234_v9 = vadd.f32 %v9233_v22, %v9193_v27  ;;  %v15680_v24 = vpop.f32.mrb[111].mxu1  ;;  %v9237_v38 = vmax.f32 %v9231_v36, 0.0 }
0x21db   : > { %v9238_v39 = vmax.f32 %v9234_v9, 0.0 }
0x21dd   : > { %v9248_v5 = vpack.c.bf16 %v9238_v39, %v9237_v38  ;;  %v16972_v38 = vld [vmem:[%s21420_s10 + $0xbf8] sm:$0xff]  }
0x21df   : > { %15690 = vmatmul.mubr.msk.bf16.vlgmr.msra.gmra.mrb[132].mxu0 %vm1072_vm6, %v9248_v5 }
0x21e0   : > { %15059 = vmatpush3.bf16.msra.mxu0 %v16945_v49 }
0x21e1   : > { %15060 = vmatprep.subr.bf16.mxu0 %v16948_v50 }
0x21e4   : > { %15061 = vmatpush3.bf16.msra.mxu0 %v16949_v54 }
0x21e5   : > { %15062 = vmatprep.subr.bf16.mxu0 %v16952_v52 }
0x21e8   : > { %15063 = vmatpush3.bf16.msra.mxu0 %v16953_v26 }
0x21e9   : > { %15064 = vmatprep.subr.bf16.mxu0 %v16956_v13 }
0x21ec   : > { %15065 = vmatpush3.bf16.msra.mxu0 %v16957_v12 }
0x21ed   : > { %15066 = vmatprep.subr.bf16.mxu0 %v16960_v58 }
0x21f0   : > { %15067 = vmatpush3.bf16.msra.mxu0 %v16961_v55 }
0x21f1   : > { %15068 = vmatprep.subr.bf16.mxu0 %v16964_v25 }
0x21f4   : > { %15069 = vmatpush3.bf16.msra.mxu0 %v16965_v32 }
0x21f5   : > { %15070 = vmatprep.subr.bf16.mxu0 %v16968_v28 }
0x21f8   : > { %15071 = vmatpush3.bf16.msra.mxu0 %v16969_v61 }
0x22b2   : > { %v9310_v23 = vpop.f32.mrb[132].mxu0 }
0x22b3   : > { %v20163_v4 = vadd.f32 %v9310_v23, %v19973_v30  ;;  %v15691_v0 = vpop.f32.mrb[133].mxu0 }
0x22b4   : > { %v9313_v56 = vpop.f32.mrb[134].mxu0 }
0x22b5   : > { %v20178_v30 = vadd.f32 %v9313_v56, %v19988_v29  ;;  %v15692_v27 = vpop.f32.mrb[135].mxu0  ;;  %v9350_v35 = vrot.slane %v20163_v4, 7  ;;  %v9332_v22 = vrot.slane %v20163_v4, 4  ;;  %v16970_v29 = vld [vmem:[%s21420_s10 + $0xc38] sm:$0xff]   ;;  %v9357_v24 = vrot.slane %v20163_v4, 1 }
0x22b6   : > { %15072 = vmatprep.subr.bf16.mxu0 %v16970_v29  ;;  %v9323_v57 = vrot.slane %v20163_v4, 3  ;;  %v9341_v60 = vrot.slane %v20163_v4, 5 }
0x22b7   : > { %v9348_v36 = vrot.slane %v20178_v30, 7  ;;  %v9330_v34 = vrot.slane %v20178_v30, 4  ;;  %v9358_v9 = vrot.slane %v20178_v30, 1  ;;  %15073 = vmatpush3.bf16.msra.mxu0 %v16972_v38  ;;  %v9320_v12 = vrot.slane %v20178_v30, 3 }
0x22b8   : > { %15705 = vmatprep.subr.bf16.mxu0 %v17133_v1  ;;  %v9339_v58 = vrot.slane %v20178_v30, 5 }
0x22b9   : > { %v9351_v39 = vsel %vm1960_vm12, %v9350_v35, %v9348_v36  ;;  %v9354_v5 = vsel %vm1960_vm12, %v9348_v36, %v9350_v35  ;;  %v9333_v44 = vsel %vm1214_vm15, %v9332_v22, %v9330_v34  ;;  %v9336_v45 = vsel %vm1214_vm15, %v9330_v34, %v9332_v22 }
0x22ba   : > { %v9355_v46 = vmul.f32 %v9354_v5, %v17738_v2  ;;  %v9356_v48 = vmul.f32 %v9351_v39, %v17740_v3  ;;  %v9337_v49 = vmul.f32 %v9336_v45, %v17744_v8  ;;  %v9338_v50 = vmul.f32 %v9333_v44, %v17742_v7  ;;  %v16971_v39 = vld [vmem:[%s21420_s10 + $0xc40] sm:$0xff]  }
0x22bb   : > { %v9368_v53 = vmul.f32 %v9333_v44, %v17762_v18  ;;  %v9369_v17 = vmul.f32 %v9336_v45, %v17749_v11  ;;  %v9359_v54 = vsel %vm875_vm0, %v9357_v24, %v9358_v9  ;;  %v9363_v52 = vsel %vm875_vm0, %v9358_v9, %v9357_v24 }
0x22bc   : > { %v16257_v47 = vpack.i.bf16 %v9356_v48, %v9355_v46  ;;  %v16262_v63 = vpack.i.bf16 %v9338_v50, %v9337_v49  ;;  %v9364_v26 = vmul.f32 %v9359_v54, %v17796_v41  ;;  %v9365_v13 = vmul.f32 %v9363_v52, %v17794_v40 }
0x22bd   : > { %v16267_v59 = vpack.i.bf16 %v9369_v17, %v9368_v53  ;;  %v9324_v55 = vsel %vm2011_vm5, %v9323_v57, %v9320_v12  ;;  %v9327_v25 = vsel %vm2011_vm5, %v9320_v12, %v9323_v57  ;;  %v9342_v21 = vsel %vm1213_vm14, %v9341_v60, %v9339_v58  ;;  %v16977_v57 = vld [vmem:[%s21421_s11 + $0x148] sm:$0xff]  }
0x22be   : > { %16258 = vrot.lane.b32.xlu1 %v16257_v47, %s21471_s1  ;;  %16263 = vrot.lane.b32.xlu0 %v16262_v63, %s21471_s1  ;;  %v16272_v51 = vpack.i.bf16 %v9365_v13, %v9364_v26  ;;  %v9345_v62 = vsel %vm1213_vm14, %v9339_v58, %v9341_v60  ;;  %v9328_v23 = vmul.f32 %v9327_v25, %v17867_v20  ;;  %v16973_v63 = vld [vmem:[%s21420_s10 + $0xc48] sm:$0xff]   ;;  %v16974_v26 = vld [vmem:[%s21420_s10 + $0xc50] sm:$0xff]  }
0x22bf   : > { %v9329_v0 = vmul.f32 %v9324_v55, %v17861_v15  ;;  %v9346_v31 = vmul.f32 %v9345_v62, %v17863_v16  ;;  %v9347_v33 = vmul.f32 %v9342_v21, %v17859_v14  ;;  %v9366_v5 = vmul.f32 %v9324_v55, %v17865_v19  ;;  %v16975_v13 = vld [vmem:[%s21420_s10 + $0xc58] sm:$0xff]   ;;  %v16976_v58 = vld [vmem:[%s21421_s11 + $0x140] sm:$0xff]   ;;  %v16978_v60 = vld [vmem:[%s21421_s11 + $0x150] sm:$0xff]  }
0x22c0   : > { %v9367_v44 = vmul.f32 %v9327_v25, %v17897_v6  ;;  %v16979_v55 = vld [vmem:[%s21421_s11 + $0x158] sm:$0xff]  }
0x22c2   : > { %16268 = vrot.lane.b32.xlu1 %v16267_v59, %s21471_s1  ;;  %16273 = vrot.lane.b32.xlu0 %v16272_v51, %s21471_s1  ;;  %v9370_v59 = vmul.f32 %v9342_v21, %v17902_v43  ;;  %v9371_v51 = vmul.f32 %v9345_v62, %v17899_v42 }
0x22c4   : > { %v9489_v12 = vpack.c.bf16 %v9371_v51, %v9370_v59  ;;  %v16991_v59 = vld [vmem:[%s21420_s10 + $0xc78] sm:$0xff]   ;;  %v16994_v51 = vld [vmem:[%s21420_s10 + $0xcc0] sm:$0xff]  }
0x2330   : > { %v16259_v32 = vpop.permute.xlu1 %16258  ;;  %v16264_v10 = vpop.permute.xlu0 %16263 }
0x2331   : > { %v16261_v28 = vunpack.i.h.bf16 %v16259_v32  ;;  %v16260_v56 = vunpack.i.l.bf16 %v16259_v32  ;;  %v16266_v61 = vunpack.i.h.bf16 %v16264_v10  ;;  %v16265_v27 = vunpack.i.l.bf16 %v16264_v10 }
0x2333   : > { %v9404_v35 = vsel %vm1072_vm6, %v9328_v23, %v16265_v27  ;;  %v9405_v36 = vsel %vm1072_vm6, %v9329_v0, %v16266_v61  ;;  %v9406_v34 = vsel %vm1072_vm6, %v9346_v31, %v16260_v56  ;;  %v9407_v22 = vsel %vm1072_vm6, %v9347_v33, %v16261_v28 }
0x2334   : > { %v16269_v9 = vpop.permute.xlu1 %16268  ;;  %v16274_v29 = vpop.permute.xlu0 %16273  ;;  %v9486_v24 = vpack.c.bf16 %v9407_v22, %v9406_v34  ;;  %v9485_v38 = vpack.c.bf16 %v9405_v36, %v9404_v35 }
0x2335   : > { %v16271_v45 = vunpack.i.h.bf16 %v16269_v9  ;;  %v16270_v46 = vunpack.i.l.bf16 %v16269_v9  ;;  %v16276_v48 = vunpack.i.h.bf16 %v16274_v29  ;;  %v16275_v49 = vunpack.i.l.bf16 %v16274_v29 }
0x2336   : > { %9741 = vmatprep.mubr.bf16.mxu1 %v9486_v24 }
0x2337   : > { %v9409_v50 = vsel %vm1072_vm6, %v20178_v30, %v16276_v48  ;;  %v9408_v53 = vsel %vm1072_vm6, %v20163_v4, %v16275_v49  ;;  %9742 = vmatmul.mubr.bf16.vlgmr.msra.gmra.mrb[112].mxu1 %v9485_v38  ;;  %v9410_v17 = vsel %vm1072_vm6, %v9366_v5, %v16270_v46  ;;  %v9411_v54 = vsel %vm1072_vm6, %v9367_v44, %v16271_v45  ;;  %v16980_v44 = vld [vmem:[%s21420_s10 + $0xca0] sm:$0xff]   ;;  %v16982_v46 = vld [vmem:[%s21420_s10 + $0xca8] sm:$0xff]  }
0x2338   : > { %15694 = vmatpush3.bf16.msra.mxu1 %v16971_v39  ;;  %v9488_v52 = vpack.c.bf16 %v9411_v54, %v9410_v17  ;;  %v9487_v47 = vpack.c.bf16 %v9409_v50, %v9408_v53  ;;  %15701 = vmatprep.mubr.msk.bf16.mxu1 %vm17134_vm2, %v17133_v1  ;;  %v16981_v45 = vld [vmem:[%s21420_s10 + $0xc60] sm:$0xff]   ;;  %v16988_v50 = vld [vmem:[%s21420_s10 + $0xd28] sm:$0xff]   ;;  %v16986_v17 = vld [vmem:[%s21420_s10 + $0xcb0] sm:$0xff]  }
0x2339   : > { %15695 = vmatprep.subr.bf16.mxu1 %v17133_v1  ;;  %v16984_v48 = vld [vmem:[%s21420_s10 + $0xd20] sm:$0xff]   ;;  %v16983_v53 = vld [vmem:[%s21420_s10 + $0xc68] sm:$0xff]  }
0x233a   : > { %9782 = vmatprep.mubr.bf16.mxu0 %v9488_v52  ;;  %v16985_v49 = vld [vmem:[%s21420_s10 + $0xce0] sm:$0xff]   ;;  %v16989_v54 = vld [vmem:[%s21420_s10 + $0xce8] sm:$0xff]   ;;  %v16992_v52 = vld [vmem:[%s21420_s10 + $0xd30] sm:$0xff]  }
0x233b   : > { %9783 = vmatmul.mubr.bf16.vlgmr.msra.gmra.mrb[136].mxu0 %v9487_v47  ;;  %v16987_v47 = vld [vmem:[%s21420_s10 + $0xc70] sm:$0xff]  }
0x233c   : > { %15696 = vmatpush3.bf16.msra.mxu1 %v16973_v63  ;;  %15713 = vmatprep.mubr.msk.bf16.mxu0 %vm17134_vm2, %v17133_v1  ;;  %v16990_v63 = vld [vmem:[%s21420_s10 + $0xcb8] sm:$0xff]  }
0x233d   : > { %15697 = vmatprep.subr.bf16.mxu1 %v17133_v1  ;;  %15706 = vmatpush3.bf16.msra.mxu0 %v16976_v58  ;;  %v17000_v58 = vld [vmem:[%s21420_s10 + $0xd40] sm:$0xff]  }
0x233e   : > { %15707 = vmatprep.subr.bf16.mxu0 %v17133_v1 }
0x2340   : > { %15698 = vmatpush3.bf16.msra.mxu1 %v16974_v26  ;;  %v16993_v26 = vld [vmem:[%s21420_s10 + $0xcf0] sm:$0xff]  }
0x2341   : > { %15699 = vmatprep.subr.bf16.mxu1 %v17133_v1  ;;  %15708 = vmatpush3.bf16.msra.mxu0 %v16977_v57  ;;  %v16995_v57 = vld [vmem:[%s21420_s10 + $0xc80] sm:$0xff]  }
0x2342   : > { %15709 = vmatprep.subr.bf16.mxu0 %v17133_v1 }
0x2344   : > { %15700 = vmatpush3.bf16.msra.mxu1 %v16975_v13  ;;  %v16996_v13 = vld [vmem:[%s21420_s10 + $0xd38] sm:$0xff]  }
0x2345   : > { %15710 = vmatpush3.bf16.msra.mxu0 %v16978_v60  ;;  %15090 = vmatprep.subr.bf16.mxu1 %v16980_v44  ;;  %v16998_v60 = vld [vmem:[%s21420_s10 + $0xcc8] sm:$0xff]  }
0x2346   : > { %15711 = vmatprep.subr.bf16.mxu0 %v17133_v1 }
0x2347   : > { %15702 = vmatmul.mubr.msk.bf16.vlgmr.msra.gmra.mrb[116].mxu1 %vm1072_vm6, %v9489_v12  ;;  %v16997_v12 = vld [vmem:[%s21420_s10 + $0xcf8] sm:$0xff]  }
0x2348   : > { %15091 = vmatpush3.bf16.msra.mxu1 %v16981_v45 }
0x2349   : > { %15712 = vmatpush3.bf16.msra.mxu0 %v16979_v55  ;;  %15092 = vmatprep.subr.bf16.mxu1 %v16982_v46  ;;  %v17001_v55 = vld [vmem:[%s21420_s10 + $0xd00] sm:$0xff]  }
0x234a   : > { %15112 = vmatprep.subr.bf16.mxu0 %v16984_v48 }
0x234c   : > { %15093 = vmatpush3.bf16.msra.mxu1 %v16983_v53 }
0x234d   : > { %15094 = vmatprep.subr.bf16.mxu1 %v16986_v17 }
0x2350   : > { %15095 = vmatpush3.bf16.msra.mxu1 %v16987_v47 }
0x2351   : > { %15096 = vmatprep.subr.bf16.mxu1 %v16990_v63 }
0x2354   : > { %15097 = vmatpush3.bf16.msra.mxu1 %v16991_v59 }
0x2355   : > { %15098 = vmatprep.subr.bf16.mxu1 %v16994_v51 }
0x2358   : > { %15099 = vmatpush3.bf16.msra.mxu1 %v16995_v57 }
0x2359   : > { %15100 = vmatprep.subr.bf16.mxu1 %v16998_v60 }
0x240a   : > { %v15052_v25 = vpop.f32.mrb[112].mxu1 }
0x240b   : > { %v15053_v21 = vpop.f32.mrb[113].mxu1 }
0x240c   : > { %v15054_v62 = vadd.f32 %v15053_v21, %v15052_v25  ;;  %v15055_v32 = vpop.f32.mrb[114].mxu1  ;;  %v17004_v25 = vld [vmem:[%s21420_s10 + $0xd48] sm:$0xff]  }
0x240d   : > { %v15056_v10 = vpop.f32.mrb[115].mxu1  ;;  %v16999_v21 = vld [vmem:[%s21420_s10 + $0xc88] sm:$0xff]  }
0x240e   : > { %v15057_v23 = vadd.f32 %v15056_v10, %v15055_v32  ;;  %v15074_v0 = vpop.f32.mrb[136].mxu0  ;;  %v17005_v32 = vld [vmem:[%s21420_s10 + $0xd08] sm:$0xff]   ;;  %15101 = vmatpush3.bf16.msra.mxu1 %v16999_v21  ;;  %v17003_v10 = vld [vmem:[%s21420_s10 + $0xc90] sm:$0xff]  }
0x240f   : > { %v15075_v31 = vpop.f32.mrb[137].mxu0 }
0x2410   : > { %v15076_v33 = vadd.f32 %v15075_v31, %v15074_v0  ;;  %v15077_v28 = vpop.f32.mrb[138].mxu0 }
0x2411   : > { %v15078_v56 = vpop.f32.mrb[139].mxu0 }
0x2412   : > { %v15079_v61 = vadd.f32 %v15078_v56, %v15077_v28  ;;  %v9785_v27 = vadd.f32 %v15076_v33, %v15054_v62  ;;  %v17002_v62 = vld [vmem:[%s21420_s10 + $0xcd0] sm:$0xff]   ;;  %v17006_v33 = vld [vmem:[%s21420_s10 + $0xcd8] sm:$0xff]  }
0x2413   : > { %15102 = vmatprep.subr.bf16.mxu1 %v17002_v62  ;;  %v17007_v28 = vld [vmem:[%s21420_s10 + $0xc98] sm:$0xff]   ;;  %v17008_v56 = vld [vmem:[%s21420_s10 + $0xd50] sm:$0xff]  }
0x2414   : > { %v9788_v35 = vadd.f32 %v15079_v61, %v15057_v23  ;;  %15103 = vmatpush3.bf16.msra.mxu1 %v17003_v10 }
0x2415   : > { %15104 = vmatprep.subr.bf16.mxu1 %v17006_v33 }
0x2418   : > { %15105 = vmatpush3.bf16.msra.mxu1 %v17007_v28 }
0x2419   : > { %15717 = vmatprep.subr.bf16.mxu1 %v17133_v1 }
0x241a   : > { %v9825_v36 = vpop.f32.mrb[116].mxu1 }
0x241b   : > { %v9826_v34 = vadd.f32 %v9825_v36, %v9785_v27  ;;  %v15703_v22 = vpop.f32.mrb[117].mxu1  ;;  %v17009_v27 = vld [vmem:[%s21420_s10 + $0xd10] sm:$0xff]  }
0x241c   : > { %v9828_v9 = vpop.f32.mrb[118].mxu1 }
0x241d   : > { %v9829_v29 = vadd.f32 %v9828_v9, %v9788_v35  ;;  %v15704_v24 = vpop.f32.mrb[119].mxu1  ;;  %v9832_v38 = vmax.f32 %v9826_v34, 0.0 }
0x241e   : > { %v17010_v24 = vld [vmem:[%s21420_s10 + $0xd58] sm:$0xff]  }
0x241f   : > { %v9833_v39 = vmax.f32 %v9829_v29, 0.0 }
0x2421   : > { %v9843_v5 = vpack.c.bf16 %v9833_v39, %v9832_v38  ;;  %v17012_v38 = vld [vmem:[%s21420_s10 + $0xd18] sm:$0xff]  }
0x2423   : > { %15714 = vmatmul.mubr.msk.bf16.vlgmr.msra.gmra.mrb[140].mxu0 %vm1072_vm6, %v9843_v5 }
0x2424   : > { %15113 = vmatpush3.bf16.msra.mxu0 %v16985_v49 }
0x2425   : > { %15114 = vmatprep.subr.bf16.mxu0 %v16988_v50 }
0x2428   : > { %15115 = vmatpush3.bf16.msra.mxu0 %v16989_v54 }
0x2429   : > { %15116 = vmatprep.subr.bf16.mxu0 %v16992_v52 }
0x242c   : > { %15117 = vmatpush3.bf16.msra.mxu0 %v16993_v26 }
0x242d   : > { %15118 = vmatprep.subr.bf16.mxu0 %v16996_v13 }
0x2430   : > { %15119 = vmatpush3.bf16.msra.mxu0 %v16997_v12 }
0x2431   : > { %15120 = vmatprep.subr.bf16.mxu0 %v17000_v58 }
0x2434   : > { %15121 = vmatpush3.bf16.msra.mxu0 %v17001_v55 }
0x2435   : > { %15122 = vmatprep.subr.bf16.mxu0 %v17004_v25 }
0x2438   : > { %15123 = vmatpush3.bf16.msra.mxu0 %v17005_v32 }
0x2439   : > { %15124 = vmatprep.subr.bf16.mxu0 %v17008_v56 }
0x243c   : > { %15125 = vmatpush3.bf16.msra.mxu0 %v17009_v27 }
0x243d   : > { %15126 = vmatprep.subr.bf16.mxu0 %v17010_v24 }
0x2440   : > { %15127 = vmatpush3.bf16.msra.mxu0 %v17012_v38 }
0x2441   : > { %15729 = vmatprep.subr.bf16.mxu0 %v17133_v1 }
0x24f6   : > { %v9905_v23 = vpop.f32.mrb[140].mxu0 }
0x24f7   : > { %v20353_v0 = vadd.f32 %v9905_v23, %v20163_v4  ;;  %v15715_v31 = vpop.f32.mrb[141].mxu0 }
0x24f8   : > { %v9908_v61 = vpop.f32.mrb[142].mxu0 }
0x24f9   : > { %v20368_v4 = vadd.f32 %v9908_v61, %v20178_v30  ;;  %v15716_v35 = vpop.f32.mrb[143].mxu0  ;;  %v9945_v36 = vrot.slane %v20353_v0, 7  ;;  %v9927_v9 = vrot.slane %v20353_v0, 4  ;;  %v9952_v30 = vrot.slane %v20353_v0, 1 }
0x24fa   : > { %v9918_v57 = vrot.slane %v20353_v0, 3  ;;  %v9936_v60 = vrot.slane %v20353_v0, 5 }
0x24fb   : > { %v9943_v34 = vrot.slane %v20368_v4, 7  ;;  %v9925_v22 = vrot.slane %v20368_v4, 4  ;;  %v9953_v29 = vrot.slane %v20368_v4, 1  ;;  %v9915_v12 = vrot.slane %v20368_v4, 3 }
0x24fc   : > { %v9934_v58 = vrot.slane %v20368_v4, 5 }
0x24fd   : > { %v9946_v39 = vsel %vm1960_vm12, %v9945_v36, %v9943_v34  ;;  %v9949_v5 = vsel %vm1960_vm12, %v9943_v34, %v9945_v36  ;;  %v9928_v44 = vsel %vm1214_vm15, %v9927_v9, %v9925_v22  ;;  %v9931_v45 = vsel %vm1214_vm15, %v9925_v22, %v9927_v9 }
0x24fe   : > { %v9950_v46 = vmul.f32 %v9949_v5, %v17738_v2  ;;  %v9951_v48 = vmul.f32 %v9946_v39, %v17740_v3  ;;  %v9932_v49 = vmul.f32 %v9931_v45, %v17744_v8  ;;  %v9933_v50 = vmul.f32 %v9928_v44, %v17742_v7  ;;  %v17011_v39 = vld [vmem:[%s21420_s10 + $0xd60] sm:$0xff]  }
0x24ff   : > { %v9963_v53 = vmul.f32 %v9928_v44, %v17762_v18  ;;  %v9964_v17 = vmul.f32 %v9931_v45, %v17749_v11  ;;  %v9954_v54 = vsel %vm875_vm0, %v9952_v30, %v9953_v29  ;;  %v9958_v52 = vsel %vm875_vm0, %v9953_v29, %v9952_v30 }
0x2500   : > { %v16277_v47 = vpack.i.bf16 %v9951_v48, %v9950_v46  ;;  %v16282_v63 = vpack.i.bf16 %v9933_v50, %v9932_v49  ;;  %v9959_v26 = vmul.f32 %v9954_v54, %v17796_v41  ;;  %v9960_v13 = vmul.f32 %v9958_v52, %v17794_v40 }
0x2501   : > { %v16287_v59 = vpack.i.bf16 %v9964_v17, %v9963_v53  ;;  %v9919_v55 = vsel %vm2011_vm5, %v9918_v57, %v9915_v12  ;;  %v9922_v25 = vsel %vm2011_vm5, %v9915_v12, %v9918_v57  ;;  %v9937_v21 = vsel %vm1213_vm14, %v9936_v60, %v9934_v58  ;;  %v17017_v57 = vld [vmem:[%s21421_s11 + $0x168] sm:$0xff]  }
0x2502   : > { %16278 = vrot.lane.b32.xlu1 %v16277_v47, %s21471_s1  ;;  %16283 = vrot.lane.b32.xlu0 %v16282_v63, %s21471_s1  ;;  %v16292_v51 = vpack.i.bf16 %v9960_v13, %v9959_v26  ;;  %v9940_v62 = vsel %vm1213_vm14, %v9934_v58, %v9936_v60  ;;  %v9923_v23 = vmul.f32 %v9922_v25, %v17867_v20  ;;  %v17013_v63 = vld [vmem:[%s21420_s10 + $0xd68] sm:$0xff]   ;;  %v17014_v26 = vld [vmem:[%s21420_s10 + $0xd70] sm:$0xff]  }
0x2503   : > { %v9924_v31 = vmul.f32 %v9919_v55, %v17861_v15  ;;  %v9941_v33 = vmul.f32 %v9940_v62, %v17863_v16  ;;  %v9942_v28 = vmul.f32 %v9937_v21, %v17859_v14  ;;  %v9961_v5 = vmul.f32 %v9919_v55, %v17865_v19  ;;  %v17015_v13 = vld [vmem:[%s21420_s10 + $0xd78] sm:$0xff]   ;;  %v17016_v58 = vld [vmem:[%s21421_s11 + $0x160] sm:$0xff]   ;;  %v17018_v60 = vld [vmem:[%s21421_s11 + $0x170] sm:$0xff]  }
0x2504   : > { %v9962_v44 = vmul.f32 %v9922_v25, %v17897_v6  ;;  %v17019_v55 = vld [vmem:[%s21421_s11 + $0x178] sm:$0xff]  }
0x2506   : > { %16288 = vrot.lane.b32.xlu1 %v16287_v59, %s21471_s1  ;;  %16293 = vrot.lane.b32.xlu0 %v16292_v51, %s21471_s1  ;;  %v9965_v59 = vmul.f32 %v9937_v21, %v17902_v43  ;;  %v9966_v51 = vmul.f32 %v9940_v62, %v17899_v42 }
0x2508   : > { %v10084_v12 = vpack.c.bf16 %v9966_v51, %v9965_v59  ;;  %v17031_v59 = vld [vmem:[%s21428_s18 + $0x18] sm:$0xff]   ;;  %v17034_v51 = vld [vmem:[%s21428_s18 + $0x60] sm:$0xff]  }
0x2574   : > { %v16279_v32 = vpop.permute.xlu1 %16278  ;;  %v16284_v10 = vpop.permute.xlu0 %16283 }
0x2575   : > { %v16281_v56 = vunpack.i.h.bf16 %v16279_v32  ;;  %v16280_v61 = vunpack.i.l.bf16 %v16279_v32  ;;  %v16286_v27 = vunpack.i.h.bf16 %v16284_v10  ;;  %v16285_v35 = vunpack.i.l.bf16 %v16284_v10 }
0x2577   : > { %v9999_v36 = vsel %vm1072_vm6, %v9923_v23, %v16285_v35  ;;  %v10000_v34 = vsel %vm1072_vm6, %v9924_v31, %v16286_v27  ;;  %v10001_v22 = vsel %vm1072_vm6, %v9941_v33, %v16280_v61  ;;  %v10002_v9 = vsel %vm1072_vm6, %v9942_v28, %v16281_v56 }
0x2578   : > { %v16289_v29 = vpop.permute.xlu1 %16288  ;;  %v16294_v30 = vpop.permute.xlu0 %16293  ;;  %v10081_v24 = vpack.c.bf16 %v10002_v9, %v10001_v22  ;;  %v10080_v38 = vpack.c.bf16 %v10000_v34, %v9999_v36 }
0x2579   : > { %v16291_v45 = vunpack.i.h.bf16 %v16289_v29  ;;  %v16290_v46 = vunpack.i.l.bf16 %v16289_v29  ;;  %v16296_v48 = vunpack.i.h.bf16 %v16294_v30  ;;  %v16295_v49 = vunpack.i.l.bf16 %v16294_v30 }
0x257a   : > { %10336 = vmatprep.mubr.bf16.mxu1 %v10081_v24 }
0x257b   : > { %v10004_v50 = vsel %vm1072_vm6, %v20368_v4, %v16296_v48  ;;  %v10003_v53 = vsel %vm1072_vm6, %v20353_v0, %v16295_v49  ;;  %10337 = vmatmul.mubr.bf16.vlgmr.msra.gmra.mrb[120].mxu1 %v10080_v38  ;;  %v10005_v17 = vsel %vm1072_vm6, %v9961_v5, %v16290_v46  ;;  %v10006_v54 = vsel %vm1072_vm6, %v9962_v44, %v16291_v45  ;;  %v17020_v44 = vld [vmem:[%s21428_s18 + $0x40] sm:$0xff]   ;;  %v17022_v46 = vld [vmem:[%s21428_s18 + $0x48] sm:$0xff]  }
0x257c   : > { %v10082_v52 = vpack.c.bf16 %v10004_v50, %v10003_v53  ;;  %15718 = vmatpush3.bf16.msra.mxu1 %v17011_v39  ;;  %v10083_v47 = vpack.c.bf16 %v10006_v54, %v10005_v17  ;;  %15725 = vmatprep.mubr.msk.bf16.mxu1 %vm17134_vm2, %v17133_v1  ;;  %v17021_v45 = vld [vmem:[%s21428_s18] sm:$0xff]   ;;  %v17028_v50 = vld [vmem:[%s21428_s18 + $0xc8] sm:$0xff]   ;;  %v17026_v17 = vld [vmem:[%s21428_s18 + $0x50] sm:$0xff]  }
0x257d   : > { %15719 = vmatprep.subr.bf16.mxu1 %v17133_v1  ;;  %v17024_v48 = vld [vmem:[%s21428_s18 + $0xc0] sm:$0xff]   ;;  %v17023_v53 = vld [vmem:[%s21428_s18 + $0x8] sm:$0xff]  }
0x257e   : > { %10377 = vmatprep.mubr.bf16.mxu0 %v10083_v47  ;;  %v17025_v49 = vld [vmem:[%s21428_s18 + $0x80] sm:$0xff]   ;;  %v17029_v54 = vld [vmem:[%s21428_s18 + $0x88] sm:$0xff]   ;;  %v17027_v47 = vld [vmem:[%s21428_s18 + $0x10] sm:$0xff]  }
0x257f   : > { %10378 = vmatmul.mubr.bf16.vlgmr.msra.gmra.mrb[144].mxu0 %v10082_v52  ;;  %v17032_v52 = vld [vmem:[%s21428_s18 + $0xd0] sm:$0xff]  }
0x2580   : > { %15720 = vmatpush3.bf16.msra.mxu1 %v17013_v63  ;;  %15737 = vmatprep.mubr.msk.bf16.mxu0 %vm17134_vm2, %v17133_v1  ;;  %v17030_v63 = vld [vmem:[%s21428_s18 + $0x58] sm:$0xff]  }
0x2581   : > { %15721 = vmatprep.subr.bf16.mxu1 %v17133_v1  ;;  %15730 = vmatpush3.bf16.msra.mxu0 %v17016_v58  ;;  %v17040_v58 = vld [vmem:[%s21428_s18 + $0xe0] sm:$0xff]  }
0x2582   : > { %15731 = vmatprep.subr.bf16.mxu0 %v17133_v1 }
0x2584   : > { %15722 = vmatpush3.bf16.msra.mxu1 %v17014_v26  ;;  %v17033_v26 = vld [vmem:[%s21428_s18 + $0x90] sm:$0xff]  }
0x2585   : > { %15723 = vmatprep.subr.bf16.mxu1 %v17133_v1  ;;  %15732 = vmatpush3.bf16.msra.mxu0 %v17017_v57  ;;  %v17035_v57 = vld [vmem:[%s21428_s18 + $0x20] sm:$0xff]  }
0x2586   : > { %15733 = vmatprep.subr.bf16.mxu0 %v17133_v1 }
0x2588   : > { %15724 = vmatpush3.bf16.msra.mxu1 %v17015_v13  ;;  %v17036_v13 = vld [vmem:[%s21428_s18 + $0xd8] sm:$0xff]  }
0x2589   : > { %15734 = vmatpush3.bf16.msra.mxu0 %v17018_v60  ;;  %15144 = vmatprep.subr.bf16.mxu1 %v17020_v44  ;;  %v17038_v60 = vld [vmem:[%s21428_s18 + $0x68] sm:$0xff]   ;;  %v17050_v44 = vld [vmem:[%s21428_s18 + $0xf8] sm:$0xff]  }
0x258a   : > { %15735 = vmatprep.subr.bf16.mxu0 %v17133_v1 }
0x258b   : > { %15726 = vmatmul.mubr.msk.bf16.vlgmr.msra.gmra.mrb[124].mxu1 %vm1072_vm6, %v10084_v12  ;;  %v17037_v12 = vld [vmem:[%s21428_s18 + $0x98] sm:$0xff]  }
0x258c   : > { %15145 = vmatpush3.bf16.msra.mxu1 %v17021_v45  ;;  %v17052_v45 = vld [vmem:[%s21428_s18 + $0xb8] sm:$0xff]  }
0x258d   : > { %15736 = vmatpush3.bf16.msra.mxu0 %v17019_v55  ;;  %15146 = vmatprep.subr.bf16.mxu1 %v17022_v46  ;;  %v17041_v55 = vld [vmem:[%s21428_s18 + $0xa0] sm:$0xff]  }
0x258e   : > { %15166 = vmatprep.subr.bf16.mxu0 %v17024_v48 }
0x2590   : > { %15147 = vmatpush3.bf16.msra.mxu1 %v17023_v53 }
0x2591   : > { %15148 = vmatprep.subr.bf16.mxu1 %v17026_v17 }
0x2594   : > { %15149 = vmatpush3.bf16.msra.mxu1 %v17027_v47 }
0x2595   : > { %15150 = vmatprep.subr.bf16.mxu1 %v17030_v63 }
0x2598   : > { %15151 = vmatpush3.bf16.msra.mxu1 %v17031_v59 }
0x2599   : > { %15152 = vmatprep.subr.bf16.mxu1 %v17034_v51 }
0x259c   : > { %15153 = vmatpush3.bf16.msra.mxu1 %v17035_v57 }
0x259d   : > { %15154 = vmatprep.subr.bf16.mxu1 %v17038_v60 }
0x264e   : > { %v15106_v25 = vpop.f32.mrb[120].mxu1 }
0x264f   : > { %v15107_v21 = vpop.f32.mrb[121].mxu1 }
0x2650   : > { %v15108_v62 = vadd.f32 %v15107_v21, %v15106_v25  ;;  %v15109_v32 = vpop.f32.mrb[122].mxu1  ;;  %v17044_v25 = vld [vmem:[%s21428_s18 + $0xe8] sm:$0xff]  }
0x2651   : > { %v15110_v10 = vpop.f32.mrb[123].mxu1  ;;  %v17039_v21 = vld [vmem:[%s21428_s18 + $0x28] sm:$0xff]  }
0x2652   : > { %v15111_v23 = vadd.f32 %v15110_v10, %v15109_v32  ;;  %v15128_v31 = vpop.f32.mrb[144].mxu0  ;;  %v17045_v32 = vld [vmem:[%s21428_s18 + $0xa8] sm:$0xff]   ;;  %15155 = vmatpush3.bf16.msra.mxu1 %v17039_v21  ;;  %v17043_v10 = vld [vmem:[%s21428_s18 + $0x30] sm:$0xff]  }
0x2653   : > { %v15129_v33 = vpop.f32.mrb[145].mxu0 }
0x2654   : > { %v15130_v28 = vadd.f32 %v15129_v33, %v15128_v31  ;;  %v15131_v56 = vpop.f32.mrb[146].mxu0 }
0x2655   : > { %v15132_v61 = vpop.f32.mrb[147].mxu0 }
0x2656   : > { %v15133_v27 = vadd.f32 %v15132_v61, %v15131_v56  ;;  %v10380_v35 = vadd.f32 %v15130_v28, %v15108_v62  ;;  %v17042_v62 = vld [vmem:[%s21428_s18 + $0x70] sm:$0xff]  }
0x2657   : > { %15156 = vmatprep.subr.bf16.mxu1 %v17042_v62 }
0x2658   : > { %v10383_v36 = vadd.f32 %v15133_v27, %v15111_v23  ;;  %15157 = vmatpush3.bf16.msra.mxu1 %v17043_v10 }
0x265e   : > { %v10420_v34 = vpop.f32.mrb[124].mxu1 }
0x265f   : > { %v10421_v22 = vadd.f32 %v10420_v34, %v10380_v35  ;;  %v15727_v9 = vpop.f32.mrb[125].mxu1  ;;  %v17046_v34 = vld [vmem:[%s21428_s18 + $0x78] sm:$0xff]  }
0x2660   : > { %v10423_v29 = vpop.f32.mrb[126].mxu1  ;;  %15158 = vmatprep.subr.bf16.mxu1 %v17046_v34 }
0x2661   : > { %v10424_v30 = vadd.f32 %v10423_v29, %v10383_v36  ;;  %v15728_v24 = vpop.f32.mrb[127].mxu1  ;;  %v10427_v38 = vmax.f32 %v10421_v22, 0.0  ;;  %v17047_v22 = vld [vmem:[%s21428_s18 + $0x38] sm:$0xff]  }
0x2662   : > { %15159 = vmatpush3.bf16.msra.mxu1 %v17047_v22 }
0x2663   : > { %v10428_v39 = vmax.f32 %v10424_v30, 0.0  ;;  %15741 = vmatprep.subr.bf16.mxu1 %v17133_v1 }
0x2665   : > { %v10438_v5 = vpack.c.bf16 %v10428_v39, %v10427_v38 }
0x2667   : > { %15738 = vmatmul.mubr.msk.bf16.vlgmr.msra.gmra.mrb[148].mxu0 %vm1072_vm6, %v10438_v5 }
0x2668   : > { %15167 = vmatpush3.bf16.msra.mxu0 %v17025_v49 }
0x2669   : > { %15168 = vmatprep.subr.bf16.mxu0 %v17028_v50 }
0x266c   : > { %15169 = vmatpush3.bf16.msra.mxu0 %v17029_v54 }
0x266d   : > { %15170 = vmatprep.subr.bf16.mxu0 %v17032_v52 }
0x2670   : > { %15171 = vmatpush3.bf16.msra.mxu0 %v17033_v26 }
0x2671   : > { %15172 = vmatprep.subr.bf16.mxu0 %v17036_v13 }
0x2674   : > { %15173 = vmatpush3.bf16.msra.mxu0 %v17037_v12 }
0x2675   : > { %15174 = vmatprep.subr.bf16.mxu0 %v17040_v58 }
0x2678   : > { %15175 = vmatpush3.bf16.msra.mxu0 %v17041_v55 }
0x2679   : > { %15176 = vmatprep.subr.bf16.mxu0 %v17044_v25 }
0x267c   : > { %15177 = vmatpush3.bf16.msra.mxu0 %v17045_v32 }
0x273a   : > { %v10500_v23 = vpop.f32.mrb[148].mxu0 }
0x273b   : > { %v10507_v31 = vadd.f32 %v10500_v23, %v20353_v0  ;;  %v15739_v33 = vpop.f32.mrb[149].mxu0  ;;  %v17048_v0 = vld [vmem:[%s21428_s18 + $0xf0] sm:$0xff]  }
0x273c   : > { %v10503_v28 = vpop.f32.mrb[150].mxu0  ;;  %15178 = vmatprep.subr.bf16.mxu0 %v17048_v0 }
0x273d   : > { %vm10509_vm11 = vcmp.gt.f32.partialorder %v10507_v31, 0.0  ;;  %v10511_v56 = vmul.f32 0.01, %v10507_v31  ;;  %v10508_v61 = vadd.f32 %v10503_v28, %v20368_v4  ;;  %v15740_v27 = vpop.f32.mrb[151].mxu0  ;;  %v17049_v4 = vld [vmem:[%s21428_s18 + $0xb0] sm:$0xff]  }
0x273e   : > { %15179 = vmatpush3.bf16.msra.mxu0 %v17049_v4 }
0x273f   : > { %v20544_v35 = vsel %vm10509_vm11, %v10507_v31, %v10511_v56  ;;  %vm10510_vm13 = vcmp.gt.f32.partialorder %v10508_v61, 0.0  ;;  %v10512_v36 = vmul.f32 0.01, %v10508_v61  ;;  %15180 = vmatprep.subr.bf16.mxu0 %v17050_v44 }
0x2740   : > { %v10528_v29 = vrot.slane %v20544_v35, 4  ;;  %v10546_v30 = vrot.slane %v20544_v35, 7  ;;  %v10553_v39 = vrot.slane %v20544_v35, 1  ;;  %v10519_v12 = vrot.slane %v20544_v35, 3 }
0x2741   : > { %v20558_v9 = vsel %vm10510_vm13, %v10508_v61, %v10512_v36 }
0x2742   : > { %v10526_v24 = vrot.slane %v20558_v9, 4  ;;  %v10544_v38 = vrot.slane %v20558_v9, 7  ;;  %v10554_v5 = vrot.slane %v20558_v9, 1  ;;  %15181 = vmatpush3.bf16.msra.mxu0 %v17052_v45 }
0x2744   : > { %v10547_v46 = vsel %vm1960_vm12, %v10546_v30, %v10544_v38  ;;  %v10550_v48 = vsel %vm1960_vm12, %v10544_v38, %v10546_v30  ;;  %v10529_v49 = vsel %vm1214_vm15, %v10528_v29, %v10526_v24  ;;  %v10532_v50 = vsel %vm1214_vm15, %v10526_v24, %v10528_v29 }
0x2745   : > { %v10551_v53 = vmul.f32 %v10550_v48, %v17738_v2  ;;  %v10552_v17 = vmul.f32 %v10547_v46, %v17740_v3  ;;  %v10533_v54 = vmul.f32 %v10532_v50, %v17744_v8  ;;  %v10534_v52 = vmul.f32 %v10529_v49, %v17742_v7 }
0x2746   : > { %v10564_v47 = vmul.f32 %v10529_v49, %v17762_v18  ;;  %v10565_v63 = vmul.f32 %v10532_v50, %v17749_v11  ;;  %v10555_v26 = vsel %vm875_vm0, %v10553_v39, %v10554_v5  ;;  %v10559_v13 = vsel %vm875_vm0, %v10554_v5, %v10553_v39  ;;  %v17056_v50 = vld [vmem:[%s21430_s20] sm:$0xff]  }
0x2747   : > { %v16297_v59 = vpack.i.bf16 %v10552_v17, %v10551_v53  ;;  %v16302_v51 = vpack.i.bf16 %v10534_v52, %v10533_v54  ;;  %v10560_v2 = vmul.f32 %v10555_v26, %v17796_v41  ;;  %v10561_v3 = vmul.f32 %v10559_v13, %v17794_v40 }
0x2748   : > { %v16307_v7 = vpack.i.bf16 %v10565_v63, %v10564_v47  ;;  %v10516_v11 = vrot.slane %v20558_v9, 3  ;;  %v10535_v18 = vrot.slane %v20558_v9, 5  ;;  %v10537_v41 = vrot.slane %v20544_v35, 5 }
0x2749   : > { %16298 = vrot.lane.b32.xlu1 %v16297_v59, %s21471_s1  ;;  %16303 = vrot.lane.b32.xlu0 %v16302_v51, %s21471_s1  ;;  %v16312_v8 = vpack.i.bf16 %v10561_v3, %v10560_v2 }
0x274a   : > { %v10520_v40 = vsel %vm2011_vm5, %v10519_v12, %v10516_v11  ;;  %v10523_v58 = vsel %vm2011_vm5, %v10516_v11, %v10519_v12  ;;  %v10538_v57 = vsel %vm1213_vm14, %v10537_v41, %v10535_v18  ;;  %v10541_v60 = vsel %vm1213_vm14, %v10535_v18, %v10537_v41 }
0x274b   : > { %v10524_v21 = vmul.f32 %v10523_v58, %v17867_v20  ;;  %v10525_v62 = vmul.f32 %v10520_v40, %v17861_v15  ;;  %v10542_v32 = vmul.f32 %v10541_v60, %v17863_v16  ;;  %v10543_v10 = vmul.f32 %v10538_v57, %v17859_v14  ;;  %v17051_v14 = vld [vmem:[%s21428_s18 + $0x100] sm:$0xff]  }
0x274c   : > { %v10562_v16 = vmul.f32 %v10520_v40, %v17865_v19  ;;  %v10563_v0 = vmul.f32 %v10523_v58, %v17897_v6  ;;  %v17053_v6 = vld [vmem:[%s21428_s18 + $0x108] sm:$0xff]   ;;  %v10566_v46 = vmul.f32 %v10538_v57, %v17902_v43  ;;  %v10567_v48 = vmul.f32 %v10541_v60, %v17899_v42  ;;  %v14165_v42 = vld [vmem:[%s21429_s19] ss:$0 sm:$0xff] }
0x274d   : > { %16308 = vrot.lane.b32.xlu1 %v16307_v7, %s21471_s1  ;;  %16313 = vrot.lane.b32.xlu0 %v16312_v8, %s21471_s1 }
0x274e   : > { %v10684_v49 = vpack.c.bf16 %v10567_v48, %v10566_v46  ;;  %v828_v46 = vld [vmem:[%s21431_s21 + $0x168] sm:$0xff]  ;;  %v835_v48 = vld [vmem:[%s21431_s21 + $0x1a0] sm:$0xff] }
0x27bb   : > { %v16299_v55 = vpop.permute.xlu1 %16298  ;;  %v16304_v25 = vpop.permute.xlu0 %16303 }
0x27bc   : > { %v16301_v23 = vunpack.i.h.bf16 %v16299_v55  ;;  %v16300_v31 = vunpack.i.l.bf16 %v16299_v55  ;;  %v16306_v33 = vunpack.i.h.bf16 %v16304_v25  ;;  %v16305_v28 = vunpack.i.l.bf16 %v16304_v25 }
0x27be   : > { %v10600_v56 = vsel %vm1072_vm6, %v10524_v21, %v16305_v28  ;;  %v10601_v61 = vsel %vm1072_vm6, %v10525_v62, %v16306_v33  ;;  %v10602_v27 = vsel %vm1072_vm6, %v10542_v32, %v16300_v31  ;;  %v10603_v36 = vsel %vm1072_vm6, %v10543_v10, %v16301_v23  ;;  %v823_v62 = vld [vmem:[%s21431_s21 + $0x140] sm:$0xff]  ;;  %v17057_v32 = vld [vmem:[%s21430_s20 + $0x8] sm:$0xff]   ;;  %v17058_v10 = vld [vmem:[%s21430_s20 + $0x10] sm:$0xff]  }
0x27bf   : > { %v10680_v34 = vpack.c.bf16 %v10601_v61, %v10600_v56  ;;  %v16309_v20 = vpop.permute.xlu1 %16308  ;;  %v16314_v22 = vpop.permute.xlu0 %16313  ;;  %v10681_v15 = vpack.c.bf16 %v10603_v36, %v10602_v27  ;;  %v17064_v23 = vld [vmem:[%s21430_s20 + $0x20] sm:$0xff]   ;;  %v824_v33 = vld [vmem:[%s21431_s21 + $0x148] sm:$0xff]  ;;  %v17059_v61 = vld [vmem:[%s21430_s20 + $0x18] sm:$0xff]  }
0x27c0   : > { %v16311_v4 = vunpack.i.h.bf16 %v16309_v20  ;;  %v16310_v29 = vunpack.i.l.bf16 %v16309_v20  ;;  %v16316_v30 = vunpack.i.h.bf16 %v16314_v22  ;;  %v16315_v24 = vunpack.i.l.bf16 %v16314_v22  ;;  %v799_v31 = vld [vmem:[%s21431_s21 + $0x40] sm:$0xff]  ;;  %v800_v56 = vld [vmem:[%s21431_s21 + $0x48] sm:$0xff] }
0x27c1   : > { %10943 = vmatprep.mubr.bf16.mxu1 %v10681_v15  ;;  %v831_v28 = vld [vmem:[%s21431_s21 + $0x180] sm:$0xff]  ;;  %v808_v22 = vld [vmem:[%s21431_s21 + $0x88] sm:$0xff] }
0x27c2   : > { %v10605_v38 = vsel %vm1072_vm6, %v20558_v9, %v16316_v30  ;;  %v10604_v39 = vsel %vm1072_vm6, %v20544_v35, %v16315_v24  ;;  %10944 = vmatmul.mubr.bf16.vlgmr.msra.gmra.mrb[128].mxu1 %v10680_v34  ;;  %v10606_v5 = vsel %vm1072_vm6, %v10562_v16, %v16310_v29  ;;  %v10607_v44 = vsel %vm1072_vm6, %v10563_v0, %v16311_v4  ;;  %v17054_v35 = vld [vmem:[%s21428_s18 + $0x110] sm:$0xff]   ;;  %v17055_v9 = vld [vmem:[%s21428_s18 + $0x118] sm:$0xff]   ;;  %v17060_v27 = vld [vmem:[%s21430_s20 + $0x40] sm:$0xff]  }
0x27c3   : > { %v10682_v45 = vpack.c.bf16 %v10605_v38, %v10604_v39  ;;  %15742 = vmatpush3.bf16.msra.mxu1 %v17051_v14  ;;  %v10683_v19 = vpack.c.bf16 %v10607_v44, %v10606_v5  ;;  %15749 = vmatprep.mubr.msk.bf16.mxu1 %vm17134_vm2, %v17133_v1  ;;  %v807_v36 = vld [vmem:[%s21431_s21 + $0x80] sm:$0xff]  ;;  %v832_v34 = vld [vmem:[%s21431_s21 + $0x188] sm:$0xff]  ;;  %v825_v16 = vld [vmem:[%s21431_s21 + $0x150] sm:$0xff] }
0x27c4   : > { %15743 = vmatprep.subr.bf16.mxu1 %v17133_v1  ;;  %v839_v20 = vld [vmem:[%s21431_s21 + $0x1c0] sm:$0xff]  ;;  %v840_v14 = vld [vmem:[%s21431_s21 + $0x1c8] sm:$0xff]  ;;  %v801_v4 = vld [vmem:[%s21431_s21 + $0x50] sm:$0xff] }
0x27c5   : > { %10984 = vmatprep.mubr.bf16.mxu0 %v10683_v19  ;;  %v815_v15 = vld [vmem:[%s21431_s21 + $0xc0] sm:$0xff]  ;;  %v816_v0 = vld [vmem:[%s21431_s21 + $0xc8] sm:$0xff]  ;;  %v826_v29 = vld [vmem:[%s21431_s21 + $0x158] sm:$0xff] }
0x27c6   : > { %10985 = vmatmul.mubr.bf16.vlgmr.msra.gmra.mrb[152].mxu0 %v10682_v45  ;;  %v833_v30 = vld [vmem:[%s21431_s21 + $0x190] sm:$0xff]  ;;  %v802_v24 = vld [vmem:[%s21431_s21 + $0x58] sm:$0xff] }
0x27c7   : > { %15744 = vmatpush3.bf16.msra.mxu1 %v17053_v6  ;;  %15765 = vmatprep.mubr.msk.bf16.mxu0 %vm998_vm3, %v17056_v50  ;;  %v809_v38 = vld [vmem:[%s21431_s21 + $0x90] sm:$0xff]  ;;  %v834_v39 = vld [vmem:[%s21431_s21 + $0x198] sm:$0xff]  ;;  %v827_v6 = vld [vmem:[%s21431_s21 + $0x160] sm:$0xff] }
0x27c8   : > { %15745 = vmatprep.subr.bf16.mxu1 %v17133_v1  ;;  %v841_v5 = vld [vmem:[%s21431_s21 + $0x1d0] sm:$0xff]  ;;  %v810_v44 = vld [vmem:[%s21431_s21 + $0x98] sm:$0xff]  ;;  %v811_v50 = vld [vmem:[%s21431_s21 + $0xa0] sm:$0xff] }
0x27c9   : > { %v817_v45 = vld [vmem:[%s21431_s21 + $0xd0] sm:$0xff]  ;;  %v842_v19 = vld [vmem:[%s21431_s21 + $0x1d8] sm:$0xff] }
0x27cb   : > { %15746 = vmatpush3.bf16.msra.mxu1 %v17054_v35  ;;  %v818_v35 = vld [vmem:[%s21431_s21 + $0xd8] sm:$0xff] }
0x27cc   : > { %15747 = vmatprep.subr.bf16.mxu1 %v17133_v1 }
0x27cf   : > { %15748 = vmatpush3.bf16.msra.mxu1 %v17055_v9  ;;  %v803_v9 = vld [vmem:[%s21431_s21 + $0x60] sm:$0xff] }
0x27d2   : > { %15750 = vmatmul.mubr.msk.bf16.vlgmr.msra.gmra.mrb[132].mxu1 %vm1072_vm6, %v10684_v49  ;;  %v804_v49 = vld [vmem:[%s21431_s21 + $0x68] sm:$0xff] }
0x27d3   : > { %15755 = vmatprep.mubr.msk.bf16.mxu1 %vm998_vm3, %v17064_v23  ;;  %v797_v23 = vld [vmem:[%s21431_s21 + $0x30] sm:$0xff] }
0x2895   : > { %v15160_v53 = vpop.f32.mrb[128].mxu1 }
0x2896   : > { %v15161_v17 = vpop.f32.mrb[129].mxu1 }
0x2897   : > { %v15162_v54 = vadd.f32 %v15161_v17, %v15160_v53  ;;  %v15163_v52 = vpop.f32.mrb[130].mxu1  ;;  %v836_v53 = vld [vmem:[%s21431_s21 + $0x1a8] sm:$0xff]  ;;  %v843_v17 = vld [vmem:[%s21431_s21 + $0x1e0] sm:$0xff] }
0x2898   : > { %v15164_v43 = vpop.f32.mrb[131].mxu1 }
0x2899   : > { %v15165_v1 = vadd.f32 %v15164_v43, %v15163_v52  ;;  %v15182_v47 = vpop.f32.mrb[152].mxu0  ;;  %v10946_v26 = vadd.f32 %v15162_v54, %v14165_v42  ;;  %v812_v54 = vld [vmem:[%s21431_s21 + $0xa8] sm:$0xff]  ;;  %v819_v52 = vld [vmem:[%s21431_s21 + $0xe0] sm:$0xff]  ;;  %v829_v43 = vld [vmem:[%s21431_s21 + $0x170] sm:$0xff] }
0x289a   : > { %v15183_v63 = vpop.f32.mrb[153].mxu0 }
0x289b   : > { %v15184_v13 = vadd.f32 %v15183_v63, %v15182_v47  ;;  %v15185_v59 = vpop.f32.mrb[154].mxu0  ;;  %v10949_v2 = vadd.f32 %v15165_v1, %v14165_v42  ;;  %v844_v42 = vld [vmem:[%s21431_s21 + $0x1e8] sm:$0xff]  ;;  %v805_v47 = vld [vmem:[%s21431_s21 + $0x70] sm:$0xff]  ;;  %v830_v63 = vld [vmem:[%s21431_s21 + $0x178] sm:$0xff] }
0x289c   : > { %v15186_v51 = vpop.f32.mrb[155].mxu0  ;;  %v820_v1 = vld [vmem:[%s21431_s21 + $0xe8] sm:$0xff] }
0x289d   : > { %v15187_v3 = vadd.f32 %v15186_v51, %v15185_v59  ;;  %v10987_v7 = vadd.f32 %v15184_v13, %v10946_v26  ;;  %v837_v26 = vld [vmem:[%s21431_s21 + $0x1b0] sm:$0xff]  ;;  %v806_v13 = vld [vmem:[%s21431_s21 + $0x78] sm:$0xff] }
0x289e   : > { %v813_v59 = vld [vmem:[%s21431_s21 + $0xb0] sm:$0xff]  ;;  %v838_v51 = vld [vmem:[%s21431_s21 + $0x1b8] sm:$0xff] }
0x289f   : > { %v10990_v8 = vadd.f32 %v15187_v3, %v10949_v2  ;;  %v845_v2 = vld [vmem:[%s21431_s21 + $0x1f0] sm:$0xff]  ;;  %v814_v3 = vld [vmem:[%s21431_s21 + $0xb8] sm:$0xff] }
0x28a5   : > { %v11027_v11 = vpop.f32.mrb[132].mxu1 }
0x28a6   : > { %v11028_v18 = vadd.f32 %v11027_v11, %v10987_v7  ;;  %v15751_v12 = vpop.f32.mrb[133].mxu1  ;;  %v821_v7 = vld [vmem:[%s21431_s21 + $0xf0] sm:$0xff]  ;;  %v791_v11 = vld [vmem:[%s21431_s21] sm:$0xff] }
0x28a7   : > { %v11030_v41 = vpop.f32.mrb[134].mxu1  ;;  %v793_v12 = vld [vmem:[%s21431_s21 + $0x10] sm:$0xff] }
0x28a8   : > { %v11036_v40 = vmul.f32 0.01, %v11028_v18  ;;  %v11031_v58 = vadd.f32 %v11030_v41, %v10990_v8  ;;  %v15752_v57 = vpop.f32.mrb[135].mxu1  ;;  %vm11034_vm2 = vcmp.gt.f32.partialorder %v11028_v18, 0.0  ;;  %v846_v8 = vld [vmem:[%s21431_s21 + $0x1f8] sm:$0xff]  ;;  %v792_v41 = vld [vmem:[%s21431_s21 + $0x8] sm:$0xff] }
0x28a9   : > { %v847_v57 = vld [vmem:[%s21431_s21 + $0x200] sm:$0xff] }
0x28aa   : > { %vm11035_vm14 = vcmp.gt.f32.partialorder %v11031_v58, 0.0  ;;  %v11037_v60 = vmul.f32 0.01, %v11031_v58  ;;  %v11038_v55 = vsel %vm11034_vm2, %v11028_v18, %v11036_v40  ;;  %v822_v18 = vld [vmem:[%s21431_s21 + $0xf8] sm:$0xff]  ;;  %v795_v40 = vld [vmem:[%s21431_s21 + $0x20] sm:$0xff] }
0x28ac   : > { %v11039_v25 = vsel %vm11035_vm14, %v11031_v58, %v11037_v60  ;;  %v794_v58 = vld [vmem:[%s21431_s21 + $0x18] sm:$0xff]  ;;  %v796_v60 = vld [vmem:[%s21431_s21 + $0x28] sm:$0xff] }
0x28ad   : > { %v11048_v21 = vpack.c.bf16 %v11039_v25, %v11038_v55  ;;  %v849_v55 = vld [vmem:[%s21431_s21 + $0x210] sm:$0xff] }
0x28af   : > { %11079 = vrot.lane.b32.xlu0 %v11048_v21, %s21481_s29  ;;  %11285 = vrot.lane.b32.xlu1 %v11048_v21, %s21471_s1 }
0x28b0   : > { %15763 = vmatprep.subr.bf16.mxu0 %v11048_v21 }
0x28b1   : > { %15764 = vmatpush3.bf16.msra.mxu0 %v11048_v21 }
0x28b3   : > { %11742 = vperm.xlu0 %16005, %v823_v62   ;;  %11402 = vrot.lane.b32.xlu1 %v11048_v21, %s21470_s28  ;;  %v848_v62 = vld [vmem:[%s21431_s21 + $0x208] sm:$0xff] }
0x28b4   : > { %15766 = vmatmul.mubr.msk.bf16.vlgmr.msra.gmra.mrb[156].mxu0 %vm998_vm3, %v17057_v32  ;;  %v17066_v32 = vld [vmem:[%s21430_s20 + $0x28] sm:$0xff]  }
0x28b5   : > { %15769 = vmatprep.mubr.msk.bf16.mxu0 %vm998_vm3, %v17058_v10  ;;  %v17061_v10 = vld [vmem:[%s21430_s20 + $0x48] sm:$0xff]  }
0x28b7   : > { %11573 = vperm.xlu0 %16005, %v799_v31   ;;  %11747 = vperm.xlu1 %16006, %v824_v33   ;;  %v850_v33 = vld [vmem:[%s21431_s21 + $0x218] sm:$0xff] }
0x28bb   : > { %11790 = vperm.xlu0 %16005, %v831_v28   ;;  %11578 = vperm.xlu1 %16006, %v800_v56   ;;  %v17062_v28 = vld [vmem:[%s21430_s20 + $0x50] sm:$0xff]  }
0x28bc   : > { %15770 = vmatmul.mubr.msk.bf16.gmra.mrb[160].mxu0 %vm998_vm3, %v17059_v61  ;;  %v17068_v56 = vld [vmem:[%s21430_s20 + $0x30] sm:$0xff]   ;;  %v851_v61 = vld [vmem:[%s21431_s21 + $0x220] sm:$0xff] }
0x28bd   : > { %15775 = vmatprep.mubr.msk.bf16.mxu0 %vm998_vm3, %v17060_v27  ;;  %v798_v27 = vld [vmem:[%s21431_s21 + $0x38] sm:$0xff] }
0x28bf   : > { %11646 = vperm.xlu0 %16005, %v807_v36   ;;  %11795 = vperm.xlu1 %16006, %v832_v34   ;;  %v17070_v36 = vld [vmem:[%s21430_s20 + $0x38] sm:$0xff]  }
0x28c0   : > { %v17063_v34 = vld [vmem:[%s21430_s20 + $0x58] sm:$0xff]  }
0x28c3   : > { %11838 = vperm.xlu0 %16005, %v839_v20   ;;  %11651 = vperm.xlu1 %16006, %v808_v22   ;;  %v853_v20 = vld [vmem:[%s21431_s21 + $0x230] sm:$0xff]  ;;  %v17065_v22 = vld [vmem:[%s21430_s20 + $0x60] sm:$0xff]  }
0x28c7   : > { %11694 = vperm.xlu0 %16005, %v815_v15   ;;  %11843 = vperm.xlu1 %16006, %v840_v14   ;;  %v852_v15 = vld [vmem:[%s21431_s21 + $0x228] sm:$0xff] }
0x28c8   : > { %v17067_v14 = vld [vmem:[%s21430_s20 + $0x68] sm:$0xff]  }
0x28cb   : > { %11752 = vperm.xlu0 %16005, %v825_v16   ;;  %11699 = vperm.xlu1 %16006, %v816_v0   ;;  %v17069_v16 = vld [vmem:[%s21430_s20 + $0x70] sm:$0xff]   ;;  %v17071_v0 = vld [vmem:[%s21430_s20 + $0x78] sm:$0xff]  }
0x28cf   : > { %11583 = vperm.xlu0 %16005, %v801_v4   ;;  %11757 = vperm.xlu1 %16006, %v826_v29  }
0x28d3   : > { %11800 = vperm.xlu0 %16005, %v833_v30   ;;  %11588 = vperm.xlu1 %16006, %v802_v24  }
0x28d7   : > { %11656 = vperm.xlu0 %16005, %v809_v38   ;;  %11805 = vperm.xlu1 %16006, %v834_v39  }
0x28db   : > { %11848 = vperm.xlu0 %16005, %v841_v5   ;;  %11661 = vperm.xlu1 %16006, %v810_v44  }
0x28df   : > { %11704 = vperm.xlu0 %16005, %v817_v45   ;;  %11853 = vperm.xlu1 %16006, %v842_v19  }
0x28e3   : > { %11762 = vperm.xlu0 %16005, %v827_v6   ;;  %11709 = vperm.xlu1 %16006, %v818_v35  }
0x28e7   : > { %11593 = vperm.xlu0 %16005, %v803_v9   ;;  %11767 = vperm.xlu1 %16006, %v828_v46  }
0x28eb   : > { %11810 = vperm.xlu0 %16005, %v835_v48   ;;  %11598 = vperm.xlu1 %16006, %v804_v49  }
0x28ef   : > { %11666 = vperm.xlu0 %16005, %v811_v50   ;;  %11815 = vperm.xlu1 %16006, %v836_v53  }
0x28f3   : > { %11858 = vperm.xlu0 %16005, %v843_v17   ;;  %11671 = vperm.xlu1 %16006, %v812_v54   ;;  %v17072_v17 = vld [vmem:[%s21432_s22 + $0x80] sm:$0xff]   ;;  %v17073_v54 = vld [vmem:[%s21432_s22 + $0x88] sm:$0xff]  }
0x28f7   : > { %11714 = vperm.xlu0 %16005, %v819_v52   ;;  %11863 = vperm.xlu1 %16006, %v844_v42  }
0x28fb   : > { %11772 = vperm.xlu0 %16005, %v829_v43   ;;  %11719 = vperm.xlu1 %16006, %v820_v1  }
0x28ff   : > { %11603 = vperm.xlu0 %16005, %v805_v47   ;;  %11777 = vperm.xlu1 %16006, %v830_v63  }
0x2903   : > { %11820 = vperm.xlu0 %16005, %v837_v26   ;;  %11608 = vperm.xlu1 %16006, %v806_v13  }
0x2907   : > { %11676 = vperm.xlu0 %16005, %v813_v59   ;;  %11825 = vperm.xlu1 %16006, %v838_v51  }
0x290b   : > { %11868 = vperm.xlu0 %16005, %v845_v2   ;;  %11681 = vperm.xlu1 %16006, %v814_v3  }
0x290f   : > { %11724 = vperm.xlu0 %16005, %v821_v7   ;;  %11873 = vperm.xlu1 %16006, %v846_v8  }
0x2913   : > { %11525 = vperm.xlu0 %16005, %v791_v11   ;;  %11729 = vperm.xlu1 %16006, %v822_v18  }
0x2917   : > { %11535 = vperm.xlu0 %16005, %v793_v12   ;;  %11530 = vperm.xlu1 %16006, %v792_v41  }
0x291b   : > { %11545 = vperm.xlu0 %16005, %v795_v40   ;;  %11540 = vperm.xlu1 %16006, %v794_v58  }
0x291f   : > { %11886 = vperm.xlu0 %16005, %v847_v57   ;;  %11550 = vperm.xlu1 %16006, %v796_v60  }
0x2921   : > { %v11080_v25 = vpop.permute.xlu0 %11079  ;;  %v11286_v21 = vpop.permute.xlu1 %11285 }
0x2922   : > { %15753 = vmatprep.subr.bf16.mxu1 %v11080_v25  ;;  %15773 = vmatprep.subr.bf16.mxu0 %v11286_v21 }
0x2923   : > { %11896 = vperm.xlu0 %16005, %v849_v55   ;;  %15754 = vmatpush3.bf16.msra.mxu1 %v11080_v25 }
0x2924   : > { %11891 = vperm.xlu1 %16006, %v848_v62   ;;  %15774 = vmatpush3.bf16.msra.mxu0 %v11286_v21  ;;  %v17074_v21 = vld [vmem:[%s21432_s22 + $0x40] sm:$0xff]  }
0x2925   : > { %v11403_v31 = vpop.permute.xlu1 %11402  ;;  %v17075_v62 = vld [vmem:[%s21432_s22] sm:$0xff]   ;;  %15213 = vmatprep.subr.bf16.mxu1 %v17074_v21 }
0x2926   : > { %15783 = vmatprep.subr.bf16.mxu0 %v11403_v31  ;;  %15756 = vmatmul.mubr.msk.bf16.vlgmr.msra.gmra.mrb[136].mxu1 %vm998_vm3, %v17066_v32 }
0x2927   : > { %15776 = vmatmul.mubr.msk.bf16.vlgmr.msra.gmra.mrb[156].mxu0 %vm998_vm3, %v17061_v10  ;;  %11555 = vperm.xlu0 %16005, %v797_v23  }
0x2928   : > { %11901 = vperm.xlu1 %16006, %v850_v33   ;;  %15784 = vmatpush3.bf16.msra.mxu0 %v11403_v31 }
0x2929   : > { %15779 = vmatprep.mubr.msk.bf16.mxu0 %vm998_vm3, %v17062_v28  ;;  %15759 = vmatprep.mubr.msk.bf16.mxu1 %vm998_vm3, %v17068_v56 }
0x292a   : > { %15793 = vmatprep.subr.bf16.mxu0 %v17072_v17  ;;  %15214 = vmatpush3.bf16.msra.mxu1 %v17075_v62 }
0x292b   : > { %11906 = vperm.xlu0 %16005, %v851_v61  }
0x292c   : > { %11560 = vperm.xlu1 %16006, %v798_v27  }
0x292e   : > { %15760 = vmatmul.mubr.msk.bf16.gmra.mrb[140].mxu1 %vm998_vm3, %v17070_v36 }
0x292f   : > { %15780 = vmatmul.mubr.msk.bf16.gmra.mrb[160].mxu0 %vm998_vm3, %v17063_v34  ;;  %11916 = vperm.xlu0 %16005, %v853_v20  }
0x2930   : > { %11911 = vperm.xlu1 %16006, %v852_v15   ;;  %15785 = vmatprep.mubr.msk.bf16.mxu0 %vm998_vm3, %v17065_v22 }
0x2932   : > { %v20894_v4 = vpop.permute.xlu0 %11742 }
0x2936   : > { %v20896_v29 = vpop.permute.xlu1 %11747  ;;  %v20898_v30 = vpop.permute.xlu0 %11573 }
0x2937   : > { %15786 = vmatmul.mubr.msk.bf16.vlgmr.msra.gmra.mrb[156].mxu0 %vm998_vm3, %v17067_v14 }
0x2938   : > { %15789 = vmatprep.mubr.msk.bf16.mxu0 %vm998_vm3, %v17069_v16  ;;  %15794 = vmatpush3.bf16.msra.mxu0 %v17072_v17 }
0x2939   : > { %15795 = vmatprep.subr.bf16.mxu0 %v17073_v54 }
0x293a   : > { %v20900_v24 = vpop.permute.xlu1 %11578  ;;  %v20902_v38 = vpop.permute.xlu0 %11790 }
0x293c   : > { %15796 = vmatpush3.bf16.msra.mxu0 %v17073_v54 }
0x293e   : > { %v20904_v39 = vpop.permute.xlu1 %11795  ;;  %v20906_v5 = vpop.permute.xlu0 %11646 }
0x293f   : > { %15790 = vmatmul.mubr.msk.bf16.gmra.mrb[160].mxu0 %vm998_vm3, %v17071_v0 }
0x2942   : > { %v20908_v44 = vpop.permute.xlu1 %11651  ;;  %v20910_v45 = vpop.permute.xlu0 %11838 }
0x2946   : > { %v20912_v19 = vpop.permute.xlu1 %11843  ;;  %v20914_v6 = vpop.permute.xlu0 %11694 }
0x294a   : > { %v20916_v35 = vpop.permute.xlu1 %11699  ;;  %v20918_v9 = vpop.permute.xlu0 %11752 }
0x294e   : > { %v20920_v46 = vpop.permute.xlu1 %11757  ;;  %v20922_v48 = vpop.permute.xlu0 %11583 }
0x2952   : > { %v20924_v49 = vpop.permute.xlu1 %11588  ;;  %v20926_v50 = vpop.permute.xlu0 %11800 }
0x2956   : > { %v20928_v53 = vpop.permute.xlu1 %11805  ;;  %v20936_v52 = vpop.permute.xlu0 %11656 }
0x295a   : > { %v20938_v42 = vpop.permute.xlu1 %11661  ;;  %v20940_v43 = vpop.permute.xlu0 %11848 }
0x295e   : > { %v20942_v1 = vpop.permute.xlu1 %11853  ;;  %v20944_v47 = vpop.permute.xlu0 %11704 }
0x2962   : > { %v20946_v63 = vpop.permute.xlu1 %11709  ;;  %v20948_v26 = vpop.permute.xlu0 %11762 }
0x2966   : > { %v20950_v13 = vpop.permute.xlu1 %11767  ;;  %v20952_v59 = vpop.permute.xlu0 %11593 }
0x2967   : > { %21482 = vst [vmem:[#allocation4_spill] sm:$0xff] %v20950_v13 }
0x296a   : > { %v20954_v51 = vpop.permute.xlu1 %11598  ;;  %v20956_v2 = vpop.permute.xlu0 %11810 }
0x296b   : > { %21483 = vst [vmem:[#allocation5_spill] sm:$0xff] %v20956_v2 }
0x296e   : > { %v20958_v3 = vpop.permute.xlu1 %11815  ;;  %v20960_v7 = vpop.permute.xlu0 %11666 }
0x296f   : > { %21484 = vst [vmem:[#allocation6_spill] sm:$0xff] %v20958_v3  ;;  %21485 = vst [vmem:[#allocation7_spill] sm:$0xff] %v20960_v7 }
0x2972   : > { %v20962_v8 = vpop.permute.xlu1 %11671  ;;  %v20964_v11 = vpop.permute.xlu0 %11858 }
0x2973   : > { %21486 = vst [vmem:[#allocation8_spill] sm:$0xff] %v20962_v8 }
0x2976   : > { %v20966_v18 = vpop.permute.xlu1 %11863  ;;  %v20968_v12 = vpop.permute.xlu0 %11714 }
0x2977   : > { %21487 = vst [vmem:[#allocation9_spill] sm:$0xff] %v20968_v12 }
0x297a   : > { %v20970_v41 = vpop.permute.xlu1 %11719  ;;  %v20972_v40 = vpop.permute.xlu0 %11772 }
0x297b   : > { %21488 = vst [vmem:[#allocation10_spill] sm:$0xff] %v20970_v41  ;;  %21489 = vst [vmem:[#allocation11_spill] sm:$0xff] %v20972_v40 }
0x297e   : > { %v20974_v58 = vpop.permute.xlu1 %11777  ;;  %v20976_v57 = vpop.permute.xlu0 %11603 }
0x297f   : > { %21490 = vst [vmem:[#allocation12_spill] sm:$0xff] %v20974_v58 }
0x2982   : > { %v20978_v60 = vpop.permute.xlu1 %11608  ;;  %v20980_v55 = vpop.permute.xlu0 %11820 }
0x2983   : > { %21491 = vst [vmem:[#allocation13_spill] sm:$0xff] %v20980_v55 }
0x2986   : > { %v20982_v25 = vpop.permute.xlu1 %11825  ;;  %v20990_v32 = vpop.permute.xlu0 %11676 }
0x2987   : > { %21492 = vst [vmem:[#allocation14_spill] sm:$0xff] %v20982_v25  ;;  %21493 = vst [vmem:[#allocation15_spill] sm:$0xff] %v20990_v32 }
0x298a   : > { %v20992_v10 = vpop.permute.xlu1 %11681  ;;  %v20994_v23 = vpop.permute.xlu0 %11868 }
0x298b   : > { %21494 = vst [vmem:[#allocation16_spill] sm:$0xff] %v20992_v10 }
0x298e   : > { %v20996_v31 = vpop.permute.xlu1 %11873  ;;  %v20998_v33 = vpop.permute.xlu0 %11724 }
0x2992   : > { %v21000_v28 = vpop.permute.xlu1 %11729  ;;  %v21002_v56 = vpop.permute.xlu0 %11525 }
0x2993   : > { %21495 = vst [vmem:[#allocation17_spill] sm:$0xff] %v21002_v56  ;;  %v17077_v56 = vld [vmem:[%s21432_s22 + $0x8] sm:$0xff]  }
0x2996   : > { %v21004_v61 = vpop.permute.xlu1 %11530  ;;  %v21006_v22 = vpop.permute.xlu0 %11535 }
0x2997   : > { %21496 = vst [vmem:[#allocation18_spill] sm:$0xff] %v21004_v61  ;;  %21497 = vst [vmem:[#allocation19_spill] sm:$0xff] %v21006_v22  ;;  %v17076_v61 = vld [vmem:[%s21432_s22 + $0x48] sm:$0xff]  }
0x2998   : > { %15215 = vmatprep.subr.bf16.mxu1 %v17076_v61  ;;  %v17078_v61 = vld [vmem:[%s21432_s22 + $0x50] sm:$0xff]  }
0x2999   : > { %15216 = vmatpush3.bf16.msra.mxu1 %v17077_v56 }
0x299a   : > { %v21008_v15 = vpop.permute.xlu1 %11540  ;;  %v21010_v0 = vpop.permute.xlu0 %11545  ;;  %15217 = vmatprep.subr.bf16.mxu1 %v17078_v61 }
0x299b   : > { %21498 = vst [vmem:[#allocation20_spill] sm:$0xff] %v21008_v15  ;;  %21499 = vst [vmem:[#allocation21_spill] sm:$0xff] %v21010_v0 }
0x299e   : > { %v21012_v54 = vpop.permute.xlu1 %11550  ;;  %v11887_v62 = vpop.permute.xlu0 %11886 }
0x299f   : > { %21500 = vst [vmem:[#allocation22_spill] sm:$0xff] %v21012_v54 }
0x29a2   : > { %v21028_v25 = vpop.permute.xlu0 %11896 }
0x29a3   : > { %v11892_v22 = vpop.permute.xlu1 %11891 }
0x29f9   : > { %v15757_v27 = vpop.f32.mrb[136].mxu1 }
0x29fa   : > { %v11128_v36 = vpop.f32.mrb[137].mxu1 }
0x29fb   : > { %v15758_v34 = vpop.f32.mrb[138].mxu1 }
0x29fc   : > { %v11131_v20 = vpop.f32.mrb[139].mxu1 }
0x2a01   : > { %v15761_v14 = vpop.f32.mrb[140].mxu1 }
0x2a02   : > { %v11144_v16 = vpop.f32.mrb[141].mxu1 }
0x2a03   : > { %v15762_v17 = vpop.f32.mrb[142].mxu1 }
0x2a04   : > { %v11147_v21 = vpop.f32.mrb[143].mxu1 }
0x2a0a   : > { %v15787_v37 = vpop.f32.mrb[156].mxu0 }
0x2a0b   : > { %v21020_v15 = vadd.f32 %v15787_v37, %v15757_v27  ;;  %v11451_v10 = vpop.f32.mrb[157].mxu0  ;;  %v21034_v27 = vpop.permute.xlu1 %11901 }
0x2a0c   : > { %v21022_v0 = vadd.f32 %v11451_v10, %v11128_v36  ;;  %v15788_v32 = vpop.f32.mrb[158].mxu0 }
0x2a0d   : > { %v21024_v54 = vadd.f32 %v15788_v32, %v15758_v34  ;;  %v11454_v12 = vpop.f32.mrb[159].mxu0  ;;  %v11624_v55 = vrot.slane %v21020_v15, 1  ;;  %v11877_v37 = vmul.f32 %v21020_v15, %v20912_v19  ;;  %v11614_v56 = vmul.f32 %v21020_v15, %v20924_v49  ;;  %v17079_v19 = vld [vmem:[%s21432_s22 + $0x10] sm:$0xff]  }
0x2a0e   : > { %v21026_v41 = vadd.f32 %v11454_v12, %v11131_v20  ;;  %v11621_v36 = vrot.slane %v21022_v0, 1  ;;  %15218 = vmatpush3.bf16.msra.mxu1 %v17079_v19 }
0x2a0f   : > { %v11626_v7 = vrot.slane %v21024_v54, 1  ;;  %v21083_v19 = vpop.permute.xlu1 %11560 }
0x2a10   : > { %21501 = vst [vmem:[#allocation23_spill] sm:$0xff] %v21026_v41  ;;  %v11622_v10 = vrot.slane %v21026_v41, 1  ;;  %v11876_v32 = vmul.f32 %v21026_v41, %v20910_v45  ;;  %v11613_v12 = vmul.f32 %v21026_v41, %v20922_v48  ;;  %v11504_v45 = vrot.slane %v21026_v41, 7 }
0x2a11   : > { %v21053_v20 = vsel %vm875_vm0, %v11624_v55, %v11626_v7 }
0x2a12   : > { %v15791_v48 = vpop.f32.mrb[160].mxu0  ;;  %v16317_v8 = vpack.i.bf16 %v11877_v37, %v11876_v32  ;;  %v16322_v49 = vpack.i.bf16 %v11614_v56, %v11613_v12  ;;  %v11625_v58 = vsel %vm875_vm0, %v11622_v10, %v11624_v55  ;;  %v11925_v40 = vmul.f32 %v11892_v22, %v21053_v20  ;;  %v17080_v37 = vld [vmem:[%s21432_s22 + $0x58] sm:$0xff]  }
0x2a13   : > { %v21057_v3 = vadd.f32 %v15791_v48, %v15761_v14  ;;  %v11467_v2 = vpop.f32.mrb[161].mxu0  ;;  %v11924_v13 = vmul.f32 %v11887_v62, %v11625_v58  ;;  %v21062_v34 = vsel %vm875_vm0, %v11621_v36, %v11622_v10  ;;  %v11781_v41 = vmul.f32 %v20896_v29, %v11625_v58  ;;  %v17081_v55 = vld [vmem:[%s21432_s22 + $0x18] sm:$0xff]   ;;  %v21078_v10 = vpop.permute.xlu0 %11555  ;;  %15219 = vmatprep.subr.bf16.mxu1 %v17080_v37  ;;  %v17083_v37 = vld [vmem:[%s21432_s22 + $0x20] sm:$0xff]  }
0x2a14   : > { %v11506_v22 = vrot.slane %v21020_v15, 7  ;;  %v21072_v14 = vadd.f32 %v11467_v2, %v11144_v16  ;;  %16318 = vrot.lane.b32.xlu0 %v16317_v8, %s21481_s29  ;;  %16323 = vrot.lane.b32.xlu1 %v16322_v49, %s21470_s28  ;;  %v15792_v62 = vpop.f32.mrb[162].mxu0  ;;  %v11780_v29 = vmul.f32 %v20894_v4, %v21062_v34  ;;  %v11686_v61 = vmul.f32 %v20936_v52, %v11625_v58 }
0x2a15   : > { %v21080_v32 = vadd.f32 %v15792_v62, %v15762_v17  ;;  %v11470_v12 = vpop.f32.mrb[163].mxu0  ;;  %v12210_v56 = vpack.c.bf16 %v11925_v40, %v11924_v13  ;;  %v21502_v48 = vrot.slane %v21024_v54, 7  ;;  %v11503_v17 = vrot.slane %v21022_v0, 7  ;;  %15220 = vmatpush3.bf16.msra.mxu1 %v17081_v55 }
0x2a16   : > { %v11628_v2 = vrot.slane %v21072_v14, 1  ;;  %v21086_v8 = vadd.f32 %v11470_v12, %v11147_v21  ;;  %v16327_v16 = vpack.i.bf16 %v11781_v41, %v11780_v29  ;;  %v11632_v49 = vrot.slane %v21057_v3, 1 }
0x2a17   : > { %v21091_v4 = vsel %vm1960_vm12, %v11506_v22, %v21502_v48  ;;  %15797 = vmatprep.mubr.msk.bf16.mxu0 %vm1008_vm4, %v12210_v56  ;;  %v11687_v52 = vmul.f32 %v20938_v42, %v21053_v20  ;;  %v21099_v13 = vsel %vm1960_vm12, %v11504_v45, %v11506_v22  ;;  %v11619_v40 = vrot.slane %v21080_v32, 1  ;;  %v17082_v42 = vld [vmem:[%s21432_s22 + $0x60] sm:$0xff]   ;;  %v11907_v12 = vpop.permute.xlu0 %11906 }
0x2a18   : > { %v21102_v41 = vsel %vm875_vm0, %v11626_v7, %v11628_v2  ;;  %v11630_v58 = vrot.slane %v21086_v8, 1  ;;  %16328 = vrot.lane.b32.xlu0 %v16327_v16, %s21470_s28  ;;  %v11734_v21 = vmul.f32 %v20944_v47, %v21099_v13  ;;  %v11735_v7 = vmul.f32 %v20946_v63, %v21091_v4  ;;  %15221 = vmatprep.subr.bf16.mxu1 %v17082_v42 }
0x2a19   : > { %v16337_v55 = vpack.i.bf16 %v11687_v52, %v11686_v61  ;;  %v21120_v22 = vsel %vm1960_vm12, %v11503_v17, %v11504_v45  ;;  %v11829_v47 = vmul.f32 %v20904_v39, %v21099_v13  ;;  %v11926_v63 = vmul.f32 %v21028_v25, %v21102_v41  ;;  %v11912_v39 = vpop.permute.xlu1 %11911  ;;  %15222 = vmatpush3.bf16.msra.mxu1 %v17083_v37  ;;  %v17084_v25 = vld [vmem:[%s21432_s22 + $0x68] sm:$0xff]  }
0x2a1a   : > { %v21125_v62 = vsel %vm875_vm0, %v11628_v2, %v11630_v58  ;;  %v11828_v29 = vmul.f32 %v20902_v38, %v21120_v22  ;;  %v21135_v56 = vsel %vm875_vm0, %v11630_v58, %v11632_v49  ;;  %v11879_v2 = vmul.f32 %v21072_v14, %v20942_v1  ;;  %15223 = vmatprep.subr.bf16.mxu1 %v17084_v25 }
0x2a1b   : > { %16338 = vrot.lane.b32.xlu1 %v16337_v55, %s21471_s1  ;;  %v11927_v45 = vmul.f32 %v21034_v27, %v21125_v62  ;;  %v21140_v38 = vsel %vm875_vm0, %v11632_v49, %v11619_v40  ;;  %v11928_v16 = vmul.f32 %v11907_v12, %v21135_v56  ;;  %v16342_v48 = vpack.i.bf16 %v11735_v7, %v11734_v21 }
0x2a1c   : > { %v16332_v61 = vpack.i.bf16 %v11829_v47, %v11828_v29  ;;  %v11616_v52 = vmul.f32 %v21072_v14, %v20954_v51  ;;  %v11929_v58 = vmul.f32 %v11912_v39, %v21140_v38  ;;  %v11878_v1 = vmul.f32 %v21024_v54, %v20940_v43  ;;  %v17085_v51 = vld [vmem:[%s21432_s22 + $0x28] sm:$0xff]  }
0x2a1d   : > { %v12213_v27 = vpack.c.bf16 %v11927_v45, %v11926_v63  ;;  %v11615_v49 = vmul.f32 %v21024_v54, %v20952_v59  ;;  %v11880_v37 = vmul.f32 %v21086_v8, %v20964_v11  ;;  %v11510_v55 = vrot.slane %v21072_v14, 7  ;;  %v17086_v59 = vld [vmem:[%s21432_s22 + $0x70] sm:$0xff]   ;;  %15224 = vmatpush3.bf16.msra.mxu1 %v17085_v51 }
0x2a1e   : > { %16333 = vrot.lane.b32.xlu0 %v16332_v61, %s21471_s1  ;;  %v12216_v42 = vpack.c.bf16 %v11929_v58, %v11928_v16  ;;  %v16347_v21 = vpack.i.bf16 %v11879_v2, %v11878_v1  ;;  %v11611_v7 = vmul.f32 %v21080_v32, %v20898_v30  ;;  %v11493_v47 = vrot.slane %v21080_v32, 7  ;;  %15225 = vmatprep.subr.bf16.mxu1 %v17086_v59  ;;  %v17089_v58 = vld [vmem:[%s21432_s22 + $0x38] sm:$0xff]  }
0x2a1f   : > { %16343 = vrot.lane.b32.xlu1 %v16342_v48, %s21481_s29  ;;  %15798 = vmatmul.mubr.msk.bf16.vlgmr.msra.gmra.mrb[164].mxu0 %vm1008_vm4, %v12213_v27  ;;  %v16352_v43 = vpack.i.bf16 %v11616_v52, %v11615_v49  ;;  %v11512_v11 = vrot.slane %v21086_v8, 7  ;;  %v11881_v29 = vmul.f32 %v21057_v3, %v20966_v18  ;;  %v21176_v12 = vsel %vm875_vm0, %v11619_v40, %v11621_v36  ;;  %v17087_v36 = vld [vmem:[%s21432_s22 + $0x30] sm:$0xff]   ;;  %v21506_v59 = vld [vmem:[#allocation6_spill] sm:$0xff] }
0x2a20   : > { %15801 = vmatprep.mubr.msk.bf16.mxu0 %vm1008_vm4, %v12216_v42  ;;  %v11612_v30 = vmul.f32 %v21022_v0, %v20900_v24  ;;  %v11617_v63 = vmul.f32 %v21086_v8, %v20976_v57  ;;  %v11618_v45 = vmul.f32 %v21057_v3, %v20978_v60  ;;  %v11492_v39 = vrot.slane %v21057_v3, 7 }
0x2a21   : > { %v16362_v61 = vpack.i.bf16 %v11881_v29, %v11880_v37  ;;  %v11783_v18 = vmul.f32 %v20920_v46, %v21102_v41  ;;  %v11684_v24 = vmul.f32 %v20906_v5, %v21176_v12  ;;  %v21503_v57 = vrot.slane %v21024_v54, 7  ;;  %v17088_v46 = vld [vmem:[%s21432_s22 + $0x78] sm:$0xff]   ;;  %15226 = vmatpush3.bf16.msra.mxu1 %v17087_v36 }
0x2a22   : > { %16348 = vrot.lane.b32.xlu0 %v16347_v21, %s21481_s29  ;;  %v16357_v40 = vpack.i.bf16 %v11612_v30, %v11611_v7  ;;  %v16402_v60 = vpack.i.bf16 %v11618_v45, %v11617_v63  ;;  %v11782_v16 = vmul.f32 %v20918_v9, %v21053_v20  ;;  %v21207_v5 = vsel %vm1960_vm12, %v11493_v47, %v11503_v17  ;;  %v21508_v30 = vld [vmem:[#allocation12_spill] sm:$0xff] }
0x2a23   : > { %16353 = vrot.lane.b32.xlu1 %v16352_v43, %s21470_s28  ;;  %v21196_v2 = vsel %vm1960_vm12, %v21503_v57, %v11510_v55  ;;  %v21210_v25 = vsel %vm1960_vm12, %v11512_v11, %v11492_v39  ;;  %v11685_v48 = vmul.f32 %v20908_v44, %v21062_v34  ;;  %v21216_v27 = vsel %vm1960_vm12, %v11492_v39, %v11493_v47  ;;  %v21509_v45 = vld [vmem:[#allocation8_spill] sm:$0xff]  ;;  %v21512_v57 = vld [vmem:[#allocation14_spill] sm:$0xff] }
0x2a24   : > { %v16367_v52 = vpack.i.bf16 %v11783_v18, %v11782_v16  ;;  %v11831_v9 = vmul.f32 %v20928_v53, %v21196_v2  ;;  %v11882_v20 = vmul.f32 %v21080_v32, %v20994_v23  ;;  %v11883_v17 = vmul.f32 %v21022_v0, %v20996_v31  ;;  %15227 = vmatprep.subr.bf16.mxu1 %v17088_v46 }
0x2a25   : > { %v16377_v1 = vpack.i.bf16 %v11685_v48, %v11684_v24  ;;  %v11732_v44 = vmul.f32 %v20914_v6, %v21207_v5  ;;  %v11738_v49 = vmul.f32 %v20998_v33, %v21210_v25  ;;  %v11830_v53 = vmul.f32 %v20926_v50, %v21091_v4  ;;  %v21504_v33 = vld [vmem:[#allocation4_spill] sm:$0xff]  ;;  %15228 = vmatpush3.bf16.msra.mxu1 %v17089_v58  ;;  %v21513_v48 = vld [vmem:[#allocation10_spill] sm:$0xff] }
0x2a26   : > { %16363 = vrot.lane.b32.xlu0 %v16362_v61, %s21481_s29  ;;  %v16412_v23 = vpack.i.bf16 %v11883_v17, %v11882_v20  ;;  %v11739_v31 = vmul.f32 %v21000_v28, %v21216_v27  ;;  %v11733_v42 = vmul.f32 %v20916_v35, %v21120_v22  ;;  %v11784_v6 = vmul.f32 %v20948_v26, %v21125_v62  ;;  %v854_v35 = vld [vmem:[%s21431_s21 + $0x238] sm:$0xff]  ;;  %v21505_v26 = vld [vmem:[#allocation5_spill] sm:$0xff]  ;;  %v21510_v61 = vld [vmem:[#allocation7_spill] sm:$0xff] }
0x2a27   : > { %16358 = vrot.lane.b32.xlu1 %v16357_v40, %s21470_s28  ;;  %v16372_v21 = vpack.i.bf16 %v11831_v9, %v11830_v53  ;;  %v11785_v37 = vmul.f32 %v21504_v33, %v21135_v56  ;;  %v21244_v50 = vsel %vm1960_vm12, %v11510_v55, %v11512_v11  ;;  %v11833_v47 = vmul.f32 %v21506_v59, %v21210_v25  ;;  %v21507_v11 = vld [vmem:[#allocation11_spill] sm:$0xff]  ;;  %v21511_v40 = vld [vmem:[#allocation13_spill] sm:$0xff]  ;;  %v21516_v58 = vld [vmem:[#allocation16_spill] sm:$0xff]  ;;  %v21286_v53 = vpop.permute.xlu0 %11916 }
0x2a28   : > { %v16432_v51 = vpack.i.bf16 %v11739_v31, %v11738_v49  ;;  %v16382_v43 = vpack.i.bf16 %v11733_v42, %v11732_v44  ;;  %v11832_v7 = vmul.f32 %v21505_v26, %v21244_v50  ;;  %v11786_v29 = vmul.f32 %v21507_v11, %v21140_v38  ;;  %v21515_v20 = vld [vmem:[#allocation15_spill] sm:$0xff] }
0x2a29   : > { %v16387_v28 = vpack.i.bf16 %v11785_v37, %v11784_v6  ;;  %v11787_v63 = vmul.f32 %v21508_v30, %v21176_v12  ;;  %v11689_v39 = vmul.f32 %v21509_v45, %v21125_v62  ;;  %v11688_v18 = vmul.f32 %v21510_v61, %v21102_v41  ;;  %v21514_v62 = vld [vmem:[#allocation9_spill] sm:$0xff]  ;;  %v21517_v49 = vld [vmem:[#allocation3_spill] sm:$0xff] }
0x2a2a   : > { %16368 = vrot.lane.b32.xlu0 %v16367_v52, %s21470_s28  ;;  %v16392_v55 = vpack.i.bf16 %v11833_v47, %v11832_v7  ;;  %v11834_v24 = vmul.f32 %v21511_v40, %v21216_v27  ;;  %v11835_v46 = vmul.f32 %v21512_v57, %v21207_v5  ;;  %v11737_v52 = vmul.f32 %v21513_v48, %v21244_v50  ;;  %v21520_v45 = vld [vmem:[#allocation23_spill] sm:$0xff] }
0x2a2b   : > { %16378 = vrot.lane.b32.xlu1 %v16377_v1, %s21471_s1  ;;  %v16397_v36 = vpack.i.bf16 %v11787_v63, %v11786_v29  ;;  %v16417_v16 = vpack.i.bf16 %v11689_v39, %v11688_v18  ;;  %v11690_v17 = vmul.f32 %v21515_v20, %v21135_v56  ;;  %v11691_v1 = vmul.f32 %v21516_v58, %v21140_v38 }
0x2a2c   : > { %v16407_v9 = vpack.i.bf16 %v11835_v46, %v11834_v24  ;;  %vm6579_vm0 = vcmask 0  }
0x2a2d   : > { %v16427_v44 = vpack.i.bf16 %v11691_v1, %v11690_v17 }
0x2a2e   : > { %16373 = vrot.lane.b32.xlu0 %v16372_v21, %s21471_s1 }
0x2a2f   : > { %16383 = vrot.lane.b32.xlu1 %v16382_v43, %s21481_s29  ;;  %v21518_v43 = vld [vmem:[#allocation19_spill] sm:$0xff] }
0x2a32   : > { %16388 = vrot.lane.b32.xlu0 %v16387_v28, %s21470_s28 }
0x2a33   : > { %11921 = vperm.xlu1 %16006, %v854_v35   ;;  %v11565_v35 = vmul.f32 %v21518_v43, %v21120_v22 }
0x2a36   : > { %16393 = vrot.lane.b32.xlu0 %v16392_v55, %s21471_s1 }
0x2a37   : > { %16403 = vrot.lane.b32.xlu1 %v16402_v60, %s21470_s28  ;;  %v11736_v60 = vmul.f32 %v21514_v62, %v21196_v2 }
0x2a39   : > { %v16422_v41 = vpack.i.bf16 %v11737_v52, %v11736_v60 }
0x2a3a   : > { %16398 = vrot.lane.b32.xlu0 %v16397_v36, %s21470_s28 }
0x2a3b   : > { %16418 = vrot.lane.b32.xlu1 %v16417_v16, %s21471_s1 }
0x2a3e   : > { %16408 = vrot.lane.b32.xlu0 %v16407_v9, %s21471_s1 }
0x2a3f   : > { %16423 = vrot.lane.b32.xlu1 %v16422_v41, %s21481_s29 }
0x2a42   : > { %16413 = vrot.lane.b32.xlu0 %v16412_v23, %s21481_s29  ;;  %v21519_v23 = vld [vmem:[#allocation20_spill] sm:$0xff] }
0x2a43   : > { %16428 = vrot.lane.b32.xlu1 %v16427_v44, %s21471_s1  ;;  %v11566_v28 = vmul.f32 %v21519_v23, %v21099_v13 }
0x2a47   : > { %16433 = vrot.lane.b32.xlu1 %v16432_v51, %s21481_s29  ;;  %s773_s29 = scalar_lea.vmem %s21435_s25, %s21527_s2 }
0x2a61   : > { %6569 = vadd.xlane.f32.xlu0 %v21517_v49 }
0x2a86   : > { %v16319_v31 = vpop.permute.xlu0 %16318  ;;  %v16324_v56 = vpop.permute.xlu1 %16323 }
0x2a87   : > { %v16326_v21 = vunpack.i.h.bf16 %v16324_v56  ;;  %v16325_v38 = vunpack.i.l.bf16 %v16324_v56  ;;  %v16321_v7 = vunpack.i.h.bf16 %v16319_v31  ;;  %v16320_v59 = vunpack.i.l.bf16 %v16319_v31  ;;  %v21521_v31 = vld [vmem:[#allocation17_spill] sm:$0xff] }
0x2a88   : > { %v11563_v56 = vmul.f32 %v21521_v31, %v21216_v27 }
0x2a89   : > { %v12126_v55 = vsel %vm1008_vm4, %v11565_v35, %v16325_v38  ;;  %v12127_v11 = vsel %vm1008_vm4, %v11566_v28, %v16326_v21 }
0x2a8a   : > { %v16329_v42 = vpop.permute.xlu0 %16328 }
0x2a8b   : > { %v16331_v33 = vunpack.i.h.bf16 %v16329_v42  ;;  %v16330_v37 = vunpack.i.l.bf16 %v16329_v42  ;;  %v21522_v42 = vld [vmem:[#allocation18_spill] sm:$0xff] }
0x2a8c   : > { %v11564_v21 = vmul.f32 %v21522_v42, %v21207_v5 }
0x2a8d   : > { %v16339_v6 = vpop.permute.xlu1 %16338  ;;  %v12149_v39 = vsel %vm1008_vm4, %v21520_v45, %v16331_v33  ;;  %v12148_v22 = vsel %vm1008_vm4, %v21022_v0, %v16330_v37 }
0x2a8e   : > { %v16341_v26 = vunpack.i.h.bf16 %v16339_v6  ;;  %v16340_v51 = vunpack.i.l.bf16 %v16339_v6 }
0x2a90   : > { %v16334_v47 = vpop.permute.xlu0 %16333  ;;  %v12134_v18 = vsel %vm1072_vm6, %v12126_v55, %v16340_v51  ;;  %v12135_v36 = vsel %vm1072_vm6, %v12127_v11, %v16341_v26 }
0x2a91   : > { %v16344_v29 = vpop.permute.xlu1 %16343  ;;  %v16336_v30 = vunpack.i.h.bf16 %v16334_v47  ;;  %v16335_v63 = vunpack.i.l.bf16 %v16334_v47 }
0x2a92   : > { %v16346_v61 = vunpack.i.h.bf16 %v16344_v29  ;;  %v16345_v13 = vunpack.i.l.bf16 %v16344_v29 }
0x2a93   : > { %v12157_v40 = vsel %vm1072_vm6, %v12149_v39, %v16336_v30  ;;  %v12156_v24 = vsel %vm1072_vm6, %v12148_v22, %v16335_v63 }
0x2a94   : > { %v16349_v57 = vpop.permute.xlu0 %16348  ;;  %v12164_v46 = vsel %vm1535_vm7, %v12156_v24, %v16320_v59  ;;  %v12165_v16 = vsel %vm1535_vm7, %v12157_v40, %v16321_v7  ;;  %v12142_v48 = vsel %vm1535_vm7, %v12134_v18, %v16345_v13  ;;  %v12143_v52 = vsel %vm1535_vm7, %v12135_v36, %v16346_v61 }
0x2a95   : > { %v21306_v0 = vpop.permute.xlu1 %16353  ;;  %v12209_v62 = vpack.c.bf16 %v12165_v16, %v12164_v46  ;;  %v12211_v60 = vpack.c.bf16 %v12143_v52, %v12142_v48  ;;  %v16351_v33 = vunpack.i.h.bf16 %v16349_v57  ;;  %v16350_v37 = vunpack.i.l.bf16 %v16349_v57 }
0x2a96   : > { %v16356_v31 = vunpack.i.h.bf16 %v21306_v0 }
0x2a97   : > { %12379 = vmatprep.mubr.bf16.mxu1 %v12209_v62 }
0x2a98   : > { %v16364_v9 = vpop.permute.xlu0 %16363 }
0x2a99   : > { %v16359_v41 = vpop.permute.xlu1 %16358  ;;  %v16366_v24 = vunpack.i.h.bf16 %v16364_v9  ;;  %v16365_v57 = vunpack.i.l.bf16 %v16364_v9 }
0x2a9a   : > { %v16361_v17 = vunpack.i.h.bf16 %v16359_v41  ;;  %v16360_v58 = vunpack.i.l.bf16 %v16359_v41 }
0x2a9c   : > { %v16369_v20 = vpop.permute.xlu0 %16368  ;;  %v12124_v35 = vsel %vm1008_vm4, %v11563_v56, %v16360_v58  ;;  %v12125_v23 = vsel %vm1008_vm4, %v11564_v21, %v16361_v17  ;;  %v16355_v56 = vunpack.i.l.bf16 %v21306_v0 }
0x2a9d   : > { %v16379_v1 = vpop.permute.xlu1 %16378  ;;  %v16371_v44 = vunpack.i.h.bf16 %v16369_v20  ;;  %v16370_v49 = vunpack.i.l.bf16 %v16369_v20 }
0x2a9e   : > { %v16381_v38 = vunpack.i.h.bf16 %v16379_v1  ;;  %v16380_v6 = vunpack.i.l.bf16 %v16379_v1 }
0x2a9f   : > { %v12151_v7 = vsel %vm1008_vm4, %v21024_v54, %v16371_v44  ;;  %v12150_v27 = vsel %vm1008_vm4, %v21020_v15, %v16370_v49 }
0x2aa0   : > { %v16374_v43 = vpop.permute.xlu0 %16373  ;;  %v12132_v47 = vsel %vm1072_vm6, %v12124_v35, %v16380_v6  ;;  %v12133_v55 = vsel %vm1072_vm6, %v12125_v23, %v16381_v38  ;;  %v21523_v38 = vld [vmem:[#allocation21_spill] sm:$0xff] }
0x2aa1   : > { %v16384_v28 = vpop.permute.xlu1 %16383  ;;  %v16376_v26 = vunpack.i.h.bf16 %v16374_v43  ;;  %v16375_v51 = vunpack.i.l.bf16 %v16374_v43  ;;  %v11567_v6 = vmul.f32 %v21523_v38, %v21091_v4 }
0x2aa2   : > { %v16386_v59 = vunpack.i.h.bf16 %v16384_v28  ;;  %v16385_v5 = vunpack.i.l.bf16 %v16384_v28 }
0x2aa3   : > { %v12158_v11 = vsel %vm1072_vm6, %v12150_v27, %v16375_v51  ;;  %v12159_v29 = vsel %vm1072_vm6, %v12151_v7, %v16376_v26  ;;  %v12128_v28 = vsel %vm1008_vm4, %v11567_v6, %v16355_v56 }
0x2aa4   : > { %v12140_v30 = vsel %vm1535_vm7, %v12132_v47, %v16385_v5  ;;  %v12141_v63 = vsel %vm1535_vm7, %v12133_v55, %v16386_v59  ;;  %v16389_v45 = vpop.permute.xlu0 %16388  ;;  %v12166_v54 = vsel %vm1535_vm7, %v12158_v11, %v16350_v37  ;;  %v12167_v39 = vsel %vm1535_vm7, %v12159_v29, %v16351_v33  ;;  %v21524_v33 = vld [vmem:[#allocation22_spill] sm:$0xff] }
0x2aa5   : > { %v12208_v15 = vpack.c.bf16 %v12141_v63, %v12140_v30  ;;  %v12212_v22 = vpack.c.bf16 %v12167_v39, %v12166_v54  ;;  %v16391_v61 = vunpack.i.h.bf16 %v16389_v45  ;;  %v16390_v13 = vunpack.i.l.bf16 %v16389_v45 }
0x2aa7   : > { %12380 = vmatmul.mubr.bf16.vlgmr.msra.gmra.mrb[144].mxu1 %v12208_v15  ;;  %v12153_v46 = vsel %vm1008_vm4, %v21086_v8, %v16391_v61  ;;  %v12152_v16 = vsel %vm1008_vm4, %v21072_v14, %v16390_v13  ;;  %v11930_v8 = vmul.f32 %v21286_v53, %v21176_v12  ;;  %v11568_v12 = vmul.f32 %v21524_v33, %v21196_v2 }
0x2aa8   : > { %12387 = vmatprep.mubr.bf16.mxu1 %v12212_v22  ;;  %v16394_v18 = vpop.permute.xlu0 %16393  ;;  %v11569_v22 = vmul.f32 %v21078_v10, %v21244_v50  ;;  %v11570_v61 = vmul.f32 %v21083_v19, %v21210_v25 }
0x2aa9   : > { %v16396_v36 = vunpack.i.h.bf16 %v16394_v18  ;;  %v16395_v40 = vunpack.i.l.bf16 %v16394_v18  ;;  %v12129_v26 = vsel %vm1008_vm4, %v11568_v12, %v16356_v31 }
0x2aab   : > { %v12161_v48 = vsel %vm1072_vm6, %v12153_v46, %v16396_v36  ;;  %v12160_v52 = vsel %vm1072_vm6, %v12152_v16, %v16395_v40 }
0x2aac   : > { %v12168_v62 = vsel %vm1535_vm7, %v12160_v52, %v16365_v57  ;;  %v12169_v41 = vsel %vm1535_vm7, %v12161_v48, %v16366_v24  ;;  %v16399_v20 = vpop.permute.xlu0 %16398 }
0x2aad   : > { %v12215_v17 = vpack.c.bf16 %v12169_v41, %v12168_v62  ;;  %v16401_v42 = vunpack.i.h.bf16 %v16399_v20  ;;  %v16400_v21 = vunpack.i.l.bf16 %v16399_v20 }
0x2aaf   : > { %12388 = vmatmul.mubr.bf16.gmra.mrb[148].mxu1 %v12211_v60  ;;  %v12155_v0 = vsel %vm1008_vm4, %v21080_v32, %v16401_v42  ;;  %v12154_v51 = vsel %vm1008_vm4, %v21057_v3, %v16400_v21 }
0x2ab0   : > { %12395 = vmatprep.mubr.bf16.mxu1 %v12215_v17  ;;  %v16409_v9 = vpop.permute.xlu0 %16408 }
0x2ab1   : > { %v16411_v53 = vunpack.i.h.bf16 %v16409_v9 }
0x2ab2   : > { %v11922_v58 = vpop.permute.xlu1 %11921 }
0x2ab3   : > { %v11931_v1 = vmul.f32 %v11922_v58, %v21062_v34  ;;  %v16410_v34 = vunpack.i.l.bf16 %v16409_v9  ;;  %v12163_v2 = vsel %vm1072_vm6, %v12155_v0, %v16411_v53 }
0x2ab4   : > { %v16414_v49 = vpop.permute.xlu0 %16413 }
0x2ab5   : > { %v12219_v14 = vpack.c.bf16 %v11931_v1, %v11930_v8  ;;  %v16416_v37 = vunpack.i.h.bf16 %v16414_v49  ;;  %v16415_v43 = vunpack.i.l.bf16 %v16414_v49  ;;  %v12162_v7 = vsel %vm1072_vm6, %v12154_v51, %v16410_v34 }
0x2ab6   : > { %v16404_v44 = vpop.permute.xlu1 %16403 }
0x2ab7   : > { %15802 = vmatmul.mubr.msk.bf16.gmra.mrb[168].mxu0 %vm1008_vm4, %v12219_v14  ;;  %v12170_v55 = vsel %vm1535_vm7, %v12162_v7, %v16415_v43  ;;  %v12171_v11 = vsel %vm1535_vm7, %v12163_v2, %v16416_v37  ;;  %v16406_v63 = vunpack.i.h.bf16 %v16404_v44  ;;  %v16405_v45 = vunpack.i.l.bf16 %v16404_v44  ;;  %v21375_v44 = vld [vmem:[%s21433_s23] ss:$0 sm:$0xff] }
0x2ab8   : > { %v12218_v54 = vpack.c.bf16 %v12171_v11, %v12170_v55 }
0x2ab9   : > { %v12130_v18 = vsel %vm1008_vm4, %v11569_v22, %v16405_v45  ;;  %v12131_v36 = vsel %vm1008_vm4, %v11570_v61, %v16406_v63 }
0x2aba   : > { %v16419_v60 = vpop.permute.xlu1 %16418 }
0x2abb   : > { %v16421_v35 = vunpack.i.h.bf16 %v16419_v60  ;;  %v16420_v23 = vunpack.i.l.bf16 %v16419_v60 }
0x2abd   : > { %v12137_v5 = vsel %vm1072_vm6, %v12129_v26, %v16421_v35  ;;  %v12136_v47 = vsel %vm1072_vm6, %v12128_v28, %v16420_v23 }
0x2abe   : > { %v16424_v4 = vpop.permute.xlu1 %16423 }
0x2abf   : > { %v16426_v27 = vunpack.i.h.bf16 %v16424_v4  ;;  %v16425_v59 = vunpack.i.l.bf16 %v16424_v4 }
0x2ac1   : > { %v12144_v32 = vsel %vm1535_vm7, %v12136_v47, %v16425_v59  ;;  %v12145_v29 = vsel %vm1535_vm7, %v12137_v5, %v16426_v27 }
0x2ac2   : > { %v16429_v3 = vpop.permute.xlu1 %16428  ;;  %v12214_v30 = vpack.c.bf16 %v12145_v29, %v12144_v32 }
0x2ac3   : > { %v16431_v39 = vunpack.i.h.bf16 %v16429_v3  ;;  %v16430_v15 = vunpack.i.l.bf16 %v16429_v3 }
0x2ac4   : > { %12396 = vmatmul.mubr.bf16.gmra.mrb[152].mxu1 %v12214_v30 }
0x2ac5   : > { %12403 = vmatprep.mubr.bf16.mxu1 %v12218_v54  ;;  %v12139_v57 = vsel %vm1072_vm6, %v12131_v36, %v16431_v39  ;;  %v12138_v46 = vsel %vm1072_vm6, %v12130_v18, %v16430_v15 }
0x2ac6   : > { %v16434_v13 = vpop.permute.xlu1 %16433 }
0x2ac7   : > { %v16436_v40 = vunpack.i.h.bf16 %v16434_v13  ;;  %v16435_v24 = vunpack.i.l.bf16 %v16434_v13 }
0x2ac9   : > { %v12146_v16 = vsel %vm1535_vm7, %v12138_v46, %v16435_v24  ;;  %v12147_v10 = vsel %vm1535_vm7, %v12139_v57, %v16436_v40 }
0x2aca   : > { %v12217_v50 = vpack.c.bf16 %v12147_v10, %v12146_v16 }
0x2acc   : > { %12404 = vmatmul.mubr.bf16.gmra.mrb[156].mxu1 %v12217_v50 }
0x2aee   : > { %v6570_v19 = vpop.xlane.xlu0 %6569 }
0x2aef   : > { %v6571_v25 = vrot.slane %v6570_v19, 4 }
0x2af1   : > { %v6572_v48 = vadd.f32 %v6571_v25, %v6570_v19 }
0x2af2   : > { %v15799_v52 = vpop.f32.mrb[164].mxu0 }
0x2af3   : > { %v6573_v62 = vrot.slane %v6572_v48, 2  ;;  %v12446_v41 = vpop.f32.mrb[165].mxu0 }
0x2af4   : > { %v15800_v20 = vpop.f32.mrb[166].mxu0 }
0x2af5   : > { %v12449_v17 = vpop.f32.mrb[167].mxu0  ;;  %v6574_v58 = vadd.f32 %v6573_v62, %v6572_v48 }
0x2af7   : > { %v6575_v9 = vrot.slane %v6574_v58, 1 }
0x2af9   : > { %v6576_v8 = vadd.f32 %v6575_v9, %v6574_v58 }
0x2afb   : > { %15910 = vpush %v6576_v8 }
0x2b2c   : > { %s15911_s8 = spop %15910 }
0x2b2d   : > { %v6578_v1 = vstv %s15911_s8 }
0x2b2e   : > { %6580 = vst.msk [vmem:[%s773_s29] sm:$0x1] %vm6579_vm0, %v6578_v1 }
0x2b7a   : > { %v15229_v14 = vpop.f32.mrb[144].mxu1 }
0x2b7b   : > { %v15230_v49 = vpop.f32.mrb[145].mxu1 }
0x2b7c   : > { %v15231_v31 = vadd.f32 %v15230_v49, %v15229_v14  ;;  %v15232_v56 = vpop.f32.mrb[146].mxu1 }
0x2b7d   : > { %v15233_v42 = vpop.f32.mrb[147].mxu1 }
0x2b7e   : > { %v12382_v21 = vadd.f32 %v15231_v31, %v21375_v44  ;;  %v15234_v60 = vadd.f32 %v15233_v42, %v15232_v56 }
0x2b80   : > { %v12447_v38 = vadd.f32 %v12446_v41, %v12382_v21  ;;  %v12385_v6 = vadd.f32 %v15234_v60, %v21375_v44 }
0x2b82   : > { %v12477_v33 = vsub.f32 0.0, %v12447_v38  ;;  %v12450_v12 = vadd.f32 %v12449_v17, %v12385_v6  ;;  %v15235_v53 = vpop.f32.mrb[148].mxu1 }
0x2b83   : > { %v15236_v34 = vpop.f32.mrb[149].mxu1 }
0x2b84   : > { %v12485_v37 = vmul.f32 1.442695, %v12477_v33  ;;  %v12478_v43 = vsub.f32 0.0, %v12450_v12  ;;  %v15237_v35 = vadd.f32 %v15236_v34, %v15235_v53  ;;  %v15238_v23 = vpop.f32.mrb[150].mxu1 }
0x2b85   : > { %v15239_v28 = vpop.f32.mrb[151].mxu1 }
0x2b86   : > { %17090 = vpow2.f32 %v12485_v37  ;;  %v12487_v26 = vmul.f32 1.442695, %v12478_v43  ;;  %v12390_v0 = vadd.f32 %v15237_v35, %v21375_v44  ;;  %v15240_v51 = vadd.f32 %v15239_v28, %v15238_v23 }
0x2b88   : > { %17092 = vpow2.f32 %v12487_v26  ;;  %v12455_v4 = vadd.f32 %v15799_v52, %v12390_v0  ;;  %v12393_v7 = vadd.f32 %v15240_v51, %v21375_v44 }
0x2b8a   : > { %v12479_v2 = vsub.f32 0.0, %v12455_v4  ;;  %v12458_v27 = vadd.f32 %v15800_v20, %v12393_v7  ;;  %v15803_v59 = vpop.f32.mrb[168].mxu0 }
0x2b8b   : > { %v12462_v5 = vpop.f32.mrb[169].mxu0 }
0x2b8c   : > { %v12489_v47 = vmul.f32 1.442695, %v12479_v2  ;;  %v12480_v55 = vsub.f32 0.0, %v12458_v27  ;;  %v15804_v11 = vpop.f32.mrb[170].mxu0 }
0x2b8d   : > { %v12465_v32 = vpop.f32.mrb[171].mxu0 }
0x2b8e   : > { %17094 = vpow2.f32 %v12489_v47  ;;  %v12491_v29 = vmul.f32 1.442695, %v12480_v55 }
0x2b90   : > { %v17091_v3 = vpop.eup %17090  ;;  %17096 = vpow2.f32 %v12491_v29 }
0x2b91   : > { %v12501_v30 = vadd.f32 1.0, %v17091_v3 }
0x2b92   : > { %v17093_v63 = vpop.eup %17092 }
0x2b93   : > { %17098 = vrcp.f32 %v12501_v30  ;;  %v12502_v45 = vadd.f32 1.0, %v17093_v63 }
0x2b95   : > { %17100 = vrcp.f32 %v12502_v45 }
0x2b97   : > { %v15241_v54 = vpop.f32.mrb[152].mxu1 }
0x2b98   : > { %v17095_v39 = vpop.eup %17094  ;;  %v15242_v15 = vpop.f32.mrb[153].mxu1 }
0x2b99   : > { %v12503_v22 = vadd.f32 1.0, %v17095_v39  ;;  %v15243_v61 = vadd.f32 %v15242_v15, %v15241_v54  ;;  %v15244_v13 = vpop.f32.mrb[154].mxu1 }
0x2b9a   : > { %v17097_v18 = vpop.eup %17096  ;;  %v15245_v36 = vpop.f32.mrb[155].mxu1 }
0x2b9b   : > { %17102 = vrcp.f32 %v12503_v22  ;;  %v12504_v40 = vadd.f32 1.0, %v17097_v18  ;;  %v12398_v24 = vadd.f32 %v15243_v61, %v21375_v44  ;;  %v15246_v57 = vadd.f32 %v15245_v36, %v15244_v13 }
0x2b9d   : > { %v17099_v46 = vpop.eup %17098  ;;  %17104 = vrcp.f32 %v12504_v40  ;;  %v12463_v16 = vadd.f32 %v12462_v5, %v12398_v24  ;;  %v12401_v10 = vadd.f32 %v15246_v57, %v21375_v44 }
0x2b9e   : > { %12525 = vst.msk [vmem:[%s21385_s4] sm:$0xff] %vm998_vm3, %v17099_v46 }
0x2b9f   : > { %v17101_v50 = vpop.eup %17100  ;;  %v12481_v19 = vsub.f32 0.0, %v12463_v16  ;;  %v12466_v25 = vadd.f32 %v12465_v32, %v12401_v10  ;;  %v15247_v48 = vpop.f32.mrb[156].mxu1 }
0x2ba0   : > { %12526 = vst.msk [vmem:[%s21385_s4 + $0x8] sm:$0xff] %vm998_vm3, %v17101_v50  ;;  %v15248_v52 = vpop.f32.mrb[157].mxu1 }
0x2ba1   : > { %v12493_v62 = vmul.f32 1.442695, %v12481_v19  ;;  %v12482_v41 = vsub.f32 0.0, %v12466_v25  ;;  %v15249_v20 = vadd.f32 %v15248_v52, %v15247_v48  ;;  %v15250_v17 = vpop.f32.mrb[158].mxu1 }
0x2ba2   : > { %v15251_v58 = vpop.f32.mrb[159].mxu1 }
0x2ba3   : > { %17106 = vpow2.f32 %v12493_v62  ;;  %v12495_v9 = vmul.f32 1.442695, %v12482_v41  ;;  %v12406_v8 = vadd.f32 %v15249_v20, %v21375_v44  ;;  %v15252_v1 = vadd.f32 %v15251_v58, %v15250_v17 }
0x2ba5   : > { %v17103_v14 = vpop.eup %17102  ;;  %17108 = vpow2.f32 %v12495_v9  ;;  %v12471_v49 = vadd.f32 %v15803_v59, %v12406_v8  ;;  %v12409_v31 = vadd.f32 %v15252_v1, %v21375_v44 }
0x2ba6   : > { %12527 = vst.msk [vmem:[%s21385_s4 + $0x10] sm:$0xff] %vm998_vm3, %v17103_v14 }
0x2ba7   : > { %v17105_v56 = vpop.eup %17104  ;;  %v12483_v42 = vsub.f32 0.0, %v12471_v49  ;;  %v12474_v21 = vadd.f32 %v15804_v11, %v12409_v31 }
0x2ba8   : > { %12528 = vst.msk [vmem:[%s21385_s4 + $0x18] sm:$0xff] %vm998_vm3, %v17105_v56 }
0x2ba9   : > { %v12497_v60 = vmul.f32 1.442695, %v12483_v42  ;;  %v12484_v38 = vsub.f32 0.0, %v12474_v21 }
0x2bab   : > { %17110 = vpow2.f32 %v12497_v60  ;;  %v12499_v6 = vmul.f32 1.442695, %v12484_v38 }
0x2bad   : > { %v17107_v33 = vpop.eup %17106  ;;  %17112 = vpow2.f32 %v12499_v6 }
0x2bae   : > { %v12505_v12 = vadd.f32 1.0, %v17107_v33 }
0x2baf   : > { %v17109_v53 = vpop.eup %17108 }
0x2bb0   : > { %17114 = vrcp.f32 %v12505_v12  ;;  %v12506_v44 = vadd.f32 1.0, %v17109_v53 }
0x2bb2   : > { %17116 = vrcp.f32 %v12506_v44 }
0x2bb5   : > { %v17111_v34 = vpop.eup %17110 }
0x2bb6   : > { %v12507_v37 = vadd.f32 1.0, %v17111_v34 }
0x2bb7   : > { %v17113_v43 = vpop.eup %17112 }
0x2bb8   : > { %17118 = vrcp.f32 %v12507_v37  ;;  %v12508_v35 = vadd.f32 1.0, %v17113_v43 }
0x2bba   : > { %v17115_v23 = vpop.eup %17114  ;;  %17120 = vrcp.f32 %v12508_v35 }
0x2bbb   : > { %12529 = vst.msk [vmem:[%s21385_s4 + $0x20] sm:$0xff] %vm998_vm3, %v17115_v23 }
0x2bbc   : > { %v17117_v28 = vpop.eup %17116 }
0x2bbd   : > { %12530 = vst.msk [vmem:[%s21385_s4 + $0x28] sm:$0xff] %vm998_vm3, %v17117_v28 }
0x2bc2   : > { %v17119_v26 = vpop.eup %17118 }
0x2bc3   : > { %12531 = vst.msk [vmem:[%s21385_s4 + $0x30] sm:$0xff] %vm998_vm3, %v17119_v26 }
0x2bc4   : > { %v17121_v0 = vpop.eup %17120 }
0x2bc5   : > { %12532 = vst.msk [vmem:[%s21385_s4 + $0x38] sm:$0xff] %vm998_vm3, %v17121_v0 }
0x2bc6 PF: > { %s21525_s2 = sld [smem:[#allocation2_spill]] }
0x2bcc   : > { %s36_s29 = sadd.s32 1, %s21525_s2  }
0x2bcd   : > { %p33_p4 = scmp.ge.s32.totalorder %s36_s29, 4  }
0x2bcf   :  { %35 = sbr.rel (!%p33_p4) target bundleno = 12 (0xc), region = 186 }

</bundles_post_ra>
